<compile_context>
chip_gen: v5e
topology: v5e:2x2
jax: 0.10.0
libtpu: 0.0.40
codegen_flags: <defaults>
</compile_context>

<pallas_src>
import functools

import numpy as np
import jax
import jax.numpy as jnp
from jax.experimental import pallas as pl
from jax.experimental.pallas import tpu as pltpu

# ----------------------------- config (scaled-down wav2vec2-base) -------------
CONV_LAYERS = [(32, 10, 5), (32, 3, 2), (32, 2, 2)]  # (out_ch, kernel, stride)
CONV_DIM = 32
EMBED_DIM = 64
FFN_DIM = 128
NUM_HEADS = 4
HEAD_DIM = EMBED_DIM // NUM_HEADS
NUM_LAYERS = 2
POS_CONV_KERNEL = 8
POS_CONV_GROUPS = 4
VOCAB = 16
LOGIT_PAD = 128          # lane-dense padded logits width
EPS = 1e-5

_WEIGHT_ORDER = (
    "w0", "gn_g", "gn_b", "w1", "w2",
    "fp_ln_g", "fp_ln_b", "fp_w", "fp_b",
    "pos_w", "pos_b", "enc_ln_g", "enc_ln_b",
    "wq", "bq", "wk", "bk", "wv", "bv", "wo", "bo",
    "ln1_g", "ln1_b", "wf1", "bf1", "wf2", "bf2", "ln2_g", "ln2_b",
    "fc_w", "fc_b",
)


def _round_up(n, m):
    return (n + m - 1) // m * m


def _ln_rows(x, g, b):
    """LayerNorm over last axis of a 2-D f32 tile; g/b are (1, D) rows."""
    mu = jnp.mean(x, axis=-1, keepdims=True)
    var = jnp.mean(jnp.square(x - mu), axis=-1, keepdims=True)
    return (x - mu) * jax.lax.rsqrt(var + EPS) * g + b


# ----------------------------- the single fused kernel ------------------------
def _asr_kernel(x_ref, w0_ref, gng_ref, gnb_ref, w1_ref, w2_ref,
                fplg_ref, fplb_ref, fpw_ref, fpb_ref,
                posw_ref, posb_ref, encg_ref, encb_ref,
                wq_ref, bq_ref, wk_ref, bk_ref, wv_ref, bv_ref,
                wo_ref, bo_ref, ln1g_ref, ln1b_ref,
                wf1_ref, bf1_ref, wf2_ref, bf2_ref, ln2g_ref, ln2b_ref,
                fcw_ref, fcb_ref,
                o_ref,
                s_h0, s_h1, s_hp,
                *, t0, t1, t2):
    f32 = jnp.float32
    bf16 = jnp.bfloat16
    scale = 1.0 / float(HEAD_DIM) ** 0.5

    # -- conv0 (K=10, stride=5): input is waveform pre-reshaped to (S//5, 5),
    #    so frame t = rows t,t+1 -> two tap-block matmuls (no im2col gather).
    #    Then GroupNorm(num_groups=C, over time) + GELU.
    xa = x_ref[0, pl.ds(0, t0), :].astype(bf16)           # samples 5t .. 5t+4
    xb = x_ref[0, pl.ds(1, t0), :].astype(bf16)           # samples 5t+5 .. 5t+9
    y0 = (jnp.dot(xa, w0_ref[0], preferred_element_type=f32)
          + jnp.dot(xb, w0_ref[1], preferred_element_type=f32))        # (t0, 32)
    mu = jnp.mean(y0, axis=0, keepdims=True)              # per-channel over time
    var = jnp.mean(jnp.square(y0 - mu), axis=0, keepdims=True)
    y0 = (y0 - mu) * jax.lax.rsqrt(var + EPS) * gng_ref[...] + gnb_ref[...]
    # TODO(synk): PyTorch nn.GELU() uses exact erf; tanh approximation used for
    # guaranteed EUP lowering on TPU (numerical diff ~1e-3).
    y0 = jax.nn.gelu(y0, approximate=True)
    s_h0[pl.ds(0, t0), :] = y0

    # -- conv1 (K=3, stride=2): K-tap accumulation over sublane-strided reads --
    y1 = jnp.zeros((t1, CONV_DIM), f32)
    for k in range(CONV_LAYERS[1][1]):
        tap = s_h0[pl.ds(k, t1, stride=2), :].astype(bf16)
        y1 = y1 + jnp.dot(tap, w1_ref[k], preferred_element_type=f32)
    y1 = jax.nn.gelu(y1, approximate=True)
    s_h1[pl.ds(0, t1), :] = y1

    # -- conv2 (K=2, stride=2) --
    y2 = jnp.zeros((t2, CONV_DIM), f32)
    for k in range(CONV_LAYERS[2][1]):
        tap = s_h1[pl.ds(k, t2, stride=2), :].astype(bf16)
        y2 = y2 + jnp.dot(tap, w2_ref[k], preferred_element_type=f32)
    h = jax.nn.gelu(y2, approximate=True)                 # (t2, CONV_DIM)

    # -- feature projection: LayerNorm fused into the projection matmul --
    hn = _ln_rows(h, fplg_ref[...], fplb_ref[...])
    h = (jnp.dot(hn.astype(bf16), fpw_ref[...], preferred_element_type=f32)
         + fpb_ref[...])                                  # (t2, EMBED_DIM)

    # -- pos-conv embedding (grouped conv, pad=4, even-kernel trim of last frame)
    #    as 8 per-tap matmuls over a zero-padded VMEM scratch, + GELU + residual
    #    + encoder LayerNorm --
    s_hp[...] = jnp.zeros_like(s_hp)
    s_hp[pl.ds(POS_CONV_KERNEL, t2), :] = h               # rows [8, 8+t2)
    pos = jnp.zeros((t2, EMBED_DIM), f32)
    for k in range(POS_CONV_KERNEL):
        tap = s_hp[pl.ds(POS_CONV_KERNEL // 2 + k, t2), :].astype(bf16)
        pos = pos + jnp.dot(tap, posw_ref[k], preferred_element_type=f32)
    pos = jax.nn.gelu(pos + posb_ref[...], approximate=True)
    h = _ln_rows(h + pos, encg_ref[...], encb_ref[...])

    # -- transformer encoder layers (post-LN), statically unrolled.
    #    Per-head pre-split weights -> no 16-lane slices of a fused QKV tile;
    #    output projection folded into the head loop as f32 accumulation. --
    for l in range(NUM_LAYERS):
        x = h
        xb16 = x.astype(bf16)
        attn = jnp.zeros((t2, EMBED_DIM), f32)
        for hd in range(NUM_HEADS):
            q = jnp.dot(xb16, wq_ref[l, hd], preferred_element_type=f32) + bq_ref[l, hd]
            kk = jnp.dot(xb16, wk_ref[l, hd], preferred_element_type=f32) + bk_ref[l, hd]
            v = jnp.dot(xb16, wv_ref[l, hd], preferred_element_type=f32) + bv_ref[l, hd]
            s = jax.lax.dot_general(q.astype(bf16), kk.astype(bf16),
                                    (((1,), (1,)), ((), ())),
                                    preferred_element_type=f32) * scale
            s = s - jnp.max(s, axis=-1, keepdims=True)
            p = jnp.exp(s)
            p = p * pl.reciprocal(jnp.sum(p, axis=-1, keepdims=True), approx=True)
            oh = jnp.dot(p.astype(bf16), v.astype(bf16), preferred_element_type=f32)
            attn = attn + jnp.dot(oh.astype(bf16), wo_ref[l, hd],
                                  preferred_element_type=f32)
        attn = attn + bo_ref[l]
        y = _ln_rows(x + attn, ln1g_ref[l], ln1b_ref[l])
        ff = jnp.dot(y.astype(bf16), wf1_ref[l], preferred_element_type=f32) + bf1_ref[l]
        ff = jax.nn.gelu(ff, approximate=True)
        ff = jnp.dot(ff.astype(bf16), wf2_ref[l], preferred_element_type=f32) + bf2_ref[l]
        h = _ln_rows(y + ff, ln2g_ref[l], ln2b_ref[l])

    # -- final fc: lane-dense (t2, 128) padded logits tile --
    logits = (jnp.dot(h.astype(bf16), fcw_ref[...], preferred_element_type=f32)
              + fcb_ref[...])
    o_ref[0] = logits.astype(o_ref.dtype)


# ----------------------------- parameters (PyTorch-style) ---------------------
def init_params(key):
    keys = iter(jax.random.split(key, 64))

    def nrm(shape, scale=0.02):
        return scale * jax.random.normal(next(keys), shape, jnp.float32)

    p = {'fe': [], 'layers': []}
    c_in = 1
    for i, (c_out, k, _s) in enumerate(CONV_LAYERS):
        layer = {'w': nrm((c_out, c_in, k))}                      # Conv1d, bias=False
        if i == 0:
            layer['gn_g'] = jnp.ones((c_out,), jnp.float32)
            layer['gn_b'] = jnp.zeros((c_out,), jnp.float32)
        p['fe'].append(layer)
        c_in = c_out
    p['fp_ln_g'] = jnp.ones((CONV_DIM,), jnp.float32)
    p['fp_ln_b'] = jnp.zeros((CONV_DIM,), jnp.float32)
    p['fp_w'] = nrm((CONV_DIM, EMBED_DIM))
    p['fp_b'] = jnp.zeros((EMBED_DIM,), jnp.float32)
    p['pos_w'] = nrm((EMBED_DIM, EMBED_DIM // POS_CONV_GROUPS, POS_CONV_KERNEL))
    p['pos_b'] = jnp.zeros((EMBED_DIM,), jnp.float32)
    p['enc_ln_g'] = jnp.ones((EMBED_DIM,), jnp.float32)
    p['enc_ln_b'] = jnp.zeros((EMBED_DIM,), jnp.float32)
    for _ in range(NUM_LAYERS):
        p['layers'].append({
            'q_w': nrm((EMBED_DIM, EMBED_DIM)), 'q_b': jnp.zeros((EMBED_DIM,), jnp.float32),
            'k_w': nrm((EMBED_DIM, EMBED_DIM)), 'k_b': jnp.zeros((EMBED_DIM,), jnp.float32),
            'v_w': nrm((EMBED_DIM, EMBED_DIM)), 'v_b': jnp.zeros((EMBED_DIM,), jnp.float32),
            'o_w': nrm((EMBED_DIM, EMBED_DIM)), 'o_b': jnp.zeros((EMBED_DIM,), jnp.float32),
            'ln1_g': jnp.ones((EMBED_DIM,), jnp.float32), 'ln1_b': jnp.zeros((EMBED_DIM,), jnp.float32),
            'ff1_w': nrm((EMBED_DIM, FFN_DIM)), 'ff1_b': jnp.zeros((FFN_DIM,), jnp.float32),
            'ff2_w': nrm((FFN_DIM, EMBED_DIM)), 'ff2_b': jnp.zeros((EMBED_DIM,), jnp.float32),
            'ln2_g': jnp.ones((EMBED_DIM,), jnp.float32), 'ln2_b': jnp.zeros((EMBED_DIM,), jnp.float32),
        })
    p['fc_w'] = nrm((EMBED_DIM, VOCAB))
    p['fc_b'] = jnp.zeros((VOCAB,), jnp.float32)
    return p


def prepare_weights(p):
    """Build per-tap / per-head / bf16 / lane-padded weights ONCE at init.

    Runs OUTSIDE jit (numpy) so no weight-reshaping XLA ops execute per forward.
    """
    def n32(a):
        return np.asarray(jax.device_get(a), np.float32)

    def row(a):
        return jnp.asarray(n32(a).reshape(1, -1), jnp.float32)

    def bf(a):
        return jnp.asarray(a, jnp.bfloat16)

    d = {}
    # conv0: torch (C_out, C_in=1, K=10) -> two (stride=5, C_out) tap blocks.
    w0 = np.transpose(n32(p['fe'][0]['w']), (2, 1, 0)).reshape(CONV_LAYERS[0][1], CONV_DIM)
    d['w0'] = bf(w0.reshape(2, CONV_LAYERS[0][2], CONV_DIM))
    d['gn_g'] = row(p['fe'][0]['gn_g'])
    d['gn_b'] = row(p['fe'][0]['gn_b'])
    # conv1 / conv2: (C_out, C_in, K) -> per-tap (K, C_in, C_out).
    d['w1'] = bf(np.transpose(n32(p['fe'][1]['w']), (2, 1, 0)))
    d['w2'] = bf(np.transpose(n32(p['fe'][2]['w']), (2, 1, 0)))
    d['fp_ln_g'] = row(p['fp_ln_g'])
    d['fp_ln_b'] = row(p['fp_ln_b'])
    d['fp_w'] = bf(n32(p['fp_w']))
    d['fp_b'] = row(p['fp_b'])
    # pos-conv: grouped (C_out, C_in//G, K) -> dense per-tap (K, C_in, C_out).
    pw = n32(p['pos_w'])
    og = EMBED_DIM // POS_CONV_GROUPS
    cg = pw.shape[1]
    wp = np.zeros((POS_CONV_KERNEL, EMBED_DIM, EMBED_DIM), np.float32)
    for g in range(POS_CONV_GROUPS):
        for k in range(POS_CONV_KERNEL):
            wp[k, g * cg:(g + 1) * cg, g * og:(g + 1) * og] = pw[g * og:(g + 1) * og, :, k].T
    d['pos_w'] = bf(wp)
    d['pos_b'] = row(p['pos_b'])
    d['enc_ln_g'] = row(p['enc_ln_g'])
    d['enc_ln_b'] = row(p['enc_ln_b'])

    def head_w(key):
        return bf(np.stack([np.stack([n32(l[key])[:, h * HEAD_DIM:(h + 1) * HEAD_DIM]
                                      for h in range(NUM_HEADS)])
                            for l in p['layers']]))            # (L, H, D, dh)

    def head_b(key):
        return jnp.asarray(
            np.stack([np.stack([n32(l[key])[h * HEAD_DIM:(h + 1) * HEAD_DIM].reshape(1, -1)
                                for h in range(NUM_HEADS)])
                      for l in p['layers']]), jnp.float32)      # (L, H, 1, dh)

    d['wq'], d['bq'] = head_w('q_w'), head_b('q_b')
    d['wk'], d['bk'] = head_w('k_w'), head_b('k_b')
    d['wv'], d['bv'] = head_w('v_w'), head_b('v_b')
    # output projection split per head (folded into the head loop in-kernel).
    d['wo'] = bf(np.stack([np.stack([n32(l['o_w'])[h * HEAD_DIM:(h + 1) * HEAD_DIM, :]
                                     for h in range(NUM_HEADS)])
                           for l in p['layers']]))              # (L, H, dh, D)
    d['bo'] = jnp.asarray(np.stack([n32(l['o_b']).reshape(1, -1) for l in p['layers']]),
                          jnp.float32)

    def stack_row(key):
        return jnp.asarray(np.stack([n32(l[key]).reshape(1, -1) for l in p['layers']]),
                           jnp.float32)

    d['ln1_g'], d['ln1_b'] = stack_row('ln1_g'), stack_row('ln1_b')
    d['wf1'] = bf(np.stack([n32(l['ff1_w']) for l in p['layers']]))
    d['bf1'] = stack_row('ff1_b')
    d['wf2'] = bf(np.stack([n32(l['ff2_w']) for l in p['layers']]))
    d['bf2'] = stack_row('ff2_b')
    d['ln2_g'], d['ln2_b'] = stack_row('ln2_g'), stack_row('ln2_b')
    # final fc: lane-dense 128-wide padded weights.
    fcw = np.zeros((EMBED_DIM, LOGIT_PAD), np.float32)
    fcw[:, :VOCAB] = n32(p['fc_w'])
    d['fc_w'] = bf(fcw)
    fcb = np.zeros((1, LOGIT_PAD), np.float32)
    fcb[0, :VOCAB] = n32(p['fc_b'])
    d['fc_b'] = jnp.asarray(fcb, jnp.float32)
    return d


# ----------------------------- forward ------------------------------------------
def model_asr_forward(prep, x):
    # x: (B, num_samples) or (B, 1, num_samples) raw waveform
    if x.ndim == 3 and x.shape[1] == 1:
        x = x[:, 0, :]                                            # squeeze(1)
    B, S = x.shape
    k0, s0 = CONV_LAYERS[0][1], CONV_LAYERS[0][2]
    assert S % s0 == 0 and k0 == 2 * s0, "conv0 tap-block layout needs S%5==0"
    t0 = (S - k0) // s0 + 1
    t1 = (t0 - CONV_LAYERS[1][1]) // CONV_LAYERS[1][2] + 1
    t2 = (t1 - CONV_LAYERS[2][1]) // CONV_LAYERS[2][2] + 1

    # single cheap reshape in XLA; all patch extraction happens in-kernel.
    x5 = x.reshape(B, S // s0, s0).astype(jnp.float32)

    weights = [prep[name] for name in _WEIGHT_ORDER]

    def _full_spec(a):
        nd = a.ndim
        return pl.BlockSpec(a.shape, lambda b, _n=nd: (0,) * _n)

    in_specs = ([pl.BlockSpec((1, S // s0, s0), lambda b: (b, 0, 0))]
                + [_full_spec(w) for w in weights])

    kernel = functools.partial(_asr_kernel, t0=t0, t1=t1, t2=t2)
    logits = pl.pallas_call(
        kernel,
        grid=(B,),
        in_specs=in_specs,
        out_specs=pl.BlockSpec((1, t2, LOGIT_PAD), lambda b: (b, 0, 0)),
        out_shape=jax.ShapeDtypeStruct((B, t2, LOGIT_PAD), jnp.float32),
        scratch_shapes=[
            pltpu.VMEM((_round_up(t0, 8), CONV_DIM), jnp.float32),      # conv0 out
            pltpu.VMEM((_round_up(t1, 8), CONV_DIM), jnp.float32),      # conv1 out
            pltpu.VMEM((_round_up(t2 + POS_CONV_KERNEL + POS_CONV_KERNEL // 2, 8),
                        EMBED_DIM), jnp.float32),                       # pos-conv pad
        ],
        compiler_params=pltpu.CompilerParams(dimension_semantics=("parallel",)),
    )(x5, *weights)
    return logits[:, :, :VOCAB]


# ----------------------------- main ----------------------------------------------
if __name__ == "__main__":
    key = jax.random.PRNGKey(0)
    pkey, xkey = jax.random.split(key)
    params = init_params(pkey)
    prep = prepare_weights(params)          # hoisted out of the jitted forward

    # (B, 1, num_samples) waveform -> exercises the squeeze(1) branch.
    x = jax.random.normal(xkey, (2, 1, 400), jnp.float32)

    forward = jax.jit(model_asr_forward)
    out = forward(prep, x)
    out = jax.block_until_ready(out)

    # conv strides 5*2*2=20: (400-10)//5+1=79 -> 39 -> 19 frames
    assert out.shape == (2, 19, VOCAB), out.shape
    assert bool(jnp.all(jnp.isfinite(out)))
    print("KERNEL_OK")
</pallas_src>

<mosaic_0001>
module attributes {stable_mosaic.version = 11 : i64} {
  func.func @_asr_kernel(%arg0: i32, %arg1: memref<1x80x5xf32, #tpu.memory_space<vmem>>, %arg2: memref<2x5x32xbf16, #tpu.memory_space<vmem>>, %arg3: memref<1x32xf32, #tpu.memory_space<vmem>>, %arg4: memref<1x32xf32, #tpu.memory_space<vmem>>, %arg5: memref<3x32x32xbf16, #tpu.memory_space<vmem>>, %arg6: memref<2x32x32xbf16, #tpu.memory_space<vmem>>, %arg7: memref<1x32xf32, #tpu.memory_space<vmem>>, %arg8: memref<1x32xf32, #tpu.memory_space<vmem>>, %arg9: memref<32x64xbf16, #tpu.memory_space<vmem>>, %arg10: memref<1x64xf32, #tpu.memory_space<vmem>>, %arg11: memref<8x64x64xbf16, #tpu.memory_space<vmem>>, %arg12: memref<1x64xf32, #tpu.memory_space<vmem>>, %arg13: memref<1x64xf32, #tpu.memory_space<vmem>>, %arg14: memref<1x64xf32, #tpu.memory_space<vmem>>, %arg15: memref<2x4x64x16xbf16, #tpu.memory_space<vmem>>, %arg16: memref<2x4x1x16xf32, #tpu.memory_space<vmem>>, %arg17: memref<2x4x64x16xbf16, #tpu.memory_space<vmem>>, %arg18: memref<2x4x1x16xf32, #tpu.memory_space<vmem>>, %arg19: memref<2x4x64x16xbf16, #tpu.memory_space<vmem>>, %arg20: memref<2x4x1x16xf32, #tpu.memory_space<vmem>>, %arg21: memref<2x4x16x64xbf16, #tpu.memory_space<vmem>>, %arg22: memref<2x1x64xf32, #tpu.memory_space<vmem>>, %arg23: memref<2x1x64xf32, #tpu.memory_space<vmem>>, %arg24: memref<2x1x64xf32, #tpu.memory_space<vmem>>, %arg25: memref<2x64x128xbf16, #tpu.memory_space<vmem>>, %arg26: memref<2x1x128xf32, #tpu.memory_space<vmem>>, %arg27: memref<2x128x64xbf16, #tpu.memory_space<vmem>>, %arg28: memref<2x1x64xf32, #tpu.memory_space<vmem>>, %arg29: memref<2x1x64xf32, #tpu.memory_space<vmem>>, %arg30: memref<2x1x64xf32, #tpu.memory_space<vmem>>, %arg31: memref<64x128xbf16, #tpu.memory_space<vmem>>, %arg32: memref<1x128xf32, #tpu.memory_space<vmem>>, %arg33: memref<1x19x128xf32, #tpu.memory_space<vmem>>, %arg34: memref<80x32xf32, #tpu.memory_space<vmem>>, %arg35: memref<40x32xf32, #tpu.memory_space<vmem>>, %arg36: memref<32x64xf32, #tpu.memory_space<vmem>>) attributes {dimension_semantics = [#tpu.dimension_semantics<parallel>], iteration_bounds = array<i64: 2>, scalar_prefetch = 0 : i64, scratch_operands = 3 : i64, tpu.core_type = #tpu.core_type<tc>, window_params = [{transform_indices = @transform_0, window_bounds = array<i64: 1, 80, 5>}, {pipeline_mode = #tpu.pipeline_mode<synchronous>, transform_indices = @transform_1, window_bounds = array<i64: 2, 5, 32>}, {pipeline_mode = #tpu.pipeline_mode<synchronous>, transform_indices = @transform_2, window_bounds = array<i64: 1, 32>}, {pipeline_mode = #tpu.pipeline_mode<synchronous>, transform_indices = @transform_3, window_bounds = array<i64: 1, 32>}, {pipeline_mode = #tpu.pipeline_mode<synchronous>, transform_indices = @transform_4, window_bounds = array<i64: 3, 32, 32>}, {pipeline_mode = #tpu.pipeline_mode<synchronous>, transform_indices = @transform_5, window_bounds = array<i64: 2, 32, 32>}, {pipeline_mode = #tpu.pipeline_mode<synchronous>, transform_indices = @transform_6, window_bounds = array<i64: 1, 32>}, {pipeline_mode = #tpu.pipeline_mode<synchronous>, transform_indices = @transform_7, window_bounds = array<i64: 1, 32>}, {pipeline_mode = #tpu.pipeline_mode<synchronous>, transform_indices = @transform_8, window_bounds = array<i64: 32, 64>}, {pipeline_mode = #tpu.pipeline_mode<synchronous>, transform_indices = @transform_9, window_bounds = array<i64: 1, 64>}, {pipeline_mode = #tpu.pipeline_mode<synchronous>, transform_indices = @transform_10, window_bounds = array<i64: 8, 64, 64>}, {pipeline_mode = #tpu.pipeline_mode<synchronous>, transform_indices = @transform_11, window_bounds = array<i64: 1, 64>}, {pipeline_mode = #tpu.pipeline_mode<synchronous>, transform_indices = @transform_12, window_bounds = array<i64: 1, 64>}, {pipeline_mode = #tpu.pipeline_mode<synchronous>, transform_indices = @transform_13, window_bounds = array<i64: 1, 64>}, {pipeline_mode = #tpu.pipeline_mode<synchronous>, transform_indices = @transform_14, window_bounds = array<i64: 2, 4, 64, 16>}, {pipeline_mode = #tpu.pipeline_mode<synchronous>, transform_indices = @transform_15, window_bounds = array<i64: 2, 4, 1, 16>}, {pipeline_mode = #tpu.pipeline_mode<synchronous>, transform_indices = @transform_16, window_bounds = array<i64: 2, 4, 64, 16>}, {pipeline_mode = #tpu.pipeline_mode<synchronous>, transform_indices = @transform_17, window_bounds = array<i64: 2, 4, 1, 16>}, {pipeline_mode = #tpu.pipeline_mode<synchronous>, transform_indices = @transform_18, window_bounds = array<i64: 2, 4, 64, 16>}, {pipeline_mode = #tpu.pipeline_mode<synchronous>, transform_indices = @transform_19, window_bounds = array<i64: 2, 4, 1, 16>}, {pipeline_mode = #tpu.pipeline_mode<synchronous>, transform_indices = @transform_20, window_bounds = array<i64: 2, 4, 16, 64>}, {pipeline_mode = #tpu.pipeline_mode<synchronous>, transform_indices = @transform_21, window_bounds = array<i64: 2, 1, 64>}, {pipeline_mode = #tpu.pipeline_mode<synchronous>, transform_indices = @transform_22, window_bounds = array<i64: 2, 1, 64>}, {pipeline_mode = #tpu.pipeline_mode<synchronous>, transform_indices = @transform_23, window_bounds = array<i64: 2, 1, 64>}, {pipeline_mode = #tpu.pipeline_mode<synchronous>, transform_indices = @transform_24, window_bounds = array<i64: 2, 64, 128>}, {pipeline_mode = #tpu.pipeline_mode<synchronous>, transform_indices = @transform_25, window_bounds = array<i64: 2, 1, 128>}, {pipeline_mode = #tpu.pipeline_mode<synchronous>, transform_indices = @transform_26, window_bounds = array<i64: 2, 128, 64>}, {pipeline_mode = #tpu.pipeline_mode<synchronous>, transform_indices = @transform_27, window_bounds = array<i64: 2, 1, 64>}, {pipeline_mode = #tpu.pipeline_mode<synchronous>, transform_indices = @transform_28, window_bounds = array<i64: 2, 1, 64>}, {pipeline_mode = #tpu.pipeline_mode<synchronous>, transform_indices = @transform_29, window_bounds = array<i64: 2, 1, 64>}, {pipeline_mode = #tpu.pipeline_mode<synchronous>, transform_indices = @transform_30, window_bounds = array<i64: 64, 128>}, {pipeline_mode = #tpu.pipeline_mode<synchronous>, transform_indices = @transform_31, window_bounds = array<i64: 1, 128>}, {transform_indices = @transform_32, window_bounds = array<i64: 1, 19, 128>}]} {
    %c0 = arith.constant 0 : index
    %c0_0 = arith.constant 0 : index
    %c0_1 = arith.constant 0 : index
    %0 = vector.load %arg1[%c0, %c0_0, %c0_1] : memref<1x80x5xf32, #tpu.memory_space<vmem>>, vector<1x79x5xf32>
    %1 = vector.shape_cast %0 : vector<1x79x5xf32> to vector<79x5xf32>
    %2 = arith.truncf %1 : vector<79x5xf32> to vector<79x5xbf16>
    %c0_2 = arith.constant 0 : index
    %c1 = arith.constant 1 : index
    %c0_3 = arith.constant 0 : index
    %3 = vector.load %arg1[%c0_2, %c1, %c0_3] : memref<1x80x5xf32, #tpu.memory_space<vmem>>, vector<1x79x5xf32>
    %4 = vector.shape_cast %3 : vector<1x79x5xf32> to vector<79x5xf32>
    %5 = arith.truncf %4 : vector<79x5xf32> to vector<79x5xbf16>
    %c0_4 = arith.constant 0 : index
    %c0_5 = arith.constant 0 : index
    %c0_6 = arith.constant 0 : index
    %6 = vector.load %arg2[%c0_4, %c0_5, %c0_6] : memref<2x5x32xbf16, #tpu.memory_space<vmem>>, vector<1x5x32xbf16>
    %7 = vector.shape_cast %6 : vector<1x5x32xbf16> to vector<5x32xbf16>
    %cst = arith.constant dense<0.000000e+00> : vector<79x32xf32>
    %8 = tpu.matmul %2, %7, %cst {dimension_numbers = #tpu.dot_dimension_numbers<[1], [0], [0], [1], [0, 0, 1, 1], [], []>} : vector<79x5xbf16>, vector<5x32xbf16>, vector<79x32xf32> -> vector<79x32xf32>
    %c1_7 = arith.constant 1 : index
    %c0_8 = arith.constant 0 : index
    %c0_9 = arith.constant 0 : index
    %9 = vector.load %arg2[%c1_7, %c0_8, %c0_9] : memref<2x5x32xbf16, #tpu.memory_space<vmem>>, vector<1x5x32xbf16>
    %10 = vector.shape_cast %9 : vector<1x5x32xbf16> to vector<5x32xbf16>
    %cst_10 = arith.constant dense<0.000000e+00> : vector<79x32xf32>
    %11 = tpu.matmul %5, %10, %cst_10 {dimension_numbers = #tpu.dot_dimension_numbers<[1], [0], [0], [1], [0, 0, 1, 1], [], []>} : vector<79x5xbf16>, vector<5x32xbf16>, vector<79x32xf32> -> vector<79x32xf32>
    %12 = arith.addf %8, %11 : vector<79x32xf32>
    %cst_11 = arith.constant dense<0.000000e+00> : vector<32xf32>
    %13 = vector.multi_reduction <add>, %12, %cst_11 [0] : vector<79x32xf32> to vector<32xf32>
    %14 = vector.shape_cast %13 : vector<32xf32> to vector<1x32xf32>
    %cst_12 = arith.constant 7.900000e+01 : f32
    %15 = vector.broadcast %cst_12 : f32 to vector<1x32xf32>
    %16 = arith.divf %14, %15 : vector<1x32xf32>
    %17 = vector.broadcast %16 : vector<1x32xf32> to vector<79x32xf32>
    %18 = arith.subf %12, %17 : vector<79x32xf32>
    %19 = arith.mulf %18, %18 : vector<79x32xf32>
    %cst_13 = arith.constant dense<0.000000e+00> : vector<32xf32>
    %20 = vector.multi_reduction <add>, %19, %cst_13 [0] : vector<79x32xf32> to vector<32xf32>
    %21 = vector.shape_cast %20 : vector<32xf32> to vector<1x32xf32>
    %cst_14 = arith.constant 7.900000e+01 : f32
    %22 = vector.broadcast %cst_14 : f32 to vector<1x32xf32>
    %23 = arith.divf %21, %22 : vector<1x32xf32>
    %24 = vector.broadcast %16 : vector<1x32xf32> to vector<79x32xf32>
    %25 = arith.subf %12, %24 : vector<79x32xf32>
    %cst_15 = arith.constant 9.99999974E-6 : f32
    %26 = vector.broadcast %cst_15 : f32 to vector<1x32xf32>
    %27 = arith.addf %23, %26 : vector<1x32xf32>
    %28 = math.rsqrt %27 : vector<1x32xf32>
    %29 = vector.broadcast %28 : vector<1x32xf32> to vector<79x32xf32>
    %30 = arith.mulf %25, %29 : vector<79x32xf32>
    %c0_16 = arith.constant 0 : index
    %c0_17 = arith.constant 0 : index
    %31 = vector.load %arg3[%c0_16, %c0_17] : memref<1x32xf32, #tpu.memory_space<vmem>>, vector<1x32xf32>
    %32 = vector.broadcast %31 : vector<1x32xf32> to vector<79x32xf32>
    %33 = arith.mulf %30, %32 : vector<79x32xf32>
    %c0_18 = arith.constant 0 : index
    %c0_19 = arith.constant 0 : index
    %34 = vector.load %arg4[%c0_18, %c0_19] : memref<1x32xf32, #tpu.memory_space<vmem>>, vector<1x32xf32>
    %35 = vector.broadcast %34 : vector<1x32xf32> to vector<79x32xf32>
    %36 = arith.addf %33, %35 : vector<79x32xf32>
    %37 = arith.mulf %36, %36 : vector<79x32xf32>
    %38 = arith.mulf %36, %37 : vector<79x32xf32>
    %cst_20 = arith.constant 4.471500e-02 : f32
    %39 = vector.broadcast %cst_20 : f32 to vector<79x32xf32>
    %40 = arith.mulf %39, %38 : vector<79x32xf32>
    %41 = arith.addf %36, %40 : vector<79x32xf32>
    %cst_21 = arith.constant 0.797884583 : f32
    %42 = vector.broadcast %cst_21 : f32 to vector<79x32xf32>
    %43 = arith.mulf %42, %41 : vector<79x32xf32>
    %44 = math.tanh %43 : vector<79x32xf32>
    %cst_22 = arith.constant 1.000000e+00 : f32
    %45 = vector.broadcast %cst_22 : f32 to vector<79x32xf32>
    %46 = arith.addf %45, %44 : vector<79x32xf32>
    %cst_23 = arith.constant 5.000000e-01 : f32
    %47 = vector.broadcast %cst_23 : f32 to vector<79x32xf32>
    %48 = arith.mulf %47, %46 : vector<79x32xf32>
    %49 = arith.mulf %36, %48 : vector<79x32xf32>
    %c0_24 = arith.constant 0 : index
    %c0_25 = arith.constant 0 : index
    %50 = vector.load %arg34[%c0_24, %c0_25] : memref<80x32xf32, #tpu.memory_space<vmem>>, vector<79x32xf32>
    tpu.vector_store %arg34[%c0_24, %c0_25], %49 {strides = array<i32>} : memref<80x32xf32, #tpu.memory_space<vmem>>, vector<79x32xf32>,
    %cst_26 = arith.constant 0.000000e+00 : f32
    %51 = vector.broadcast %cst_26 : f32 to vector<39x32xf32>
    %c0_27 = arith.constant 0 : index
    %c0_28 = arith.constant 0 : index
    %52 = tpu.strided_load %arg34[%c0_27, %c0_28] {strides = array<i32: 2, 1>} : memref<80x32xf32, #tpu.memory_space<vmem>>, vector<39x32xf32>
    %53 = arith.truncf %52 : vector<39x32xf32> to vector<39x32xbf16>
    %c0_29 = arith.constant 0 : index
    %c0_30 = arith.constant 0 : index
    %c0_31 = arith.constant 0 : index
    %54 = vector.load %arg5[%c0_29, %c0_30, %c0_31] : memref<3x32x32xbf16, #tpu.memory_space<vmem>>, vector<1x32x32xbf16>
    %55 = vector.shape_cast %54 : vector<1x32x32xbf16> to vector<32x32xbf16>
    %cst_32 = arith.constant dense<0.000000e+00> : vector<39x32xf32>
    %56 = tpu.matmul %53, %55, %cst_32 {dimension_numbers = #tpu.dot_dimension_numbers<[1], [0], [0], [1], [0, 0, 1, 1], [], []>} : vector<39x32xbf16>, vector<32x32xbf16>, vector<39x32xf32> -> vector<39x32xf32>
    %57 = arith.addf %51, %56 : vector<39x32xf32>
    %c1_33 = arith.constant 1 : index
    %c0_34 = arith.constant 0 : index
    %58 = tpu.strided_load %arg34[%c1_33, %c0_34] {strides = array<i32: 2, 1>} : memref<80x32xf32, #tpu.memory_space<vmem>>, vector<39x32xf32>
    %59 = arith.truncf %58 : vector<39x32xf32> to vector<39x32xbf16>
    %c1_35 = arith.constant 1 : index
    %c0_36 = arith.constant 0 : index
    %c0_37 = arith.constant 0 : index
    %60 = vector.load %arg5[%c1_35, %c0_36, %c0_37] : memref<3x32x32xbf16, #tpu.memory_space<vmem>>, vector<1x32x32xbf16>
    %61 = vector.shape_cast %60 : vector<1x32x32xbf16> to vector<32x32xbf16>
    %cst_38 = arith.constant dense<0.000000e+00> : vector<39x32xf32>
    %62 = tpu.matmul %59, %61, %cst_38 {dimension_numbers = #tpu.dot_dimension_numbers<[1], [0], [0], [1], [0, 0, 1, 1], [], []>} : vector<39x32xbf16>, vector<32x32xbf16>, vector<39x32xf32> -> vector<39x32xf32>
    %63 = arith.addf %57, %62 : vector<39x32xf32>
    %c2 = arith.constant 2 : index
    %c0_39 = arith.constant 0 : index
    %64 = tpu.strided_load %arg34[%c2, %c0_39] {strides = array<i32: 2, 1>} : memref<80x32xf32, #tpu.memory_space<vmem>>, vector<39x32xf32>
    %65 = arith.truncf %64 : vector<39x32xf32> to vector<39x32xbf16>
    %c2_40 = arith.constant 2 : index
    %c0_41 = arith.constant 0 : index
    %c0_42 = arith.constant 0 : index
    %66 = vector.load %arg5[%c2_40, %c0_41, %c0_42] : memref<3x32x32xbf16, #tpu.memory_space<vmem>>, vector<1x32x32xbf16>
    %67 = vector.shape_cast %66 : vector<1x32x32xbf16> to vector<32x32xbf16>
    %cst_43 = arith.constant dense<0.000000e+00> : vector<39x32xf32>
    %68 = tpu.matmul %65, %67, %cst_43 {dimension_numbers = #tpu.dot_dimension_numbers<[1], [0], [0], [1], [0, 0, 1, 1], [], []>} : vector<39x32xbf16>, vector<32x32xbf16>, vector<39x32xf32> -> vector<39x32xf32>
    %69 = arith.addf %63, %68 : vector<39x32xf32>
    %70 = arith.mulf %69, %69 : vector<39x32xf32>
    %71 = arith.mulf %69, %70 : vector<39x32xf32>
    %cst_44 = arith.constant 4.471500e-02 : f32
    %72 = vector.broadcast %cst_44 : f32 to vector<39x32xf32>
    %73 = arith.mulf %72, %71 : vector<39x32xf32>
    %74 = arith.addf %69, %73 : vector<39x32xf32>
    %cst_45 = arith.constant 0.797884583 : f32
    %75 = vector.broadcast %cst_45 : f32 to vector<39x32xf32>
    %76 = arith.mulf %75, %74 : vector<39x32xf32>
    %77 = math.tanh %76 : vector<39x32xf32>
    %cst_46 = arith.constant 1.000000e+00 : f32
    %78 = vector.broadcast %cst_46 : f32 to vector<39x32xf32>
    %79 = arith.addf %78, %77 : vector<39x32xf32>
    %cst_47 = arith.constant 5.000000e-01 : f32
    %80 = vector.broadcast %cst_47 : f32 to vector<39x32xf32>
    %81 = arith.mulf %80, %79 : vector<39x32xf32>
    %82 = arith.mulf %69, %81 : vector<39x32xf32>
    %c0_48 = arith.constant 0 : index
    %c0_49 = arith.constant 0 : index
    %83 = vector.load %arg35[%c0_48, %c0_49] : memref<40x32xf32, #tpu.memory_space<vmem>>, vector<39x32xf32>
    tpu.vector_store %arg35[%c0_48, %c0_49], %82 {strides = array<i32>} : memref<40x32xf32, #tpu.memory_space<vmem>>, vector<39x32xf32>,
    %cst_50 = arith.constant 0.000000e+00 : f32
    %84 = vector.broadcast %cst_50 : f32 to vector<19x32xf32>
    %c0_51 = arith.constant 0 : index
    %c0_52 = arith.constant 0 : index
    %85 = tpu.strided_load %arg35[%c0_51, %c0_52] {strides = array<i32: 2, 1>} : memref<40x32xf32, #tpu.memory_space<vmem>>, vector<19x32xf32>
    %86 = arith.truncf %85 : vector<19x32xf32> to vector<19x32xbf16>
    %c0_53 = arith.constant 0 : index
    %c0_54 = arith.constant 0 : index
    %c0_55 = arith.constant 0 : index
    %87 = vector.load %arg6[%c0_53, %c0_54, %c0_55] : memref<2x32x32xbf16, #tpu.memory_space<vmem>>, vector<1x32x32xbf16>
    %88 = vector.shape_cast %87 : vector<1x32x32xbf16> to vector<32x32xbf16>
    %cst_56 = arith.constant dense<0.000000e+00> : vector<19x32xf32>
    %89 = tpu.matmul %86, %88, %cst_56 {dimension_numbers = #tpu.dot_dimension_numbers<[1], [0], [0], [1], [0, 0, 1, 1], [], []>} : vector<19x32xbf16>, vector<32x32xbf16>, vector<19x32xf32> -> vector<19x32xf32>
    %90 = arith.addf %84, %89 : vector<19x32xf32>
    %c1_57 = arith.constant 1 : index
    %c0_58 = arith.constant 0 : index
    %91 = tpu.strided_load %arg35[%c1_57, %c0_58] {strides = array<i32: 2, 1>} : memref<40x32xf32, #tpu.memory_space<vmem>>, vector<19x32xf32>
    %92 = arith.truncf %91 : vector<19x32xf32> to vector<19x32xbf16>
    %c1_59 = arith.constant 1 : index
    %c0_60 = arith.constant 0 : index
    %c0_61 = arith.constant 0 : index
    %93 = vector.load %arg6[%c1_59, %c0_60, %c0_61] : memref<2x32x32xbf16, #tpu.memory_space<vmem>>, vector<1x32x32xbf16>
    %94 = vector.shape_cast %93 : vector<1x32x32xbf16> to vector<32x32xbf16>
    %cst_62 = arith.constant dense<0.000000e+00> : vector<19x32xf32>
    %95 = tpu.matmul %92, %94, %cst_62 {dimension_numbers = #tpu.dot_dimension_numbers<[1], [0], [0], [1], [0, 0, 1, 1], [], []>} : vector<19x32xbf16>, vector<32x32xbf16>, vector<19x32xf32> -> vector<19x32xf32>
    %96 = arith.addf %90, %95 : vector<19x32xf32>
    %97 = arith.mulf %96, %96 : vector<19x32xf32>
    %98 = arith.mulf %96, %97 : vector<19x32xf32>
    %cst_63 = arith.constant 4.471500e-02 : f32
    %99 = vector.broadcast %cst_63 : f32 to vector<19x32xf32>
    %100 = arith.mulf %99, %98 : vector<19x32xf32>
    %101 = arith.addf %96, %100 : vector<19x32xf32>
    %cst_64 = arith.constant 0.797884583 : f32
    %102 = vector.broadcast %cst_64 : f32 to vector<19x32xf32>
    %103 = arith.mulf %102, %101 : vector<19x32xf32>
    %104 = math.tanh %103 : vector<19x32xf32>
    %cst_65 = arith.constant 1.000000e+00 : f32
    %105 = vector.broadcast %cst_65 : f32 to vector<19x32xf32>
    %106 = arith.addf %105, %104 : vector<19x32xf32>
    %cst_66 = arith.constant 5.000000e-01 : f32
    %107 = vector.broadcast %cst_66 : f32 to vector<19x32xf32>
    %108 = arith.mulf %107, %106 : vector<19x32xf32>
    %109 = arith.mulf %96, %108 : vector<19x32xf32>
    %c0_67 = arith.constant 0 : index
    %c0_68 = arith.constant 0 : index
    %110 = vector.load %arg7[%c0_67, %c0_68] : memref<1x32xf32, #tpu.memory_space<vmem>>, vector<1x32xf32>
    %c0_69 = arith.constant 0 : index
    %c0_70 = arith.constant 0 : index
    %111 = vector.load %arg8[%c0_69, %c0_70] : memref<1x32xf32, #tpu.memory_space<vmem>>, vector<1x32xf32>
    %cst_71 = arith.constant dense<0.000000e+00> : vector<19xf32>
    %112 = vector.multi_reduction <add>, %109, %cst_71 [1] : vector<19x32xf32> to vector<19xf32>
    %113 = vector.shape_cast %112 : vector<19xf32> to vector<19x1xf32>
    %cst_72 = arith.constant 3.200000e+01 : f32
    %114 = vector.broadcast %cst_72 : f32 to vector<19x1xf32>
    %115 = arith.divf %113, %114 : vector<19x1xf32>
    %116 = vector.broadcast %115 : vector<19x1xf32> to vector<19x32xf32>
    %117 = arith.subf %109, %116 : vector<19x32xf32>
    %118 = arith.mulf %117, %117 : vector<19x32xf32>
    %cst_73 = arith.constant dense<0.000000e+00> : vector<19xf32>
    %119 = vector.multi_reduction <add>, %118, %cst_73 [1] : vector<19x32xf32> to vector<19xf32>
    %120 = vector.shape_cast %119 : vector<19xf32> to vector<19x1xf32>
    %cst_74 = arith.constant 3.200000e+01 : f32
    %121 = vector.broadcast %cst_74 : f32 to vector<19x1xf32>
    %122 = arith.divf %120, %121 : vector<19x1xf32>
    %123 = vector.broadcast %115 : vector<19x1xf32> to vector<19x32xf32>
    %124 = arith.subf %109, %123 : vector<19x32xf32>
    %cst_75 = arith.constant 9.99999974E-6 : f32
    %125 = vector.broadcast %cst_75 : f32 to vector<19x1xf32>
    %126 = arith.addf %122, %125 : vector<19x1xf32>
    %127 = math.rsqrt %126 : vector<19x1xf32>
    %128 = vector.broadcast %127 : vector<19x1xf32> to vector<19x32xf32>
    %129 = arith.mulf %124, %128 : vector<19x32xf32>
    %130 = vector.broadcast %110 : vector<1x32xf32> to vector<19x32xf32>
    %131 = arith.mulf %129, %130 : vector<19x32xf32>
    %132 = vector.broadcast %111 : vector<1x32xf32> to vector<19x32xf32>
    %133 = arith.addf %131, %132 : vector<19x32xf32>
    %134 = arith.truncf %133 : vector<19x32xf32> to vector<19x32xbf16>
    %c0_76 = arith.constant 0 : index
    %c0_77 = arith.constant 0 : index
    %135 = vector.load %arg9[%c0_76, %c0_77] : memref<32x64xbf16, #tpu.memory_space<vmem>>, vector<32x64xbf16>
    %cst_78 = arith.constant dense<0.000000e+00> : vector<19x64xf32>
    %136 = tpu.matmul %134, %135, %cst_78 {dimension_numbers = #tpu.dot_dimension_numbers<[1], [0], [0], [1], [0, 0, 1, 1], [], []>} : vector<19x32xbf16>, vector<32x64xbf16>, vector<19x64xf32> -> vector<19x64xf32>
    %c0_79 = arith.constant 0 : index
    %c0_80 = arith.constant 0 : index
    %137 = vector.load %arg10[%c0_79, %c0_80] : memref<1x64xf32, #tpu.memory_space<vmem>>, vector<1x64xf32>
    %138 = vector.broadcast %137 : vector<1x64xf32> to vector<19x64xf32>
    %139 = arith.addf %136, %138 : vector<19x64xf32>
    %cst_81 = arith.constant 0.000000e+00 : f32
    %140 = vector.broadcast %cst_81 : f32 to vector<32x64xf32>
    %c0_82 = arith.constant 0 : index
    %c0_83 = arith.constant 0 : index
    %141 = vector.load %arg36[%c0_82, %c0_83] : memref<32x64xf32, #tpu.memory_space<vmem>>, vector<32x64xf32>
    tpu.vector_store %arg36[%c0_82, %c0_83], %140 {strides = array<i32>} : memref<32x64xf32, #tpu.memory_space<vmem>>, vector<32x64xf32>,
    %c8 = arith.constant 8 : index
    %c0_84 = arith.constant 0 : index
    %142 = vector.load %arg36[%c8, %c0_84] : memref<32x64xf32, #tpu.memory_space<vmem>>, vector<19x64xf32>
    tpu.vector_store %arg36[%c8, %c0_84], %139 {strides = array<i32>} : memref<32x64xf32, #tpu.memory_space<vmem>>, vector<19x64xf32>,
    %cst_85 = arith.constant 0.000000e+00 : f32
    %143 = vector.broadcast %cst_85 : f32 to vector<19x64xf32>
    %c4 = arith.constant 4 : index
    %c0_86 = arith.constant 0 : index
    %144 = vector.load %arg36[%c4, %c0_86] : memref<32x64xf32, #tpu.memory_space<vmem>>, vector<19x64xf32>
    %145 = arith.truncf %144 : vector<19x64xf32> to vector<19x64xbf16>
    %c0_87 = arith.constant 0 : index
    %c0_88 = arith.constant 0 : index
    %c0_89 = arith.constant 0 : index
    %146 = vector.load %arg11[%c0_87, %c0_88, %c0_89] : memref<8x64x64xbf16, #tpu.memory_space<vmem>>, vector<1x64x64xbf16>
    %147 = vector.shape_cast %146 : vector<1x64x64xbf16> to vector<64x64xbf16>
    %cst_90 = arith.constant dense<0.000000e+00> : vector<19x64xf32>
    %148 = tpu.matmul %145, %147, %cst_90 {dimension_numbers = #tpu.dot_dimension_numbers<[1], [0], [0], [1], [0, 0, 1, 1], [], []>} : vector<19x64xbf16>, vector<64x64xbf16>, vector<19x64xf32> -> vector<19x64xf32>
    %149 = arith.addf %143, %148 : vector<19x64xf32>
    %c5 = arith.constant 5 : index
    %c0_91 = arith.constant 0 : index
    %150 = vector.load %arg36[%c5, %c0_91] : memref<32x64xf32, #tpu.memory_space<vmem>>, vector<19x64xf32>
    %151 = arith.truncf %150 : vector<19x64xf32> to vector<19x64xbf16>
    %c1_92 = arith.constant 1 : index
    %c0_93 = arith.constant 0 : index
    %c0_94 = arith.constant 0 : index
    %152 = vector.load %arg11[%c1_92, %c0_93, %c0_94] : memref<8x64x64xbf16, #tpu.memory_space<vmem>>, vector<1x64x64xbf16>
    %153 = vector.shape_cast %152 : vector<1x64x64xbf16> to vector<64x64xbf16>
    %cst_95 = arith.constant dense<0.000000e+00> : vector<19x64xf32>
    %154 = tpu.matmul %151, %153, %cst_95 {dimension_numbers = #tpu.dot_dimension_numbers<[1], [0], [0], [1], [0, 0, 1, 1], [], []>} : vector<19x64xbf16>, vector<64x64xbf16>, vector<19x64xf32> -> vector<19x64xf32>
    %155 = arith.addf %149, %154 : vector<19x64xf32>
    %c6 = arith.constant 6 : index
    %c0_96 = arith.constant 0 : index
    %156 = vector.load %arg36[%c6, %c0_96] : memref<32x64xf32, #tpu.memory_space<vmem>>, vector<19x64xf32>
    %157 = arith.truncf %156 : vector<19x64xf32> to vector<19x64xbf16>
    %c2_97 = arith.constant 2 : index
    %c0_98 = arith.constant 0 : index
    %c0_99 = arith.constant 0 : index
    %158 = vector.load %arg11[%c2_97, %c0_98, %c0_99] : memref<8x64x64xbf16, #tpu.memory_space<vmem>>, vector<1x64x64xbf16>
    %159 = vector.shape_cast %158 : vector<1x64x64xbf16> to vector<64x64xbf16>
    %cst_100 = arith.constant dense<0.000000e+00> : vector<19x64xf32>
    %160 = tpu.matmul %157, %159, %cst_100 {dimension_numbers = #tpu.dot_dimension_numbers<[1], [0], [0], [1], [0, 0, 1, 1], [], []>} : vector<19x64xbf16>, vector<64x64xbf16>, vector<19x64xf32> -> vector<19x64xf32>
    %161 = arith.addf %155, %160 : vector<19x64xf32>
    %c7 = arith.constant 7 : index
    %c0_101 = arith.constant 0 : index
    %162 = vector.load %arg36[%c7, %c0_101] : memref<32x64xf32, #tpu.memory_space<vmem>>, vector<19x64xf32>
    %163 = arith.truncf %162 : vector<19x64xf32> to vector<19x64xbf16>
    %c3 = arith.constant 3 : index
    %c0_102 = arith.constant 0 : index
    %c0_103 = arith.constant 0 : index
    %164 = vector.load %arg11[%c3, %c0_102, %c0_103] : memref<8x64x64xbf16, #tpu.memory_space<vmem>>, vector<1x64x64xbf16>
    %165 = vector.shape_cast %164 : vector<1x64x64xbf16> to vector<64x64xbf16>
    %cst_104 = arith.constant dense<0.000000e+00> : vector<19x64xf32>
    %166 = tpu.matmul %163, %165, %cst_104 {dimension_numbers = #tpu.dot_dimension_numbers<[1], [0], [0], [1], [0, 0, 1, 1], [], []>} : vector<19x64xbf16>, vector<64x64xbf16>, vector<19x64xf32> -> vector<19x64xf32>
    %167 = arith.addf %161, %166 : vector<19x64xf32>
    %c8_105 = arith.constant 8 : index
    %c0_106 = arith.constant 0 : index
    %168 = vector.load %arg36[%c8_105, %c0_106] : memref<32x64xf32, #tpu.memory_space<vmem>>, vector<19x64xf32>
    %169 = arith.truncf %168 : vector<19x64xf32> to vector<19x64xbf16>
    %c4_107 = arith.constant 4 : index
    %c0_108 = arith.constant 0 : index
    %c0_109 = arith.constant 0 : index
    %170 = vector.load %arg11[%c4_107, %c0_108, %c0_109] : memref<8x64x64xbf16, #tpu.memory_space<vmem>>, vector<1x64x64xbf16>
    %171 = vector.shape_cast %170 : vector<1x64x64xbf16> to vector<64x64xbf16>
    %cst_110 = arith.constant dense<0.000000e+00> : vector<19x64xf32>
    %172 = tpu.matmul %169, %171, %cst_110 {dimension_numbers = #tpu.dot_dimension_numbers<[1], [0], [0], [1], [0, 0, 1, 1], [], []>} : vector<19x64xbf16>, vector<64x64xbf16>, vector<19x64xf32> -> vector<19x64xf32>
    %173 = arith.addf %167, %172 : vector<19x64xf32>
    %c9 = arith.constant 9 : index
    %c0_111 = arith.constant 0 : index
    %174 = vector.load %arg36[%c9, %c0_111] : memref<32x64xf32, #tpu.memory_space<vmem>>, vector<19x64xf32>
    %175 = arith.truncf %174 : vector<19x64xf32> to vector<19x64xbf16>
    %c5_112 = arith.constant 5 : index
    %c0_113 = arith.constant 0 : index
    %c0_114 = arith.constant 0 : index
    %176 = vector.load %arg11[%c5_112, %c0_113, %c0_114] : memref<8x64x64xbf16, #tpu.memory_space<vmem>>, vector<1x64x64xbf16>
    %177 = vector.shape_cast %176 : vector<1x64x64xbf16> to vector<64x64xbf16>
    %cst_115 = arith.constant dense<0.000000e+00> : vector<19x64xf32>
    %178 = tpu.matmul %175, %177, %cst_115 {dimension_numbers = #tpu.dot_dimension_numbers<[1], [0], [0], [1], [0, 0, 1, 1], [], []>} : vector<19x64xbf16>, vector<64x64xbf16>, vector<19x64xf32> -> vector<19x64xf32>
    %179 = arith.addf %173, %178 : vector<19x64xf32>
    %c10 = arith.constant 10 : index
    %c0_116 = arith.constant 0 : index
    %180 = vector.load %arg36[%c10, %c0_116] : memref<32x64xf32, #tpu.memory_space<vmem>>, vector<19x64xf32>
    %181 = arith.truncf %180 : vector<19x64xf32> to vector<19x64xbf16>
    %c6_117 = arith.constant 6 : index
    %c0_118 = arith.constant 0 : index
    %c0_119 = arith.constant 0 : index
    %182 = vector.load %arg11[%c6_117, %c0_118, %c0_119] : memref<8x64x64xbf16, #tpu.memory_space<vmem>>, vector<1x64x64xbf16>
    %183 = vector.shape_cast %182 : vector<1x64x64xbf16> to vector<64x64xbf16>
    %cst_120 = arith.constant dense<0.000000e+00> : vector<19x64xf32>
    %184 = tpu.matmul %181, %183, %cst_120 {dimension_numbers = #tpu.dot_dimension_numbers<[1], [0], [0], [1], [0, 0, 1, 1], [], []>} : vector<19x64xbf16>, vector<64x64xbf16>, vector<19x64xf32> -> vector<19x64xf32>
    %185 = arith.addf %179, %184 : vector<19x64xf32>
    %c11 = arith.constant 11 : index
    %c0_121 = arith.constant 0 : index
    %186 = vector.load %arg36[%c11, %c0_121] : memref<32x64xf32, #tpu.memory_space<vmem>>, vector<19x64xf32>
    %187 = arith.truncf %186 : vector<19x64xf32> to vector<19x64xbf16>
    %c7_122 = arith.constant 7 : index
    %c0_123 = arith.constant 0 : index
    %c0_124 = arith.constant 0 : index
    %188 = vector.load %arg11[%c7_122, %c0_123, %c0_124] : memref<8x64x64xbf16, #tpu.memory_space<vmem>>, vector<1x64x64xbf16>
    %189 = vector.shape_cast %188 : vector<1x64x64xbf16> to vector<64x64xbf16>
    %cst_125 = arith.constant dense<0.000000e+00> : vector<19x64xf32>
    %190 = tpu.matmul %187, %189, %cst_125 {dimension_numbers = #tpu.dot_dimension_numbers<[1], [0], [0], [1], [0, 0, 1, 1], [], []>} : vector<19x64xbf16>, vector<64x64xbf16>, vector<19x64xf32> -> vector<19x64xf32>
    %191 = arith.addf %185, %190 : vector<19x64xf32>
    %c0_126 = arith.constant 0 : index
    %c0_127 = arith.constant 0 : index
    %192 = vector.load %arg12[%c0_126, %c0_127] : memref<1x64xf32, #tpu.memory_space<vmem>>, vector<1x64xf32>
    %193 = vector.broadcast %192 : vector<1x64xf32> to vector<19x64xf32>
    %194 = arith.addf %191, %193 : vector<19x64xf32>
    %195 = arith.mulf %194, %194 : vector<19x64xf32>
    %196 = arith.mulf %194, %195 : vector<19x64xf32>
    %cst_128 = arith.constant 4.471500e-02 : f32
    %197 = vector.broadcast %cst_128 : f32 to vector<19x64xf32>
    %198 = arith.mulf %197, %196 : vector<19x64xf32>
    %199 = arith.addf %194, %198 : vector<19x64xf32>
    %cst_129 = arith.constant 0.797884583 : f32
    %200 = vector.broadcast %cst_129 : f32 to vector<19x64xf32>
    %201 = arith.mulf %200, %199 : vector<19x64xf32>
    %202 = math.tanh %201 : vector<19x64xf32>
    %cst_130 = arith.constant 1.000000e+00 : f32
    %203 = vector.broadcast %cst_130 : f32 to vector<19x64xf32>
    %204 = arith.addf %203, %202 : vector<19x64xf32>
    %cst_131 = arith.constant 5.000000e-01 : f32
    %205 = vector.broadcast %cst_131 : f32 to vector<19x64xf32>
    %206 = arith.mulf %205, %204 : vector<19x64xf32>
    %207 = arith.mulf %194, %206 : vector<19x64xf32>
    %208 = arith.addf %139, %207 : vector<19x64xf32>
    %c0_132 = arith.constant 0 : index
    %c0_133 = arith.constant 0 : index
    %209 = vector.load %arg13[%c0_132, %c0_133] : memref<1x64xf32, #tpu.memory_space<vmem>>, vector<1x64xf32>
    %c0_134 = arith.constant 0 : index
    %c0_135 = arith.constant 0 : index
    %210 = vector.load %arg14[%c0_134, %c0_135] : memref<1x64xf32, #tpu.memory_space<vmem>>, vector<1x64xf32>
    %cst_136 = arith.constant dense<0.000000e+00> : vector<19xf32>
    %211 = vector.multi_reduction <add>, %208, %cst_136 [1] : vector<19x64xf32> to vector<19xf32>
    %212 = vector.shape_cast %211 : vector<19xf32> to vector<19x1xf32>
    %cst_137 = arith.constant 6.400000e+01 : f32
    %213 = vector.broadcast %cst_137 : f32 to vector<19x1xf32>
    %214 = arith.divf %212, %213 : vector<19x1xf32>
    %215 = vector.broadcast %214 : vector<19x1xf32> to vector<19x64xf32>
    %216 = arith.subf %208, %215 : vector<19x64xf32>
    %217 = arith.mulf %216, %216 : vector<19x64xf32>
    %cst_138 = arith.constant dense<0.000000e+00> : vector<19xf32>
    %218 = vector.multi_reduction <add>, %217, %cst_138 [1] : vector<19x64xf32> to vector<19xf32>
    %219 = vector.shape_cast %218 : vector<19xf32> to vector<19x1xf32>
    %cst_139 = arith.constant 6.400000e+01 : f32
    %220 = vector.broadcast %cst_139 : f32 to vector<19x1xf32>
    %221 = arith.divf %219, %220 : vector<19x1xf32>
    %222 = vector.broadcast %214 : vector<19x1xf32> to vector<19x64xf32>
    %223 = arith.subf %208, %222 : vector<19x64xf32>
    %cst_140 = arith.constant 9.99999974E-6 : f32
    %224 = vector.broadcast %cst_140 : f32 to vector<19x1xf32>
    %225 = arith.addf %221, %224 : vector<19x1xf32>
    %226 = math.rsqrt %225 : vector<19x1xf32>
    %227 = vector.broadcast %226 : vector<19x1xf32> to vector<19x64xf32>
    %228 = arith.mulf %223, %227 : vector<19x64xf32>
    %229 = vector.broadcast %209 : vector<1x64xf32> to vector<19x64xf32>
    %230 = arith.mulf %228, %229 : vector<19x64xf32>
    %231 = vector.broadcast %210 : vector<1x64xf32> to vector<19x64xf32>
    %232 = arith.addf %230, %231 : vector<19x64xf32>
    %233 = arith.truncf %232 : vector<19x64xf32> to vector<19x64xbf16>
    %cst_141 = arith.constant 0.000000e+00 : f32
    %234 = vector.broadcast %cst_141 : f32 to vector<19x64xf32>
    %c0_142 = arith.constant 0 : index
    %c0_143 = arith.constant 0 : index
    %c0_144 = arith.constant 0 : index
    %c0_145 = arith.constant 0 : index
    %235 = vector.load %arg15[%c0_142, %c0_143, %c0_144, %c0_145] : memref<2x4x64x16xbf16, #tpu.memory_space<vmem>>, vector<1x1x64x16xbf16>
    %236 = vector.shape_cast %235 : vector<1x1x64x16xbf16> to vector<64x16xbf16>
    %cst_146 = arith.constant dense<0.000000e+00> : vector<19x16xf32>
    %237 = tpu.matmul %233, %236, %cst_146 {dimension_numbers = #tpu.dot_dimension_numbers<[1], [0], [0], [1], [0, 0, 1, 1], [], []>} : vector<19x64xbf16>, vector<64x16xbf16>, vector<19x16xf32> -> vector<19x16xf32>
    %c0_147 = arith.constant 0 : index
    %c0_148 = arith.constant 0 : index
    %c0_149 = arith.constant 0 : index
    %c0_150 = arith.constant 0 : index
    %238 = vector.load %arg16[%c0_147, %c0_148, %c0_149, %c0_150] : memref<2x4x1x16xf32, #tpu.memory_space<vmem>>, vector<1x1x1x16xf32>
    %239 = vector.shape_cast %238 : vector<1x1x1x16xf32> to vector<1x16xf32>
    %240 = vector.broadcast %239 : vector<1x16xf32> to vector<19x16xf32>
    %241 = arith.addf %237, %240 : vector<19x16xf32>
    %c0_151 = arith.constant 0 : index
    %c0_152 = arith.constant 0 : index
    %c0_153 = arith.constant 0 : index
    %c0_154 = arith.constant 0 : index
    %242 = vector.load %arg17[%c0_151, %c0_152, %c0_153, %c0_154] : memref<2x4x64x16xbf16, #tpu.memory_space<vmem>>, vector<1x1x64x16xbf16>
    %243 = vector.shape_cast %242 : vector<1x1x64x16xbf16> to vector<64x16xbf16>
    %cst_155 = arith.constant dense<0.000000e+00> : vector<19x16xf32>
    %244 = tpu.matmul %233, %243, %cst_155 {dimension_numbers = #tpu.dot_dimension_numbers<[1], [0], [0], [1], [0, 0, 1, 1], [], []>} : vector<19x64xbf16>, vector<64x16xbf16>, vector<19x16xf32> -> vector<19x16xf32>
    %c0_156 = arith.constant 0 : index
    %c0_157 = arith.constant 0 : index
    %c0_158 = arith.constant 0 : index
    %c0_159 = arith.constant 0 : index
    %245 = vector.load %arg18[%c0_156, %c0_157, %c0_158, %c0_159] : memref<2x4x1x16xf32, #tpu.memory_space<vmem>>, vector<1x1x1x16xf32>
    %246 = vector.shape_cast %245 : vector<1x1x1x16xf32> to vector<1x16xf32>
    %247 = vector.broadcast %246 : vector<1x16xf32> to vector<19x16xf32>
    %248 = arith.addf %244, %247 : vector<19x16xf32>
    %c0_160 = arith.constant 0 : index
    %c0_161 = arith.constant 0 : index
    %c0_162 = arith.constant 0 : index
    %c0_163 = arith.constant 0 : index
    %249 = vector.load %arg19[%c0_160, %c0_161, %c0_162, %c0_163] : memref<2x4x64x16xbf16, #tpu.memory_space<vmem>>, vector<1x1x64x16xbf16>
    %250 = vector.shape_cast %249 : vector<1x1x64x16xbf16> to vector<64x16xbf16>
    %cst_164 = arith.constant dense<0.000000e+00> : vector<19x16xf32>
    %251 = tpu.matmul %233, %250, %cst_164 {dimension_numbers = #tpu.dot_dimension_numbers<[1], [0], [0], [1], [0, 0, 1, 1], [], []>} : vector<19x64xbf16>, vector<64x16xbf16>, vector<19x16xf32> -> vector<19x16xf32>
    %c0_165 = arith.constant 0 : index
    %c0_166 = arith.constant 0 : index
    %c0_167 = arith.constant 0 : index
    %c0_168 = arith.constant 0 : index
    %252 = vector.load %arg20[%c0_165, %c0_166, %c0_167, %c0_168] : memref<2x4x1x16xf32, #tpu.memory_space<vmem>>, vector<1x1x1x16xf32>
    %253 = vector.shape_cast %252 : vector<1x1x1x16xf32> to vector<1x16xf32>
    %254 = vector.broadcast %253 : vector<1x16xf32> to vector<19x16xf32>
    %255 = arith.addf %251, %254 : vector<19x16xf32>
    %256 = arith.truncf %241 : vector<19x16xf32> to vector<19x16xbf16>
    %257 = arith.truncf %248 : vector<19x16xf32> to vector<19x16xbf16>
    %cst_169 = arith.constant dense<0.000000e+00> : vector<19x19xf32>
    %258 = tpu.matmul %256, %257, %cst_169 {dimension_numbers = #tpu.dot_dimension_numbers<[1], [1], [0], [0], [0, 0, 1, 0], [], []>} : vector<19x16xbf16>, vector<19x16xbf16>, vector<19x19xf32> -> vector<19x19xf32>
    %cst_170 = arith.constant 2.500000e-01 : f32
    %259 = vector.broadcast %cst_170 : f32 to vector<19x19xf32>
    %260 = arith.mulf %258, %259 : vector<19x19xf32>
    %cst_171 = arith.constant dense<0xFF800000> : vector<19xf32>
    %261 = vector.multi_reduction <maximumf>, %260, %cst_171 [1] : vector<19x19xf32> to vector<19xf32>
    %262 = vector.shape_cast %261 : vector<19xf32> to vector<19x1xf32>
    %263 = vector.broadcast %262 : vector<19x1xf32> to vector<19x19xf32>
    %264 = arith.subf %260, %263 : vector<19x19xf32>
    %265 = math.exp %264 : vector<19x19xf32>
    %cst_172 = arith.constant dense<0.000000e+00> : vector<19xf32>
    %266 = vector.multi_reduction <add>, %265, %cst_172 [1] : vector<19x19xf32> to vector<19xf32>
    %267 = vector.shape_cast %266 : vector<19xf32> to vector<19x1xf32>
    %268 = tpu.reciprocal %267 {approx = true} : vector<19x1xf32> -> vector<19x1xf32>
    %269 = vector.broadcast %268 : vector<19x1xf32> to vector<19x19xf32>
    %270 = arith.mulf %265, %269 : vector<19x19xf32>
    %271 = arith.truncf %270 : vector<19x19xf32> to vector<19x19xbf16>
    %272 = arith.truncf %255 : vector<19x16xf32> to vector<19x16xbf16>
    %cst_173 = arith.constant dense<0.000000e+00> : vector<19x16xf32>
    %273 = tpu.matmul %271, %272, %cst_173 {dimension_numbers = #tpu.dot_dimension_numbers<[1], [0], [0], [1], [0, 0, 1, 1], [], []>} : vector<19x19xbf16>, vector<19x16xbf16>, vector<19x16xf32> -> vector<19x16xf32>
    %274 = arith.truncf %273 : vector<19x16xf32> to vector<19x16xbf16>
    %c0_174 = arith.constant 0 : index
    %c0_175 = arith.constant 0 : index
    %c0_176 = arith.constant 0 : index
    %c0_177 = arith.constant 0 : index
    %275 = vector.load %arg21[%c0_174, %c0_175, %c0_176, %c0_177] : memref<2x4x16x64xbf16, #tpu.memory_space<vmem>>, vector<1x1x16x64xbf16>
    %276 = vector.shape_cast %275 : vector<1x1x16x64xbf16> to vector<16x64xbf16>
    %cst_178 = arith.constant dense<0.000000e+00> : vector<19x64xf32>
    %277 = tpu.matmul %274, %276, %cst_178 {dimension_numbers = #tpu.dot_dimension_numbers<[1], [0], [0], [1], [0, 0, 1, 1], [], []>} : vector<19x16xbf16>, vector<16x64xbf16>, vector<19x64xf32> -> vector<19x64xf32>
    %278 = arith.addf %234, %277 : vector<19x64xf32>
    %c0_179 = arith.constant 0 : index
    %c1_180 = arith.constant 1 : index
    %c0_181 = arith.constant 0 : index
    %c0_182 = arith.constant 0 : index
    %279 = vector.load %arg15[%c0_179, %c1_180, %c0_181, %c0_182] : memref<2x4x64x16xbf16, #tpu.memory_space<vmem>>, vector<1x1x64x16xbf16>
    %280 = vector.shape_cast %279 : vector<1x1x64x16xbf16> to vector<64x16xbf16>
    %cst_183 = arith.constant dense<0.000000e+00> : vector<19x16xf32>
    %281 = tpu.matmul %233, %280, %cst_183 {dimension_numbers = #tpu.dot_dimension_numbers<[1], [0], [0], [1], [0, 0, 1, 1], [], []>} : vector<19x64xbf16>, vector<64x16xbf16>, vector<19x16xf32> -> vector<19x16xf32>
    %c0_184 = arith.constant 0 : index
    %c1_185 = arith.constant 1 : index
    %c0_186 = arith.constant 0 : index
    %c0_187 = arith.constant 0 : index
    %282 = vector.load %arg16[%c0_184, %c1_185, %c0_186, %c0_187] : memref<2x4x1x16xf32, #tpu.memory_space<vmem>>, vector<1x1x1x16xf32>
    %283 = vector.shape_cast %282 : vector<1x1x1x16xf32> to vector<1x16xf32>
    %284 = vector.broadcast %283 : vector<1x16xf32> to vector<19x16xf32>
    %285 = arith.addf %281, %284 : vector<19x16xf32>
    %c0_188 = arith.constant 0 : index
    %c1_189 = arith.constant 1 : index
    %c0_190 = arith.constant 0 : index
    %c0_191 = arith.constant 0 : index
    %286 = vector.load %arg17[%c0_188, %c1_189, %c0_190, %c0_191] : memref<2x4x64x16xbf16, #tpu.memory_space<vmem>>, vector<1x1x64x16xbf16>
    %287 = vector.shape_cast %286 : vector<1x1x64x16xbf16> to vector<64x16xbf16>
    %cst_192 = arith.constant dense<0.000000e+00> : vector<19x16xf32>
    %288 = tpu.matmul %233, %287, %cst_192 {dimension_numbers = #tpu.dot_dimension_numbers<[1], [0], [0], [1], [0, 0, 1, 1], [], []>} : vector<19x64xbf16>, vector<64x16xbf16>, vector<19x16xf32> -> vector<19x16xf32>
    %c0_193 = arith.constant 0 : index
    %c1_194 = arith.constant 1 : index
    %c0_195 = arith.constant 0 : index
    %c0_196 = arith.constant 0 : index
    %289 = vector.load %arg18[%c0_193, %c1_194, %c0_195, %c0_196] : memref<2x4x1x16xf32, #tpu.memory_space<vmem>>, vector<1x1x1x16xf32>
    %290 = vector.shape_cast %289 : vector<1x1x1x16xf32> to vector<1x16xf32>
    %291 = vector.broadcast %290 : vector<1x16xf32> to vector<19x16xf32>
    %292 = arith.addf %288, %291 : vector<19x16xf32>
    %c0_197 = arith.constant 0 : index
    %c1_198 = arith.constant 1 : index
    %c0_199 = arith.constant 0 : index
    %c0_200 = arith.constant 0 : index
    %293 = vector.load %arg19[%c0_197, %c1_198, %c0_199, %c0_200] : memref<2x4x64x16xbf16, #tpu.memory_space<vmem>>, vector<1x1x64x16xbf16>
    %294 = vector.shape_cast %293 : vector<1x1x64x16xbf16> to vector<64x16xbf16>
    %cst_201 = arith.constant dense<0.000000e+00> : vector<19x16xf32>
    %295 = tpu.matmul %233, %294, %cst_201 {dimension_numbers = #tpu.dot_dimension_numbers<[1], [0], [0], [1], [0, 0, 1, 1], [], []>} : vector<19x64xbf16>, vector<64x16xbf16>, vector<19x16xf32> -> vector<19x16xf32>
    %c0_202 = arith.constant 0 : index
    %c1_203 = arith.constant 1 : index
    %c0_204 = arith.constant 0 : index
    %c0_205 = arith.constant 0 : index
    %296 = vector.load %arg20[%c0_202, %c1_203, %c0_204, %c0_205] : memref<2x4x1x16xf32, #tpu.memory_space<vmem>>, vector<1x1x1x16xf32>
    %297 = vector.shape_cast %296 : vector<1x1x1x16xf32> to vector<1x16xf32>
    %298 = vector.broadcast %297 : vector<1x16xf32> to vector<19x16xf32>
    %299 = arith.addf %295, %298 : vector<19x16xf32>
    %300 = arith.truncf %285 : vector<19x16xf32> to vector<19x16xbf16>
    %301 = arith.truncf %292 : vector<19x16xf32> to vector<19x16xbf16>
    %cst_206 = arith.constant dense<0.000000e+00> : vector<19x19xf32>
    %302 = tpu.matmul %300, %301, %cst_206 {dimension_numbers = #tpu.dot_dimension_numbers<[1], [1], [0], [0], [0, 0, 1, 0], [], []>} : vector<19x16xbf16>, vector<19x16xbf16>, vector<19x19xf32> -> vector<19x19xf32>
    %cst_207 = arith.constant 2.500000e-01 : f32
    %303 = vector.broadcast %cst_207 : f32 to vector<19x19xf32>
    %304 = arith.mulf %302, %303 : vector<19x19xf32>
    %cst_208 = arith.constant dense<0xFF800000> : vector<19xf32>
    %305 = vector.multi_reduction <maximumf>, %304, %cst_208 [1] : vector<19x19xf32> to vector<19xf32>
    %306 = vector.shape_cast %305 : vector<19xf32> to vector<19x1xf32>
    %307 = vector.broadcast %306 : vector<19x1xf32> to vector<19x19xf32>
    %308 = arith.subf %304, %307 : vector<19x19xf32>
    %309 = math.exp %308 : vector<19x19xf32>
    %cst_209 = arith.constant dense<0.000000e+00> : vector<19xf32>
    %310 = vector.multi_reduction <add>, %309, %cst_209 [1] : vector<19x19xf32> to vector<19xf32>
    %311 = vector.shape_cast %310 : vector<19xf32> to vector<19x1xf32>
    %312 = tpu.reciprocal %311 {approx = true} : vector<19x1xf32> -> vector<19x1xf32>
    %313 = vector.broadcast %312 : vector<19x1xf32> to vector<19x19xf32>
    %314 = arith.mulf %309, %313 : vector<19x19xf32>
    %315 = arith.truncf %314 : vector<19x19xf32> to vector<19x19xbf16>
    %316 = arith.truncf %299 : vector<19x16xf32> to vector<19x16xbf16>
    %cst_210 = arith.constant dense<0.000000e+00> : vector<19x16xf32>
    %317 = tpu.matmul %315, %316, %cst_210 {dimension_numbers = #tpu.dot_dimension_numbers<[1], [0], [0], [1], [0, 0, 1, 1], [], []>} : vector<19x19xbf16>, vector<19x16xbf16>, vector<19x16xf32> -> vector<19x16xf32>
    %318 = arith.truncf %317 : vector<19x16xf32> to vector<19x16xbf16>
    %c0_211 = arith.constant 0 : index
    %c1_212 = arith.constant 1 : index
    %c0_213 = arith.constant 0 : index
    %c0_214 = arith.constant 0 : index
    %319 = vector.load %arg21[%c0_211, %c1_212, %c0_213, %c0_214] : memref<2x4x16x64xbf16, #tpu.memory_space<vmem>>, vector<1x1x16x64xbf16>
    %320 = vector.shape_cast %319 : vector<1x1x16x64xbf16> to vector<16x64xbf16>
    %cst_215 = arith.constant dense<0.000000e+00> : vector<19x64xf32>
    %321 = tpu.matmul %318, %320, %cst_215 {dimension_numbers = #tpu.dot_dimension_numbers<[1], [0], [0], [1], [0, 0, 1, 1], [], []>} : vector<19x16xbf16>, vector<16x64xbf16>, vector<19x64xf32> -> vector<19x64xf32>
    %322 = arith.addf %278, %321 : vector<19x64xf32>
    %c0_216 = arith.constant 0 : index
    %c2_217 = arith.constant 2 : index
    %c0_218 = arith.constant 0 : index
    %c0_219 = arith.constant 0 : index
    %323 = vector.load %arg15[%c0_216, %c2_217, %c0_218, %c0_219] : memref<2x4x64x16xbf16, #tpu.memory_space<vmem>>, vector<1x1x64x16xbf16>
    %324 = vector.shape_cast %323 : vector<1x1x64x16xbf16> to vector<64x16xbf16>
    %cst_220 = arith.constant dense<0.000000e+00> : vector<19x16xf32>
    %325 = tpu.matmul %233, %324, %cst_220 {dimension_numbers = #tpu.dot_dimension_numbers<[1], [0], [0], [1], [0, 0, 1, 1], [], []>} : vector<19x64xbf16>, vector<64x16xbf16>, vector<19x16xf32> -> vector<19x16xf32>
    %c0_221 = arith.constant 0 : index
    %c2_222 = arith.constant 2 : index
    %c0_223 = arith.constant 0 : index
    %c0_224 = arith.constant 0 : index
    %326 = vector.load %arg16[%c0_221, %c2_222, %c0_223, %c0_224] : memref<2x4x1x16xf32, #tpu.memory_space<vmem>>, vector<1x1x1x16xf32>
    %327 = vector.shape_cast %326 : vector<1x1x1x16xf32> to vector<1x16xf32>
    %328 = vector.broadcast %327 : vector<1x16xf32> to vector<19x16xf32>
    %329 = arith.addf %325, %328 : vector<19x16xf32>
    %c0_225 = arith.constant 0 : index
    %c2_226 = arith.constant 2 : index
    %c0_227 = arith.constant 0 : index
    %c0_228 = arith.constant 0 : index
    %330 = vector.load %arg17[%c0_225, %c2_226, %c0_227, %c0_228] : memref<2x4x64x16xbf16, #tpu.memory_space<vmem>>, vector<1x1x64x16xbf16>
    %331 = vector.shape_cast %330 : vector<1x1x64x16xbf16> to vector<64x16xbf16>
    %cst_229 = arith.constant dense<0.000000e+00> : vector<19x16xf32>
    %332 = tpu.matmul %233, %331, %cst_229 {dimension_numbers = #tpu.dot_dimension_numbers<[1], [0], [0], [1], [0, 0, 1, 1], [], []>} : vector<19x64xbf16>, vector<64x16xbf16>, vector<19x16xf32> -> vector<19x16xf32>
    %c0_230 = arith.constant 0 : index
    %c2_231 = arith.constant 2 : index
    %c0_232 = arith.constant 0 : index
    %c0_233 = arith.constant 0 : index
    %333 = vector.load %arg18[%c0_230, %c2_231, %c0_232, %c0_233] : memref<2x4x1x16xf32, #tpu.memory_space<vmem>>, vector<1x1x1x16xf32>
    %334 = vector.shape_cast %333 : vector<1x1x1x16xf32> to vector<1x16xf32>
    %335 = vector.broadcast %334 : vector<1x16xf32> to vector<19x16xf32>
    %336 = arith.addf %332, %335 : vector<19x16xf32>
    %c0_234 = arith.constant 0 : index
    %c2_235 = arith.constant 2 : index
    %c0_236 = arith.constant 0 : index
    %c0_237 = arith.constant 0 : index
    %337 = vector.load %arg19[%c0_234, %c2_235, %c0_236, %c0_237] : memref<2x4x64x16xbf16, #tpu.memory_space<vmem>>, vector<1x1x64x16xbf16>
    %338 = vector.shape_cast %337 : vector<1x1x64x16xbf16> to vector<64x16xbf16>
    %cst_238 = arith.constant dense<0.000000e+00> : vector<19x16xf32>
    %339 = tpu.matmul %233, %338, %cst_238 {dimension_numbers = #tpu.dot_dimension_numbers<[1], [0], [0], [1], [0, 0, 1, 1], [], []>} : vector<19x64xbf16>, vector<64x16xbf16>, vector<19x16xf32> -> vector<19x16xf32>
    %c0_239 = arith.constant 0 : index
    %c2_240 = arith.constant 2 : index
    %c0_241 = arith.constant 0 : index
    %c0_242 = arith.constant 0 : index
    %340 = vector.load %arg20[%c0_239, %c2_240, %c0_241, %c0_242] : memref<2x4x1x16xf32, #tpu.memory_space<vmem>>, vector<1x1x1x16xf32>
    %341 = vector.shape_cast %340 : vector<1x1x1x16xf32> to vector<1x16xf32>
    %342 = vector.broadcast %341 : vector<1x16xf32> to vector<19x16xf32>
    %343 = arith.addf %339, %342 : vector<19x16xf32>
    %344 = arith.truncf %329 : vector<19x16xf32> to vector<19x16xbf16>
    %345 = arith.truncf %336 : vector<19x16xf32> to vector<19x16xbf16>
    %cst_243 = arith.constant dense<0.000000e+00> : vector<19x19xf32>
    %346 = tpu.matmul %344, %345, %cst_243 {dimension_numbers = #tpu.dot_dimension_numbers<[1], [1], [0], [0], [0, 0, 1, 0], [], []>} : vector<19x16xbf16>, vector<19x16xbf16>, vector<19x19xf32> -> vector<19x19xf32>
    %cst_244 = arith.constant 2.500000e-01 : f32
    %347 = vector.broadcast %cst_244 : f32 to vector<19x19xf32>
    %348 = arith.mulf %346, %347 : vector<19x19xf32>
    %cst_245 = arith.constant dense<0xFF800000> : vector<19xf32>
    %349 = vector.multi_reduction <maximumf>, %348, %cst_245 [1] : vector<19x19xf32> to vector<19xf32>
    %350 = vector.shape_cast %349 : vector<19xf32> to vector<19x1xf32>
    %351 = vector.broadcast %350 : vector<19x1xf32> to vector<19x19xf32>
    %352 = arith.subf %348, %351 : vector<19x19xf32>
    %353 = math.exp %352 : vector<19x19xf32>
    %cst_246 = arith.constant dense<0.000000e+00> : vector<19xf32>
    %354 = vector.multi_reduction <add>, %353, %cst_246 [1] : vector<19x19xf32> to vector<19xf32>
    %355 = vector.shape_cast %354 : vector<19xf32> to vector<19x1xf32>
    %356 = tpu.reciprocal %355 {approx = true} : vector<19x1xf32> -> vector<19x1xf32>
    %357 = vector.broadcast %356 : vector<19x1xf32> to vector<19x19xf32>
    %358 = arith.mulf %353, %357 : vector<19x19xf32>
    %359 = arith.truncf %358 : vector<19x19xf32> to vector<19x19xbf16>
    %360 = arith.truncf %343 : vector<19x16xf32> to vector<19x16xbf16>
    %cst_247 = arith.constant dense<0.000000e+00> : vector<19x16xf32>
    %361 = tpu.matmul %359, %360, %cst_247 {dimension_numbers = #tpu.dot_dimension_numbers<[1], [0], [0], [1], [0, 0, 1, 1], [], []>} : vector<19x19xbf16>, vector<19x16xbf16>, vector<19x16xf32> -> vector<19x16xf32>
    %362 = arith.truncf %361 : vector<19x16xf32> to vector<19x16xbf16>
    %c0_248 = arith.constant 0 : index
    %c2_249 = arith.constant 2 : index
    %c0_250 = arith.constant 0 : index
    %c0_251 = arith.constant 0 : index
    %363 = vector.load %arg21[%c0_248, %c2_249, %c0_250, %c0_251] : memref<2x4x16x64xbf16, #tpu.memory_space<vmem>>, vector<1x1x16x64xbf16>
    %364 = vector.shape_cast %363 : vector<1x1x16x64xbf16> to vector<16x64xbf16>
    %cst_252 = arith.constant dense<0.000000e+00> : vector<19x64xf32>
    %365 = tpu.matmul %362, %364, %cst_252 {dimension_numbers = #tpu.dot_dimension_numbers<[1], [0], [0], [1], [0, 0, 1, 1], [], []>} : vector<19x16xbf16>, vector<16x64xbf16>, vector<19x64xf32> -> vector<19x64xf32>
    %366 = arith.addf %322, %365 : vector<19x64xf32>
    %c0_253 = arith.constant 0 : index
    %c3_254 = arith.constant 3 : index
    %c0_255 = arith.constant 0 : index
    %c0_256 = arith.constant 0 : index
    %367 = vector.load %arg15[%c0_253, %c3_254, %c0_255, %c0_256] : memref<2x4x64x16xbf16, #tpu.memory_space<vmem>>, vector<1x1x64x16xbf16>
    %368 = vector.shape_cast %367 : vector<1x1x64x16xbf16> to vector<64x16xbf16>
    %cst_257 = arith.constant dense<0.000000e+00> : vector<19x16xf32>
    %369 = tpu.matmul %233, %368, %cst_257 {dimension_numbers = #tpu.dot_dimension_numbers<[1], [0], [0], [1], [0, 0, 1, 1], [], []>} : vector<19x64xbf16>, vector<64x16xbf16>, vector<19x16xf32> -> vector<19x16xf32>
    %c0_258 = arith.constant 0 : index
    %c3_259 = arith.constant 3 : index
    %c0_260 = arith.constant 0 : index
    %c0_261 = arith.constant 0 : index
    %370 = vector.load %arg16[%c0_258, %c3_259, %c0_260, %c0_261] : memref<2x4x1x16xf32, #tpu.memory_space<vmem>>, vector<1x1x1x16xf32>
    %371 = vector.shape_cast %370 : vector<1x1x1x16xf32> to vector<1x16xf32>
    %372 = vector.broadcast %371 : vector<1x16xf32> to vector<19x16xf32>
    %373 = arith.addf %369, %372 : vector<19x16xf32>
    %c0_262 = arith.constant 0 : index
    %c3_263 = arith.constant 3 : index
    %c0_264 = arith.constant 0 : index
    %c0_265 = arith.constant 0 : index
    %374 = vector.load %arg17[%c0_262, %c3_263, %c0_264, %c0_265] : memref<2x4x64x16xbf16, #tpu.memory_space<vmem>>, vector<1x1x64x16xbf16>
    %375 = vector.shape_cast %374 : vector<1x1x64x16xbf16> to vector<64x16xbf16>
    %cst_266 = arith.constant dense<0.000000e+00> : vector<19x16xf32>
    %376 = tpu.matmul %233, %375, %cst_266 {dimension_numbers = #tpu.dot_dimension_numbers<[1], [0], [0], [1], [0, 0, 1, 1], [], []>} : vector<19x64xbf16>, vector<64x16xbf16>, vector<19x16xf32> -> vector<19x16xf32>
    %c0_267 = arith.constant 0 : index
    %c3_268 = arith.constant 3 : index
    %c0_269 = arith.constant 0 : index
    %c0_270 = arith.constant 0 : index
    %377 = vector.load %arg18[%c0_267, %c3_268, %c0_269, %c0_270] : memref<2x4x1x16xf32, #tpu.memory_space<vmem>>, vector<1x1x1x16xf32>
    %378 = vector.shape_cast %377 : vector<1x1x1x16xf32> to vector<1x16xf32>
    %379 = vector.broadcast %378 : vector<1x16xf32> to vector<19x16xf32>
    %380 = arith.addf %376, %379 : vector<19x16xf32>
    %c0_271 = arith.constant 0 : index
    %c3_272 = arith.constant 3 : index
    %c0_273 = arith.constant 0 : index
    %c0_274 = arith.constant 0 : index
    %381 = vector.load %arg19[%c0_271, %c3_272, %c0_273, %c0_274] : memref<2x4x64x16xbf16, #tpu.memory_space<vmem>>, vector<1x1x64x16xbf16>
    %382 = vector.shape_cast %381 : vector<1x1x64x16xbf16> to vector<64x16xbf16>
    %cst_275 = arith.constant dense<0.000000e+00> : vector<19x16xf32>
    %383 = tpu.matmul %233, %382, %cst_275 {dimension_numbers = #tpu.dot_dimension_numbers<[1], [0], [0], [1], [0, 0, 1, 1], [], []>} : vector<19x64xbf16>, vector<64x16xbf16>, vector<19x16xf32> -> vector<19x16xf32>
    %c0_276 = arith.constant 0 : index
    %c3_277 = arith.constant 3 : index
    %c0_278 = arith.constant 0 : index
    %c0_279 = arith.constant 0 : index
    %384 = vector.load %arg20[%c0_276, %c3_277, %c0_278, %c0_279] : memref<2x4x1x16xf32, #tpu.memory_space<vmem>>, vector<1x1x1x16xf32>
    %385 = vector.shape_cast %384 : vector<1x1x1x16xf32> to vector<1x16xf32>
    %386 = vector.broadcast %385 : vector<1x16xf32> to vector<19x16xf32>
    %387 = arith.addf %383, %386 : vector<19x16xf32>
    %388 = arith.truncf %373 : vector<19x16xf32> to vector<19x16xbf16>
    %389 = arith.truncf %380 : vector<19x16xf32> to vector<19x16xbf16>
    %cst_280 = arith.constant dense<0.000000e+00> : vector<19x19xf32>
    %390 = tpu.matmul %388, %389, %cst_280 {dimension_numbers = #tpu.dot_dimension_numbers<[1], [1], [0], [0], [0, 0, 1, 0], [], []>} : vector<19x16xbf16>, vector<19x16xbf16>, vector<19x19xf32> -> vector<19x19xf32>
    %cst_281 = arith.constant 2.500000e-01 : f32
    %391 = vector.broadcast %cst_281 : f32 to vector<19x19xf32>
    %392 = arith.mulf %390, %391 : vector<19x19xf32>
    %cst_282 = arith.constant dense<0xFF800000> : vector<19xf32>
    %393 = vector.multi_reduction <maximumf>, %392, %cst_282 [1] : vector<19x19xf32> to vector<19xf32>
    %394 = vector.shape_cast %393 : vector<19xf32> to vector<19x1xf32>
    %395 = vector.broadcast %394 : vector<19x1xf32> to vector<19x19xf32>
    %396 = arith.subf %392, %395 : vector<19x19xf32>
    %397 = math.exp %396 : vector<19x19xf32>
    %cst_283 = arith.constant dense<0.000000e+00> : vector<19xf32>
    %398 = vector.multi_reduction <add>, %397, %cst_283 [1] : vector<19x19xf32> to vector<19xf32>
    %399 = vector.shape_cast %398 : vector<19xf32> to vector<19x1xf32>
    %400 = tpu.reciprocal %399 {approx = true} : vector<19x1xf32> -> vector<19x1xf32>
    %401 = vector.broadcast %400 : vector<19x1xf32> to vector<19x19xf32>
    %402 = arith.mulf %397, %401 : vector<19x19xf32>
    %403 = arith.truncf %402 : vector<19x19xf32> to vector<19x19xbf16>
    %404 = arith.truncf %387 : vector<19x16xf32> to vector<19x16xbf16>
    %cst_284 = arith.constant dense<0.000000e+00> : vector<19x16xf32>
    %405 = tpu.matmul %403, %404, %cst_284 {dimension_numbers = #tpu.dot_dimension_numbers<[1], [0], [0], [1], [0, 0, 1, 1], [], []>} : vector<19x19xbf16>, vector<19x16xbf16>, vector<19x16xf32> -> vector<19x16xf32>
    %406 = arith.truncf %405 : vector<19x16xf32> to vector<19x16xbf16>
    %c0_285 = arith.constant 0 : index
    %c3_286 = arith.constant 3 : index
    %c0_287 = arith.constant 0 : index
    %c0_288 = arith.constant 0 : index
    %407 = vector.load %arg21[%c0_285, %c3_286, %c0_287, %c0_288] : memref<2x4x16x64xbf16, #tpu.memory_space<vmem>>, vector<1x1x16x64xbf16>
    %408 = vector.shape_cast %407 : vector<1x1x16x64xbf16> to vector<16x64xbf16>
    %cst_289 = arith.constant dense<0.000000e+00> : vector<19x64xf32>
    %409 = tpu.matmul %406, %408, %cst_289 {dimension_numbers = #tpu.dot_dimension_numbers<[1], [0], [0], [1], [0, 0, 1, 1], [], []>} : vector<19x16xbf16>, vector<16x64xbf16>, vector<19x64xf32> -> vector<19x64xf32>
    %410 = arith.addf %366, %409 : vector<19x64xf32>
    %c0_290 = arith.constant 0 : index
    %c0_291 = arith.constant 0 : index
    %c0_292 = arith.constant 0 : index
    %411 = vector.load %arg22[%c0_290, %c0_291, %c0_292] : memref<2x1x64xf32, #tpu.memory_space<vmem>>, vector<1x1x64xf32>
    %412 = vector.shape_cast %411 : vector<1x1x64xf32> to vector<1x64xf32>
    %413 = vector.broadcast %412 : vector<1x64xf32> to vector<19x64xf32>
    %414 = arith.addf %410, %413 : vector<19x64xf32>
    %415 = arith.addf %232, %414 : vector<19x64xf32>
    %c0_293 = arith.constant 0 : index
    %c0_294 = arith.constant 0 : index
    %c0_295 = arith.constant 0 : index
    %416 = vector.load %arg23[%c0_293, %c0_294, %c0_295] : memref<2x1x64xf32, #tpu.memory_space<vmem>>, vector<1x1x64xf32>
    %417 = vector.shape_cast %416 : vector<1x1x64xf32> to vector<1x64xf32>
    %c0_296 = arith.constant 0 : index
    %c0_297 = arith.constant 0 : index
    %c0_298 = arith.constant 0 : index
    %418 = vector.load %arg24[%c0_296, %c0_297, %c0_298] : memref<2x1x64xf32, #tpu.memory_space<vmem>>, vector<1x1x64xf32>
    %419 = vector.shape_cast %418 : vector<1x1x64xf32> to vector<1x64xf32>
    %cst_299 = arith.constant dense<0.000000e+00> : vector<19xf32>
    %420 = vector.multi_reduction <add>, %415, %cst_299 [1] : vector<19x64xf32> to vector<19xf32>
    %421 = vector.shape_cast %420 : vector<19xf32> to vector<19x1xf32>
    %cst_300 = arith.constant 6.400000e+01 : f32
    %422 = vector.broadcast %cst_300 : f32 to vector<19x1xf32>
    %423 = arith.divf %421, %422 : vector<19x1xf32>
    %424 = vector.broadcast %423 : vector<19x1xf32> to vector<19x64xf32>
    %425 = arith.subf %415, %424 : vector<19x64xf32>
    %426 = arith.mulf %425, %425 : vector<19x64xf32>
    %cst_301 = arith.constant dense<0.000000e+00> : vector<19xf32>
    %427 = vector.multi_reduction <add>, %426, %cst_301 [1] : vector<19x64xf32> to vector<19xf32>
    %428 = vector.shape_cast %427 : vector<19xf32> to vector<19x1xf32>
    %cst_302 = arith.constant 6.400000e+01 : f32
    %429 = vector.broadcast %cst_302 : f32 to vector<19x1xf32>
    %430 = arith.divf %428, %429 : vector<19x1xf32>
    %431 = vector.broadcast %423 : vector<19x1xf32> to vector<19x64xf32>
    %432 = arith.subf %415, %431 : vector<19x64xf32>
    %cst_303 = arith.constant 9.99999974E-6 : f32
    %433 = vector.broadcast %cst_303 : f32 to vector<19x1xf32>
    %434 = arith.addf %430, %433 : vector<19x1xf32>
    %435 = math.rsqrt %434 : vector<19x1xf32>
    %436 = vector.broadcast %435 : vector<19x1xf32> to vector<19x64xf32>
    %437 = arith.mulf %432, %436 : vector<19x64xf32>
    %438 = vector.broadcast %417 : vector<1x64xf32> to vector<19x64xf32>
    %439 = arith.mulf %437, %438 : vector<19x64xf32>
    %440 = vector.broadcast %419 : vector<1x64xf32> to vector<19x64xf32>
    %441 = arith.addf %439, %440 : vector<19x64xf32>
    %442 = arith.truncf %441 : vector<19x64xf32> to vector<19x64xbf16>
    %c0_304 = arith.constant 0 : index
    %c0_305 = arith.constant 0 : index
    %c0_306 = arith.constant 0 : index
    %443 = vector.load %arg25[%c0_304, %c0_305, %c0_306] : memref<2x64x128xbf16, #tpu.memory_space<vmem>>, vector<1x64x128xbf16>
    %444 = vector.shape_cast %443 : vector<1x64x128xbf16> to vector<64x128xbf16>
    %cst_307 = arith.constant dense<0.000000e+00> : vector<19x128xf32>
    %445 = tpu.matmul %442, %444, %cst_307 {dimension_numbers = #tpu.dot_dimension_numbers<[1], [0], [0], [1], [0, 0, 1, 1], [], []>} : vector<19x64xbf16>, vector<64x128xbf16>, vector<19x128xf32> -> vector<19x128xf32>
    %c0_308 = arith.constant 0 : index
    %c0_309 = arith.constant 0 : index
    %c0_310 = arith.constant 0 : index
    %446 = vector.load %arg26[%c0_308, %c0_309, %c0_310] : memref<2x1x128xf32, #tpu.memory_space<vmem>>, vector<1x1x128xf32>
    %447 = vector.shape_cast %446 : vector<1x1x128xf32> to vector<1x128xf32>
    %448 = vector.broadcast %447 : vector<1x128xf32> to vector<19x128xf32>
    %449 = arith.addf %445, %448 : vector<19x128xf32>
    %450 = arith.mulf %449, %449 : vector<19x128xf32>
    %451 = arith.mulf %449, %450 : vector<19x128xf32>
    %cst_311 = arith.constant 4.471500e-02 : f32
    %452 = vector.broadcast %cst_311 : f32 to vector<19x128xf32>
    %453 = arith.mulf %452, %451 : vector<19x128xf32>
    %454 = arith.addf %449, %453 : vector<19x128xf32>
    %cst_312 = arith.constant 0.797884583 : f32
    %455 = vector.broadcast %cst_312 : f32 to vector<19x128xf32>
    %456 = arith.mulf %455, %454 : vector<19x128xf32>
    %457 = math.tanh %456 : vector<19x128xf32>
    %cst_313 = arith.constant 1.000000e+00 : f32
    %458 = vector.broadcast %cst_313 : f32 to vector<19x128xf32>
    %459 = arith.addf %458, %457 : vector<19x128xf32>
    %cst_314 = arith.constant 5.000000e-01 : f32
    %460 = vector.broadcast %cst_314 : f32 to vector<19x128xf32>
    %461 = arith.mulf %460, %459 : vector<19x128xf32>
    %462 = arith.mulf %449, %461 : vector<19x128xf32>
    %463 = arith.truncf %462 : vector<19x128xf32> to vector<19x128xbf16>
    %c0_315 = arith.constant 0 : index
    %c0_316 = arith.constant 0 : index
    %c0_317 = arith.constant 0 : index
    %464 = vector.load %arg27[%c0_315, %c0_316, %c0_317] : memref<2x128x64xbf16, #tpu.memory_space<vmem>>, vector<1x128x64xbf16>
    %465 = vector.shape_cast %464 : vector<1x128x64xbf16> to vector<128x64xbf16>
    %cst_318 = arith.constant dense<0.000000e+00> : vector<19x64xf32>
    %466 = tpu.matmul %463, %465, %cst_318 {dimension_numbers = #tpu.dot_dimension_numbers<[1], [0], [0], [1], [0, 0, 1, 1], [], []>} : vector<19x128xbf16>, vector<128x64xbf16>, vector<19x64xf32> -> vector<19x64xf32>
    %c0_319 = arith.constant 0 : index
    %c0_320 = arith.constant 0 : index
    %c0_321 = arith.constant 0 : index
    %467 = vector.load %arg28[%c0_319, %c0_320, %c0_321] : memref<2x1x64xf32, #tpu.memory_space<vmem>>, vector<1x1x64xf32>
    %468 = vector.shape_cast %467 : vector<1x1x64xf32> to vector<1x64xf32>
    %469 = vector.broadcast %468 : vector<1x64xf32> to vector<19x64xf32>
    %470 = arith.addf %466, %469 : vector<19x64xf32>
    %471 = arith.addf %441, %470 : vector<19x64xf32>
    %c0_322 = arith.constant 0 : index
    %c0_323 = arith.constant 0 : index
    %c0_324 = arith.constant 0 : index
    %472 = vector.load %arg29[%c0_322, %c0_323, %c0_324] : memref<2x1x64xf32, #tpu.memory_space<vmem>>, vector<1x1x64xf32>
    %473 = vector.shape_cast %472 : vector<1x1x64xf32> to vector<1x64xf32>
    %c0_325 = arith.constant 0 : index
    %c0_326 = arith.constant 0 : index
    %c0_327 = arith.constant 0 : index
    %474 = vector.load %arg30[%c0_325, %c0_326, %c0_327] : memref<2x1x64xf32, #tpu.memory_space<vmem>>, vector<1x1x64xf32>
    %475 = vector.shape_cast %474 : vector<1x1x64xf32> to vector<1x64xf32>
    %cst_328 = arith.constant dense<0.000000e+00> : vector<19xf32>
    %476 = vector.multi_reduction <add>, %471, %cst_328 [1] : vector<19x64xf32> to vector<19xf32>
    %477 = vector.shape_cast %476 : vector<19xf32> to vector<19x1xf32>
    %cst_329 = arith.constant 6.400000e+01 : f32
    %478 = vector.broadcast %cst_329 : f32 to vector<19x1xf32>
    %479 = arith.divf %477, %478 : vector<19x1xf32>
    %480 = vector.broadcast %479 : vector<19x1xf32> to vector<19x64xf32>
    %481 = arith.subf %471, %480 : vector<19x64xf32>
    %482 = arith.mulf %481, %481 : vector<19x64xf32>
    %cst_330 = arith.constant dense<0.000000e+00> : vector<19xf32>
    %483 = vector.multi_reduction <add>, %482, %cst_330 [1] : vector<19x64xf32> to vector<19xf32>
    %484 = vector.shape_cast %483 : vector<19xf32> to vector<19x1xf32>
    %cst_331 = arith.constant 6.400000e+01 : f32
    %485 = vector.broadcast %cst_331 : f32 to vector<19x1xf32>
    %486 = arith.divf %484, %485 : vector<19x1xf32>
    %487 = vector.broadcast %479 : vector<19x1xf32> to vector<19x64xf32>
    %488 = arith.subf %471, %487 : vector<19x64xf32>
    %cst_332 = arith.constant 9.99999974E-6 : f32
    %489 = vector.broadcast %cst_332 : f32 to vector<19x1xf32>
    %490 = arith.addf %486, %489 : vector<19x1xf32>
    %491 = math.rsqrt %490 : vector<19x1xf32>
    %492 = vector.broadcast %491 : vector<19x1xf32> to vector<19x64xf32>
    %493 = arith.mulf %488, %492 : vector<19x64xf32>
    %494 = vector.broadcast %473 : vector<1x64xf32> to vector<19x64xf32>
    %495 = arith.mulf %493, %494 : vector<19x64xf32>
    %496 = vector.broadcast %475 : vector<1x64xf32> to vector<19x64xf32>
    %497 = arith.addf %495, %496 : vector<19x64xf32>
    %498 = arith.truncf %497 : vector<19x64xf32> to vector<19x64xbf16>
    %cst_333 = arith.constant 0.000000e+00 : f32
    %499 = vector.broadcast %cst_333 : f32 to vector<19x64xf32>
    %c1_334 = arith.constant 1 : index
    %c0_335 = arith.constant 0 : index
    %c0_336 = arith.constant 0 : index
    %c0_337 = arith.constant 0 : index
    %500 = vector.load %arg15[%c1_334, %c0_335, %c0_336, %c0_337] : memref<2x4x64x16xbf16, #tpu.memory_space<vmem>>, vector<1x1x64x16xbf16>
    %501 = vector.shape_cast %500 : vector<1x1x64x16xbf16> to vector<64x16xbf16>
    %cst_338 = arith.constant dense<0.000000e+00> : vector<19x16xf32>
    %502 = tpu.matmul %498, %501, %cst_338 {dimension_numbers = #tpu.dot_dimension_numbers<[1], [0], [0], [1], [0, 0, 1, 1], [], []>} : vector<19x64xbf16>, vector<64x16xbf16>, vector<19x16xf32> -> vector<19x16xf32>
    %c1_339 = arith.constant 1 : index
    %c0_340 = arith.constant 0 : index
    %c0_341 = arith.constant 0 : index
    %c0_342 = arith.constant 0 : index
    %503 = vector.load %arg16[%c1_339, %c0_340, %c0_341, %c0_342] : memref<2x4x1x16xf32, #tpu.memory_space<vmem>>, vector<1x1x1x16xf32>
    %504 = vector.shape_cast %503 : vector<1x1x1x16xf32> to vector<1x16xf32>
    %505 = vector.broadcast %504 : vector<1x16xf32> to vector<19x16xf32>
    %506 = arith.addf %502, %505 : vector<19x16xf32>
    %c1_343 = arith.constant 1 : index
    %c0_344 = arith.constant 0 : index
    %c0_345 = arith.constant 0 : index
    %c0_346 = arith.constant 0 : index
    %507 = vector.load %arg17[%c1_343, %c0_344, %c0_345, %c0_346] : memref<2x4x64x16xbf16, #tpu.memory_space<vmem>>, vector<1x1x64x16xbf16>
    %508 = vector.shape_cast %507 : vector<1x1x64x16xbf16> to vector<64x16xbf16>
    %cst_347 = arith.constant dense<0.000000e+00> : vector<19x16xf32>
    %509 = tpu.matmul %498, %508, %cst_347 {dimension_numbers = #tpu.dot_dimension_numbers<[1], [0], [0], [1], [0, 0, 1, 1], [], []>} : vector<19x64xbf16>, vector<64x16xbf16>, vector<19x16xf32> -> vector<19x16xf32>
    %c1_348 = arith.constant 1 : index
    %c0_349 = arith.constant 0 : index
    %c0_350 = arith.constant 0 : index
    %c0_351 = arith.constant 0 : index
    %510 = vector.load %arg18[%c1_348, %c0_349, %c0_350, %c0_351] : memref<2x4x1x16xf32, #tpu.memory_space<vmem>>, vector<1x1x1x16xf32>
    %511 = vector.shape_cast %510 : vector<1x1x1x16xf32> to vector<1x16xf32>
    %512 = vector.broadcast %511 : vector<1x16xf32> to vector<19x16xf32>
    %513 = arith.addf %509, %512 : vector<19x16xf32>
    %c1_352 = arith.constant 1 : index
    %c0_353 = arith.constant 0 : index
    %c0_354 = arith.constant 0 : index
    %c0_355 = arith.constant 0 : index
    %514 = vector.load %arg19[%c1_352, %c0_353, %c0_354, %c0_355] : memref<2x4x64x16xbf16, #tpu.memory_space<vmem>>, vector<1x1x64x16xbf16>
    %515 = vector.shape_cast %514 : vector<1x1x64x16xbf16> to vector<64x16xbf16>
    %cst_356 = arith.constant dense<0.000000e+00> : vector<19x16xf32>
    %516 = tpu.matmul %498, %515, %cst_356 {dimension_numbers = #tpu.dot_dimension_numbers<[1], [0], [0], [1], [0, 0, 1, 1], [], []>} : vector<19x64xbf16>, vector<64x16xbf16>, vector<19x16xf32> -> vector<19x16xf32>
    %c1_357 = arith.constant 1 : index
    %c0_358 = arith.constant 0 : index
    %c0_359 = arith.constant 0 : index
    %c0_360 = arith.constant 0 : index
    %517 = vector.load %arg20[%c1_357, %c0_358, %c0_359, %c0_360] : memref<2x4x1x16xf32, #tpu.memory_space<vmem>>, vector<1x1x1x16xf32>
    %518 = vector.shape_cast %517 : vector<1x1x1x16xf32> to vector<1x16xf32>
    %519 = vector.broadcast %518 : vector<1x16xf32> to vector<19x16xf32>
    %520 = arith.addf %516, %519 : vector<19x16xf32>
    %521 = arith.truncf %506 : vector<19x16xf32> to vector<19x16xbf16>
    %522 = arith.truncf %513 : vector<19x16xf32> to vector<19x16xbf16>
    %cst_361 = arith.constant dense<0.000000e+00> : vector<19x19xf32>
    %523 = tpu.matmul %521, %522, %cst_361 {dimension_numbers = #tpu.dot_dimension_numbers<[1], [1], [0], [0], [0, 0, 1, 0], [], []>} : vector<19x16xbf16>, vector<19x16xbf16>, vector<19x19xf32> -> vector<19x19xf32>
    %cst_362 = arith.constant 2.500000e-01 : f32
    %524 = vector.broadcast %cst_362 : f32 to vector<19x19xf32>
    %525 = arith.mulf %523, %524 : vector<19x19xf32>
    %cst_363 = arith.constant dense<0xFF800000> : vector<19xf32>
    %526 = vector.multi_reduction <maximumf>, %525, %cst_363 [1] : vector<19x19xf32> to vector<19xf32>
    %527 = vector.shape_cast %526 : vector<19xf32> to vector<19x1xf32>
    %528 = vector.broadcast %527 : vector<19x1xf32> to vector<19x19xf32>
    %529 = arith.subf %525, %528 : vector<19x19xf32>
    %530 = math.exp %529 : vector<19x19xf32>
    %cst_364 = arith.constant dense<0.000000e+00> : vector<19xf32>
    %531 = vector.multi_reduction <add>, %530, %cst_364 [1] : vector<19x19xf32> to vector<19xf32>
    %532 = vector.shape_cast %531 : vector<19xf32> to vector<19x1xf32>
    %533 = tpu.reciprocal %532 {approx = true} : vector<19x1xf32> -> vector<19x1xf32>
    %534 = vector.broadcast %533 : vector<19x1xf32> to vector<19x19xf32>
    %535 = arith.mulf %530, %534 : vector<19x19xf32>
    %536 = arith.truncf %535 : vector<19x19xf32> to vector<19x19xbf16>
    %537 = arith.truncf %520 : vector<19x16xf32> to vector<19x16xbf16>
    %cst_365 = arith.constant dense<0.000000e+00> : vector<19x16xf32>
    %538 = tpu.matmul %536, %537, %cst_365 {dimension_numbers = #tpu.dot_dimension_numbers<[1], [0], [0], [1], [0, 0, 1, 1], [], []>} : vector<19x19xbf16>, vector<19x16xbf16>, vector<19x16xf32> -> vector<19x16xf32>
    %539 = arith.truncf %538 : vector<19x16xf32> to vector<19x16xbf16>
    %c1_366 = arith.constant 1 : index
    %c0_367 = arith.constant 0 : index
    %c0_368 = arith.constant 0 : index
    %c0_369 = arith.constant 0 : index
    %540 = vector.load %arg21[%c1_366, %c0_367, %c0_368, %c0_369] : memref<2x4x16x64xbf16, #tpu.memory_space<vmem>>, vector<1x1x16x64xbf16>
    %541 = vector.shape_cast %540 : vector<1x1x16x64xbf16> to vector<16x64xbf16>
    %cst_370 = arith.constant dense<0.000000e+00> : vector<19x64xf32>
    %542 = tpu.matmul %539, %541, %cst_370 {dimension_numbers = #tpu.dot_dimension_numbers<[1], [0], [0], [1], [0, 0, 1, 1], [], []>} : vector<19x16xbf16>, vector<16x64xbf16>, vector<19x64xf32> -> vector<19x64xf32>
    %543 = arith.addf %499, %542 : vector<19x64xf32>
    %c1_371 = arith.constant 1 : index
    %c1_372 = arith.constant 1 : index
    %c0_373 = arith.constant 0 : index
    %c0_374 = arith.constant 0 : index
    %544 = vector.load %arg15[%c1_371, %c1_372, %c0_373, %c0_374] : memref<2x4x64x16xbf16, #tpu.memory_space<vmem>>, vector<1x1x64x16xbf16>
    %545 = vector.shape_cast %544 : vector<1x1x64x16xbf16> to vector<64x16xbf16>
    %cst_375 = arith.constant dense<0.000000e+00> : vector<19x16xf32>
    %546 = tpu.matmul %498, %545, %cst_375 {dimension_numbers = #tpu.dot_dimension_numbers<[1], [0], [0], [1], [0, 0, 1, 1], [], []>} : vector<19x64xbf16>, vector<64x16xbf16>, vector<19x16xf32> -> vector<19x16xf32>
    %c1_376 = arith.constant 1 : index
    %c1_377 = arith.constant 1 : index
    %c0_378 = arith.constant 0 : index
    %c0_379 = arith.constant 0 : index
    %547 = vector.load %arg16[%c1_376, %c1_377, %c0_378, %c0_379] : memref<2x4x1x16xf32, #tpu.memory_space<vmem>>, vector<1x1x1x16xf32>
    %548 = vector.shape_cast %547 : vector<1x1x1x16xf32> to vector<1x16xf32>
    %549 = vector.broadcast %548 : vector<1x16xf32> to vector<19x16xf32>
    %550 = arith.addf %546, %549 : vector<19x16xf32>
    %c1_380 = arith.constant 1 : index
    %c1_381 = arith.constant 1 : index
    %c0_382 = arith.constant 0 : index
    %c0_383 = arith.constant 0 : index
    %551 = vector.load %arg17[%c1_380, %c1_381, %c0_382, %c0_383] : memref<2x4x64x16xbf16, #tpu.memory_space<vmem>>, vector<1x1x64x16xbf16>
    %552 = vector.shape_cast %551 : vector<1x1x64x16xbf16> to vector<64x16xbf16>
    %cst_384 = arith.constant dense<0.000000e+00> : vector<19x16xf32>
    %553 = tpu.matmul %498, %552, %cst_384 {dimension_numbers = #tpu.dot_dimension_numbers<[1], [0], [0], [1], [0, 0, 1, 1], [], []>} : vector<19x64xbf16>, vector<64x16xbf16>, vector<19x16xf32> -> vector<19x16xf32>
    %c1_385 = arith.constant 1 : index
    %c1_386 = arith.constant 1 : index
    %c0_387 = arith.constant 0 : index
    %c0_388 = arith.constant 0 : index
    %554 = vector.load %arg18[%c1_385, %c1_386, %c0_387, %c0_388] : memref<2x4x1x16xf32, #tpu.memory_space<vmem>>, vector<1x1x1x16xf32>
    %555 = vector.shape_cast %554 : vector<1x1x1x16xf32> to vector<1x16xf32>
    %556 = vector.broadcast %555 : vector<1x16xf32> to vector<19x16xf32>
    %557 = arith.addf %553, %556 : vector<19x16xf32>
    %c1_389 = arith.constant 1 : index
    %c1_390 = arith.constant 1 : index
    %c0_391 = arith.constant 0 : index
    %c0_392 = arith.constant 0 : index
    %558 = vector.load %arg19[%c1_389, %c1_390, %c0_391, %c0_392] : memref<2x4x64x16xbf16, #tpu.memory_space<vmem>>, vector<1x1x64x16xbf16>
    %559 = vector.shape_cast %558 : vector<1x1x64x16xbf16> to vector<64x16xbf16>
    %cst_393 = arith.constant dense<0.000000e+00> : vector<19x16xf32>
    %560 = tpu.matmul %498, %559, %cst_393 {dimension_numbers = #tpu.dot_dimension_numbers<[1], [0], [0], [1], [0, 0, 1, 1], [], []>} : vector<19x64xbf16>, vector<64x16xbf16>, vector<19x16xf32> -> vector<19x16xf32>
    %c1_394 = arith.constant 1 : index
    %c1_395 = arith.constant 1 : index
    %c0_396 = arith.constant 0 : index
    %c0_397 = arith.constant 0 : index
    %561 = vector.load %arg20[%c1_394, %c1_395, %c0_396, %c0_397] : memref<2x4x1x16xf32, #tpu.memory_space<vmem>>, vector<1x1x1x16xf32>
    %562 = vector.shape_cast %561 : vector<1x1x1x16xf32> to vector<1x16xf32>
    %563 = vector.broadcast %562 : vector<1x16xf32> to vector<19x16xf32>
    %564 = arith.addf %560, %563 : vector<19x16xf32>
    %565 = arith.truncf %550 : vector<19x16xf32> to vector<19x16xbf16>
    %566 = arith.truncf %557 : vector<19x16xf32> to vector<19x16xbf16>
    %cst_398 = arith.constant dense<0.000000e+00> : vector<19x19xf32>
    %567 = tpu.matmul %565, %566, %cst_398 {dimension_numbers = #tpu.dot_dimension_numbers<[1], [1], [0], [0], [0, 0, 1, 0], [], []>} : vector<19x16xbf16>, vector<19x16xbf16>, vector<19x19xf32> -> vector<19x19xf32>
    %cst_399 = arith.constant 2.500000e-01 : f32
    %568 = vector.broadcast %cst_399 : f32 to vector<19x19xf32>
    %569 = arith.mulf %567, %568 : vector<19x19xf32>
    %cst_400 = arith.constant dense<0xFF800000> : vector<19xf32>
    %570 = vector.multi_reduction <maximumf>, %569, %cst_400 [1] : vector<19x19xf32> to vector<19xf32>
    %571 = vector.shape_cast %570 : vector<19xf32> to vector<19x1xf32>
    %572 = vector.broadcast %571 : vector<19x1xf32> to vector<19x19xf32>
    %573 = arith.subf %569, %572 : vector<19x19xf32>
    %574 = math.exp %573 : vector<19x19xf32>
    %cst_401 = arith.constant dense<0.000000e+00> : vector<19xf32>
    %575 = vector.multi_reduction <add>, %574, %cst_401 [1] : vector<19x19xf32> to vector<19xf32>
    %576 = vector.shape_cast %575 : vector<19xf32> to vector<19x1xf32>
    %577 = tpu.reciprocal %576 {approx = true} : vector<19x1xf32> -> vector<19x1xf32>
    %578 = vector.broadcast %577 : vector<19x1xf32> to vector<19x19xf32>
    %579 = arith.mulf %574, %578 : vector<19x19xf32>
    %580 = arith.truncf %579 : vector<19x19xf32> to vector<19x19xbf16>
    %581 = arith.truncf %564 : vector<19x16xf32> to vector<19x16xbf16>
    %cst_402 = arith.constant dense<0.000000e+00> : vector<19x16xf32>
    %582 = tpu.matmul %580, %581, %cst_402 {dimension_numbers = #tpu.dot_dimension_numbers<[1], [0], [0], [1], [0, 0, 1, 1], [], []>} : vector<19x19xbf16>, vector<19x16xbf16>, vector<19x16xf32> -> vector<19x16xf32>
    %583 = arith.truncf %582 : vector<19x16xf32> to vector<19x16xbf16>
    %c1_403 = arith.constant 1 : index
    %c1_404 = arith.constant 1 : index
    %c0_405 = arith.constant 0 : index
    %c0_406 = arith.constant 0 : index
    %584 = vector.load %arg21[%c1_403, %c1_404, %c0_405, %c0_406] : memref<2x4x16x64xbf16, #tpu.memory_space<vmem>>, vector<1x1x16x64xbf16>
    %585 = vector.shape_cast %584 : vector<1x1x16x64xbf16> to vector<16x64xbf16>
    %cst_407 = arith.constant dense<0.000000e+00> : vector<19x64xf32>
    %586 = tpu.matmul %583, %585, %cst_407 {dimension_numbers = #tpu.dot_dimension_numbers<[1], [0], [0], [1], [0, 0, 1, 1], [], []>} : vector<19x16xbf16>, vector<16x64xbf16>, vector<19x64xf32> -> vector<19x64xf32>
    %587 = arith.addf %543, %586 : vector<19x64xf32>
    %c1_408 = arith.constant 1 : index
    %c2_409 = arith.constant 2 : index
    %c0_410 = arith.constant 0 : index
    %c0_411 = arith.constant 0 : index
    %588 = vector.load %arg15[%c1_408, %c2_409, %c0_410, %c0_411] : memref<2x4x64x16xbf16, #tpu.memory_space<vmem>>, vector<1x1x64x16xbf16>
    %589 = vector.shape_cast %588 : vector<1x1x64x16xbf16> to vector<64x16xbf16>
    %cst_412 = arith.constant dense<0.000000e+00> : vector<19x16xf32>
    %590 = tpu.matmul %498, %589, %cst_412 {dimension_numbers = #tpu.dot_dimension_numbers<[1], [0], [0], [1], [0, 0, 1, 1], [], []>} : vector<19x64xbf16>, vector<64x16xbf16>, vector<19x16xf32> -> vector<19x16xf32>
    %c1_413 = arith.constant 1 : index
    %c2_414 = arith.constant 2 : index
    %c0_415 = arith.constant 0 : index
    %c0_416 = arith.constant 0 : index
    %591 = vector.load %arg16[%c1_413, %c2_414, %c0_415, %c0_416] : memref<2x4x1x16xf32, #tpu.memory_space<vmem>>, vector<1x1x1x16xf32>
    %592 = vector.shape_cast %591 : vector<1x1x1x16xf32> to vector<1x16xf32>
    %593 = vector.broadcast %592 : vector<1x16xf32> to vector<19x16xf32>
    %594 = arith.addf %590, %593 : vector<19x16xf32>
    %c1_417 = arith.constant 1 : index
    %c2_418 = arith.constant 2 : index
    %c0_419 = arith.constant 0 : index
    %c0_420 = arith.constant 0 : index
    %595 = vector.load %arg17[%c1_417, %c2_418, %c0_419, %c0_420] : memref<2x4x64x16xbf16, #tpu.memory_space<vmem>>, vector<1x1x64x16xbf16>
    %596 = vector.shape_cast %595 : vector<1x1x64x16xbf16> to vector<64x16xbf16>
    %cst_421 = arith.constant dense<0.000000e+00> : vector<19x16xf32>
    %597 = tpu.matmul %498, %596, %cst_421 {dimension_numbers = #tpu.dot_dimension_numbers<[1], [0], [0], [1], [0, 0, 1, 1], [], []>} : vector<19x64xbf16>, vector<64x16xbf16>, vector<19x16xf32> -> vector<19x16xf32>
    %c1_422 = arith.constant 1 : index
    %c2_423 = arith.constant 2 : index
    %c0_424 = arith.constant 0 : index
    %c0_425 = arith.constant 0 : index
    %598 = vector.load %arg18[%c1_422, %c2_423, %c0_424, %c0_425] : memref<2x4x1x16xf32, #tpu.memory_space<vmem>>, vector<1x1x1x16xf32>
    %599 = vector.shape_cast %598 : vector<1x1x1x16xf32> to vector<1x16xf32>
    %600 = vector.broadcast %599 : vector<1x16xf32> to vector<19x16xf32>
    %601 = arith.addf %597, %600 : vector<19x16xf32>
    %c1_426 = arith.constant 1 : index
    %c2_427 = arith.constant 2 : index
    %c0_428 = arith.constant 0 : index
    %c0_429 = arith.constant 0 : index
    %602 = vector.load %arg19[%c1_426, %c2_427, %c0_428, %c0_429] : memref<2x4x64x16xbf16, #tpu.memory_space<vmem>>, vector<1x1x64x16xbf16>
    %603 = vector.shape_cast %602 : vector<1x1x64x16xbf16> to vector<64x16xbf16>
    %cst_430 = arith.constant dense<0.000000e+00> : vector<19x16xf32>
    %604 = tpu.matmul %498, %603, %cst_430 {dimension_numbers = #tpu.dot_dimension_numbers<[1], [0], [0], [1], [0, 0, 1, 1], [], []>} : vector<19x64xbf16>, vector<64x16xbf16>, vector<19x16xf32> -> vector<19x16xf32>
    %c1_431 = arith.constant 1 : index
    %c2_432 = arith.constant 2 : index
    %c0_433 = arith.constant 0 : index
    %c0_434 = arith.constant 0 : index
    %605 = vector.load %arg20[%c1_431, %c2_432, %c0_433, %c0_434] : memref<2x4x1x16xf32, #tpu.memory_space<vmem>>, vector<1x1x1x16xf32>
    %606 = vector.shape_cast %605 : vector<1x1x1x16xf32> to vector<1x16xf32>
    %607 = vector.broadcast %606 : vector<1x16xf32> to vector<19x16xf32>
    %608 = arith.addf %604, %607 : vector<19x16xf32>
    %609 = arith.truncf %594 : vector<19x16xf32> to vector<19x16xbf16>
    %610 = arith.truncf %601 : vector<19x16xf32> to vector<19x16xbf16>
    %cst_435 = arith.constant dense<0.000000e+00> : vector<19x19xf32>
    %611 = tpu.matmul %609, %610, %cst_435 {dimension_numbers = #tpu.dot_dimension_numbers<[1], [1], [0], [0], [0, 0, 1, 0], [], []>} : vector<19x16xbf16>, vector<19x16xbf16>, vector<19x19xf32> -> vector<19x19xf32>
    %cst_436 = arith.constant 2.500000e-01 : f32
    %612 = vector.broadcast %cst_436 : f32 to vector<19x19xf32>
    %613 = arith.mulf %611, %612 : vector<19x19xf32>
    %cst_437 = arith.constant dense<0xFF800000> : vector<19xf32>
    %614 = vector.multi_reduction <maximumf>, %613, %cst_437 [1] : vector<19x19xf32> to vector<19xf32>
    %615 = vector.shape_cast %614 : vector<19xf32> to vector<19x1xf32>
    %616 = vector.broadcast %615 : vector<19x1xf32> to vector<19x19xf32>
    %617 = arith.subf %613, %616 : vector<19x19xf32>
    %618 = math.exp %617 : vector<19x19xf32>
    %cst_438 = arith.constant dense<0.000000e+00> : vector<19xf32>
    %619 = vector.multi_reduction <add>, %618, %cst_438 [1] : vector<19x19xf32> to vector<19xf32>
    %620 = vector.shape_cast %619 : vector<19xf32> to vector<19x1xf32>
    %621 = tpu.reciprocal %620 {approx = true} : vector<19x1xf32> -> vector<19x1xf32>
    %622 = vector.broadcast %621 : vector<19x1xf32> to vector<19x19xf32>
    %623 = arith.mulf %618, %622 : vector<19x19xf32>
    %624 = arith.truncf %623 : vector<19x19xf32> to vector<19x19xbf16>
    %625 = arith.truncf %608 : vector<19x16xf32> to vector<19x16xbf16>
    %cst_439 = arith.constant dense<0.000000e+00> : vector<19x16xf32>
    %626 = tpu.matmul %624, %625, %cst_439 {dimension_numbers = #tpu.dot_dimension_numbers<[1], [0], [0], [1], [0, 0, 1, 1], [], []>} : vector<19x19xbf16>, vector<19x16xbf16>, vector<19x16xf32> -> vector<19x16xf32>
    %627 = arith.truncf %626 : vector<19x16xf32> to vector<19x16xbf16>
    %c1_440 = arith.constant 1 : index
    %c2_441 = arith.constant 2 : index
    %c0_442 = arith.constant 0 : index
    %c0_443 = arith.constant 0 : index
    %628 = vector.load %arg21[%c1_440, %c2_441, %c0_442, %c0_443] : memref<2x4x16x64xbf16, #tpu.memory_space<vmem>>, vector<1x1x16x64xbf16>
    %629 = vector.shape_cast %628 : vector<1x1x16x64xbf16> to vector<16x64xbf16>
    %cst_444 = arith.constant dense<0.000000e+00> : vector<19x64xf32>
    %630 = tpu.matmul %627, %629, %cst_444 {dimension_numbers = #tpu.dot_dimension_numbers<[1], [0], [0], [1], [0, 0, 1, 1], [], []>} : vector<19x16xbf16>, vector<16x64xbf16>, vector<19x64xf32> -> vector<19x64xf32>
    %631 = arith.addf %587, %630 : vector<19x64xf32>
    %c1_445 = arith.constant 1 : index
    %c3_446 = arith.constant 3 : index
    %c0_447 = arith.constant 0 : index
    %c0_448 = arith.constant 0 : index
    %632 = vector.load %arg15[%c1_445, %c3_446, %c0_447, %c0_448] : memref<2x4x64x16xbf16, #tpu.memory_space<vmem>>, vector<1x1x64x16xbf16>
    %633 = vector.shape_cast %632 : vector<1x1x64x16xbf16> to vector<64x16xbf16>
    %cst_449 = arith.constant dense<0.000000e+00> : vector<19x16xf32>
    %634 = tpu.matmul %498, %633, %cst_449 {dimension_numbers = #tpu.dot_dimension_numbers<[1], [0], [0], [1], [0, 0, 1, 1], [], []>} : vector<19x64xbf16>, vector<64x16xbf16>, vector<19x16xf32> -> vector<19x16xf32>
    %c1_450 = arith.constant 1 : index
    %c3_451 = arith.constant 3 : index
    %c0_452 = arith.constant 0 : index
    %c0_453 = arith.constant 0 : index
    %635 = vector.load %arg16[%c1_450, %c3_451, %c0_452, %c0_453] : memref<2x4x1x16xf32, #tpu.memory_space<vmem>>, vector<1x1x1x16xf32>
    %636 = vector.shape_cast %635 : vector<1x1x1x16xf32> to vector<1x16xf32>
    %637 = vector.broadcast %636 : vector<1x16xf32> to vector<19x16xf32>
    %638 = arith.addf %634, %637 : vector<19x16xf32>
    %c1_454 = arith.constant 1 : index
    %c3_455 = arith.constant 3 : index
    %c0_456 = arith.constant 0 : index
    %c0_457 = arith.constant 0 : index
    %639 = vector.load %arg17[%c1_454, %c3_455, %c0_456, %c0_457] : memref<2x4x64x16xbf16, #tpu.memory_space<vmem>>, vector<1x1x64x16xbf16>
    %640 = vector.shape_cast %639 : vector<1x1x64x16xbf16> to vector<64x16xbf16>
    %cst_458 = arith.constant dense<0.000000e+00> : vector<19x16xf32>
    %641 = tpu.matmul %498, %640, %cst_458 {dimension_numbers = #tpu.dot_dimension_numbers<[1], [0], [0], [1], [0, 0, 1, 1], [], []>} : vector<19x64xbf16>, vector<64x16xbf16>, vector<19x16xf32> -> vector<19x16xf32>
    %c1_459 = arith.constant 1 : index
    %c3_460 = arith.constant 3 : index
    %c0_461 = arith.constant 0 : index
    %c0_462 = arith.constant 0 : index
    %642 = vector.load %arg18[%c1_459, %c3_460, %c0_461, %c0_462] : memref<2x4x1x16xf32, #tpu.memory_space<vmem>>, vector<1x1x1x16xf32>
    %643 = vector.shape_cast %642 : vector<1x1x1x16xf32> to vector<1x16xf32>
    %644 = vector.broadcast %643 : vector<1x16xf32> to vector<19x16xf32>
    %645 = arith.addf %641, %644 : vector<19x16xf32>
    %c1_463 = arith.constant 1 : index
    %c3_464 = arith.constant 3 : index
    %c0_465 = arith.constant 0 : index
    %c0_466 = arith.constant 0 : index
    %646 = vector.load %arg19[%c1_463, %c3_464, %c0_465, %c0_466] : memref<2x4x64x16xbf16, #tpu.memory_space<vmem>>, vector<1x1x64x16xbf16>
    %647 = vector.shape_cast %646 : vector<1x1x64x16xbf16> to vector<64x16xbf16>
    %cst_467 = arith.constant dense<0.000000e+00> : vector<19x16xf32>
    %648 = tpu.matmul %498, %647, %cst_467 {dimension_numbers = #tpu.dot_dimension_numbers<[1], [0], [0], [1], [0, 0, 1, 1], [], []>} : vector<19x64xbf16>, vector<64x16xbf16>, vector<19x16xf32> -> vector<19x16xf32>
    %c1_468 = arith.constant 1 : index
    %c3_469 = arith.constant 3 : index
    %c0_470 = arith.constant 0 : index
    %c0_471 = arith.constant 0 : index
    %649 = vector.load %arg20[%c1_468, %c3_469, %c0_470, %c0_471] : memref<2x4x1x16xf32, #tpu.memory_space<vmem>>, vector<1x1x1x16xf32>
    %650 = vector.shape_cast %649 : vector<1x1x1x16xf32> to vector<1x16xf32>
    %651 = vector.broadcast %650 : vector<1x16xf32> to vector<19x16xf32>
    %652 = arith.addf %648, %651 : vector<19x16xf32>
    %653 = arith.truncf %638 : vector<19x16xf32> to vector<19x16xbf16>
    %654 = arith.truncf %645 : vector<19x16xf32> to vector<19x16xbf16>
    %cst_472 = arith.constant dense<0.000000e+00> : vector<19x19xf32>
    %655 = tpu.matmul %653, %654, %cst_472 {dimension_numbers = #tpu.dot_dimension_numbers<[1], [1], [0], [0], [0, 0, 1, 0], [], []>} : vector<19x16xbf16>, vector<19x16xbf16>, vector<19x19xf32> -> vector<19x19xf32>
    %cst_473 = arith.constant 2.500000e-01 : f32
    %656 = vector.broadcast %cst_473 : f32 to vector<19x19xf32>
    %657 = arith.mulf %655, %656 : vector<19x19xf32>
    %cst_474 = arith.constant dense<0xFF800000> : vector<19xf32>
    %658 = vector.multi_reduction <maximumf>, %657, %cst_474 [1] : vector<19x19xf32> to vector<19xf32>
    %659 = vector.shape_cast %658 : vector<19xf32> to vector<19x1xf32>
    %660 = vector.broadcast %659 : vector<19x1xf32> to vector<19x19xf32>
    %661 = arith.subf %657, %660 : vector<19x19xf32>
    %662 = math.exp %661 : vector<19x19xf32>
    %cst_475 = arith.constant dense<0.000000e+00> : vector<19xf32>
    %663 = vector.multi_reduction <add>, %662, %cst_475 [1] : vector<19x19xf32> to vector<19xf32>
    %664 = vector.shape_cast %663 : vector<19xf32> to vector<19x1xf32>
    %665 = tpu.reciprocal %664 {approx = true} : vector<19x1xf32> -> vector<19x1xf32>
    %666 = vector.broadcast %665 : vector<19x1xf32> to vector<19x19xf32>
    %667 = arith.mulf %662, %666 : vector<19x19xf32>
    %668 = arith.truncf %667 : vector<19x19xf32> to vector<19x19xbf16>
    %669 = arith.truncf %652 : vector<19x16xf32> to vector<19x16xbf16>
    %cst_476 = arith.constant dense<0.000000e+00> : vector<19x16xf32>
    %670 = tpu.matmul %668, %669, %cst_476 {dimension_numbers = #tpu.dot_dimension_numbers<[1], [0], [0], [1], [0, 0, 1, 1], [], []>} : vector<19x19xbf16>, vector<19x16xbf16>, vector<19x16xf32> -> vector<19x16xf32>
    %671 = arith.truncf %670 : vector<19x16xf32> to vector<19x16xbf16>
    %c1_477 = arith.constant 1 : index
    %c3_478 = arith.constant 3 : index
    %c0_479 = arith.constant 0 : index
    %c0_480 = arith.constant 0 : index
    %672 = vector.load %arg21[%c1_477, %c3_478, %c0_479, %c0_480] : memref<2x4x16x64xbf16, #tpu.memory_space<vmem>>, vector<1x1x16x64xbf16>
    %673 = vector.shape_cast %672 : vector<1x1x16x64xbf16> to vector<16x64xbf16>
    %cst_481 = arith.constant dense<0.000000e+00> : vector<19x64xf32>
    %674 = tpu.matmul %671, %673, %cst_481 {dimension_numbers = #tpu.dot_dimension_numbers<[1], [0], [0], [1], [0, 0, 1, 1], [], []>} : vector<19x16xbf16>, vector<16x64xbf16>, vector<19x64xf32> -> vector<19x64xf32>
    %675 = arith.addf %631, %674 : vector<19x64xf32>
    %c1_482 = arith.constant 1 : index
    %c0_483 = arith.constant 0 : index
    %c0_484 = arith.constant 0 : index
    %676 = vector.load %arg22[%c1_482, %c0_483, %c0_484] : memref<2x1x64xf32, #tpu.memory_space<vmem>>, vector<1x1x64xf32>
    %677 = vector.shape_cast %676 : vector<1x1x64xf32> to vector<1x64xf32>
    %678 = vector.broadcast %677 : vector<1x64xf32> to vector<19x64xf32>
    %679 = arith.addf %675, %678 : vector<19x64xf32>
    %680 = arith.addf %497, %679 : vector<19x64xf32>
    %c1_485 = arith.constant 1 : index
    %c0_486 = arith.constant 0 : index
    %c0_487 = arith.constant 0 : index
    %681 = vector.load %arg23[%c1_485, %c0_486, %c0_487] : memref<2x1x64xf32, #tpu.memory_space<vmem>>, vector<1x1x64xf32>
    %682 = vector.shape_cast %681 : vector<1x1x64xf32> to vector<1x64xf32>
    %c1_488 = arith.constant 1 : index
    %c0_489 = arith.constant 0 : index
    %c0_490 = arith.constant 0 : index
    %683 = vector.load %arg24[%c1_488, %c0_489, %c0_490] : memref<2x1x64xf32, #tpu.memory_space<vmem>>, vector<1x1x64xf32>
    %684 = vector.shape_cast %683 : vector<1x1x64xf32> to vector<1x64xf32>
    %cst_491 = arith.constant dense<0.000000e+00> : vector<19xf32>
    %685 = vector.multi_reduction <add>, %680, %cst_491 [1] : vector<19x64xf32> to vector<19xf32>
    %686 = vector.shape_cast %685 : vector<19xf32> to vector<19x1xf32>
    %cst_492 = arith.constant 6.400000e+01 : f32
    %687 = vector.broadcast %cst_492 : f32 to vector<19x1xf32>
    %688 = arith.divf %686, %687 : vector<19x1xf32>
    %689 = vector.broadcast %688 : vector<19x1xf32> to vector<19x64xf32>
    %690 = arith.subf %680, %689 : vector<19x64xf32>
    %691 = arith.mulf %690, %690 : vector<19x64xf32>
    %cst_493 = arith.constant dense<0.000000e+00> : vector<19xf32>
    %692 = vector.multi_reduction <add>, %691, %cst_493 [1] : vector<19x64xf32> to vector<19xf32>
    %693 = vector.shape_cast %692 : vector<19xf32> to vector<19x1xf32>
    %cst_494 = arith.constant 6.400000e+01 : f32
    %694 = vector.broadcast %cst_494 : f32 to vector<19x1xf32>
    %695 = arith.divf %693, %694 : vector<19x1xf32>
    %696 = vector.broadcast %688 : vector<19x1xf32> to vector<19x64xf32>
    %697 = arith.subf %680, %696 : vector<19x64xf32>
    %cst_495 = arith.constant 9.99999974E-6 : f32
    %698 = vector.broadcast %cst_495 : f32 to vector<19x1xf32>
    %699 = arith.addf %695, %698 : vector<19x1xf32>
    %700 = math.rsqrt %699 : vector<19x1xf32>
    %701 = vector.broadcast %700 : vector<19x1xf32> to vector<19x64xf32>
    %702 = arith.mulf %697, %701 : vector<19x64xf32>
    %703 = vector.broadcast %682 : vector<1x64xf32> to vector<19x64xf32>
    %704 = arith.mulf %702, %703 : vector<19x64xf32>
    %705 = vector.broadcast %684 : vector<1x64xf32> to vector<19x64xf32>
    %706 = arith.addf %704, %705 : vector<19x64xf32>
    %707 = arith.truncf %706 : vector<19x64xf32> to vector<19x64xbf16>
    %c1_496 = arith.constant 1 : index
    %c0_497 = arith.constant 0 : index
    %c0_498 = arith.constant 0 : index
    %708 = vector.load %arg25[%c1_496, %c0_497, %c0_498] : memref<2x64x128xbf16, #tpu.memory_space<vmem>>, vector<1x64x128xbf16>
    %709 = vector.shape_cast %708 : vector<1x64x128xbf16> to vector<64x128xbf16>
    %cst_499 = arith.constant dense<0.000000e+00> : vector<19x128xf32>
    %710 = tpu.matmul %707, %709, %cst_499 {dimension_numbers = #tpu.dot_dimension_numbers<[1], [0], [0], [1], [0, 0, 1, 1], [], []>} : vector<19x64xbf16>, vector<64x128xbf16>, vector<19x128xf32> -> vector<19x128xf32>
    %c1_500 = arith.constant 1 : index
    %c0_501 = arith.constant 0 : index
    %c0_502 = arith.constant 0 : index
    %711 = vector.load %arg26[%c1_500, %c0_501, %c0_502] : memref<2x1x128xf32, #tpu.memory_space<vmem>>, vector<1x1x128xf32>
    %712 = vector.shape_cast %711 : vector<1x1x128xf32> to vector<1x128xf32>
    %713 = vector.broadcast %712 : vector<1x128xf32> to vector<19x128xf32>
    %714 = arith.addf %710, %713 : vector<19x128xf32>
    %715 = arith.mulf %714, %714 : vector<19x128xf32>
    %716 = arith.mulf %714, %715 : vector<19x128xf32>
    %cst_503 = arith.constant 4.471500e-02 : f32
    %717 = vector.broadcast %cst_503 : f32 to vector<19x128xf32>
    %718 = arith.mulf %717, %716 : vector<19x128xf32>
    %719 = arith.addf %714, %718 : vector<19x128xf32>
    %cst_504 = arith.constant 0.797884583 : f32
    %720 = vector.broadcast %cst_504 : f32 to vector<19x128xf32>
    %721 = arith.mulf %720, %719 : vector<19x128xf32>
    %722 = math.tanh %721 : vector<19x128xf32>
    %cst_505 = arith.constant 1.000000e+00 : f32
    %723 = vector.broadcast %cst_505 : f32 to vector<19x128xf32>
    %724 = arith.addf %723, %722 : vector<19x128xf32>
    %cst_506 = arith.constant 5.000000e-01 : f32
    %725 = vector.broadcast %cst_506 : f32 to vector<19x128xf32>
    %726 = arith.mulf %725, %724 : vector<19x128xf32>
    %727 = arith.mulf %714, %726 : vector<19x128xf32>
    %728 = arith.truncf %727 : vector<19x128xf32> to vector<19x128xbf16>
    %c1_507 = arith.constant 1 : index
    %c0_508 = arith.constant 0 : index
    %c0_509 = arith.constant 0 : index
    %729 = vector.load %arg27[%c1_507, %c0_508, %c0_509] : memref<2x128x64xbf16, #tpu.memory_space<vmem>>, vector<1x128x64xbf16>
    %730 = vector.shape_cast %729 : vector<1x128x64xbf16> to vector<128x64xbf16>
    %cst_510 = arith.constant dense<0.000000e+00> : vector<19x64xf32>
    %731 = tpu.matmul %728, %730, %cst_510 {dimension_numbers = #tpu.dot_dimension_numbers<[1], [0], [0], [1], [0, 0, 1, 1], [], []>} : vector<19x128xbf16>, vector<128x64xbf16>, vector<19x64xf32> -> vector<19x64xf32>
    %c1_511 = arith.constant 1 : index
    %c0_512 = arith.constant 0 : index
    %c0_513 = arith.constant 0 : index
    %732 = vector.load %arg28[%c1_511, %c0_512, %c0_513] : memref<2x1x64xf32, #tpu.memory_space<vmem>>, vector<1x1x64xf32>
    %733 = vector.shape_cast %732 : vector<1x1x64xf32> to vector<1x64xf32>
    %734 = vector.broadcast %733 : vector<1x64xf32> to vector<19x64xf32>
    %735 = arith.addf %731, %734 : vector<19x64xf32>
    %736 = arith.addf %706, %735 : vector<19x64xf32>
    %c1_514 = arith.constant 1 : index
    %c0_515 = arith.constant 0 : index
    %c0_516 = arith.constant 0 : index
    %737 = vector.load %arg29[%c1_514, %c0_515, %c0_516] : memref<2x1x64xf32, #tpu.memory_space<vmem>>, vector<1x1x64xf32>
    %738 = vector.shape_cast %737 : vector<1x1x64xf32> to vector<1x64xf32>
    %c1_517 = arith.constant 1 : index
    %c0_518 = arith.constant 0 : index
    %c0_519 = arith.constant 0 : index
    %739 = vector.load %arg30[%c1_517, %c0_518, %c0_519] : memref<2x1x64xf32, #tpu.memory_space<vmem>>, vector<1x1x64xf32>
    %740 = vector.shape_cast %739 : vector<1x1x64xf32> to vector<1x64xf32>
    %cst_520 = arith.constant dense<0.000000e+00> : vector<19xf32>
    %741 = vector.multi_reduction <add>, %736, %cst_520 [1] : vector<19x64xf32> to vector<19xf32>
    %742 = vector.shape_cast %741 : vector<19xf32> to vector<19x1xf32>
    %cst_521 = arith.constant 6.400000e+01 : f32
    %743 = vector.broadcast %cst_521 : f32 to vector<19x1xf32>
    %744 = arith.divf %742, %743 : vector<19x1xf32>
    %745 = vector.broadcast %744 : vector<19x1xf32> to vector<19x64xf32>
    %746 = arith.subf %736, %745 : vector<19x64xf32>
    %747 = arith.mulf %746, %746 : vector<19x64xf32>
    %cst_522 = arith.constant dense<0.000000e+00> : vector<19xf32>
    %748 = vector.multi_reduction <add>, %747, %cst_522 [1] : vector<19x64xf32> to vector<19xf32>
    %749 = vector.shape_cast %748 : vector<19xf32> to vector<19x1xf32>
    %cst_523 = arith.constant 6.400000e+01 : f32
    %750 = vector.broadcast %cst_523 : f32 to vector<19x1xf32>
    %751 = arith.divf %749, %750 : vector<19x1xf32>
    %752 = vector.broadcast %744 : vector<19x1xf32> to vector<19x64xf32>
    %753 = arith.subf %736, %752 : vector<19x64xf32>
    %cst_524 = arith.constant 9.99999974E-6 : f32
    %754 = vector.broadcast %cst_524 : f32 to vector<19x1xf32>
    %755 = arith.addf %751, %754 : vector<19x1xf32>
    %756 = math.rsqrt %755 : vector<19x1xf32>
    %757 = vector.broadcast %756 : vector<19x1xf32> to vector<19x64xf32>
    %758 = arith.mulf %753, %757 : vector<19x64xf32>
    %759 = vector.broadcast %738 : vector<1x64xf32> to vector<19x64xf32>
    %760 = arith.mulf %758, %759 : vector<19x64xf32>
    %761 = vector.broadcast %740 : vector<1x64xf32> to vector<19x64xf32>
    %762 = arith.addf %760, %761 : vector<19x64xf32>
    %763 = arith.truncf %762 : vector<19x64xf32> to vector<19x64xbf16>
    %c0_525 = arith.constant 0 : index
    %c0_526 = arith.constant 0 : index
    %764 = vector.load %arg31[%c0_525, %c0_526] : memref<64x128xbf16, #tpu.memory_space<vmem>>, vector<64x128xbf16>
    %cst_527 = arith.constant dense<0.000000e+00> : vector<19x128xf32>
    %765 = tpu.matmul %763, %764, %cst_527 {dimension_numbers = #tpu.dot_dimension_numbers<[1], [0], [0], [1], [0, 0, 1, 1], [], []>} : vector<19x64xbf16>, vector<64x128xbf16>, vector<19x128xf32> -> vector<19x128xf32>
    %c0_528 = arith.constant 0 : index
    %c0_529 = arith.constant 0 : index
    %766 = vector.load %arg32[%c0_528, %c0_529] : memref<1x128xf32, #tpu.memory_space<vmem>>, vector<1x128xf32>
    %767 = vector.broadcast %766 : vector<1x128xf32> to vector<19x128xf32>
    %768 = arith.addf %765, %767 : vector<19x128xf32>
    %c0_530 = arith.constant 0 : index
    %c0_531 = arith.constant 0 : index
    %c0_532 = arith.constant 0 : index
    %769 = vector.load %arg33[%c0_530, %c0_531, %c0_532] : memref<1x19x128xf32, #tpu.memory_space<vmem>>, vector<1x19x128xf32>
    %770 = vector.shape_cast %769 : vector<1x19x128xf32> to vector<19x128xf32>
    %771 = vector.shape_cast %768 : vector<19x128xf32> to vector<1x19x128xf32>
    tpu.vector_store %arg33[%c0_530, %c0_531, %c0_532], %771 {strides = array<i32>} : memref<1x19x128xf32, #tpu.memory_space<vmem>>, vector<1x19x128xf32>,
    return
  }
  func.func @transform_0(%arg0: i32) -> (i32, i32, i32) {
    %c0_i32 = arith.constant 0 : i32
    %c0_i32_0 = arith.constant 0 : i32
    %c0_i32_1 = arith.constant 0 : i32
    return %arg0, %c0_i32, %c0_i32_0 : i32, i32, i32
  }
  func.func @transform_1(%arg0: i32) -> (i32, i32, i32) {
    %c0_i32 = arith.constant 0 : i32
    %c0_i32_0 = arith.constant 0 : i32
    %c0_i32_1 = arith.constant 0 : i32
    %c0_i32_2 = arith.constant 0 : i32
    return %c0_i32, %c0_i32_0, %c0_i32_1 : i32, i32, i32
  }
  func.func @transform_2(%arg0: i32) -> (i32, i32) {
    %c0_i32 = arith.constant 0 : i32
    %c0_i32_0 = arith.constant 0 : i32
    %c0_i32_1 = arith.constant 0 : i32
    return %c0_i32, %c0_i32_0 : i32, i32
  }
  func.func @transform_3(%arg0: i32) -> (i32, i32) {
    %c0_i32 = arith.constant 0 : i32
    %c0_i32_0 = arith.constant 0 : i32
    %c0_i32_1 = arith.constant 0 : i32
    return %c0_i32, %c0_i32_0 : i32, i32
  }
  func.func @transform_4(%arg0: i32) -> (i32, i32, i32) {
    %c0_i32 = arith.constant 0 : i32
    %c0_i32_0 = arith.constant 0 : i32
    %c0_i32_1 = arith.constant 0 : i32
    %c0_i32_2 = arith.constant 0 : i32
    return %c0_i32, %c0_i32_0, %c0_i32_1 : i32, i32, i32
  }
  func.func @transform_5(%arg0: i32) -> (i32, i32, i32) {
    %c0_i32 = arith.constant 0 : i32
    %c0_i32_0 = arith.constant 0 : i32
    %c0_i32_1 = arith.constant 0 : i32
    %c0_i32_2 = arith.constant 0 : i32
    return %c0_i32, %c0_i32_0, %c0_i32_1 : i32, i32, i32
  }
  func.func @transform_6(%arg0: i32) -> (i32, i32) {
    %c0_i32 = arith.constant 0 : i32
    %c0_i32_0 = arith.constant 0 : i32
    %c0_i32_1 = arith.constant 0 : i32
    return %c0_i32, %c0_i32_0 : i32, i32
  }
  func.func @transform_7(%arg0: i32) -> (i32, i32) {
    %c0_i32 = arith.constant 0 : i32
    %c0_i32_0 = arith.constant 0 : i32
    %c0_i32_1 = arith.constant 0 : i32
    return %c0_i32, %c0_i32_0 : i32, i32
  }
  func.func @transform_8(%arg0: i32) -> (i32, i32) {
    %c0_i32 = arith.constant 0 : i32
    %c0_i32_0 = arith.constant 0 : i32
    %c0_i32_1 = arith.constant 0 : i32
    return %c0_i32, %c0_i32_0 : i32, i32
  }
  func.func @transform_9(%arg0: i32) -> (i32, i32) {
    %c0_i32 = arith.constant 0 : i32
    %c0_i32_0 = arith.constant 0 : i32
    %c0_i32_1 = arith.constant 0 : i32
    return %c0_i32, %c0_i32_0 : i32, i32
  }
  func.func @transform_10(%arg0: i32) -> (i32, i32, i32) {
    %c0_i32 = arith.constant 0 : i32
    %c0_i32_0 = arith.constant 0 : i32
    %c0_i32_1 = arith.constant 0 : i32
    %c0_i32_2 = arith.constant 0 : i32
    return %c0_i32, %c0_i32_0, %c0_i32_1 : i32, i32, i32
  }
  func.func @transform_11(%arg0: i32) -> (i32, i32) {
    %c0_i32 = arith.constant 0 : i32
    %c0_i32_0 = arith.constant 0 : i32
    %c0_i32_1 = arith.constant 0 : i32
    return %c0_i32, %c0_i32_0 : i32, i32
  }
  func.func @transform_12(%arg0: i32) -> (i32, i32) {
    %c0_i32 = arith.constant 0 : i32
    %c0_i32_0 = arith.constant 0 : i32
    %c0_i32_1 = arith.constant 0 : i32
    return %c0_i32, %c0_i32_0 : i32, i32
  }
  func.func @transform_13(%arg0: i32) -> (i32, i32) {
    %c0_i32 = arith.constant 0 : i32
    %c0_i32_0 = arith.constant 0 : i32
    %c0_i32_1 = arith.constant 0 : i32
    return %c0_i32, %c0_i32_0 : i32, i32
  }
  func.func @transform_14(%arg0: i32) -> (i32, i32, i32, i32) {
    %c0_i32 = arith.constant 0 : i32
    %c0_i32_0 = arith.constant 0 : i32
    %c0_i32_1 = arith.constant 0 : i32
    %c0_i32_2 = arith.constant 0 : i32
    %c0_i32_3 = arith.constant 0 : i32
    return %c0_i32, %c0_i32_0, %c0_i32_1, %c0_i32_2 : i32, i32, i32, i32
  }
  func.func @transform_15(%arg0: i32) -> (i32, i32, i32, i32) {
    %c0_i32 = arith.constant 0 : i32
    %c0_i32_0 = arith.constant 0 : i32
    %c0_i32_1 = arith.constant 0 : i32
    %c0_i32_2 = arith.constant 0 : i32
    %c0_i32_3 = arith.constant 0 : i32
    return %c0_i32, %c0_i32_0, %c0_i32_1, %c0_i32_2 : i32, i32, i32, i32
  }
  func.func @transform_16(%arg0: i32) -> (i32, i32, i32, i32) {
    %c0_i32 = arith.constant 0 : i32
    %c0_i32_0 = arith.constant 0 : i32
    %c0_i32_1 = arith.constant 0 : i32
    %c0_i32_2 = arith.constant 0 : i32
    %c0_i32_3 = arith.constant 0 : i32
    return %c0_i32, %c0_i32_0, %c0_i32_1, %c0_i32_2 : i32, i32, i32, i32
  }
  func.func @transform_17(%arg0: i32) -> (i32, i32, i32, i32) {
    %c0_i32 = arith.constant 0 : i32
    %c0_i32_0 = arith.constant 0 : i32
    %c0_i32_1 = arith.constant 0 : i32
    %c0_i32_2 = arith.constant 0 : i32
    %c0_i32_3 = arith.constant 0 : i32
    return %c0_i32, %c0_i32_0, %c0_i32_1, %c0_i32_2 : i32, i32, i32, i32
  }
  func.func @transform_18(%arg0: i32) -> (i32, i32, i32, i32) {
    %c0_i32 = arith.constant 0 : i32
    %c0_i32_0 = arith.constant 0 : i32
    %c0_i32_1 = arith.constant 0 : i32
    %c0_i32_2 = arith.constant 0 : i32
    %c0_i32_3 = arith.constant 0 : i32
    return %c0_i32, %c0_i32_0, %c0_i32_1, %c0_i32_2 : i32, i32, i32, i32
  }
  func.func @transform_19(%arg0: i32) -> (i32, i32, i32, i32) {
    %c0_i32 = arith.constant 0 : i32
    %c0_i32_0 = arith.constant 0 : i32
    %c0_i32_1 = arith.constant 0 : i32
    %c0_i32_2 = arith.constant 0 : i32
    %c0_i32_3 = arith.constant 0 : i32
    return %c0_i32, %c0_i32_0, %c0_i32_1, %c0_i32_2 : i32, i32, i32, i32
  }
  func.func @transform_20(%arg0: i32) -> (i32, i32, i32, i32) {
    %c0_i32 = arith.constant 0 : i32
    %c0_i32_0 = arith.constant 0 : i32
    %c0_i32_1 = arith.constant 0 : i32
    %c0_i32_2 = arith.constant 0 : i32
    %c0_i32_3 = arith.constant 0 : i32
    return %c0_i32, %c0_i32_0, %c0_i32_1, %c0_i32_2 : i32, i32, i32, i32
  }
  func.func @transform_21(%arg0: i32) -> (i32, i32, i32) {
    %c0_i32 = arith.constant 0 : i32
    %c0_i32_0 = arith.constant 0 : i32
    %c0_i32_1 = arith.constant 0 : i32
    %c0_i32_2 = arith.constant 0 : i32
    return %c0_i32, %c0_i32_0, %c0_i32_1 : i32, i32, i32
  }
  func.func @transform_22(%arg0: i32) -> (i32, i32, i32) {
    %c0_i32 = arith.constant 0 : i32
    %c0_i32_0 = arith.constant 0 : i32
    %c0_i32_1 = arith.constant 0 : i32
    %c0_i32_2 = arith.constant 0 : i32
    return %c0_i32, %c0_i32_0, %c0_i32_1 : i32, i32, i32
  }
  func.func @transform_23(%arg0: i32) -> (i32, i32, i32) {
    %c0_i32 = arith.constant 0 : i32
    %c0_i32_0 = arith.constant 0 : i32
    %c0_i32_1 = arith.constant 0 : i32
    %c0_i32_2 = arith.constant 0 : i32
    return %c0_i32, %c0_i32_0, %c0_i32_1 : i32, i32, i32
  }
  func.func @transform_24(%arg0: i32) -> (i32, i32, i32) {
    %c0_i32 = arith.constant 0 : i32
    %c0_i32_0 = arith.constant 0 : i32
    %c0_i32_1 = arith.constant 0 : i32
    %c0_i32_2 = arith.constant 0 : i32
    return %c0_i32, %c0_i32_0, %c0_i32_1 : i32, i32, i32
  }
  func.func @transform_25(%arg0: i32) -> (i32, i32, i32) {
    %c0_i32 = arith.constant 0 : i32
    %c0_i32_0 = arith.constant 0 : i32
    %c0_i32_1 = arith.constant 0 : i32
    %c0_i32_2 = arith.constant 0 : i32
    return %c0_i32, %c0_i32_0, %c0_i32_1 : i32, i32, i32
  }
  func.func @transform_26(%arg0: i32) -> (i32, i32, i32) {
    %c0_i32 = arith.constant 0 : i32
    %c0_i32_0 = arith.constant 0 : i32
    %c0_i32_1 = arith.constant 0 : i32
    %c0_i32_2 = arith.constant 0 : i32
    return %c0_i32, %c0_i32_0, %c0_i32_1 : i32, i32, i32
  }
  func.func @transform_27(%arg0: i32) -> (i32, i32, i32) {
    %c0_i32 = arith.constant 0 : i32
    %c0_i32_0 = arith.constant 0 : i32
    %c0_i32_1 = arith.constant 0 : i32
    %c0_i32_2 = arith.constant 0 : i32
    return %c0_i32, %c0_i32_0, %c0_i32_1 : i32, i32, i32
  }
  func.func @transform_28(%arg0: i32) -> (i32, i32, i32) {
    %c0_i32 = arith.constant 0 : i32
    %c0_i32_0 = arith.constant 0 : i32
    %c0_i32_1 = arith.constant 0 : i32
    %c0_i32_2 = arith.constant 0 : i32
    return %c0_i32, %c0_i32_0, %c0_i32_1 : i32, i32, i32
  }
  func.func @transform_29(%arg0: i32) -> (i32, i32, i32) {
    %c0_i32 = arith.constant 0 : i32
    %c0_i32_0 = arith.constant 0 : i32
    %c0_i32_1 = arith.constant 0 : i32
    %c0_i32_2 = arith.constant 0 : i32
    return %c0_i32, %c0_i32_0, %c0_i32_1 : i32, i32, i32
  }
  func.func @transform_30(%arg0: i32) -> (i32, i32) {
    %c0_i32 = arith.constant 0 : i32
    %c0_i32_0 = arith.constant 0 : i32
    %c0_i32_1 = arith.constant 0 : i32
    return %c0_i32, %c0_i32_0 : i32, i32
  }
  func.func @transform_31(%arg0: i32) -> (i32, i32) {
    %c0_i32 = arith.constant 0 : i32
    %c0_i32_0 = arith.constant 0 : i32
    %c0_i32_1 = arith.constant 0 : i32
    return %c0_i32, %c0_i32_0 : i32, i32
  }
  func.func @transform_32(%arg0: i32) -> (i32, i32, i32) {
    %c0_i32 = arith.constant 0 : i32
    %c0_i32_0 = arith.constant 0 : i32
    %c0_i32_1 = arith.constant 0 : i32
    return %arg0, %c0_i32, %c0_i32_0 : i32, i32, i32
  }
}

</mosaic_0001>

<bundles_post_ra>
// kernel: squeeze.1
= control target key start
LH: loop header
LB: loop body
LE: loop exit
PB: predicated region body
PF: predicated region fallthrough
CT: control target
= control target key end

     0   :  { %s778_s14 = smov 127   ;;  %s779_s15 = smov 124   ;;  %vm19_vm0 = vcmask 39936   ;;  %vm572_vm1 = vcmask 1014784   ;;  %vm588_vm2 = vcmask 1022976   ;;  %vm604_vm3 = vcmask 1039360   ;;  %s1205_s0 = inlined_call_operand.vmem [shape: f32[2,400], index: 0, kind: input, shape index: {}]   ;;  %s1206_s1 = inlined_call_operand.vmem [shape: f32[2,80,5], index: 1, kind: output, shape index: {}]  }
   0x1   :  { %v614_v0 = vld [vmem:[%s1205_s0 + $0x6] sm:$0x3]  ;;  %v615_v1 = vld [vmem:[%s1205_s0 + $0x4] sm:$0x3]  ;;  %v616_v2 = vld [vmem:[%s1205_s0 + $0x2] sm:$0x3] }
   0x2   :  { %7 = vst [vmem:[#allocation0 + $0x18] sm:$0x3] %v614_v0  ;;  %v16_v3 = vld [vmem:[%s1205_s0] sm:$0x3]  ;;  %s37_s0 = smov 3  ;;  %s780_s16 = smov 122  }
   0x3   :  { %11 = vst [vmem:[#allocation0 + $0x10] sm:$0x3] %v615_v1  ;;  %s29_s17 = smov 3  ;;  %s58_s18 = smov 3  ;;  %vm608_vm4 = vcmask 7168   ;;  %vm611_vm5 = vcmask 39944  }
   0x4   :  { %15 = vst [vmem:[#allocation0 + $0x8] sm:$0x3] %v616_v2  ;;  %s781_s19 = smov 126   ;;  %s782_s20 = smov 123   ;;  %vm576_vm6 = vcmask 31744   ;;  %vm579_vm7 = vcmask 39968  }
   0x5   :  { %17 = vst [vmem:[#allocation0] sm:$0x3] %v16_v3  ;;  %s783_s21 = smov 121   ;;  %s66_s22 = smov 3  ;;  %vm592_vm8 = vcmask 23552   ;;  %vm595_vm9 = vcmask 39960  }
   0x6   :  { %s784_s23 = smov 119   ;;  %s785_s24 = smov 118  }
   0x7   :  { %s786_s25 = smov 117   ;;  %s87_s26 = smov 3 }
   0x8   :  { %s95_s27 = smov 3  ;;  %s787_s28 = smov 116  }
   0x9   :  { %v22_v4 = vld [vmem:[#allocation0 + $0x18] sm:$0x3]   ;;  %s788_s29 = smov 114   ;;  %s789_s30 = smov 113  }
   0xa   :  { %v51_v5 = vld [vmem:[#allocation0 + $0x18] sm:$0x3]   ;;  %23 = vrot.lane.b32.xlu0 %v22_v4, %s778_s14  ;;  %v38_v6 = vld [vmem:[#allocation0 + $0x11] ss:$-1 sm:%s37_s0]   ;;  %s109_s2 = smov 3  ;;  %s117_s3 = smov 3 }
   0xb   :  { %39 = vrot.lane.b32.xlu1 %v38_v6, %s779_s15  ;;  %52 = vrot.lane.b32.xlu2 %v51_v5, %s780_s16  ;;  %v30_v7 = vld [vmem:[#allocation0 + $0x9] ss:$-1 sm:%s29_s17]   ;;  %v67_v10 = vld [vmem:[#allocation0 + $0x11] ss:$-1 sm:%s66_s22]   ;;  %v80_v12 = vld [vmem:[#allocation0 + $0x18] sm:$0x3]  }
   0xc   :  { %v44_v8 = vld [vmem:[#allocation0] sm:$0x3]   ;;  %v59_v9 = vld [vmem:[#allocation0 + $0x9] ss:$-1 sm:%s58_s18]   ;;  %v96_v14 = vld [vmem:[#allocation0 + $0x11] ss:$-1 sm:%s95_s27]  }
   0xd   :  { %v73_v11 = vld [vmem:[#allocation0] sm:$0x3]   ;;  %v88_v13 = vld [vmem:[#allocation0 + $0x9] ss:$-1 sm:%s87_s26]   ;;  %v118_v17 = vld [vmem:[#allocation0 + $0x11] ss:$-1 sm:%s117_s3]  }
   0xe   :  { %v102_v15 = vld [vmem:[#allocation0] sm:$0x3]   ;;  %v110_v16 = vld [vmem:[#allocation0 + $0x9] ss:$-1 sm:%s109_s2]   ;;  %s790_s4 = smov 111   ;;  %s791_s5 = smov 109  }
   0xf   :  { %v124_v18 = vld [vmem:[#allocation0] sm:$0x3]   ;;  %s792_s6 = smov 108   ;;  %s131_s7 = smov 3  ;;  %v175_v25 = vld [vmem:[#allocation0 + $0x8] sm:$0x3]  }
  0x10   :  { %s139_s8 = smov 3  ;;  %v132_v19 = vld [vmem:[#allocation0 + $0x9] ss:$-1 sm:%s131_s7]   ;;  %v146_v21 = vld [vmem:[#allocation0] sm:$0x3]   ;;  %s793_s9 = smov 106  }
  0x11   :  { %v140_v20 = vld [vmem:[#allocation0 + $0x11] ss:$-1 sm:%s139_s8]   ;;  %s794_s10 = smov 104   ;;  %s795_s11 = smov 103   ;;  %v168_v24 = vld [vmem:[#allocation0] sm:$0x3]  }
  0x12   :  { %31 = vrot.lane.b32.xlu0 %v30_v7, %s781_s19  ;;  %s153_s12 = smov 3  ;;  %s161_s13 = smov 3  ;;  %v189_v27 = vld [vmem:[#allocation0] sm:$0x3]   ;;  %v196_v28 = vld [vmem:[#allocation0 + $0x8] sm:$0x3]  }
  0x13   :  { %45 = vrot.lane.b32.xlu1 %v44_v8, %s782_s20  ;;  %60 = vrot.lane.b32.xlu2 %v59_v9, %s783_s21  ;;  %v154_v22 = vld [vmem:[#allocation0 + $0x9] ss:$-1 sm:%s153_s12]   ;;  %v162_v23 = vld [vmem:[#allocation0 + $0x11] ss:$-1 sm:%s161_s13]   ;;  %s796_s0 = smov 101   ;;  %s797_s14 = smov 99  }
  0x14   :  { %s798_s15 = smov 98   ;;  %s182_s16 = smov 3  ;;  %v210_v30 = vld [vmem:[#allocation0] sm:$0x3]   ;;  %v217_v31 = vld [vmem:[#allocation0 + $0x8] sm:$0x3]  }
  0x15   :  { %v183_v26 = vld [vmem:[#allocation0 + $0x11] ss:$-1 sm:%s182_s16]   ;;  %s799_s17 = smov 96   ;;  %s800_s18 = smov 94   ;;  %v231_v33 = vld [vmem:[#allocation0] sm:$0x3]  }
  0x16   :  { %s801_s19 = smov 93   ;;  %s203_s20 = smov 3  ;;  %v238_v34 = vld [vmem:[#allocation0 + $0x8] sm:$0x3]   ;;  %v252_v36 = vld [vmem:[#allocation0] sm:$0x3]  }
  0x17   :  { %v204_v29 = vld [vmem:[#allocation0 + $0x11] ss:$-1 sm:%s203_s20]   ;;  %s802_s21 = smov 91   ;;  %s803_s22 = smov 89   ;;  %v259_v37 = vld [vmem:[#allocation0 + $0x8] sm:$0x3]  }
  0x18   :  { %s806_s26 = smov 84   ;;  %s807_s27 = smov 83   ;;  %v273_v39 = vld [vmem:[#allocation0] sm:$0x3]   ;;  %v280_v41 = vld [vmem:[#allocation0 + $0x8] sm:$0x3]  }
  0x19   :  { %s810_s2 = smov 78   ;;  %s266_s3 = smov 3  ;;  %v294_v43 = vld [vmem:[#allocation0] sm:$0x3]   ;;  %v301_v45 = vld [vmem:[#allocation0 + $0x8] sm:$0x3]  }
  0x1a   :  { %68 = vrot.lane.b32.xlu0 %v67_v10, %s784_s23  ;;  %s804_s23 = smov 88   ;;  %v267_v38 = vld [vmem:[#allocation0 + $0x11] ss:$-1 sm:%s266_s3]   ;;  %s287_s7 = smov 3  ;;  %v314_v47 = vld [vmem:[#allocation0] sm:$0x3]  }
  0x1b   :  { %74 = vrot.lane.b32.xlu1 %v73_v11, %s785_s24  ;;  %81 = vrot.lane.b32.xlu2 %v80_v12, %s786_s25  ;;  %s224_s24 = smov 3  ;;  %s805_s25 = smov 86   ;;  %v288_v42 = vld [vmem:[#allocation0 + $0x11] ss:$-1 sm:%s287_s7]   ;;  %v321_v49 = vld [vmem:[#allocation0 + $0x8] sm:$0x3]  }
  0x1c   :  { %v225_v32 = vld [vmem:[#allocation0 + $0x11] ss:$-1 sm:%s224_s24]   ;;  %s816_s12 = smov 68   ;;  %s819_s16 = smov 63   ;;  %v334_v51 = vld [vmem:[#allocation0] sm:$0x3]  }
  0x1d   :  { %v308_v46 = vld [vmem:[#allocation0 + $0x10] sm:$0x3]   ;;  %s821_s20 = smov 59   ;;  %v341_v55 = vld [vmem:[#allocation0 + $0x8] sm:$0x3]   ;;  %s842_s3 = smov 24  }
  0x1e   :  { %v328_v50 = vld [vmem:[#allocation0 + $0x10] sm:$0x3]   ;;  %v354_v57 = vld [vmem:[#allocation0] sm:$0x3]   ;;  %v361_v61 = vld [vmem:[#allocation0 + $0x8] sm:$0x3]  }
  0x1f   :  { %v348_v56 = vld [vmem:[#allocation0 + $0x10] sm:$0x3]   ;;  %v383_v3 = vld [vmem:[#allocation0 + $0x8] sm:$0x3]   ;;  %s845_s13 = smov 3   ;;  %s515_s24 = smov 3 }
  0x20   :  { %v368_v62 = vld [vmem:[#allocation0 + $0x10] sm:$0x3]   ;;  %v405_v9 = vld [vmem:[#allocation0 + $0x8] sm:$0x3]  }
  0x21   :  { %v390_v4 = vld [vmem:[#allocation0 + $0x10] sm:$0x3]  }
  0x22   :  { %89 = vrot.lane.b32.xlu0 %v88_v13, %s787_s28  ;;  %s245_s28 = smov 3  ;;  %v412_v10 = vld [vmem:[#allocation0 + $0x10] sm:$0x3]  }
  0x23   :  { %97 = vrot.lane.b32.xlu1 %v96_v14, %s788_s29  ;;  %103 = vrot.lane.b32.xlu2 %v102_v15, %s789_s30  ;;  %v246_v35 = vld [vmem:[#allocation0 + $0x11] ss:$-1 sm:%s245_s28]   ;;  %s808_s29 = smov 81   ;;  %s809_s30 = smov 79   ;;  %v427_v15 = vld [vmem:[#allocation0 + $0x8] sm:$0x3]  }
  0x24   :  { %s823_s28 = smov 56  }
  0x2a   :  { %111 = vrot.lane.b32.xlu0 %v110_v16, %s790_s4  ;;  %s811_s4 = smov 76   ;;  %v434_v16 = vld [vmem:[#allocation0 + $0x10] sm:$0x3]  }
  0x2b   :  { %119 = vrot.lane.b32.xlu1 %v118_v17, %s791_s5  ;;  %125 = vrot.lane.b32.xlu2 %v124_v18, %s792_s6  ;;  %s812_s5 = smov 74   ;;  %s813_s6 = smov 73  }
  0x32   :  { %133 = vrot.lane.b32.xlu0 %v132_v19, %s793_s9  ;;  %s826_s9 = smov 51  }
  0x33   :  { %141 = vrot.lane.b32.xlu1 %v140_v20, %s794_s10  ;;  %147 = vrot.lane.b32.xlu2 %v146_v21, %s795_s11  ;;  %s814_s10 = smov 71   ;;  %s815_s11 = smov 69   ;;  %v449_v21 = vld [vmem:[#allocation0 + $0x8] sm:$0x3]  }
  0x3a   :  { %155 = vrot.lane.b32.xlu0 %v154_v22, %s796_s0  ;;  %s397_s0 = smov 3  ;;  %v456_v22 = vld [vmem:[#allocation0 + $0x10] sm:$0x3]  }
  0x3b   :  { %163 = vrot.lane.b32.xlu1 %v162_v23, %s797_s14  ;;  %169 = vrot.lane.b32.xlu2 %v168_v24, %s798_s15  ;;  %s817_s14 = smov 66   ;;  %s818_s15 = smov 64   ;;  %v398_v5 = vld [vmem:[#allocation0 + $0x1] ss:$-1 sm:%s397_s0]  }
  0x3c   :  { %s463_s0 = smov 3 }
  0x3d   :  { %v464_v23 = vld [vmem:[#allocation0 + $0x1] ss:$-1 sm:%s463_s0]   ;;  %s846_s0 = smov 1  }
  0x42   :  { %176 = vrot.lane.b32.xlu0 %v175_v25, %s799_s17 }
  0x43   :  { %184 = vrot.lane.b32.xlu1 %v183_v26, %s800_s18  ;;  %190 = vrot.lane.b32.xlu2 %v189_v27, %s801_s19  ;;  %s820_s19 = smov 61   ;;  %s829_s18 = smov 46   ;;  %v471_v27 = vld [vmem:[#allocation0 + $0x8] sm:$0x3]  }
  0x4a   :  { %197 = vrot.lane.b32.xlu0 %v196_v28, %s802_s21  ;;  %s822_s21 = smov 58   ;;  %v478_v28 = vld [vmem:[#allocation0 + $0x10] sm:$0x3]  }
  0x4b   :  { %205 = vrot.lane.b32.xlu1 %v204_v29, %s803_s22  ;;  %211 = vrot.lane.b32.xlu2 %v210_v30, %s804_s23  ;;  %s419_s23 = smov 3  ;;  %v569_v30 = vld [vmem:[#allocation0 + $0x10] sm:$0x3]   ;;  %s848_s22 = smov 19  }
  0x4c   :  { %v420_v11 = vld [vmem:[#allocation0 + $0x1] ss:$-1 sm:%s419_s23]   ;;  %s485_s23 = smov 3 }
  0x4d   :  { %v486_v29 = vld [vmem:[#allocation0 + $0x1] ss:$-1 sm:%s485_s23]   ;;  %s849_s23 = smov 18  }
  0x52   :  { %218 = vrot.lane.b32.xlu0 %v217_v31, %s805_s25  ;;  %v571_v31 = vld [vmem:[#allocation0 + $0x18] sm:$0x3]  }
  0x53   :  { %226 = vrot.lane.b32.xlu1 %v225_v32, %s806_s26  ;;  %232 = vrot.lane.b32.xlu2 %v231_v33, %s807_s27  ;;  %s530_s27 = smov 3 }
  0x5a   :  { %239 = vrot.lane.b32.xlu0 %v238_v34, %s808_s29  ;;  %s824_s29 = smov 54  }
  0x5b   :  { %247 = vrot.lane.b32.xlu1 %v246_v35, %s809_s30  ;;  %253 = vrot.lane.b32.xlu2 %v252_v36, %s810_s2  ;;  %s825_s30 = smov 53   ;;  %s599_s2 = smov 3 }
  0x62   :  { %260 = vrot.lane.b32.xlu0 %v259_v37, %s811_s4  ;;  %s375_s4 = smov 3  ;;  %v600_v37 = vld [vmem:[#allocation0 + $0x9] ss:$-1 sm:%s599_s2]  }
  0x63   :  { %268 = vrot.lane.b32.xlu1 %v267_v38, %s812_s5  ;;  %274 = vrot.lane.b32.xlu2 %v273_v39, %s813_s6  ;;  %v376_v63 = vld [vmem:[#allocation0 + $0x1] ss:$-1 sm:%s375_s4]   ;;  %s441_s4 = smov 3  ;;  %s602_s5 = smov 3  ;;  %v573_v39 = vsel %vm572_vm1, %v571_v31, %v569_v30 }
  0x64   :  { %v442_v17 = vld [vmem:[#allocation0 + $0x1] ss:$-1 sm:%s441_s4]   ;;  %s843_s4 = smov 23   ;;  %v603_v38 = vld [vmem:[#allocation0 + $0x11] ss:$-1 sm:%s602_s5]   ;;  %s852_s5 = smov 13  }
  0x65   :  { %v53_v40 = vpop.permute.xlu2 %52   ;;  %s538_s6 = smov 3 }
  0x66   :  { %621 = vst.msk [vmem:[%s1206_s1 + $0x4e] ss:$80 sm:$0x3] %vm19_vm0, %v53_v40  }
  0x6a   :  { %281 = vrot.lane.b32.xlu0 %v280_v41, %s814_s10  ;;  %s827_s10 = smov 49   ;;  %v605_v41 = vsel %vm604_vm3, %v603_v38, %v600_v37 }
  0x6b   :  { %289 = vrot.lane.b32.xlu1 %v288_v42, %s815_s11  ;;  %295 = vrot.lane.b32.xlu2 %v294_v43, %s816_s12  ;;  %s828_s11 = smov 48   ;;  %s844_s12 = smov 4  }
  0x6d   :  { %v61_v44 = vpop.permute.xlu2 %60  }
  0x6e   :  { %622 = vst.msk [vmem:[%s1206_s1 + $0x6b] ss:$-80 sm:$0x3] %vm19_vm0, %v61_v44  }
  0x72   :  { %302 = vrot.lane.b32.xlu0 %v301_v45, %s817_s14  ;;  %v493_v45 = vld [vmem:[#allocation0 + $0x8] sm:$0x3]   ;;  %s854_s14 = smov 9  }
  0x73   :  { %309 = vrot.lane.b32.xlu1 %v308_v46, %s818_s15  ;;  %315 = vrot.lane.b32.xlu2 %v314_v47, %s819_s16  ;;  %s507_s16 = smov 3  ;;  %v500_v46 = vld [vmem:[#allocation0 + $0x10] sm:$0x3]   ;;  %s855_s15 = smov 8  }
  0x74   :  { %v508_v47 = vld [vmem:[#allocation0 + $0x1] ss:$-1 sm:%s507_s16]   ;;  %s561_s16 = smov 3 }
  0x75   :  { %v82_v48 = vpop.permute.xlu2 %81  }
  0x76   :  { %625 = vst.msk [vmem:[%s1206_s1 + $0x4f] ss:$80 sm:$0x3] %vm19_vm0, %v82_v48  }
  0x7a   :  { %322 = vrot.lane.b32.xlu0 %v321_v49, %s820_s19  ;;  %s830_s19 = smov 44  }
  0x7b   :  { %329 = vrot.lane.b32.xlu1 %v328_v50, %s821_s20  ;;  %335 = vrot.lane.b32.xlu2 %v334_v51, %s822_s21  ;;  %s831_s20 = smov 43   ;;  %s847_s21 = smov 21   ;;  %v516_v51 = vld [vmem:[#allocation0 + $0x9] ss:$-1 sm:%s515_s24]  }
  0x7c   :  { %v24_v52 = vpop.permute.xlu0 %23  }
  0x7d   :  { %617 = vst.msk [vmem:[%s1206_s1 + $0x4d] ss:$80 sm:$0x3] %vm19_vm0, %v24_v52   ;;  %v40_v53 = vpop.permute.xlu1 %39   ;;  %v104_v54 = vpop.permute.xlu2 %103   ;;  %v523_v52 = vld [vmem:[#allocation0 + $0x10] sm:$0x3]  }
  0x7e   :  { %619 = vst.msk [vmem:[%s1206_s1 + $0x84] ss:$-80 sm:$0x3] %vm19_vm0, %v40_v53   ;;  %v531_v53 = vld [vmem:[#allocation0 + $0x1] ss:$-1 sm:%s530_s27]  }
  0x7f   :  { %628 = vst.msk [vmem:[%s1206_s1 + $0x3] ss:$80 sm:$0x3] %vm19_vm0, %v104_v54  }
  0x82   :  { %342 = vrot.lane.b32.xlu0 %v341_v55, %s823_s28  ;;  %s832_s28 = smov 41  }
  0x83   :  { %349 = vrot.lane.b32.xlu1 %v348_v56, %s824_s29  ;;  %355 = vrot.lane.b32.xlu2 %v354_v57, %s825_s30  ;;  %s833_s29 = smov 39   ;;  %s834_s30 = smov 38   ;;  %v539_v57 = vld [vmem:[#allocation0 + $0x9] ss:$-1 sm:%s538_s6]  }
  0x84   :  { %v32_v58 = vpop.permute.xlu0 %31  }
  0x85   :  { %618 = vst.msk [vmem:[%s1206_s1 + $0x6a] ss:$-80 sm:$0x3] %vm19_vm0, %v32_v58   ;;  %v46_v59 = vpop.permute.xlu1 %45   ;;  %v126_v60 = vpop.permute.xlu2 %125   ;;  %v546_v58 = vld [vmem:[#allocation0 + $0x10] sm:$0x3]  }
  0x86   :  { %620 = vst.msk [vmem:[%s1206_s1 + $0x1] ss:$80 sm:$0x3] %vm19_vm0, %v46_v59  }
  0x87   :  { %631 = vst.msk [vmem:[%s1206_s1 + $0x4] ss:$80 sm:$0x3] %vm19_vm0, %v126_v60  }
  0x8a   :  { %362 = vrot.lane.b32.xlu0 %v361_v61, %s826_s9  ;;  %s835_s9 = smov 36  }
  0x8b   :  { %369 = vrot.lane.b32.xlu1 %v368_v62, %s827_s10  ;;  %377 = vrot.lane.b32.xlu2 %v376_v63, %s828_s11  ;;  %s836_s10 = smov 34   ;;  %s837_s11 = smov 33   ;;  %v562_v63 = vld [vmem:[#allocation0 + $0x9] ss:$-1 sm:%s561_s16]  }
  0x8c   :  { %v69_v0 = vpop.permute.xlu0 %68  }
  0x8d   :  { %623 = vst.msk [vmem:[%s1206_s1 + $0x85] ss:$-80 sm:$0x3] %vm19_vm0, %v69_v0   ;;  %v75_v1 = vpop.permute.xlu1 %74   ;;  %v148_v2 = vpop.permute.xlu2 %147  }
  0x8e   :  { %624 = vst.msk [vmem:[%s1206_s1 + $0x2] ss:$80 sm:$0x3] %vm19_vm0, %v75_v1  }
  0x8f   :  { %634 = vst.msk [vmem:[%s1206_s1 + $0x5] ss:$80 sm:$0x3] %vm19_vm0, %v148_v2  }
  0x92   :  { %384 = vrot.lane.b32.xlu0 %v383_v3, %s829_s18  ;;  %s838_s18 = smov 31  }
  0x93   :  { %391 = vrot.lane.b32.xlu1 %v390_v4, %s830_s19  ;;  %399 = vrot.lane.b32.xlu2 %v398_v5, %s831_s20  ;;  %s839_s19 = smov 29   ;;  %s840_s20 = smov 28  }
  0x94   :  { %v90_v6 = vpop.permute.xlu0 %89  }
  0x95   :  { %626 = vst.msk [vmem:[%s1206_s1 + $0x6c] ss:$-80 sm:$0x3] %vm19_vm0, %v90_v6   ;;  %v98_v7 = vpop.permute.xlu1 %97   ;;  %v170_v8 = vpop.permute.xlu2 %169  }
  0x96   :  { %627 = vst.msk [vmem:[%s1206_s1 + $0x86] ss:$-80 sm:$0x3] %vm19_vm0, %v98_v7  }
  0x97   :  { %637 = vst.msk [vmem:[%s1206_s1 + $0x6] ss:$80 sm:$0x3] %vm19_vm0, %v170_v8  }
  0x9a   :  { %406 = vrot.lane.b32.xlu0 %v405_v9, %s832_s28  ;;  %s583_s28 = smov 3 }
  0x9b   :  { %413 = vrot.lane.b32.xlu1 %v412_v10, %s833_s29  ;;  %421 = vrot.lane.b32.xlu2 %v420_v11, %s834_s30  ;;  %s586_s29 = smov 3  ;;  %s841_s30 = smov 26   ;;  %v584_v33 = vld [vmem:[#allocation0 + $0x1] ss:$-1 sm:%s583_s28]  }
  0x9c   :  { %v112_v12 = vpop.permute.xlu0 %111   ;;  %v587_v34 = vld [vmem:[#allocation0 + $0x9] ss:$-1 sm:%s586_s29]  }
  0x9d   :  { %629 = vst.msk [vmem:[%s1206_s1 + $0x6d] ss:$-80 sm:$0x3] %vm19_vm0, %v112_v12   ;;  %v120_v13 = vpop.permute.xlu1 %119   ;;  %v191_v14 = vpop.permute.xlu2 %190   ;;  %v589_v40 = vsel %vm588_vm2, %v587_v34, %v584_v33  ;;  %v18_v33 = vld [vmem:[#allocation0] sm:$0x3]  }
  0x9e   :  { %630 = vst.msk [vmem:[%s1206_s1 + $0x87] ss:$-80 sm:$0x3] %vm19_vm0, %v120_v13  }
  0x9f   :  { %640 = vst.msk [vmem:[%s1206_s1 + $0x7] ss:$80 sm:$0x3] %vm19_vm0, %v191_v14  }
  0xa0   :  { %20 = vst.msk [vmem:[%s1206_s1] ss:$80 sm:$0x3] %vm19_vm0, %v18_v33  }
  0xa2   :  { %428 = vrot.lane.b32.xlu0 %v427_v15, %s835_s9  ;;  %s553_s9 = smov 3 }
  0xa3   :  { %435 = vrot.lane.b32.xlu1 %v434_v16, %s836_s10  ;;  %443 = vrot.lane.b32.xlu2 %v442_v17, %s837_s11  ;;  %v554_v59 = vld [vmem:[#allocation0 + $0x1] ss:$-1 sm:%s553_s9]  }
  0xa4   :  { %v134_v18 = vpop.permute.xlu0 %133  }
  0xa5   :  { %632 = vst.msk [vmem:[%s1206_s1 + $0x6e] ss:$-80 sm:$0x3] %vm19_vm0, %v134_v18   ;;  %v142_v19 = vpop.permute.xlu1 %141   ;;  %v212_v20 = vpop.permute.xlu2 %211  }
  0xa6   :  { %633 = vst.msk [vmem:[%s1206_s1 + $0x88] ss:$-80 sm:$0x3] %vm19_vm0, %v142_v19  }
  0xa7   :  { %643 = vst.msk [vmem:[%s1206_s1 + $0x8] ss:$80 sm:$0x3] %vm19_vm0, %v212_v20  }
  0xaa   :  { %450 = vrot.lane.b32.xlu0 %v449_v21, %s838_s18 }
  0xab   :  { %457 = vrot.lane.b32.xlu1 %v456_v22, %s839_s19  ;;  %465 = vrot.lane.b32.xlu2 %v464_v23, %s840_s20 }
  0xac   :  { %v156_v24 = vpop.permute.xlu0 %155  }
  0xad   :  { %635 = vst.msk [vmem:[%s1206_s1 + $0x6f] ss:$-80 sm:$0x3] %vm19_vm0, %v156_v24   ;;  %v164_v25 = vpop.permute.xlu1 %163   ;;  %v233_v26 = vpop.permute.xlu2 %232  }
  0xae   :  { %636 = vst.msk [vmem:[%s1206_s1 + $0x89] ss:$-80 sm:$0x3] %vm19_vm0, %v164_v25  }
  0xaf   :  { %646 = vst.msk [vmem:[%s1206_s1 + $0x9] ss:$80 sm:$0x3] %vm19_vm0, %v233_v26  }
  0xb2   :  { %472 = vrot.lane.b32.xlu0 %v471_v27, %s841_s30 }
  0xb3   :  { %479 = vrot.lane.b32.xlu1 %v478_v28, %s842_s3  ;;  %487 = vrot.lane.b32.xlu2 %v486_v29, %s843_s4  ;;  %s850_s3 = smov 16   ;;  %s851_s4 = smov 14  }
  0xb4   :  { %v177_v32 = vpop.permute.xlu0 %176  }
  0xb5   :  { %638 = vst.msk [vmem:[%s1206_s1 + $0x20] ss:$80 sm:$0x3] %vm19_vm0, %v177_v32   ;;  %v185_v35 = vpop.permute.xlu1 %184   ;;  %v254_v36 = vpop.permute.xlu2 %253  }
  0xb6   :  { %639 = vst.msk [vmem:[%s1206_s1 + $0x8a] ss:$-80 sm:$0x3] %vm19_vm0, %v185_v35  }
  0xb7   :  { %649 = vst.msk [vmem:[%s1206_s1 + $0xa] ss:$80 sm:$0x3] %vm19_vm0, %v254_v36  }
  0xba   :  { %574 = vrot.lane.b32.xlu0 %v573_v39, %s844_s12 }
  0xbb   :  { %590 = vrot.lane.b32.xlu1 %v589_v40, %s845_s13  ;;  %606 = vrot.lane.b32.xlu2 %v605_v41, %s846_s0  ;;  %s853_s0 = smov 11  }
  0xbc   :  { %v198_v42 = vpop.permute.xlu0 %197  }
  0xbd   :  { %641 = vst.msk [vmem:[%s1206_s1 + $0x21] ss:$80 sm:$0x3] %vm19_vm0, %v198_v42   ;;  %v206_v43 = vpop.permute.xlu1 %205   ;;  %v275_v44 = vpop.permute.xlu2 %274  }
  0xbe   :  { %642 = vst.msk [vmem:[%s1206_s1 + $0x8b] ss:$-80 sm:$0x3] %vm19_vm0, %v206_v43  }
  0xbf   :  { %652 = vst.msk [vmem:[%s1206_s1 + $0xb] ss:$80 sm:$0x3] %vm19_vm0, %v275_v44  }
  0xc2   :  { %494 = vrot.lane.b32.xlu0 %v493_v45, %s847_s21 }
  0xc3   :  { %501 = vrot.lane.b32.xlu1 %v500_v46, %s848_s22  ;;  %509 = vrot.lane.b32.xlu2 %v508_v47, %s849_s23  ;;  %s856_s23 = smov 6  }
  0xc4   :  { %v219_v48 = vpop.permute.xlu0 %218  }
  0xc5   :  { %644 = vst.msk [vmem:[%s1206_s1 + $0x22] ss:$80 sm:$0x3] %vm19_vm0, %v219_v48   ;;  %v227_v49 = vpop.permute.xlu1 %226   ;;  %v296_v50 = vpop.permute.xlu2 %295  }
  0xc6   :  { %645 = vst.msk [vmem:[%s1206_s1 + $0x8c] ss:$-80 sm:$0x3] %vm19_vm0, %v227_v49  }
  0xc7   :  { %655 = vst.msk [vmem:[%s1206_s1 + $0xc] ss:$80 sm:$0x3] %vm19_vm0, %v296_v50  }
  0xca   :  { %517 = vrot.lane.b32.xlu0 %v516_v51, %s850_s3 }
  0xcb   :  { %524 = vrot.lane.b32.xlu1 %v523_v52, %s851_s4  ;;  %532 = vrot.lane.b32.xlu2 %v531_v53, %s852_s5 }
  0xcc   :  { %v240_v54 = vpop.permute.xlu0 %239  }
  0xcd   :  { %647 = vst.msk [vmem:[%s1206_s1 + $0x23] ss:$80 sm:$0x3] %vm19_vm0, %v240_v54   ;;  %v248_v55 = vpop.permute.xlu1 %247   ;;  %v316_v56 = vpop.permute.xlu2 %315  }
  0xce   :  { %648 = vst.msk [vmem:[%s1206_s1 + $0x8d] ss:$-80 sm:$0x3] %vm19_vm0, %v248_v55  }
  0xcf   :  { %658 = vst.msk [vmem:[%s1206_s1 + $0xd] ss:$80 sm:$0x3] %vm19_vm0, %v316_v56  }
  0xd2   :  { %540 = vrot.lane.b32.xlu0 %v539_v57, %s853_s0 }
  0xd3   :  { %547 = vrot.lane.b32.xlu1 %v546_v58, %s854_s14  ;;  %555 = vrot.lane.b32.xlu2 %v554_v59, %s855_s15 }
  0xd4   :  { %v261_v60 = vpop.permute.xlu0 %260  }
  0xd5   :  { %650 = vst.msk [vmem:[%s1206_s1 + $0x24] ss:$80 sm:$0x3] %vm19_vm0, %v261_v60   ;;  %v269_v61 = vpop.permute.xlu1 %268   ;;  %v336_v62 = vpop.permute.xlu2 %335  }
  0xd6   :  { %651 = vst.msk [vmem:[%s1206_s1 + $0x8e] ss:$-80 sm:$0x3] %vm19_vm0, %v269_v61  }
  0xd7   :  { %661 = vst.msk [vmem:[%s1206_s1 + $0xe] ss:$80 sm:$0x3] %vm19_vm0, %v336_v62  }
  0xda   :  { %563 = vrot.lane.b32.xlu0 %v562_v63, %s856_s23 }
  0xdc   :  { %v282_v0 = vpop.permute.xlu0 %281  }
  0xdd   :  { %653 = vst.msk [vmem:[%s1206_s1 + $0x25] ss:$80 sm:$0x3] %vm19_vm0, %v282_v0   ;;  %v290_v1 = vpop.permute.xlu1 %289   ;;  %v356_v2 = vpop.permute.xlu2 %355  }
  0xde   :  { %654 = vst.msk [vmem:[%s1206_s1 + $0x8f] ss:$-80 sm:$0x3] %vm19_vm0, %v290_v1  }
  0xdf   :  { %664 = vst.msk [vmem:[%s1206_s1 + $0xf] ss:$80 sm:$0x3] %vm19_vm0, %v356_v2  }
  0xe4   :  { %v303_v3 = vpop.permute.xlu0 %302  }
  0xe5   :  { %656 = vst.msk [vmem:[%s1206_s1 + $0x26] ss:$80 sm:$0x3] %vm19_vm0, %v303_v3   ;;  %v310_v4 = vpop.permute.xlu1 %309   ;;  %v378_v5 = vpop.permute.xlu2 %377  }
  0xe6   :  { %657 = vst.msk [vmem:[%s1206_s1 + $0x40] ss:$80 sm:$0x3] %vm19_vm0, %v310_v4  }
  0xe7   :  { %667 = vst.msk [vmem:[%s1206_s1 + $0x60] ss:$-80 sm:$0x3] %vm19_vm0, %v378_v5  }
  0xec   :  { %v323_v6 = vpop.permute.xlu0 %322  }
  0xed   :  { %659 = vst.msk [vmem:[%s1206_s1 + $0x27] ss:$80 sm:$0x3] %vm19_vm0, %v323_v6   ;;  %v330_v7 = vpop.permute.xlu1 %329   ;;  %v400_v8 = vpop.permute.xlu2 %399  }
  0xee   :  { %660 = vst.msk [vmem:[%s1206_s1 + $0x41] ss:$80 sm:$0x3] %vm19_vm0, %v330_v7  }
  0xef   :  { %670 = vst.msk [vmem:[%s1206_s1 + $0x61] ss:$-80 sm:$0x3] %vm19_vm0, %v400_v8  }
  0xf4   :  { %v343_v9 = vpop.permute.xlu0 %342  }
  0xf5   :  { %662 = vst.msk [vmem:[%s1206_s1 + $0x28] ss:$80 sm:$0x3] %vm19_vm0, %v343_v9   ;;  %v350_v10 = vpop.permute.xlu1 %349   ;;  %v422_v11 = vpop.permute.xlu2 %421  }
  0xf6   :  { %663 = vst.msk [vmem:[%s1206_s1 + $0x42] ss:$80 sm:$0x3] %vm19_vm0, %v350_v10  }
  0xf7   :  { %673 = vst.msk [vmem:[%s1206_s1 + $0x62] ss:$-80 sm:$0x3] %vm19_vm0, %v422_v11  }
  0xfc   :  { %v363_v12 = vpop.permute.xlu0 %362  }
  0xfd   :  { %665 = vst.msk [vmem:[%s1206_s1 + $0x29] ss:$80 sm:$0x3] %vm19_vm0, %v363_v12   ;;  %v370_v13 = vpop.permute.xlu1 %369   ;;  %v444_v14 = vpop.permute.xlu2 %443  }
  0xfe   :  { %666 = vst.msk [vmem:[%s1206_s1 + $0x43] ss:$80 sm:$0x3] %vm19_vm0, %v370_v13  }
  0xff   :  { %676 = vst.msk [vmem:[%s1206_s1 + $0x63] ss:$-80 sm:$0x3] %vm19_vm0, %v444_v14  }
 0x104   :  { %v385_v15 = vpop.permute.xlu0 %384  }
 0x105   :  { %668 = vst.msk [vmem:[%s1206_s1 + $0x2a] ss:$80 sm:$0x3] %vm19_vm0, %v385_v15   ;;  %v392_v16 = vpop.permute.xlu1 %391   ;;  %v466_v17 = vpop.permute.xlu2 %465  }
 0x106   :  { %669 = vst.msk [vmem:[%s1206_s1 + $0x44] ss:$80 sm:$0x3] %vm19_vm0, %v392_v16  }
 0x107   :  { %679 = vst.msk [vmem:[%s1206_s1 + $0x64] ss:$-80 sm:$0x3] %vm19_vm0, %v466_v17  }
 0x10c   :  { %v407_v18 = vpop.permute.xlu0 %406  }
 0x10d   :  { %671 = vst.msk [vmem:[%s1206_s1 + $0x2b] ss:$80 sm:$0x3] %vm19_vm0, %v407_v18   ;;  %v414_v19 = vpop.permute.xlu1 %413   ;;  %v488_v20 = vpop.permute.xlu2 %487  }
 0x10e   :  { %672 = vst.msk [vmem:[%s1206_s1 + $0x45] ss:$80 sm:$0x3] %vm19_vm0, %v414_v19  }
 0x10f   :  { %682 = vst.msk [vmem:[%s1206_s1 + $0x65] ss:$-80 sm:$0x3] %vm19_vm0, %v488_v20  }
 0x114   :  { %v429_v21 = vpop.permute.xlu0 %428  }
 0x115   :  { %674 = vst.msk [vmem:[%s1206_s1 + $0x2c] ss:$80 sm:$0x3] %vm19_vm0, %v429_v21   ;;  %v436_v22 = vpop.permute.xlu1 %435   ;;  %v607_v23 = vpop.permute.xlu2 %606  }
 0x116   :  { %675 = vst.msk [vmem:[%s1206_s1 + $0x46] ss:$80 sm:$0x3] %vm19_vm0, %v436_v22  }
 0x117   :  { %697 = vst.msk [vmem:[%s1206_s1 + $0x83] ss:$-80 sm:$0x3] %vm608_vm4, %v607_v23  }
 0x118   :  { %698 = vst.msk [vmem:[%s1206_s1 + $0x83] ss:$-80 sm:$0x3] %vm611_vm5, %v607_v23  }
 0x11c   :  { %v451_v24 = vpop.permute.xlu0 %450  }
 0x11d   :  { %677 = vst.msk [vmem:[%s1206_s1 + $0x2d] ss:$80 sm:$0x3] %vm19_vm0, %v451_v24   ;;  %v458_v25 = vpop.permute.xlu1 %457   ;;  %v510_v26 = vpop.permute.xlu2 %509  }
 0x11e   :  { %678 = vst.msk [vmem:[%s1206_s1 + $0x47] ss:$80 sm:$0x3] %vm19_vm0, %v458_v25  }
 0x11f   :  { %685 = vst.msk [vmem:[%s1206_s1 + $0x66] ss:$-80 sm:$0x3] %vm19_vm0, %v510_v26  }
 0x124   :  { %v473_v27 = vpop.permute.xlu0 %472  }
 0x125   :  { %680 = vst.msk [vmem:[%s1206_s1 + $0x2e] ss:$80 sm:$0x3] %vm19_vm0, %v473_v27   ;;  %v480_v28 = vpop.permute.xlu1 %479   ;;  %v533_v29 = vpop.permute.xlu2 %532  }
 0x126   :  { %681 = vst.msk [vmem:[%s1206_s1 + $0x48] ss:$80 sm:$0x3] %vm19_vm0, %v480_v28  }
 0x127   :  { %688 = vst.msk [vmem:[%s1206_s1 + $0x67] ss:$-80 sm:$0x3] %vm19_vm0, %v533_v29  }
 0x12c   :  { %v575_v30 = vpop.permute.xlu0 %574  }
 0x12d   :  { %693 = vst.msk [vmem:[%s1206_s1 + $0x4c] ss:$80 sm:$0x3] %vm576_vm6, %v575_v30   ;;  %v591_v31 = vpop.permute.xlu1 %590   ;;  %v556_v32 = vpop.permute.xlu2 %555  }
 0x12e   :  { %694 = vst.msk [vmem:[%s1206_s1 + $0x4c] ss:$80 sm:$0x3] %vm579_vm7, %v575_v30  }
 0x12f   :  { %695 = vst.msk [vmem:[%s1206_s1 + $0x69] ss:$-80 sm:$0x3] %vm592_vm8, %v591_v31  }
 0x130   :  { %696 = vst.msk [vmem:[%s1206_s1 + $0x69] ss:$-80 sm:$0x3] %vm595_vm9, %v591_v31  }
 0x131   :  { %691 = vst.msk [vmem:[%s1206_s1 + $0x68] ss:$-80 sm:$0x3] %vm19_vm0, %v556_v32  }
 0x134   :  { %v495_v34 = vpop.permute.xlu0 %494  }
 0x135   :  { %683 = vst.msk [vmem:[%s1206_s1 + $0x2f] ss:$80 sm:$0x3] %vm19_vm0, %v495_v34   ;;  %v502_v35 = vpop.permute.xlu1 %501  }
 0x136   :  { %684 = vst.msk [vmem:[%s1206_s1 + $0x49] ss:$80 sm:$0x3] %vm19_vm0, %v502_v35  }
 0x13c   :  { %v518_v36 = vpop.permute.xlu0 %517  }
 0x13d   :  { %686 = vst.msk [vmem:[%s1206_s1 + $0x80] ss:$-80 sm:$0x3] %vm19_vm0, %v518_v36   ;;  %v525_v37 = vpop.permute.xlu1 %524  }
 0x13e   :  { %687 = vst.msk [vmem:[%s1206_s1 + $0x4a] ss:$80 sm:$0x3] %vm19_vm0, %v525_v37  }
 0x144   :  { %v541_v38 = vpop.permute.xlu0 %540  }
 0x145   :  { %689 = vst.msk [vmem:[%s1206_s1 + $0x81] ss:$-80 sm:$0x3] %vm19_vm0, %v541_v38   ;;  %v548_v39 = vpop.permute.xlu1 %547  }
 0x146   :  { %690 = vst.msk [vmem:[%s1206_s1 + $0x4b] ss:$80 sm:$0x3] %vm19_vm0, %v548_v39  }
 0x14c   :  { %v564_v40 = vpop.permute.xlu0 %563  }
 0x14d   :  { %692 = vst.msk [vmem:[%s1206_s1 + $0x82] ss:$-80 sm:$0x3] %vm19_vm0, %v564_v40  }

// kernel: model_asr_forward.1
= control target key start
LH: loop header
LB: loop body
LE: loop exit
PB: predicated region body
PF: predicated region fallthrough
CT: control target
= control target key end

     0   :  { %s7453_s6 = smov 1   ;;  %s7454_s10 = smov 2   ;;  %s8618_s0 = inlined_call_operand.smem [shape: u32[33], index: -1, kind: input, shape index: {}] }
   0x1   :  { %s7498_s5 = sld [smem:[%s8618_s0]]   ;;  %s7455_s14 = smov 3  }
   0x2   :  { %s7503_s9 = sld [smem:[%s8618_s0 + %s7453_s6]]   ;;  %s7456_s18 = smov 4  }
   0x3   :  { %s7508_s13 = sld [smem:[%s8618_s0 + %s7454_s10]]   ;;  %s7457_s22 = smov 5  }
   0x4   :  { %s7513_s17 = sld [smem:[%s8618_s0 + %s7455_s14]]   ;;  %s7458_s26 = smov 6  }
   0x5   :  { %s7518_s21 = sld [smem:[%s8618_s0 + %s7456_s18]]   ;;  %s7459_s30 = smov 7  }
   0x6   :  { %s7523_s25 = sld [smem:[%s8618_s0 + %s7457_s22]]   ;;  %s7460_s4 = smov 8  }
   0x7   :  { %8634 = sst [smem:[#allocation5_spill]] %s7498_s5  ;;  %s7461_s10 = smov 9  }
   0x8   :  { %s7528_s29 = sld [smem:[%s8618_s0 + %s7458_s26]]   ;;  %s7462_s15 = smov 10  }
   0x9   :  { %s7533_s3 = sld [smem:[%s8618_s0 + %s7459_s30]]   ;;  %s7463_s20 = smov 11  }
   0xa   :  { %s7538_s8 = sld [smem:[%s8618_s0 + %s7460_s4]]   ;;  %s7464_s26 = smov 12  }
   0xb   :  { %s7543_s14 = sld [smem:[%s8618_s0 + %s7461_s10]]   ;;  %s7465_s1 = smov 13  }
   0xc   :  { %s7548_s19 = sld [smem:[%s8618_s0 + %s7462_s15]]   ;;  %s7466_s7 = smov 14  }
   0xd   :  { %s7553_s24 = sld [smem:[%s8618_s0 + %s7463_s20]]   ;;  %s7467_s15 = smov 15  }
   0xe   :  { %s7558_s30 = sld [smem:[%s8618_s0 + %s7464_s26]]   ;;  %s7468_s22 = smov 16  }
   0xf   :  { %8635 = sst [smem:[#allocation6_spill]] %s7533_s3  ;;  %s7469_s28 = smov 17  }
  0x10   :  { %s7563_s6 = sld [smem:[%s8618_s0 + %s7465_s1]]  }
  0x11   :  { %s7568_s12 = sld [smem:[%s8618_s0 + %s7466_s7]]   ;;  %s7470_s7 = smov 18  }
  0x12   :  { %s7573_s20 = sld [smem:[%s8618_s0 + %s7467_s15]]   ;;  %s7471_s15 = smov 19  }
  0x13   :  { %s7578_s27 = sld [smem:[%s8618_s0 + %s7468_s22]]   ;;  %s7472_s22 = smov 20  }
  0x14   :  { %8636 = sst [smem:[#allocation7_spill]] %s7558_s30 }
  0x15   :  { %s7583_s4 = sld [smem:[%s8618_s0 + %s7469_s28]]   ;;  %s7473_s28 = smov 21  }
  0x16   :  { %8637 = sst [smem:[#allocation8_spill]] %s7563_s6 }
  0x17   :  { %s7588_s6 = sld [smem:[%s8618_s0 + %s7470_s7]]   ;;  %s7474_s7 = smov 22  }
  0x18   :  { %8638 = sst [smem:[#allocation9_spill]] %s7573_s20 }
  0x19   :  { %s7593_s20 = sld [smem:[%s8618_s0 + %s7471_s15]]   ;;  %s7475_s15 = smov 23  }
  0x1a   :  { %s7598_s30 = sld [smem:[%s8618_s0 + %s7472_s22]]   ;;  %s7476_s22 = smov 24  }
  0x1b   :  { %8639 = sst [smem:[#allocation10_spill]] %s7583_s4 }
  0x1c   :  { %s7603_s4 = sld [smem:[%s8618_s0 + %s7473_s28]]   ;;  %s7477_s28 = smov 25  }
  0x1d   :  { %8640 = sst [smem:[#allocation11_spill]] %s7588_s6 }
  0x1e   :  { %s7608_s6 = sld [smem:[%s8618_s0 + %s7474_s7]]   ;;  %s7478_s7 = smov 26  }
  0x1f   :  { %8641 = sst [smem:[#allocation12_spill]] %s7593_s20 }
  0x20   :  { %8642 = sst [smem:[#allocation13_spill]] %s7598_s30 }
  0x21   :  { %s7613_s20 = sld [smem:[%s8618_s0 + %s7475_s15]]   ;;  %s7479_s15 = smov 27  }
  0x22   :  { %8643 = sst [smem:[#allocation14_spill]] %s7603_s4 }
  0x23   :  { %s7618_s30 = sld [smem:[%s8618_s0 + %s7476_s22]]   ;;  %s7480_s22 = smov 28  }
  0x24   :  { %8644 = sst [smem:[#allocation15_spill]] %s7608_s6 }
  0x25   :  { %s7623_s4 = sld [smem:[%s8618_s0 + %s7477_s28]]   ;;  %s7481_s28 = smov 29  }
  0x26   :  { %s7628_s6 = sld [smem:[%s8618_s0 + %s7478_s7]]   ;;  %s7482_s7 = smov 30  }
  0x27   :  { %8645 = sst [smem:[#allocation16_spill]] %s7613_s20 }
  0x28   :  { %s7633_s20 = sld [smem:[%s8618_s0 + %s7479_s15]]   ;;  %s7483_s15 = smov 31  }
  0x29   :  { %8646 = sst [smem:[#allocation17_spill]] %s7618_s30 }
  0x2a   :  { %s7638_s30 = sld [smem:[%s8618_s0 + %s7480_s22]]   ;;  %s7484_s22 = smov 32  }
  0x2b   :  { %8647 = sst [smem:[#allocation18_spill]] %s7623_s4 }
  0x2c   :  { %8648 = sst [smem:[#allocation19_spill]] %s7628_s6 }
  0x2d   :  { %s7643_s4 = sld [smem:[%s8618_s0 + %s7481_s28]]   ;;  %s7660_s28 = smov 0  }
  0x2e   :  { %8649 = sst [smem:[#allocation20_spill]] %s7633_s20 }
  0x2f   :  { %s7648_s6 = sld [smem:[%s8618_s0 + %s7482_s7]]  }
  0x30   :  { %8650 = sst [smem:[#allocation21_spill]] %s7638_s30 }
  0x31   :  { %s7653_s20 = sld [smem:[%s8618_s0 + %s7483_s15]]  }
  0x32   :  { %s7658_s30 = sld [smem:[%s8618_s0 + %s7484_s22]]  }
  0x33 LB: > { %s5822_s1 = sadd.s32 4294967295, %s7451_s28   ;;  %p5826_p0 = scmp.ge.s32.totalorder %s7451_s28, 1  ;;  %s7451_s28 = sphi %s7660_s28, %s75_s28  }
  0x34   : > { %p895_p1 = scmp.lt.s32.totalorder %s7451_s28, 3 }
  0x36   : > { %p896_p2 = pnand %p5826_p0, %p895_p1 }
  0x37   : > { %s8651_s5 = sld [smem:[#allocation5_spill]] (!%p896_p2)  ;;  %p977_p3 = scmp.lt.s32.totalorder (!%p896_p2), %s5822_s1, 1 }
  0x38   : > { %899 = sbr.rel (%p896_p2) target bundleno = 8391 (0x20c7), region = 148  ;;  %s8652_s3 = sld [smem:[#allocation6_spill]] (!%p896_p2) }
  0x39   : > { %s8653_s7 = sld [smem:[#allocation11_spill]] (!%p896_p2) }
  0x3a   : > { %s8654_s10 = sld [smem:[#allocation7_spill]] (!%p896_p2) }
  0x3b   : > { %s8655_s11 = sld [smem:[#allocation8_spill]] (!%p896_p2) }
  0x3c   : > { %s8656_s15 = sld [smem:[#allocation12_spill]] (!%p896_p2) }
  0x3d   : > { %v5829_v0 = vld [vmem:[%s7503_s9 + $0x4] sm:$0x7]  ;;  %vm1037_vm0 = vcmask 1041408   ;;  %vm1038_vm1 = vcmask 1042432   ;;  %vm2755_vm2 = vcmask 1040384   ;;  %v7485_v1 = vmov 65535  }
  0x3e   : > { %v1039_v2 = vsel %vm1037_vm0, 4294967295, %v7485_v1  ;;  %v2756_v3 = vsel %vm2755_vm2, 4294967295, %v7485_v1  ;;  %v1018_v4 = vld [vmem:[%s7503_s9] sm:$0x7]  ;;  %s8669_s1 = smov (!%p977_p3, %s5822_s1), 1  ;;  %vm1021_vm3 = vcmask 39936  }
  0x3f   : > { %v1040_v5 = vsel %vm1038_vm1, %v1039_v2, 0  ;;  %v7670_v6 = vsel %vm1037_vm0, %v2756_v3, 0  ;;  %s7157_s0 = smul.u32 80, %s8669_s1  ;;  %vm1130_vm4 = vcmask 261120   ;;  %v7486_v3 = vmov 79.0   ;;  %s8657_s16 = sld [smem:[#allocation10_spill]] }
  0x40   : > { %v1042_v7 = vand.u32 %v5829_v0, %v1040_v5  ;;  %v1094_v8 = vand.u32 %v1040_v5, %v1018_v4  ;;  %7251 = vrcp.f32 %v7486_v3  ;;  %vm1148_vm5 = vcmask 260096   ;;  %s8658_s18 = sld [smem:[#allocation9_spill]] }
  0x41   : > { %s7676_s2 = scalar_lea.vmem %s8651_s5, %s7157_s0  ;;  %vm1730_vm10 = vcmask 256000   ;;  %s8659_s22 = sld [smem:[#allocation13_spill]] }
  0x42   : > { %1051 = vmatpush.bf16.msra.mxu0 %v1042_v7  ;;  %1103 = vmatpush.bf16.msra.mxu1 %v1094_v8  ;;  %v1003_v9 = vld [vmem:[%s7676_s2 + $0x1] sm:$0xff]  ;;  %v1004_v10 = vld [vmem:[%s7676_s2 + $0x9] sm:$0xff]  ;;  %v1005_v15 = vld [vmem:[%s7676_s2 + $0x11] sm:$0xff]  ;;  %s8660_s23 = sld [smem:[#allocation14_spill]] }
  0x43   : > { %v988_v11 = vld [vmem:[%s7676_s2] sm:$0xff]  ;;  %v1013_v12 = vpack.c.bf16 %v1004_v10, %v1003_v9  ;;  %v989_v13 = vld [vmem:[%s7676_s2 + $0x8] sm:$0xff]  ;;  %v990_v17 = vld [vmem:[%s7676_s2 + $0x10] sm:$0xff]  ;;  %s8661_s26 = sld [smem:[#allocation17_spill]] }
  0x44   : > { %v998_v14 = vpack.c.bf16 %v989_v13, %v988_v11  ;;  %v1006_v16 = vld [vmem:[%s7676_s2 + $0x19] sm:$0xff]  ;;  %v1007_v21 = vld [vmem:[%s7676_s2 + $0x21] sm:$0xff]  ;;  %v1008_v22 = vld [vmem:[%s7676_s2 + $0x29] sm:$0xff]  ;;  %s8662_s0 = sld [smem:[#allocation15_spill]] }
  0x45   : > { %5830 = vmatmul.msk.bf16.vlgmr.msra.gmra.mxu0 %vm1021_vm3, %v1013_v12  ;;  %v991_v18 = vld [vmem:[%s7676_s2 + $0x18] sm:$0xff]  ;;  %v1014_v19 = vpack.c.bf16 %v1006_v16, %v1005_v15  ;;  %v992_v23 = vld [vmem:[%s7676_s2 + $0x20] sm:$0xff]  ;;  %v993_v24 = vld [vmem:[%s7676_s2 + $0x28] sm:$0xff]  ;;  %v1015_v25 = vpack.c.bf16 %v1008_v22, %v1007_v21  ;;  %s8667_s5 = sld [smem:[#allocation21_spill]] }
  0x46   : > { %5835 = vmatmul.msk.bf16.vlgmr.msra.gmra.mxu1 %vm1021_vm3, %v998_v14  ;;  %v999_v20 = vpack.c.bf16 %v991_v18, %v990_v17  ;;  %v1000_v26 = vpack.c.bf16 %v993_v24, %v992_v23  ;;  %v1009_v27 = vld [vmem:[%s7676_s2 + $0x31] sm:$0xff]  ;;  %v1010_v28 = vld [vmem:[%s7676_s2 + $0x39] sm:$0xff]  ;;  %v1011_v33 = vld [vmem:[%s7676_s2 + $0x41] sm:$0xff]  ;;  %v7252_v15 = vpop.eup %7251 }
  0x47   : > { %v994_v29 = vld [vmem:[%s7676_s2 + $0x30] sm:$0xff]  ;;  %v995_v30 = vld [vmem:[%s7676_s2 + $0x38] sm:$0xff]  ;;  %v1016_v31 = vpack.c.bf16 %v1010_v28, %v1009_v27  ;;  %v1012_v34 = vld [vmem:[%s7676_s2 + $0x49] sm:$0x7f]  ;;  %v1158_v21 = vmul.f32 79.0, %v7252_v15  ;;  %vm1162_vm6 = vweird.f32 %v7252_v15 }
  0x48   : > { %v1001_v32 = vpack.c.bf16 %v995_v30, %v994_v29  ;;  %v996_v35 = vld [vmem:[%s7676_s2 + $0x40] sm:$0xff]  ;;  %v997_v36 = vld [vmem:[%s7676_s2 + $0x48] sm:$0x7f]  ;;  %v1017_v37 = vpack.c.bf16 %v1012_v34, %v1011_v33  ;;  %s8663_s2 = sld [smem:[#allocation16_spill]] }
  0x49   : > { %v1002_v38 = vpack.c.bf16 %v997_v36, %v996_v35  ;;  %v1159_v27 = vsub.f32 1.0, %v1158_v21 }
  0x4b   : > { %v1160_v30 = vmul.f32 %v7252_v15, %v1159_v27 }
  0x4d   : > { %v1161_v33 = vadd.f32 %v7252_v15, %v1160_v30 }
  0x4f   : > { %v1163_v36 = vsel %vm1162_vm6, %v7252_v15, %v1161_v33  ;;  %vm1856_vm6 = vcmask 523264  }
  0x55   : > { %5831 = vmatmul.msk.bf16.gmra.mxu0 %vm1021_vm3, %v1014_v19 }
  0x56   : > { %5836 = vmatmul.msk.bf16.gmra.mxu1 %vm1021_vm3, %v999_v20 }
  0x65   : > { %5832 = vmatmul.msk.bf16.gmra.mxu0 %vm1021_vm3, %v1015_v25 }
  0x66   : > { %5837 = vmatmul.msk.bf16.gmra.mxu1 %vm1021_vm3, %v1000_v26 }
  0x75   : > { %5833 = vmatmul.msk.bf16.gmra.mxu0 %vm1021_vm3, %v1016_v31 }
  0x76   : > { %5838 = vmatmul.msk.bf16.gmra.mxu1 %vm1021_vm3, %v1001_v32 }
  0x85   : > { %5834 = vmatmul.msk.bf16.gmra.mxu0 %vm1021_vm3, %v1017_v37 }
  0x86   : > { %5839 = vmatmul.msk.bf16.gmra.mxu1 %vm1021_vm3, %v1002_v38 }
  0xc2   : > { %v1053_v39 = vpop.f32.mrf.mxu0 }
  0xc3   : > { %v1105_v40 = vpop.f32.mrf.mxu1 }
  0xc4   : > { %v1106_v54 = vadd.f32 %v1105_v40, %v1053_v39 }
  0xc6   : > { %v1131_v60 = vsel %vm1130_vm4, %v1106_v54, 0.0 }
  0xca   : > { %v1055_v41 = vpop.f32.mrf.mxu0 }
  0xcb   : > { %v1107_v42 = vpop.f32.mrf.mxu1 }
  0xcc   : > { %v1108_v53 = vadd.f32 %v1107_v42, %v1055_v41 }
  0xce   : > { %v1132_v58 = vsel %vm1130_vm4, %v1108_v53, 0.0 }
  0xcf   : > { %v1133_v63 = vadd.f32 %v1132_v58, %v1131_v60 }
  0xd2   : > { %v1058_v43 = vpop.f32.mrf.mxu0 }
  0xd3   : > { %v1110_v44 = vpop.f32.mrf.mxu1 }
  0xd4   : > { %v1111_v55 = vadd.f32 %v1110_v44, %v1058_v43 }
  0xd6   : > { %v1134_v61 = vsel %vm1130_vm4, %v1111_v55, 0.0 }
  0xd7   : > { %v1135_v2 = vadd.f32 %v1134_v61, %v1133_v63 }
  0xda   : > { %v1060_v45 = vpop.f32.mrf.mxu0 }
  0xdb   : > { %v1112_v46 = vpop.f32.mrf.mxu1 }
  0xdc   : > { %v1113_v59 = vadd.f32 %v1112_v46, %v1060_v45 }
  0xde   : > { %v1136_v0 = vsel %vm1130_vm4, %v1113_v59, 0.0 }
  0xdf   : > { %v1137_v8 = vadd.f32 %v1136_v0, %v1135_v2 }
  0xe2   : > { %v1063_v47 = vpop.f32.mrf.mxu0 }
  0xe3   : > { %v1115_v48 = vpop.f32.mrf.mxu1 }
  0xe4   : > { %v1116_v62 = vadd.f32 %v1115_v48, %v1063_v47 }
  0xe6   : > { %v1138_v4 = vsel %vm1130_vm4, %v1116_v62, 0.0 }
  0xe7   : > { %v1139_v12 = vadd.f32 %v1138_v4, %v1137_v8 }
  0xea   : > { %v1065_v49 = vpop.f32.mrf.mxu0 }
  0xeb   : > { %v1117_v50 = vpop.f32.mrf.mxu1 }
  0xec   : > { %v1118_v1 = vadd.f32 %v1117_v50, %v1065_v49 }
  0xee   : > { %v1140_v10 = vsel %vm1130_vm4, %v1118_v1, 0.0 }
  0xef   : > { %v1141_v16 = vadd.f32 %v1140_v10, %v1139_v12 }
  0xf2   : > { %v1068_v51 = vpop.f32.mrf.mxu0 }
  0xf3   : > { %v1120_v52 = vpop.f32.mrf.mxu1 }
  0xf4   : > { %v1121_v5 = vadd.f32 %v1120_v52, %v1068_v51 }
  0xf6   : > { %v1142_v13 = vsel %vm1130_vm4, %v1121_v5, 0.0 }
  0xf7   : > { %v1143_v18 = vadd.f32 %v1142_v13, %v1141_v16 }
  0xfa   : > { %v1070_v56 = vpop.f32.mrf.mxu0 }
  0xfb   : > { %v1122_v57 = vpop.f32.mrf.mxu1 }
  0xfc   : > { %v1123_v11 = vadd.f32 %v1122_v57, %v1070_v56 }
  0xfe   : > { %v1144_v17 = vsel %vm1130_vm4, %v1123_v11, 0.0 }
  0xff   : > { %v1145_v22 = vadd.f32 %v1144_v17, %v1143_v18 }
 0x102   : > { %v1073_v7 = vpop.f32.mrf.mxu0 }
 0x103   : > { %v1125_v9 = vpop.f32.mrf.mxu1 }
 0x104   : > { %v1126_v14 = vadd.f32 %v1125_v9, %v1073_v7 }
 0x106   : > { %v1146_v19 = vsel %vm1130_vm4, %v1126_v14, 0.0 }
 0x107   : > { %v1147_v25 = vadd.f32 %v1146_v19, %v1145_v22 }
 0x10a   : > { %v1075_v20 = vpop.f32.mrf.mxu0 }
 0x10b   : > { %v1127_v23 = vpop.f32.mrf.mxu1 }
 0x10c   : > { %v1128_v24 = vadd.f32 %v1127_v23, %v1075_v20 }
 0x10e   : > { %v1149_v26 = vsel %vm1148_vm5, %v1128_v24, 0.0 }
 0x10f   : > { %v1150_v28 = vadd.f32 %v1149_v26, %v1147_v25 }
 0x111   : > { %v1151_v29 = vrot.slane %v1150_v28, 4 }
 0x113   : > { %v1152_v31 = vadd.f32 %v1151_v29, %v1150_v28  ;;  %v7204_v29 = vld [vmem:[%s7508_s13] ss:$0 sm:$0xff] }
 0x115   : > { %v1153_v32 = vrot.slane %v1152_v31, 2 }
 0x117   : > { %v1154_v34 = vadd.f32 %v1153_v32, %v1152_v31 }
 0x119   : > { %v1155_v35 = vrot.slane %v1154_v34, 1 }
 0x11b   : > { %v1156_v37 = vadd.f32 %v1155_v35, %v1154_v34 }
 0x11d   : > { %v1164_v38 = vmul.f32 %v1163_v36, %v1156_v37 }
 0x11f   : > { %v1165_v39 = vsub.f32 %v1106_v54, %v1164_v38  ;;  %v1166_v40 = vsub.f32 %v1108_v53, %v1164_v38  ;;  %v1167_v41 = vsub.f32 %v1111_v55, %v1164_v38  ;;  %v1168_v42 = vsub.f32 %v1113_v59, %v1164_v38 }
 0x120   : > { %v1169_v45 = vsub.f32 %v1116_v62, %v1164_v38  ;;  %v1170_v47 = vsub.f32 %v1118_v1, %v1164_v38  ;;  %v1171_v52 = vsub.f32 %v1121_v5, %v1164_v38  ;;  %v1172_v54 = vsub.f32 %v1123_v11, %v1164_v38 }
 0x121   : > { %v1175_v43 = vmul.f32 %v1165_v39, %v1165_v39  ;;  %v1176_v44 = vmul.f32 %v1166_v40, %v1166_v40  ;;  %v1177_v46 = vmul.f32 %v1167_v41, %v1167_v41  ;;  %v1178_v48 = vmul.f32 %v1168_v42, %v1168_v42 }
 0x122   : > { %v1179_v56 = vmul.f32 %v1169_v45, %v1169_v45  ;;  %v1180_v53 = vmul.f32 %v1170_v47, %v1170_v47  ;;  %v1173_v60 = vsub.f32 %v1126_v14, %v1164_v38  ;;  %v1181_v61 = vmul.f32 %v1171_v52, %v1171_v52 }
 0x123   : > { %v1185_v49 = vsel %vm1130_vm4, %v1175_v43, 0.0  ;;  %v1186_v50 = vsel %vm1130_vm4, %v1176_v44, 0.0  ;;  %v1188_v57 = vsel %vm1130_vm4, %v1177_v46, 0.0  ;;  %v1190_v55 = vsel %vm1130_vm4, %v1178_v48, 0.0  ;;  %v7205_v43 = vld [vmem:[%s7513_s17] ss:$0 sm:$0xff] }
 0x124   : > { %v1187_v51 = vadd.f32 %v1186_v50, %v1185_v49  ;;  %v1192_v62 = vsel %vm1130_vm4, %v1179_v56, 0.0  ;;  %v1174_v0 = vsub.f32 %v1128_v24, %v1164_v38  ;;  %v1182_v1 = vmul.f32 %v1172_v54, %v1172_v54 }
 0x125   : > { %v1194_v2 = vsel %vm1130_vm4, %v1180_v53, 0.0  ;;  %v1183_v4 = vmul.f32 %v1173_v60, %v1173_v60  ;;  %v1196_v5 = vsel %vm1130_vm4, %v1181_v61, 0.0 }
 0x126   : > { %v1189_v58 = vadd.f32 %v1188_v57, %v1187_v51  ;;  %v1184_v8 = vmul.f32 %v1174_v0, %v1174_v0  ;;  %v1198_v9 = vsel %vm1130_vm4, %v1182_v1, 0.0  ;;  %v6982_v1 = vld [vmem:[%s7518_s21 + $0x8] sm:$0xff] }
 0x127   : > { %v1200_v11 = vsel %vm1130_vm4, %v1183_v4, 0.0  ;;  %1465 = vmatpush.bf16.msra.mxu3 %v6982_v1 }
 0x128   : > { %v1191_v59 = vadd.f32 %v1190_v55, %v1189_v58  ;;  %v1202_v13 = vsel %vm1148_vm5, %v1184_v8, 0.0 }
 0x12a   : > { %v1193_v63 = vadd.f32 %v1192_v62, %v1191_v59 }
 0x12c   : > { %v1195_v3 = vadd.f32 %v1194_v2, %v1193_v63 }
 0x12e   : > { %v1197_v7 = vadd.f32 %v1196_v5, %v1195_v3 }
 0x130   : > { %v1199_v10 = vadd.f32 %v1198_v9, %v1197_v7 }
 0x132   : > { %v1201_v12 = vadd.f32 %v1200_v11, %v1199_v10  ;;  %v6983_v11 = vld [vmem:[%s7518_s21 + $0x10] sm:$0xff] }
 0x134   : > { %v1203_v14 = vadd.f32 %v1202_v13, %v1201_v12 }
 0x136   : > { %v1204_v15 = vrot.slane %v1203_v14, 4 }
 0x138   : > { %v1205_v16 = vadd.f32 %v1204_v15, %v1203_v14 }
 0x13a   : > { %v1206_v17 = vrot.slane %v1205_v16, 2 }
 0x13c   : > { %v1207_v18 = vadd.f32 %v1206_v17, %v1205_v16  ;;  %v6981_v16 = vld [vmem:[%s7518_s21] sm:$0xff] }
 0x13d   : > { %1466 = vmatpush.bf16.msra.mxu3 %v6981_v16 }
 0x13e   : > { %v1208_v19 = vrot.slane %v1207_v18, 1 }
 0x140   : > { %v1209_v20 = vadd.f32 %v1208_v19, %v1207_v18 }
 0x142   : > { %v1210_v21 = vmul.f32 %v1209_v20, %v1163_v36 }
 0x144   : > { %v1211_v22 = vadd.f32 1e-05, %v1210_v21 }
 0x146   : > { %7253 = vrsqrt.f32 %v1211_v22  ;;  %vm1218_vm8 = vweird.f32 %v1211_v22 }
 0x14c   : > { %v7254_v23 = vpop.eup %7253 }
 0x14d   : > { %v1213_v24 = vmul.f32 %v7254_v23, %v1211_v22  ;;  %vm1219_vm7 = vweird.f32 %v7254_v23 }
 0x14e   : > { %vm1220_vm9 = vmor %vm1218_vm8, %vm1219_vm7 }
 0x14f   : > { %v1214_v25 = vmul.f32 %v7254_v23, %v1213_v24 }
 0x151   : > { %v1215_v26 = vmul.f32 0.5, %v1214_v25 }
 0x153   : > { %v1216_v27 = vsub.f32 1.5, %v1215_v26 }
 0x155   : > { %v1217_v28 = vmul.f32 %v7254_v23, %v1216_v27 }
 0x157   : > { %v1221_v30 = vsel %vm1220_vm9, %v7254_v23, %v1217_v28 }
 0x158   : > { %v1222_v31 = vmul.f32 %v1221_v30, %v1165_v39  ;;  %v1223_v32 = vmul.f32 %v1221_v30, %v1166_v40  ;;  %v1224_v33 = vmul.f32 %v1221_v30, %v1167_v41  ;;  %v1225_v34 = vmul.f32 %v1221_v30, %v1168_v42 }
 0x159   : > { %v1226_v35 = vmul.f32 %v1221_v30, %v1169_v45  ;;  %v1227_v36 = vmul.f32 %v1221_v30, %v1170_v47  ;;  %v1228_v37 = vmul.f32 %v1221_v30, %v1171_v52  ;;  %v1229_v38 = vmul.f32 %v1221_v30, %v1172_v54 }
 0x15a   : > { %v1230_v44 = vmul.f32 %v1221_v30, %v1173_v60  ;;  %v1231_v46 = vmul.f32 %v1221_v30, %v1174_v0  ;;  %v1236_v48 = vmul.f32 %v7204_v29, %v1222_v31  ;;  %v1237_v49 = vmul.f32 %v7204_v29, %v1223_v32  ;;  %v6984_v0 = vld [vmem:[%s7518_s21 + $0x18] sm:$0xff] }
 0x15b   : > { %v1238_v50 = vmul.f32 %v7204_v29, %v1224_v33  ;;  %v1239_v51 = vmul.f32 %v7204_v29, %v1225_v34  ;;  %v1240_v56 = vmul.f32 %v7204_v29, %v1226_v35  ;;  %v1241_v57 = vmul.f32 %v7204_v29, %v1227_v36  ;;  %1421 = vmatpush.bf16.msra.mxu2 %v6984_v0 }
 0x15c   : > { %v1242_v58 = vmul.f32 %v7204_v29, %v1228_v37  ;;  %v1243_v53 = vmul.f32 %v7204_v29, %v1229_v38  ;;  %v1244_v39 = vmul.f32 %v7204_v29, %v1230_v44  ;;  %v1245_v40 = vmul.f32 %v7204_v29, %v1231_v46 }
 0x15d   : > { %v7730_v41 = vadd.f32 %v7205_v43, %v1236_v48  ;;  %v7732_v42 = vadd.f32 %v7205_v43, %v1237_v49  ;;  %v7734_v45 = vadd.f32 %v7205_v43, %v1238_v50  ;;  %v7736_v47 = vadd.f32 %v7205_v43, %v1239_v51 }
 0x15e   : > { %v7738_v52 = vadd.f32 %v7205_v43, %v1240_v56  ;;  %v7740_v54 = vadd.f32 %v7205_v43, %v1241_v57  ;;  %v7742_v55 = vadd.f32 %v7205_v43, %v1242_v58  ;;  %v7744_v59 = vadd.f32 %v7205_v43, %v1243_v53 }
 0x15f   : > { %v7746_v60 = vadd.f32 %v7205_v43, %v1244_v39  ;;  %v7748_v61 = vadd.f32 %v7205_v43, %v1245_v40  ;;  %v1260_v62 = vmul.f32 %v7730_v41, %v7730_v41  ;;  %v1261_v63 = vmul.f32 %v7732_v42, %v7732_v42  ;;  %1422 = vmatpush.bf16.msra.mxu2 %v6983_v11 }
 0x160   : > { %v1262_v2 = vmul.f32 %v7734_v45, %v7734_v45  ;;  %v1263_v3 = vmul.f32 %v7736_v47, %v7736_v47  ;;  %v1264_v4 = vmul.f32 %v7738_v52, %v7738_v52  ;;  %v1265_v5 = vmul.f32 %v7740_v54, %v7740_v54 }
 0x161   : > { %v1266_v7 = vmul.f32 %v7742_v55, %v7742_v55  ;;  %v1267_v8 = vmul.f32 %v7744_v59, %v7744_v59  ;;  %v1268_v9 = vmul.f32 %v7746_v60, %v7746_v60  ;;  %v1269_v10 = vmul.f32 %v7748_v61, %v7748_v61 }
 0x162   : > { %v1270_v12 = vmul.f32 %v1260_v62, %v7730_v41  ;;  %v1271_v13 = vmul.f32 %v1261_v63, %v7732_v42  ;;  %v1272_v14 = vmul.f32 %v1262_v2, %v7734_v45  ;;  %v1273_v15 = vmul.f32 %v1263_v3, %v7736_v47 }
 0x163   : > { %v1274_v17 = vmul.f32 %v1264_v4, %v7738_v52  ;;  %v1275_v18 = vmul.f32 %v1265_v5, %v7740_v54  ;;  %v1276_v19 = vmul.f32 %v1266_v7, %v7742_v55  ;;  %v1277_v20 = vmul.f32 %v1267_v8, %v7744_v59 }
 0x164   : > { %v1278_v21 = vmul.f32 %v1268_v9, %v7746_v60  ;;  %v1279_v22 = vmul.f32 %v1269_v10, %v7748_v61  ;;  %v1280_v23 = vmul.f32 0.044715, %v1270_v12  ;;  %v1282_v24 = vmul.f32 0.044715, %v1272_v14 }
 0x165   : > { %v1283_v25 = vmul.f32 0.044715, %v1273_v15  ;;  %v1284_v26 = vmul.f32 0.044715, %v1274_v17  ;;  %v1285_v27 = vmul.f32 0.044715, %v1275_v18 }
 0x166   : > { %v1286_v28 = vmul.f32 0.044715, %v1276_v19  ;;  %v1287_v29 = vmul.f32 0.044715, %v1277_v20  ;;  %v1281_v30 = vmul.f32 0.044715, %v1271_v13  ;;  %v1292_v33 = vadd.f32 %v1282_v24, %v7734_v45 }
 0x167   : > { %v1288_v31 = vmul.f32 0.044715, %v1278_v21  ;;  %v1289_v32 = vmul.f32 0.044715, %v1279_v22  ;;  %v1293_v34 = vadd.f32 %v1283_v25, %v7736_v47  ;;  %v1294_v35 = vadd.f32 %v1284_v26, %v7738_v52 }
 0x168   : > { %v1295_v36 = vadd.f32 %v1285_v27, %v7740_v54  ;;  %v1296_v37 = vadd.f32 %v1286_v28, %v7742_v55  ;;  %v1297_v38 = vadd.f32 %v1287_v29, %v7744_v59  ;;  %v1302_v44 = vmul.f32 0.7978846, %v1292_v33 }
 0x169   : > { %v1298_v43 = vadd.f32 %v1288_v31, %v7746_v60  ;;  %v1299_v46 = vadd.f32 %v1289_v32, %v7748_v61  ;;  %v1303_v48 = vmul.f32 0.7978846, %v1293_v34  ;;  %v1304_v49 = vmul.f32 0.7978846, %v1294_v35  ;;  %v6986_v31 = vld [vmem:[%s7518_s21 + $0x28] sm:$0xff] }
 0x16a   : > { %v1305_v50 = vmul.f32 0.7978846, %v1295_v36  ;;  %v1290_v51 = vadd.f32 %v1280_v23, %v7730_v41  ;;  %v1306_v56 = vmul.f32 0.7978846, %v1296_v37  ;;  %7255 = vtanh.f32 %v1302_v44  ;;  %1527 = vmatpush.bf16.msrb.mxu2 %v6986_v31  ;;  %v6990_v31 = vld [vmem:[%s7523_s25 + $0x18] sm:$0xff] }
 0x16b   : > { %v1291_v57 = vadd.f32 %v1281_v30, %v7732_v42  ;;  %v1307_v58 = vmul.f32 0.7978846, %v1297_v38  ;;  %7257 = vtanh.f32 %v1303_v48  ;;  %v1308_v53 = vmul.f32 0.7978846, %v1298_v43  ;;  %v6985_v43 = vld [vmem:[%s7518_s21 + $0x20] sm:$0xff]  ;;  %1647 = vmatpush.bf16.msrb.mxu3 %v6990_v31 }
 0x16c   : > { %7259 = vtanh.f32 %v1304_v49  ;;  %v1309_v39 = vmul.f32 0.7978846, %v1299_v46  ;;  %v1300_v40 = vmul.f32 0.7978846, %v1290_v51 }
 0x16d   : > { %7261 = vtanh.f32 %v1305_v50  ;;  %v1301_v62 = vmul.f32 0.7978846, %v1291_v57 }
 0x16e   : > { %7263 = vtanh.f32 %v1306_v56  ;;  %1528 = vmatpush.bf16.msrb.mxu2 %v6985_v43 }
 0x16f   : > { %7265 = vtanh.f32 %v1307_v58 }
 0x170   : > { %v7256_v63 = vpop.eup %7255  ;;  %7267 = vtanh.f32 %v1308_v53 }
 0x171   : > { %v7258_v0 = vpop.eup %7257  ;;  %7269 = vtanh.f32 %v1309_v39  ;;  %v1322_v1 = vadd.f32 1.0, %v7256_v63 }
 0x172   : > { %v7260_v2 = vpop.eup %7259  ;;  %7271 = vtanh.f32 %v1300_v40  ;;  %v1323_v3 = vadd.f32 1.0, %v7258_v0 }
 0x173   : > { %v7262_v4 = vpop.eup %7261  ;;  %v1324_v5 = vadd.f32 1.0, %v7260_v2  ;;  %7273 = vtanh.f32 %v1301_v62  ;;  %v1332_v7 = vmul.f32 0.5, %v1322_v1 }
 0x174   : > { %v7264_v8 = vpop.eup %7263  ;;  %v1325_v9 = vadd.f32 1.0, %v7262_v4  ;;  %v1333_v10 = vmul.f32 0.5, %v1323_v3 }
 0x175   : > { %v7266_v11 = vpop.eup %7265  ;;  %v1326_v12 = vadd.f32 1.0, %v7264_v8  ;;  %v1334_v13 = vmul.f32 0.5, %v1324_v5  ;;  %v1342_v14 = vmul.f32 %v1332_v7, %v7734_v45 }
 0x176   : > { %v7268_v15 = vpop.eup %7267  ;;  %v1327_v16 = vadd.f32 1.0, %v7266_v11  ;;  %v1335_v17 = vmul.f32 0.5, %v1325_v9  ;;  %v1343_v18 = vmul.f32 %v1333_v10, %v7736_v47 }
 0x177   : > { %v7270_v19 = vpop.eup %7269  ;;  %v1328_v20 = vadd.f32 1.0, %v7268_v15  ;;  %v1336_v21 = vmul.f32 0.5, %v1326_v12  ;;  %v1344_v22 = vmul.f32 %v1334_v13, %v7738_v52  ;;  %1352 = vst.msk [vmem:[#allocation2 + $0x10] sm:$0xff] %vm1130_vm4, %v1342_v14  ;;  %v6988_v15 = vld [vmem:[%s7523_s25 + $0x8] sm:$0xff] }
 0x178   : > { %v7272_v23 = vpop.eup %7271  ;;  %v1329_v24 = vadd.f32 1.0, %v7270_v19  ;;  %v1337_v25 = vmul.f32 0.5, %v1327_v16  ;;  %v1345_v26 = vmul.f32 %v1335_v17, %v7740_v54  ;;  %1353 = vst.msk [vmem:[#allocation2 + $0x18] sm:$0xff] %vm1130_vm4, %v1343_v18  ;;  %1683 = vmatpush.bf16.msrb.mxu0 %v6988_v15 }
 0x179   : > { %v7274_v45 = vpop.eup %7273  ;;  %v1338_v27 = vmul.f32 0.5, %v1328_v20  ;;  %v1346_v28 = vmul.f32 %v1336_v21, %v7742_v55  ;;  %1354 = vst.msk [vmem:[#allocation2 + $0x20] sm:$0xff] %vm1130_vm4, %v1344_v22  ;;  %v1320_v47 = vadd.f32 1.0, %v7272_v23 }
 0x17a   : > { %v1339_v29 = vmul.f32 0.5, %v1329_v24  ;;  %v1347_v52 = vmul.f32 %v1337_v25, %v7744_v59  ;;  %1355 = vst.msk [vmem:[#allocation2 + $0x28] sm:$0xff] %vm1130_vm4, %v1345_v26  ;;  %v1321_v30 = vadd.f32 1.0, %v7274_v45 }
 0x17b   : > { %v1348_v32 = vmul.f32 %v1338_v27, %v7746_v60  ;;  %1356 = vst.msk [vmem:[#allocation2 + $0x30] sm:$0xff] %vm1130_vm4, %v1346_v28  ;;  %v1330_v54 = vmul.f32 0.5, %v1320_v47 }
 0x17c   : > { %v1349_v33 = vmul.f32 %v1339_v29, %v7748_v61  ;;  %1357 = vst.msk [vmem:[#allocation2 + $0x38] sm:$0xff] %vm1130_vm4, %v1347_v52  ;;  %v1331_v55 = vmul.f32 0.5, %v1321_v30 }
 0x17d   : > { %1358 = vst.msk [vmem:[#allocation2 + $0x40] sm:$0xff] %vm1130_vm4, %v1348_v32  ;;  %v1340_v59 = vmul.f32 %v1330_v54, %v7730_v41 }
 0x17e   : > { %1359 = vst.msk [vmem:[#allocation2 + $0x48] sm:$0x7f] %vm1148_vm5, %v1349_v33  ;;  %v1341_v34 = vmul.f32 %v1331_v55, %v7732_v42 }
 0x17f   : > { %1350 = vst.msk [vmem:[#allocation2] sm:$0xff] %vm1130_vm4, %v1340_v59  ;;  %v1379_v60 = vld [vmem:[#allocation2 + $0x11] ss:$2 sm:$0xff]  ;;  %v1362_v35 = vld [vmem:[#allocation2 + $0x10] ss:$2 sm:$0xff] }
 0x180   : > { %1351 = vst.msk [vmem:[#allocation2 + $0x8] sm:$0xff] %vm1130_vm4, %v1341_v34  ;;  %v1485_v53 = vld [vmem:[#allocation2 + $0x12] ss:$2 sm:$0xff] }
 0x181   : > { %v1381_v41 = vld [vmem:[#allocation2 + $0x21] ss:$2 sm:$0xff]  ;;  %v1364_v46 = vld [vmem:[#allocation2 + $0x20] ss:$2 sm:$0xff] }
 0x182   : > { %v1487_v40 = vld [vmem:[#allocation2 + $0x22] ss:$2 sm:$0xff] }
 0x183   : > { %v1383_v44 = vld [vmem:[#allocation2 + $0x31] ss:$2 sm:$0xff]  ;;  %v1366_v42 = vld [vmem:[#allocation2 + $0x30] ss:$2 sm:$0xff] }
 0x184   : > { %v1387_v48 = vpack.c.bf16 %v1383_v44, %v1381_v41  ;;  %v1370_v49 = vpack.c.bf16 %v1366_v42, %v1364_v46  ;;  %v1489_v62 = vld [vmem:[#allocation2 + $0x32] ss:$2 sm:$0xff] }
 0x185   : > { %v1385_v50 = vld [vmem:[#allocation2 + $0x41] ss:$2 sm:$0x7f]  ;;  %v1368_v51 = vld [vmem:[#allocation2 + $0x40] ss:$2 sm:$0x7f]  ;;  %v1493_v63 = vpack.c.bf16 %v1489_v62, %v1487_v40 }
 0x186   : > { %v1388_v56 = vpack.c.bf16 %v1385_v50, %v1385_v50  ;;  %v1371_v57 = vpack.c.bf16 %v1368_v51, %v1368_v51  ;;  %v1491_v0 = vld [vmem:[#allocation2 + $0x42] ss:$2 sm:$0x7f] }
 0x187   : > { %v1377_v61 = vld [vmem:[#allocation2 + $0x1] ss:$2 sm:$0xff]  ;;  %v1360_v36 = vld [vmem:[#allocation2] ss:$2 sm:$0xff]  ;;  %v1494_v1 = vpack.c.bf16 %v1491_v0, %v1491_v0 }
 0x188   : > { %v1386_v37 = vpack.c.bf16 %v1379_v60, %v1377_v61  ;;  %v1369_v38 = vpack.c.bf16 %v1362_v35, %v1360_v36  ;;  %v1483_v58 = vld [vmem:[#allocation2 + $0x2] ss:$2 sm:$0xff] }
 0x189   : > { %v1492_v39 = vpack.c.bf16 %v1485_v53, %v1483_v58  ;;  %v6987_v61 = vld [vmem:[%s7523_s25] sm:$0xff]  ;;  %v6989_v36 = vld [vmem:[%s7523_s25 + $0x10] sm:$0xff] }
 0x18a   : > { %5852 = vmatmul.msk.bf16.vlgmr.msra.gmra.mxu2 %vm1130_vm4, %v1386_v37  ;;  %5863 = vmatmul.msk.bf16.vlgmr.msra.gmra.mxu3 %vm1130_vm4, %v1369_v38 }
 0x18b   : > { %1684 = vmatpush.bf16.msrb.mxu0 %v6987_v61  ;;  %1648 = vmatpush.bf16.msrb.mxu3 %v6989_v36 }
 0x19a   : > { %5853 = vmatmul.msk.bf16.gmra.mxu2 %vm1130_vm4, %v1387_v48  ;;  %5864 = vmatmul.msk.bf16.gmra.mxu3 %vm1130_vm4, %v1370_v49 }
 0x1aa   : > { %5854 = vmatmul.msk.bf16.gmra.mxu2 %vm1130_vm4, %v1388_v56  ;;  %5865 = vmatmul.msk.bf16.gmra.mxu3 %vm1130_vm4, %v1371_v57 }
 0x1ba   : > { %5878 = vmatmul.msk.bf16.vlgmr.msrb.gmra.mxu2 %vm1130_vm4, %v1492_v39 }
 0x1ca   : > { %5879 = vmatmul.msk.bf16.gmra.mxu2 %vm1130_vm4, %v1493_v63 }
 0x1da   : > { %5880 = vmatmul.msk.bf16.gmra.mxu2 %vm1130_vm4, %v1494_v1 }
 0x20d   : > { %v1424_v2 = vpop.f32.mrf.mxu2  ;;  %v1468_v3 = vpop.f32.mrf.mxu3 }
 0x20e   : > { %v1469_v16 = vadd.f32 %v1468_v3, %v1424_v2 }
 0x215   : > { %v1426_v4 = vpop.f32.mrf.mxu2  ;;  %v1470_v5 = vpop.f32.mrf.mxu3 }
 0x216   : > { %v1471_v21 = vadd.f32 %v1470_v5, %v1426_v4 }
 0x21d   : > { %v1429_v7 = vpop.f32.mrf.mxu2  ;;  %v1473_v8 = vpop.f32.mrf.mxu3 }
 0x21e   : > { %v1474_v28 = vadd.f32 %v1473_v8, %v1429_v7 }
 0x225   : > { %v1431_v9 = vpop.f32.mrf.mxu2  ;;  %v1475_v10 = vpop.f32.mrf.mxu3 }
 0x226   : > { %v1476_v60 = vadd.f32 %v1475_v10, %v1431_v9 }
 0x22d   : > { %v1434_v11 = vpop.f32.mrf.mxu2  ;;  %v1478_v12 = vpop.f32.mrf.mxu3 }
 0x22e   : > { %v1479_v51 = vadd.f32 %v1478_v12, %v1434_v11 }
 0x235   : > { %v1436_v13 = vpop.f32.mrf.mxu2  ;;  %v1480_v14 = vpop.f32.mrf.mxu3 }
 0x23d   : > { %v1530_v17 = vpop.f32.mrf.mxu2 }
 0x23e   : > { %v1544_v18 = vadd.f32 %v1530_v17, %v1469_v16 }
 0x240   : > { %v1549_v19 = vmul.f32 %v1544_v18, %v1544_v18 }
 0x242   : > { %v1554_v20 = vmul.f32 %v1549_v19, %v1544_v18 }
 0x244   : > { %v1559_v22 = vmul.f32 0.044715, %v1554_v20 }
 0x245   : > { %v1532_v23 = vpop.f32.mrf.mxu2 }
 0x246   : > { %v1564_v24 = vadd.f32 %v1559_v22, %v1544_v18  ;;  %v1545_v25 = vadd.f32 %v1532_v23, %v1471_v21 }
 0x248   : > { %v1569_v26 = vmul.f32 0.7978846, %v1564_v24  ;;  %v1550_v45 = vmul.f32 %v1545_v25, %v1545_v25 }
 0x24a   : > { %7275 = vtanh.f32 %v1569_v26  ;;  %v1555_v27 = vmul.f32 %v1550_v45, %v1545_v25 }
 0x24c   : > { %v1560_v47 = vmul.f32 0.044715, %v1555_v27 }
 0x24d   : > { %v1535_v29 = vpop.f32.mrf.mxu2 }
 0x24e   : > { %v1565_v52 = vadd.f32 %v1560_v47, %v1545_v25  ;;  %v1546_v30 = vadd.f32 %v1535_v29, %v1474_v28 }
 0x250   : > { %v7276_v32 = vpop.eup %7275  ;;  %v1570_v54 = vmul.f32 0.7978846, %v1565_v52  ;;  %v1551_v33 = vmul.f32 %v1546_v30, %v1546_v30 }
 0x251   : > { %v1579_v55 = vadd.f32 1.0, %v7276_v32 }
 0x252   : > { %7277 = vtanh.f32 %v1570_v54  ;;  %v1556_v59 = vmul.f32 %v1551_v33, %v1546_v30 }
 0x253   : > { %v1584_v34 = vmul.f32 0.5, %v1579_v55 }
 0x254   : > { %v1561_v35 = vmul.f32 0.044715, %v1556_v59 }
 0x255   : > { %v1589_v37 = vmul.f32 %v1584_v34, %v1544_v18  ;;  %v1537_v38 = vpop.f32.mrf.mxu2 }
 0x256   : > { %v1566_v43 = vadd.f32 %v1561_v35, %v1546_v30  ;;  %v1547_v41 = vadd.f32 %v1537_v38, %v1476_v60 }
 0x257   : > { %1594 = vst.msk [vmem:[#allocation3] sm:$0xff] %vm1130_vm4, %v1589_v37 }
 0x258   : > { %v7278_v44 = vpop.eup %7277  ;;  %v1571_v46 = vmul.f32 0.7978846, %v1566_v43  ;;  %v1552_v42 = vmul.f32 %v1547_v41, %v1547_v41 }
 0x259   : > { %v1580_v48 = vadd.f32 1.0, %v7278_v44 }
 0x25a   : > { %7279 = vtanh.f32 %v1571_v46  ;;  %v1557_v49 = vmul.f32 %v1552_v42, %v1547_v41 }
 0x25b   : > { %v1585_v50 = vmul.f32 0.5, %v1580_v48 }
 0x25c   : > { %v1562_v56 = vmul.f32 0.044715, %v1557_v49 }
 0x25d   : > { %v1590_v57 = vmul.f32 %v1585_v50, %v1545_v25  ;;  %v1540_v58 = vpop.f32.mrf.mxu2 }
 0x25e   : > { %v1567_v53 = vadd.f32 %v1562_v56, %v1547_v41  ;;  %v1548_v39 = vadd.f32 %v1540_v58, %v1479_v51 }
 0x25f   : > { %1595 = vst.msk [vmem:[#allocation3 + $0x8] sm:$0xff] %vm1130_vm4, %v1590_v57 }
 0x260   : > { %v7280_v40 = vpop.eup %7279  ;;  %v1572_v62 = vmul.f32 0.7978846, %v1567_v53  ;;  %v1553_v63 = vmul.f32 %v1548_v39, %v1548_v39 }
 0x261   : > { %v1581_v0 = vadd.f32 1.0, %v7280_v40 }
 0x262   : > { %7281 = vtanh.f32 %v1572_v62  ;;  %v1558_v1 = vmul.f32 %v1553_v63, %v1548_v39 }
 0x263   : > { %v1586_v2 = vmul.f32 0.5, %v1581_v0 }
 0x264   : > { %v1563_v3 = vmul.f32 0.044715, %v1558_v1 }
 0x265   : > { %v1591_v4 = vmul.f32 %v1586_v2, %v1546_v30  ;;  %v1542_v5 = vpop.f32.mrf.mxu2 }
 0x266   : > { %v1568_v7 = vadd.f32 %v1563_v3, %v1548_v39  ;;  %v1611_v17 = vld [vmem:[#allocation3 + $0x1] ss:$2 sm:$0xff]  ;;  %v1599_v19 = vld [vmem:[#allocation3] ss:$2 sm:$0xff] }
 0x267   : > { %1596 = vst.msk [vmem:[#allocation3 + $0x10] sm:$0xff] %vm1130_vm4, %v1591_v4  ;;  %v7487_v4 = vmov 32.0  }
 0x268   : > { %v7282_v8 = vpop.eup %7281  ;;  %v1573_v9 = vmul.f32 0.7978846, %v1568_v7 }
 0x269   : > { %v1582_v10 = vadd.f32 1.0, %v7282_v8 }
 0x26a   : > { %7283 = vtanh.f32 %v1573_v9 }
 0x26b   : > { %v1587_v11 = vmul.f32 0.5, %v1582_v10  ;;  %v6992_v10 = vld [vmem:[%s7538_s8 + $0x8] sm:$0xff] }
 0x26c   : > { %1844 = vmatpush.bf16.msrb.mxu1 %v6992_v10  ;;  %v7488_v10 = vmov 0.0  }
 0x26d   : > { %v1592_v12 = vmul.f32 %v1587_v11, %v1547_v41  ;;  %1857 = vst.msk [vmem:[#allocation4] sm:$0xff] %vm1856_vm6, %v7488_v10 }
 0x26e   : > { %1858 = vst.msk [vmem:[#allocation4 + $0x8] sm:$0xff] %vm1856_vm6, %v7488_v10 }
 0x26f   : > { %1597 = vst.msk [vmem:[#allocation3 + $0x18] sm:$0xff] %vm1130_vm4, %v1592_v12 }
 0x270   : > { %v7284_v13 = vpop.eup %7283  ;;  %1859 = vst.msk [vmem:[#allocation4 + $0x10] sm:$0xff] %vm1856_vm6, %v7488_v10 }
 0x271   : > { %v1583_v14 = vadd.f32 1.0, %v7284_v13  ;;  %1860 = vst.msk [vmem:[#allocation4 + $0x18] sm:$0xff] %vm1856_vm6, %v7488_v10 }
 0x273   : > { %v1588_v15 = vmul.f32 0.5, %v1583_v14 }
 0x275   : > { %v1593_v16 = vmul.f32 %v1588_v15, %v1548_v39 }
 0x276   : > { %v1613_v18 = vld [vmem:[#allocation3 + $0x11] ss:$2 sm:$0xff]  ;;  %v1601_v20 = vld [vmem:[#allocation3 + $0x10] ss:$2 sm:$0xff] }
 0x277   : > { %1598 = vst.msk [vmem:[#allocation3 + $0x20] sm:$0x7f] %vm1148_vm5, %v1593_v16  ;;  %v1616_v21 = vpack.c.bf16 %v1613_v18, %v1611_v17  ;;  %v1604_v22 = vpack.c.bf16 %v1601_v20, %v1599_v19 }
 0x279   : > { %5893 = vmatmul.msk.bf16.vlgmr.msrb.gmra.mxu3 %vm1130_vm4, %v1616_v21  ;;  %5903 = vmatmul.msk.bf16.vlgmr.msrb.gmra.mxu0 %vm1130_vm4, %v1604_v22 }
 0x27e   : > { %v1615_v23 = vld [vmem:[#allocation3 + $0x21] ss:$2 sm:$0x7]  ;;  %v1603_v24 = vld [vmem:[#allocation3 + $0x20] ss:$2 sm:$0x7] }
 0x27f   : > { %v1617_v25 = vpack.c.bf16 %v1615_v23, %v1615_v23  ;;  %v1605_v26 = vpack.c.bf16 %v1603_v24, %v1603_v24 }
 0x289   : > { %5894 = vmatmul.msk.bf16.gmra.mxu3 %vm1130_vm4, %v1617_v25  ;;  %5904 = vmatmul.msk.bf16.gmra.mxu0 %vm1130_vm4, %v1605_v26 }
 0x2f6   : > { %v1686_v45 = vpop.f32.mrf.mxu0 }
 0x2fc   : > { %v1650_v27 = vpop.f32.mrf.mxu3 }
 0x2fd   : > { %v1687_v28 = vadd.f32 %v1686_v45, %v1650_v27  ;;  %v6991_v27 = vld [vmem:[%s7538_s8] sm:$0xff] }
 0x2fe   : > { %v1688_v47 = vpop.f32.mrf.mxu0  ;;  %1845 = vmatpush.bf16.msrb.mxu1 %v6991_v27 }
 0x2ff   : > { %v1695_v29 = vmul.f32 %v1687_v28, %v1687_v28 }
 0x301   : > { %v1698_v52 = vmul.f32 %v1695_v29, %v1687_v28 }
 0x303   : > { %v1701_v30 = vmul.f32 0.044715, %v1698_v52 }
 0x304   : > { %v1652_v31 = vpop.f32.mrf.mxu3 }
 0x305   : > { %v1689_v32 = vadd.f32 %v1688_v47, %v1652_v31  ;;  %v1704_v54 = vadd.f32 %v1701_v30, %v1687_v28 }
 0x306   : > { %v1691_v33 = vpop.f32.mrf.mxu0 }
 0x307   : > { %v1696_v55 = vmul.f32 %v1689_v32, %v1689_v32  ;;  %v1707_v59 = vmul.f32 0.7978846, %v1704_v54 }
 0x309   : > { %v1699_v34 = vmul.f32 %v1696_v55, %v1689_v32  ;;  %7285 = vtanh.f32 %v1707_v59 }
 0x30b   : > { %v1702_v60 = vmul.f32 0.044715, %v1699_v34 }
 0x30c   : > { %v1655_v35 = vpop.f32.mrf.mxu3 }
 0x30d   : > { %v1692_v61 = vadd.f32 %v1691_v33, %v1655_v35  ;;  %v1705_v36 = vadd.f32 %v1702_v60, %v1689_v32 }
 0x30e   : > { %v1693_v37 = vpop.f32.mrf.mxu0 }
 0x30f   : > { %v7286_v38 = vpop.eup %7285  ;;  %v1697_v43 = vmul.f32 %v1692_v61, %v1692_v61  ;;  %v1708_v41 = vmul.f32 0.7978846, %v1705_v36 }
 0x310   : > { %v1713_v44 = vadd.f32 1.0, %v7286_v38 }
 0x311   : > { %v1700_v46 = vmul.f32 %v1697_v43, %v1692_v61  ;;  %7287 = vtanh.f32 %v1708_v41  ;;  %v6996_v43 = vld [vmem:[%s7548_s19 + $0x18] sm:$0xff] }
 0x312   : > { %v1716_v42 = vmul.f32 0.5, %v1713_v44  ;;  %1974 = vmatpush.bf16.msra.mxu2 %v6996_v43 }
 0x313   : > { %v1703_v48 = vmul.f32 0.044715, %v1700_v46 }
 0x314   : > { %v1657_v49 = vpop.f32.mrf.mxu3  ;;  %v1719_v50 = vmul.f32 %v1716_v42, %v1687_v28 }
 0x315   : > { %v1706_v51 = vadd.f32 %v1703_v48, %v1692_v61  ;;  %v7206_v49 = vld [vmem:[%s7528_s29] ss:$0 sm:$0xff] }
 0x316   : > { %v1724_v56 = vsel %vm1130_vm4, %v1719_v50, 0.0 }
 0x317   : > { %v7288_v57 = vpop.eup %7287  ;;  %1725 = vadd.xlane.f32.xlu0 %v1724_v56  ;;  %v1709_v58 = vmul.f32 0.7978846, %v1706_v51 }
 0x318   : > { %v1714_v53 = vadd.f32 1.0, %v7288_v57 }
 0x319   : > { %7289 = vtanh.f32 %v1709_v58 }
 0x31a   : > { %v1717_v39 = vmul.f32 0.5, %v1714_v53  ;;  %7291 = vrcp.f32 %v7487_v4 }
 0x31c   : > { %v1720_v40 = vmul.f32 %v1717_v39, %v1689_v32  ;;  %v7207_v39 = vld [vmem:[%s8652_s3] ss:$0 sm:$0xff]  ;;  %s8666_s3 = sld [smem:[#allocation20_spill]] }
 0x31e   : > { %v1727_v62 = vsel %vm1130_vm4, %v1720_v40, 0.0 }
 0x31f   : > { %v7290_v63 = vpop.eup %7289  ;;  %1728 = vadd.xlane.f32.xlu0 %v1727_v62 }
 0x320   : > { %v1715_v0 = vadd.f32 1.0, %v7290_v63  ;;  %v7292_v5 = vpop.eup %7291 }
 0x321   : > { %v1735_v7 = vmul.f32 32.0, %v7292_v5  ;;  %vm1739_vm11 = vweird.f32 %v7292_v5 }
 0x322   : > { %v1718_v1 = vmul.f32 0.5, %v1715_v0 }
 0x323   : > { %v1736_v8 = vsub.f32 1.0, %v1735_v7 }
 0x324   : > { %v1721_v2 = vmul.f32 %v1718_v1, %v1692_v61 }
 0x325   : > { %v1737_v9 = vmul.f32 %v7292_v5, %v1736_v8 }
 0x326   : > { %v1731_v3 = vsel %vm1730_vm10, %v1721_v2, 0.0 }
 0x327   : > { %1732 = vadd.xlane.f32.xlu1 %v1731_v3  ;;  %v1738_v11 = vadd.f32 %v7292_v5, %v1737_v9 }
 0x329   : > { %v1740_v12 = vsel %vm1739_vm11, %v7292_v5, %v1738_v11  ;;  %v6995_v11 = vld [vmem:[%s7548_s19 + $0x10] sm:$0xff] }
 0x32a   : > { %1975 = vmatpush.bf16.msra.mxu2 %v6995_v11 }
 0x38a   : > { %v1726_v13 = vpop.xlane.xlu0 %1725 }
 0x38b   : > { %v1741_v14 = vmul.f32 %v1740_v12, %v1726_v13  ;;  %v7004_v13 = vld [vmem:[%s7548_s19 + $0x58] sm:$0xff] }
 0x38c   : > { %2036 = vmatpush.bf16.msra.mxu0 %v7004_v13 }
 0x38d   : > { %v1744_v15 = vsub.f32 %v1719_v50, %v1741_v14  ;;  %v7008_v14 = vld [vmem:[%s7548_s19 + $0x78] sm:$0xff] }
 0x38e   : > { %2101 = vmatpush.bf16.msra.mxu1 %v7008_v14 }
 0x38f   : > { %v1747_v16 = vmul.f32 %v1744_v15, %v1744_v15 }
 0x391   : > { %v1750_v17 = vsel %vm1130_vm4, %v1747_v16, 0.0  ;;  %v7003_v16 = vld [vmem:[%s7548_s19 + $0x50] sm:$0xff] }
 0x392   : > { %1751 = vadd.xlane.f32.xlu1 %v1750_v17  ;;  %v1729_v18 = vpop.xlane.xlu0 %1728  ;;  %v7007_v17 = vld [vmem:[%s7548_s19 + $0x70] sm:$0xff]  ;;  %2037 = vmatpush.bf16.msra.mxu0 %v7003_v16 }
 0x393   : > { %v1742_v19 = vmul.f32 %v1740_v12, %v1729_v18  ;;  %2102 = vmatpush.bf16.msra.mxu1 %v7007_v17  ;;  %v6998_v18 = vld [vmem:[%s7548_s19 + $0x28] sm:$0xff] }
 0x395   : > { %v1745_v20 = vsub.f32 %v1720_v40, %v1742_v19  ;;  %v6994_v19 = vld [vmem:[%s7548_s19 + $0x8] sm:$0xff] }
 0x396   : > { %1976 = vmatpush.bf16.msra.mxu2 %v6994_v19  ;;  %v2315_v19 = vld [vmem:[#allocation4 + $0x1b] sm:$0x7] }
 0x397   : > { %v1748_v21 = vmul.f32 %v1745_v20, %v1745_v20 }
 0x399   : > { %v1753_v22 = vsel %vm1130_vm4, %v1748_v21, 0.0  ;;  %v7006_v21 = vld [vmem:[%s7548_s19 + $0x68] sm:$0xff] }
 0x39a   : > { %v1733_v23 = vpop.xlane.xlu1 %1732  ;;  %1754 = vadd.xlane.f32.xlu2 %v1753_v22  ;;  %2103 = vmatpush.bf16.msra.mxu1 %v7006_v21  ;;  %v6997_v22 = vld [vmem:[%s7548_s19 + $0x20] sm:$0xff] }
 0x39b   : > { %v1743_v24 = vmul.f32 %v1740_v12, %v1733_v23  ;;  %v6993_v23 = vld [vmem:[%s7548_s19] sm:$0xff] }
 0x39c   : > { %1977 = vmatpush.bf16.msra.mxu2 %v6993_v23  ;;  %v2317_v23 = vpack.c.bf16 %v2315_v19, %v2315_v19 }
 0x39d   : > { %v1746_v25 = vsub.f32 %v1721_v2, %v1743_v24  ;;  %v7001_v24 = vld [vmem:[%s7548_s19 + $0x40] sm:$0xff] }
 0x39f   : > { %v1749_v26 = vmul.f32 %v1746_v25, %v1746_v25 }
 0x3a1   : > { %v1756_v45 = vsel %vm1730_vm10, %v1749_v26, 0.0  ;;  %v7208_v26 = vld [vmem:[%s7543_s14] ss:$0 sm:$0xff] }
 0x3a2   : > { %1757 = vadd.xlane.f32.xlu2 %v1756_v45 }
 0x405   : > { %v1752_v28 = vpop.xlane.xlu1 %1751 }
 0x406   : > { %v1759_v47 = vmul.f32 %v1752_v28, %v1740_v12  ;;  %v7012_v28 = vld [vmem:[%s7548_s19 + $0x98] sm:$0xff] }
 0x408   : > { %v1762_v29 = vadd.f32 1e-05, %v1759_v47  ;;  %v7016_v47 = vld [vmem:[%s7548_s19 + $0xb8] sm:$0xff] }
 0x409   : > { %2231 = vmatpush.bf16.msrb.mxu2 %v7016_v47 }
 0x40a   : > { %7293 = vrsqrt.f32 %v1762_v29  ;;  %vm1771_vm13 = vweird.f32 %v1762_v29 }
 0x40d   : > { %v1755_v52 = vpop.xlane.xlu2 %1754 }
 0x40e   : > { %v1760_v30 = vmul.f32 %v1755_v52, %v1740_v12  ;;  %v7024_v52 = vld [vmem:[%s7548_s19 + $0xf8] sm:$0xff] }
 0x410   : > { %v7294_v31 = vpop.eup %7293  ;;  %v1763_v32 = vadd.f32 1e-05, %v1760_v30 }
 0x411   : > { %v1766_v54 = vmul.f32 %v7294_v31, %v1762_v29  ;;  %vm1772_vm12 = vweird.f32 %v7294_v31  ;;  %v7020_v29 = vld [vmem:[%s7548_s19 + $0xd8] sm:$0xff] }
 0x412   : > { %7295 = vrsqrt.f32 %v1763_v32  ;;  %vm1773_vm14 = vmor %vm1771_vm13, %vm1772_vm12  ;;  %vm1781_vm0 = vweird.f32 %v1763_v32 }
 0x413   : > { %v1767_v33 = vmul.f32 %v7294_v31, %v1766_v54 }
 0x415   : > { %v1768_v55 = vmul.f32 0.5, %v1767_v33  ;;  %v1758_v59 = vpop.xlane.xlu2 %1757  ;;  %v7019_v33 = vld [vmem:[%s7548_s19 + $0xd0] sm:$0xff] }
 0x416   : > { %v1761_v34 = vmul.f32 %v1758_v59, %v1740_v12  ;;  %v7000_v12 = vld [vmem:[%s7548_s19 + $0x38] sm:$0xff]  ;;  %v7010_v59 = vld [vmem:[%s7548_s19 + $0x88] sm:$0xff] }
 0x417   : > { %v1769_v60 = vsub.f32 1.5, %v1768_v55  ;;  %1926 = vmatpush.bf16.msra.mxu3 %v7000_v12  ;;  %v7023_v55 = vld [vmem:[%s7548_s19 + $0xf0] sm:$0xff] }
 0x418   : > { %v7296_v35 = vpop.eup %7295  ;;  %v1764_v61 = vadd.f32 1e-05, %v1761_v34  ;;  %v7014_v34 = vld [vmem:[%s7548_s19 + $0xa8] sm:$0xff] }
 0x419   : > { %v1770_v36 = vmul.f32 %v7294_v31, %v1769_v60  ;;  %v1776_v37 = vmul.f32 %v7296_v35, %v1763_v32  ;;  %vm1782_vm15 = vweird.f32 %v7296_v35  ;;  %v7015_v32 = vld [vmem:[%s7548_s19 + $0xb0] sm:$0xff]  ;;  %v7018_v60 = vld [vmem:[%s7548_s19 + $0xc8] sm:$0xff] }
 0x41a   : > { %7297 = vrsqrt.f32 %v1764_v61  ;;  %vm1783_vm1 = vmor %vm1781_vm0, %vm1782_vm15  ;;  %vm1791_vm3 = vweird.f32 %v1764_v61  ;;  %2232 = vmatpush.bf16.msrb.mxu2 %v7015_v32 }
 0x41b   : > { %v1777_v38 = vmul.f32 %v7296_v35, %v1776_v37  ;;  %v1774_v41 = vsel %vm1773_vm14, %v7294_v31, %v1770_v36  ;;  %v7011_v31 = vld [vmem:[%s7548_s19 + $0x90] sm:$0xff]  ;;  %v7009_v37 = vld [vmem:[%s7548_s19 + $0x80] sm:$0xff] }
 0x41c   : > { %v1795_v48 = vmul.f32 %v1774_v41, %v1744_v15  ;;  %v6999_v15 = vld [vmem:[%s7548_s19 + $0x30] sm:$0xff] }
 0x41d   : > { %v1778_v44 = vmul.f32 0.5, %v1777_v38  ;;  %1927 = vmatpush.bf16.msra.mxu3 %v6999_v15  ;;  %v7013_v38 = vld [vmem:[%s7548_s19 + $0xa0] sm:$0xff] }
 0x41e   : > { %v1801_v53 = vmul.f32 %v7206_v49, %v1795_v48  ;;  %2233 = vmatpush.bf16.msrb.mxu2 %v7014_v34 }
 0x41f   : > { %v1779_v46 = vsub.f32 1.5, %v1778_v44 }
 0x420   : > { %v7298_v42 = vpop.eup %7297  ;;  %v1807_v0 = vadd.f32 %v7207_v39, %v1801_v53  ;;  %v7021_v53 = vld [vmem:[%s7548_s19 + $0xe0] sm:$0xff] }
 0x421   : > { %v1780_v50 = vmul.f32 %v7296_v35, %v1779_v46  ;;  %v1786_v51 = vmul.f32 %v7298_v42, %v1764_v61  ;;  %vm1792_vm2 = vweird.f32 %v7298_v42  ;;  %1928 = vmatpush.bf16.msra.mxu3 %v6998_v18 }
 0x422   : > { %vm1793_vm5 = vmor %vm1791_vm3, %vm1792_vm2  ;;  %2234 = vmatpush.bf16.msrb.mxu2 %v7013_v38  ;;  %vm2710_vm2 = vcmask 154624   ;;  %vm2717_vm3 = vcmask 149504  }
 0x423   : > { %v1784_v56 = vsel %vm1783_vm1, %v7296_v35, %v1780_v50  ;;  %v1787_v57 = vmul.f32 %v7298_v42, %v1786_v51  ;;  %v7022_v35 = vld [vmem:[%s7548_s19 + $0xe8] sm:$0xff]  ;;  %vm2676_vm1 = vcmask 130048  }
 0x424   : > { %v1796_v58 = vmul.f32 %v1784_v56, %v1745_v20  ;;  %v7002_v20 = vld [vmem:[%s7548_s19 + $0x48] sm:$0xff] }
 0x425   : > { %v1788_v40 = vmul.f32 0.5, %v1787_v57  ;;  %2038 = vmatpush.bf16.msra.mxu0 %v7002_v20  ;;  %1929 = vmatpush.bf16.msra.mxu3 %v6997_v22 }
 0x426   : > { %v1802_v62 = vmul.f32 %v7206_v49, %v1796_v58  ;;  %v7017_v58 = vld [vmem:[%s7548_s19 + $0xc0] sm:$0xff] }
 0x427   : > { %v1789_v63 = vsub.f32 1.5, %v1788_v40 }
 0x428   : > { %v1808_v1 = vadd.f32 %v7207_v39, %v1802_v62 }
 0x429   : > { %v1790_v2 = vmul.f32 %v7298_v42, %v1789_v63  ;;  %2039 = vmatpush.bf16.msra.mxu0 %v7001_v24  ;;  %2166 = vmatpush.bf16.msrb.mxu3 %v7012_v28 }
 0x42a   : > { %v1810_v3 = vpack.c.bf16 %v1808_v1, %v1807_v0 }
 0x42b   : > { %v1794_v4 = vsel %vm1793_vm5, %v7298_v42, %v1790_v2 }
 0x42c   : > { %5913 = vmatmul.msk.bf16.vlgmr.msrb.gmra.mxu1 %vm1130_vm4, %v1810_v3  ;;  %v1797_v5 = vmul.f32 %v1794_v4, %v1746_v25  ;;  %v7005_v25 = vld [vmem:[%s7548_s19 + $0x60] sm:$0xff] }
 0x42d   : > { %2104 = vmatpush.bf16.msra.mxu1 %v7005_v25  ;;  %2296 = vmatpush.bf16.msrb.mxu0 %v7020_v29 }
 0x42e   : > { %v1803_v7 = vmul.f32 %v7206_v49, %v1797_v5  ;;  %2167 = vmatpush.bf16.msrb.mxu3 %v7011_v31 }
 0x430   : > { %v1809_v8 = vadd.f32 %v7207_v39, %v1803_v7 }
 0x431   : > { %2361 = vmatpush.bf16.msrb.mxu1 %v7024_v52  ;;  %2297 = vmatpush.bf16.msrb.mxu0 %v7019_v33 }
 0x432   : > { %v1811_v9 = vpack.c.bf16 %v1809_v8, %v1809_v8  ;;  %2168 = vmatpush.bf16.msrb.mxu3 %v7010_v59 }
 0x435   : > { %2362 = vmatpush.bf16.msrb.mxu1 %v7023_v55  ;;  %2298 = vmatpush.bf16.msrb.mxu0 %v7018_v60 }
 0x436   : > { %2169 = vmatpush.bf16.msrb.mxu3 %v7009_v37 }
 0x439   : > { %2363 = vmatpush.bf16.msrb.mxu1 %v7022_v35  ;;  %2299 = vmatpush.bf16.msrb.mxu0 %v7017_v58 }
 0x43c   : > { %5914 = vmatmul.msk.bf16.gmra.mxu1 %vm1130_vm4, %v1811_v9  ;;  %vm1863_vm4 = vcmask 518144  }
 0x43d   : > { %2364 = vmatpush.bf16.msrb.mxu1 %v7021_v53 }
 0x4a9   : > { %v1847_v45 = vpop.f32.mrf.mxu1 }
 0x4aa   : > { %v7871_v27 = vadd.f32 %v7208_v26, %v1847_v45 }
 0x4ac   : > { %1861 = vst.msk [vmem:[#allocation4 + $0x8] sm:$0xff] %vm1856_vm6, %v7871_v27 }
 0x4b1   : > { %v1849_v30 = vpop.f32.mrf.mxu1 }
 0x4b2   : > { %v7881_v54 = vadd.f32 %v7208_v26, %v1849_v30 }
 0x4b3   : > { %v1878_v36 = vld [vmem:[#allocation4 + $0x5] sm:$0xff] }
 0x4b4   : > { %1862 = vst.msk [vmem:[#allocation4 + $0x10] sm:$0xff] %vm1856_vm6, %v7881_v54  ;;  %v1865_v41 = vld [vmem:[#allocation4 + $0x4] sm:$0xff] }
 0x4b5   : > { %v1988_v44 = vld [vmem:[#allocation4 + $0x6] sm:$0xff] }
 0x4b6   : > { %v2053_v46 = vld [vmem:[#allocation4 + $0x7] sm:$0xff] }
 0x4b7   : > { %v2118_v11 = vld [vmem:[#allocation4 + $0x8] sm:$0xff] }
 0x4b9   : > { %v1852_v61 = vpop.f32.mrf.mxu1 }
 0x4ba   : > { %v7893_v43 = vadd.f32 %v7208_v26, %v1852_v61 }
 0x4bb   : > { %v1879_v42 = vld [vmem:[#allocation4 + $0xd] sm:$0xff]  ;;  %v1880_v62 = vld [vmem:[#allocation4 + $0x15] sm:$0x7] }
 0x4bc   : > { %v1866_v48 = vld [vmem:[#allocation4 + $0xc] sm:$0xff]  ;;  %1864 = vst.msk [vmem:[#allocation4 + $0x18] sm:$0x7] %vm1863_vm4, %v7893_v43  ;;  %v1881_v50 = vpack.c.bf16 %v1879_v42, %v1878_v36  ;;  %v1867_v63 = vld [vmem:[#allocation4 + $0x14] sm:$0x7]  ;;  %v1882_v2 = vpack.c.bf16 %v1880_v62, %v1880_v62 }
 0x4bd   : > { %v1989_v49 = vld [vmem:[#allocation4 + $0xe] sm:$0xff]  ;;  %v1868_v51 = vpack.c.bf16 %v1866_v48, %v1865_v41  ;;  %v1869_v3 = vpack.c.bf16 %v1867_v63, %v1867_v63 }
 0x4be   : > { %v1991_v56 = vpack.c.bf16 %v1989_v49, %v1988_v44  ;;  %v2054_v57 = vld [vmem:[#allocation4 + $0xf] sm:$0xff]  ;;  %5939 = vmatmul.msk.bf16.vlgmr.msra.gmra.mxu3 %vm1856_vm6, %v1881_v50 }
 0x4bf   : > { %v2056_v39 = vpack.c.bf16 %v2054_v57, %v2053_v46  ;;  %5957 = vmatmul.msk.bf16.vlgmr.msra.gmra.mxu2 %vm1856_vm6, %v1868_v51  ;;  %v2119_v7 = vld [vmem:[#allocation4 + $0x10] sm:$0xff] }
 0x4c0   : > { %5983 = vmatmul.msk.bf16.vlgmr.msra.gmra.mxu0 %vm1856_vm6, %v1991_v56  ;;  %v2183_v12 = vld [vmem:[#allocation4 + $0x9] sm:$0xff]  ;;  %v2121_v13 = vpack.c.bf16 %v2119_v7, %v2118_v11 }
 0x4c1   : > { %6009 = vmatmul.msk.bf16.vlgmr.msra.gmra.mxu1 %vm1856_vm6, %v2056_v39  ;;  %v1854_v40 = vpop.f32.mrf.mxu1  ;;  %v2248_v15 = vld [vmem:[#allocation4 + $0xa] sm:$0xff]  ;;  %v7209_v39 = vld [vmem:[%s7553_s24] ss:$0 sm:$0xff] }
 0x4c2   : > { %v2313_v16 = vld [vmem:[#allocation4 + $0xb] sm:$0xff] }
 0x4c3   : > { %v1990_v0 = vld [vmem:[#allocation4 + $0x16] sm:$0x7]  ;;  %v2185_v21 = vld [vmem:[#allocation4 + $0x19] sm:$0x7] }
 0x4c4   : > { %v2055_v1 = vld [vmem:[#allocation4 + $0x17] sm:$0x7]  ;;  %v1992_v4 = vpack.c.bf16 %v1990_v0, %v1990_v0  ;;  %v2250_v22 = vld [vmem:[#allocation4 + $0x1a] sm:$0x7]  ;;  %v2187_v25 = vpack.c.bf16 %v2185_v21, %v2185_v21 }
 0x4c5   : > { %v2057_v5 = vpack.c.bf16 %v2055_v1, %v2055_v1  ;;  %v2184_v8 = vld [vmem:[#allocation4 + $0x11] sm:$0xff]  ;;  %v2252_v26 = vpack.c.bf16 %v2250_v22, %v2250_v22 }
 0x4c6   : > { %v2249_v9 = vld [vmem:[#allocation4 + $0x12] sm:$0xff]  ;;  %v2186_v14 = vpack.c.bf16 %v2184_v8, %v2183_v12 }
 0x4c7   : > { %v2314_v10 = vld [vmem:[#allocation4 + $0x13] sm:$0xff]  ;;  %v2251_v17 = vpack.c.bf16 %v2249_v9, %v2248_v15 }
 0x4c8   : > { %v2316_v18 = vpack.c.bf16 %v2314_v10, %v2313_v16  ;;  %v2120_v20 = vld [vmem:[#allocation4 + $0x18] sm:$0x7] }
 0x4c9   : > { %v2122_v24 = vpack.c.bf16 %v2120_v20, %v2120_v20 }
 0x4ce   : > { %5940 = vmatmul.msk.bf16.gmra.mxu3 %vm1856_vm6, %v1882_v2 }
 0x4cf   : > { %5958 = vmatmul.msk.bf16.gmra.mxu2 %vm1856_vm6, %v1869_v3 }
 0x4d0   : > { %5984 = vmatmul.msk.bf16.gmra.mxu0 %vm1856_vm6, %v1992_v4 }
 0x4d1   : > { %6010 = vmatmul.msk.bf16.gmra.mxu1 %vm1856_vm6, %v2057_v5 }
 0x4de   : > { %6035 = vmatmul.msk.bf16.vlgmr.msrb.gmra.mxu3 %vm1856_vm6, %v2121_v13 }
 0x4df   : > { %6061 = vmatmul.msk.bf16.vlgmr.msrb.gmra.mxu2 %vm1856_vm6, %v2186_v14 }
 0x4e0   : > { %6087 = vmatmul.msk.bf16.vlgmr.msrb.gmra.mxu0 %vm1856_vm6, %v2251_v17 }
 0x4e1   : > { %6113 = vmatmul.msk.bf16.vlgmr.msrb.gmra.mxu1 %vm1856_vm6, %v2316_v18 }
 0x4ee   : > { %6036 = vmatmul.msk.bf16.gmra.mxu3 %vm1856_vm6, %v2122_v24 }
 0x4ef   : > { %6062 = vmatmul.msk.bf16.gmra.mxu2 %vm1856_vm6, %v2187_v25 }
 0x4f0   : > { %6088 = vmatmul.msk.bf16.gmra.mxu0 %vm1856_vm6, %v2252_v26 }
 0x4f1   : > { %6114 = vmatmul.msk.bf16.gmra.mxu1 %vm1856_vm6, %v2317_v23 }
 0x53d   : > { %v2041_v45 = vpop.f32.mrf.mxu0 }
 0x53e   : > { %v2106_v28 = vpop.f32.mrf.mxu1 }
 0x541   : > { %v1931_v47 = vpop.f32.mrf.mxu3 }
 0x542   : > { %v1979_v29 = vpop.f32.mrf.mxu2 }
 0x543   : > { %v1980_v61 = vadd.f32 %v1979_v29, %v1931_v47 }
 0x545   : > { %v2043_v52 = vpop.f32.mrf.mxu0  ;;  %v2050_v38 = vadd.f32 %v2041_v45, %v1980_v61 }
 0x546   : > { %v2108_v30 = vpop.f32.mrf.mxu1 }
 0x547   : > { %v2115_v42 = vadd.f32 %v2106_v28, %v2050_v38 }
 0x549   : > { %v1933_v31 = vpop.f32.mrf.mxu3 }
 0x54a   : > { %v1981_v32 = vpop.f32.mrf.mxu2 }
 0x54b   : > { %v1982_v46 = vadd.f32 %v1981_v32, %v1933_v31 }
 0x54d   : > { %v2046_v33 = vpop.f32.mrf.mxu0  ;;  %v2051_v51 = vadd.f32 %v2043_v52, %v1982_v46 }
 0x54e   : > { %v2111_v55 = vpop.f32.mrf.mxu1 }
 0x54f   : > { %v2116_v63 = vadd.f32 %v2108_v30, %v2051_v51 }
 0x551   : > { %v1936_v59 = vpop.f32.mrf.mxu3 }
 0x552   : > { %v1984_v34 = vpop.f32.mrf.mxu2 }
 0x553   : > { %v1985_v40 = vadd.f32 %v1984_v34, %v1936_v59 }
 0x555   : > { %v2048_v60 = vpop.f32.mrf.mxu0  ;;  %v2052_v4 = vadd.f32 %v2046_v33, %v1985_v40 }
 0x556   : > { %v2113_v35 = vpop.f32.mrf.mxu1 }
 0x557   : > { %v2117_v13 = vadd.f32 %v2111_v55, %v2052_v4 }
 0x559   : > { %v1938_v36 = vpop.f32.mrf.mxu3 }
 0x55a   : > { %v1986_v37 = vpop.f32.mrf.mxu2 }
 0x55d   : > { %v2301_v41 = vpop.f32.mrf.mxu0 }
 0x55e   : > { %v2366_v44 = vpop.f32.mrf.mxu1 }
 0x561   : > { %v2171_v48 = vpop.f32.mrf.mxu3 }
 0x562   : > { %v2236_v49 = vpop.f32.mrf.mxu2  ;;  %v2180_v50 = vadd.f32 %v2171_v48, %v2115_v42 }
 0x564   : > { %v2245_v56 = vadd.f32 %v2236_v49, %v2180_v50 }
 0x565   : > { %v2303_v57 = vpop.f32.mrf.mxu0 }
 0x566   : > { %v2368_v58 = vpop.f32.mrf.mxu1  ;;  %v2310_v53 = vadd.f32 %v2301_v41, %v2245_v56 }
 0x568   : > { %v2375_v62 = vadd.f32 %v2366_v44, %v2310_v53  ;;  %v7489_v53 = vmov 64.0  }
 0x569   : > { %v2173_v0 = vpop.f32.mrf.mxu3 }
 0x56a   : > { %v2238_v1 = vpop.f32.mrf.mxu2  ;;  %v2382_v2 = vadd.f32 %v7209_v39, %v2375_v62  ;;  %v2181_v3 = vadd.f32 %v2173_v0, %v2116_v63 }
 0x56c   : > { %v2246_v5 = vadd.f32 %v2238_v1, %v2181_v3  ;;  %v2385_v9 = vmul.f32 %v2382_v2, %v2382_v2 }
 0x56d   : > { %v2306_v7 = vpop.f32.mrf.mxu0 }
 0x56e   : > { %v2371_v8 = vpop.f32.mrf.mxu1  ;;  %v2311_v10 = vadd.f32 %v2303_v57, %v2246_v5  ;;  %v2388_v11 = vmul.f32 %v2385_v9, %v2382_v2 }
 0x570   : > { %v2376_v12 = vadd.f32 %v2368_v58, %v2311_v10  ;;  %v2391_v14 = vmul.f32 0.044715, %v2388_v11 }
 0x571   : > { %v2176_v15 = vpop.f32.mrf.mxu3 }
 0x572   : > { %v2241_v16 = vpop.f32.mrf.mxu2  ;;  %v2383_v17 = vadd.f32 %v7209_v39, %v2376_v12  ;;  %v2182_v18 = vadd.f32 %v2176_v15, %v2117_v13  ;;  %v2394_v19 = vadd.f32 %v2391_v14, %v2382_v2 }
 0x574   : > { %v2247_v20 = vadd.f32 %v2241_v16, %v2182_v18  ;;  %v2397_v23 = vmul.f32 0.7978846, %v2394_v19  ;;  %v2386_v24 = vmul.f32 %v2383_v17, %v2383_v17  ;;  %v7028_v16 = vld [vmem:[%s7568_s12 + $0x18] sm:$0xff]  ;;  %v7027_v19 = vld [vmem:[%s7568_s12 + $0x10] sm:$0xff] }
 0x575   : > { %v2308_v21 = vpop.f32.mrf.mxu0  ;;  %v7036_v18 = vld [vmem:[%s8653_s7 + $0x18] sm:$0xff]  ;;  %2550 = vmatpush.bf16.msra.mxu3 %v7028_v16 }
 0x576   : > { %v2373_v22 = vpop.f32.mrf.mxu1  ;;  %v2312_v25 = vadd.f32 %v2306_v7, %v2247_v20  ;;  %7299 = vtanh.f32 %v2397_v23  ;;  %v2389_v26 = vmul.f32 %v2386_v24, %v2383_v17  ;;  %2658 = vmatpush.bf16.msra.mxu0 %v7036_v18  ;;  %v7031_v20 = vld [vmem:[%s7578_s27 + $0x10] sm:$0xff]  ;;  %v7026_v24 = vld [vmem:[%s7568_s12 + $0x8] sm:$0xff] }
 0x577   : > { %v7035_v21 = vld [vmem:[%s8653_s7 + $0x10] sm:$0xff] }
 0x578   : > { %v2377_v45 = vadd.f32 %v2371_v8, %v2312_v25  ;;  %v2392_v28 = vmul.f32 0.044715, %v2389_v26  ;;  %v7030_v25 = vld [vmem:[%s7578_s27 + $0x8] sm:$0xff] }
 0x579   : > { %v2178_v47 = vpop.f32.mrf.mxu3  ;;  %2551 = vmatpush.bf16.msra.mxu3 %v7027_v19  ;;  %v7034_v26 = vld [vmem:[%s8653_s7 + $0x8] sm:$0xff] }
 0x57a   : > { %v2243_v29 = vpop.f32.mrf.mxu2  ;;  %v2384_v52 = vadd.f32 %v7209_v39, %v2377_v45  ;;  %v2395_v30 = vadd.f32 %v2392_v28, %v2383_v17  ;;  %2659 = vmatpush.bf16.msra.mxu0 %v7035_v21  ;;  %v7025_v28 = vld [vmem:[%s7568_s12] sm:$0xff] }
 0x57b   : > { %v7029_v47 = vld [vmem:[%s7578_s27] sm:$0xff] }
 0x57c   : > { %v7300_v31 = vpop.eup %7299  ;;  %v2387_v32 = vmul.f32 %v2384_v52, %v2384_v52  ;;  %v2398_v33 = vmul.f32 0.7978846, %v2395_v30  ;;  %v7033_v29 = vld [vmem:[%s8653_s7] sm:$0xff] }
 0x57d   : > { %v2403_v55 = vadd.f32 1.0, %v7300_v31  ;;  %2552 = vmatpush.bf16.msra.mxu3 %v7026_v24 }
 0x57e   : > { %v2390_v59 = vmul.f32 %v2387_v32, %v2384_v52  ;;  %7301 = vtanh.f32 %v2398_v33  ;;  %2660 = vmatpush.bf16.msra.mxu0 %v7034_v26 }
 0x57f   : > { %v2406_v34 = vmul.f32 0.5, %v2403_v55 }
 0x580   : > { %v2393_v60 = vmul.f32 0.044715, %v2390_v59 }
 0x581   : > { %v2409_v35 = vmul.f32 %v2406_v34, %v2382_v2  ;;  %2553 = vmatpush.bf16.msra.mxu3 %v7025_v28 }
 0x582   : > { %v2396_v61 = vadd.f32 %v2393_v60, %v2384_v52  ;;  %2661 = vmatpush.bf16.msra.mxu0 %v7033_v29 }
 0x583   : > { %v2412_v36 = vadd.f32 %v2409_v35, %v7871_v27 }
 0x584   : > { %v7302_v37 = vpop.eup %7301  ;;  %v2399_v38 = vmul.f32 0.7978846, %v2396_v61 }
 0x585   : > { %v2417_v41 = vsel %vm1856_vm6, %v2412_v36, 0.0  ;;  %v2404_v44 = vadd.f32 1.0, %v7302_v37 }
 0x586   : > { %2418 = vadd.xlane.f32.xlu0 %v2417_v41  ;;  %7303 = vtanh.f32 %v2399_v38 }
 0x587   : > { %v2407_v46 = vmul.f32 0.5, %v2404_v44  ;;  %7305 = vrcp.f32 %v7489_v53 }
 0x589   : > { %v2410_v42 = vmul.f32 %v2407_v46, %v2383_v17  ;;  %v7032_v17 = vld [vmem:[%s7578_s27 + $0x18] sm:$0xff] }
 0x58a   : > { %2604 = vmatpush.bf16.msra.mxu2 %v7032_v17 }
 0x58b   : > { %v2413_v48 = vadd.f32 %v2410_v42, %v7881_v54  ;;  %v7041_v42 = vld [vmem:[%s7568_s12 + $0x38] sm:$0xff] }
 0x58c   : > { %v7304_v49 = vpop.eup %7303 }
 0x58d   : > { %v2420_v50 = vsel %vm1856_vm6, %v2413_v48, 0.0  ;;  %v2405_v51 = vadd.f32 1.0, %v7304_v49  ;;  %v7306_v39 = vpop.eup %7305 }
 0x58e   : > { %2421 = vadd.xlane.f32.xlu1 %v2420_v50  ;;  %v2427_v40 = vmul.f32 64.0, %v7306_v39  ;;  %vm2431_vm7 = vweird.f32 %v7306_v39  ;;  %2605 = vmatpush.bf16.msra.mxu2 %v7031_v20  ;;  %v7040_v50 = vld [vmem:[%s7568_s12 + $0x30] sm:$0xff] }
 0x58f   : > { %v2408_v56 = vmul.f32 0.5, %v2405_v51  ;;  %v7044_v51 = vld [vmem:[%s7578_s27 + $0x30] sm:$0xff] }
 0x590   : > { %v2428_v62 = vsub.f32 1.0, %v2427_v40 }
 0x591   : > { %v2411_v57 = vmul.f32 %v2408_v56, %v2384_v52 }
 0x592   : > { %v2429_v63 = vmul.f32 %v7306_v39, %v2428_v62  ;;  %2606 = vmatpush.bf16.msra.mxu2 %v7030_v25  ;;  %v7039_v62 = vld [vmem:[%s7568_s12 + $0x28] sm:$0xff] }
 0x593   : > { %v2414_v27 = vadd.f32 %v2411_v57, %v7893_v43  ;;  %v7210_v57 = vld [vmem:[%s8654_s10] ss:$0 sm:$0xff]  ;;  %s8664_s10 = sld [smem:[#allocation19_spill]] }
 0x594   : > { %v2430_v0 = vadd.f32 %v7306_v39, %v2429_v63  ;;  %v7043_v63 = vld [vmem:[%s7578_s27 + $0x28] sm:$0xff] }
 0x595   : > { %v2423_v58 = vsel %vm1863_vm4, %v2414_v27, 0.0 }
 0x596   : > { %2424 = vadd.xlane.f32.xlu2 %v2423_v58  ;;  %v7922_v54 = vsel %vm2431_vm7, %v7306_v39, %v2430_v0  ;;  %2607 = vmatpush.bf16.msra.mxu2 %v7029_v47  ;;  %v7211_v0 = vld [vmem:[%s8655_s11] ss:$0 sm:$0xff]  ;;  %s8665_s11 = sld [smem:[#allocation18_spill]] }
 0x59a   : > { %2825 = vmatpush.bf16.msrb.mxu2 %v7041_v42  ;;  %v7048_v42 = vld [vmem:[%s8653_s7 + $0x30] sm:$0xff] }
 0x59e   : > { %2826 = vmatpush.bf16.msrb.mxu2 %v7040_v50 }
 0x5a2   : > { %2827 = vmatpush.bf16.msrb.mxu2 %v7039_v62 }
 0x5f9   : > { %v2419_v1 = vpop.xlane.xlu0 %2418 }
 0x5fa   : > { %v2433_v2 = vmul.f32 %v7922_v54, %v2419_v1 }
 0x5fc   : > { %v7925_v3 = vsub.f32 %v2412_v36, %v2433_v2 }
 0x5fe   : > { %v2439_v43 = vmul.f32 %v7925_v3, %v7925_v3 }
 0x600   : > { %v2442_v4 = vsel %vm1856_vm6, %v2439_v43, 0.0 }
 0x601   : > { %2443 = vadd.xlane.f32.xlu0 %v2442_v4  ;;  %v2422_v5 = vpop.xlane.xlu1 %2421 }
 0x602   : > { %v2434_v7 = vmul.f32 %v7922_v54, %v2422_v5 }
 0x604   : > { %v7931_v8 = vsub.f32 %v2413_v48, %v2434_v7  ;;  %v7045_v48 = vld [vmem:[%s7578_s27 + $0x38] sm:$0xff]  ;;  %v7042_v7 = vld [vmem:[%s7578_s27 + $0x20] sm:$0xff] }
 0x605   : > { %2881 = vmatpush.bf16.msrb.mxu0 %v7045_v48 }
 0x606   : > { %v2440_v9 = vmul.f32 %v7931_v8, %v7931_v8 }
 0x608   : > { %v2445_v10 = vsel %vm1856_vm6, %v2440_v9, 0.0 }
 0x609   : > { %2446 = vadd.xlane.f32.xlu1 %v2445_v10  ;;  %v2425_v11 = vpop.xlane.xlu2 %2424  ;;  %2882 = vmatpush.bf16.msrb.mxu0 %v7044_v51 }
 0x60a   : > { %v2435_v12 = vmul.f32 %v7922_v54, %v2425_v11 }
 0x60c   : > { %v7937_v13 = vsub.f32 %v2414_v27, %v2435_v12 }
 0x60d   : > { %2883 = vmatpush.bf16.msrb.mxu0 %v7043_v63 }
 0x60e   : > { %v2441_v14 = vmul.f32 %v7937_v13, %v7937_v13 }
 0x610   : > { %v2448_v15 = vsel %vm1863_vm4, %v2441_v14, 0.0 }
 0x611   : > { %2449 = vadd.xlane.f32.xlu2 %v2448_v15  ;;  %2884 = vmatpush.bf16.msrb.mxu0 %v7042_v7 }
 0x674   : > { %v2444_v22 = vpop.xlane.xlu0 %2443 }
 0x675   : > { %v2451_v23 = vmul.f32 %v2444_v22, %v7922_v54 }
 0x677   : > { %v2454_v45 = vadd.f32 1e-05, %v2451_v23  ;;  %v7212_v23 = vld [vmem:[%s8656_s15] ss:$0 sm:$0xff] }
 0x679   : > { %7307 = vrsqrt.f32 %v2454_v45  ;;  %vm2463_vm9 = vweird.f32 %v2454_v45 }
 0x67c   : > { %v2447_v52 = vpop.xlane.xlu1 %2446 }
 0x67d   : > { %v2452_v30 = vmul.f32 %v2447_v52, %v7922_v54 }
 0x67f   : > { %v7308_v31 = vpop.eup %7307  ;;  %v2455_v32 = vadd.f32 1e-05, %v2452_v30 }
 0x680   : > { %v2458_v33 = vmul.f32 %v7308_v31, %v2454_v45  ;;  %vm2464_vm8 = vweird.f32 %v7308_v31  ;;  %v7214_v45 = vld [vmem:[%s8657_s16] ss:$0 sm:$0xff] }
 0x681   : > { %7309 = vrsqrt.f32 %v2455_v32  ;;  %vm2465_vm10 = vmor %vm2463_vm9, %vm2464_vm8  ;;  %vm2473_vm12 = vweird.f32 %v2455_v32 }
 0x682   : > { %v2459_v55 = vmul.f32 %v7308_v31, %v2458_v33 }
 0x684   : > { %v2460_v59 = vmul.f32 0.5, %v2459_v55  ;;  %v2450_v34 = vpop.xlane.xlu2 %2449 }
 0x685   : > { %v2453_v60 = vmul.f32 %v2450_v34, %v7922_v54 }
 0x686   : > { %v2461_v35 = vsub.f32 1.5, %v2460_v59 }
 0x687   : > { %v7310_v61 = vpop.eup %7309  ;;  %v2456_v36 = vadd.f32 1e-05, %v2453_v60 }
 0x688   : > { %v2462_v37 = vmul.f32 %v7308_v31, %v2461_v35  ;;  %v2468_v38 = vmul.f32 %v7310_v61, %v2455_v32  ;;  %vm2474_vm11 = vweird.f32 %v7310_v61 }
 0x689   : > { %7311 = vrsqrt.f32 %v2456_v36  ;;  %vm2475_vm13 = vmor %vm2473_vm12, %vm2474_vm11  ;;  %vm2483_vm15 = vweird.f32 %v2456_v36 }
 0x68a   : > { %v2469_v41 = vmul.f32 %v7310_v61, %v2468_v38  ;;  %v2466_v44 = vsel %vm2465_vm10, %v7308_v31, %v2462_v37  ;;  %v7049_v38 = vld [vmem:[%s8653_s7 + $0x38] sm:$0xff] }
 0x68b   : > { %v2487_v27 = vmul.f32 %v2466_v44, %v7925_v3  ;;  %v7038_v3 = vld [vmem:[%s7568_s12 + $0x20] sm:$0xff] }
 0x68c   : > { %v2470_v46 = vmul.f32 0.5, %v2469_v41  ;;  %2828 = vmatpush.bf16.msrb.mxu2 %v7038_v3  ;;  %v7213_v41 = vld [vmem:[%s8658_s18] ss:$0 sm:$0xff] }
 0x68d   : > { %v2493_v1 = vmul.f32 %v7210_v57, %v2487_v27 }
 0x68e   : > { %v2471_v49 = vsub.f32 1.5, %v2470_v46 }
 0x68f   : > { %v7312_v56 = vpop.eup %7311  ;;  %v7969_v9 = vadd.f32 %v7211_v0, %v2493_v1 }
 0x690   : > { %v2472_v58 = vmul.f32 %v7310_v61, %v2471_v49  ;;  %v2478_v53 = vmul.f32 %v7312_v56, %v2456_v36  ;;  %vm2484_vm14 = vweird.f32 %v7312_v56 }
 0x691   : > { %vm2485_vm0 = vmor %vm2483_vm15, %vm2484_vm14 }
 0x692   : > { %v2476_v39 = vsel %vm2475_vm13, %v7310_v61, %v2472_v58  ;;  %v2479_v40 = vmul.f32 %v7312_v56, %v2478_v53  ;;  %v7215_v58 = vld [vmem:[%s8657_s16 + $0x1] ss:$0 sm:$0xff] }
 0x693   : > { %v2488_v2 = vmul.f32 %v2476_v39, %v7931_v8 }
 0x694   : > { %v2480_v43 = vmul.f32 0.5, %v2479_v40 }
 0x695   : > { %v2494_v4 = vmul.f32 %v7210_v57, %v2488_v2 }
 0x696   : > { %v2481_v5 = vsub.f32 1.5, %v2480_v43 }
 0x697   : > { %v7971_v10 = vadd.f32 %v7211_v0, %v2494_v4 }
 0x698   : > { %v2482_v11 = vmul.f32 %v7312_v56, %v2481_v5 }
 0x699   : > { %v7975_v12 = vpack.c.bf16 %v7971_v10, %v7969_v9 }
 0x69a   : > { %v2486_v8 = vsel %vm2485_vm0, %v7312_v56, %v2482_v11  ;;  %v7047_v56 = vld [vmem:[%s8653_s7 + $0x28] sm:$0xff] }
 0x69b   : > { %6131 = vmatmul.msk.bf16.vlgmr.msra.gmra.mxu3 %vm1856_vm6, %v7975_v12  ;;  %6149 = vmatmul.msk.bf16.vlgmr.msra.gmra.mxu2 %vm1856_vm6, %v7975_v12  ;;  %v2489_v14 = vmul.f32 %v2486_v8, %v7937_v13 }
 0x69c   : > { %6167 = vmatmul.msk.bf16.vlgmr.msra.gmra.mxu0 %vm1856_vm6, %v7975_v12 }
 0x69d   : > { %v2495_v15 = vmul.f32 %v7210_v57, %v2489_v14  ;;  %v7046_v57 = vld [vmem:[%s8653_s7 + $0x20] sm:$0xff] }
 0x69f   : > { %v7984_v16 = vadd.f32 %v7211_v0, %v2495_v15 }
 0x6a1   : > { %v7988_v17 = vpack.c.bf16 %v7984_v16, %v7984_v16 }
 0x6ab   : > { %6132 = vmatmul.msk.bf16.gmra.mxu3 %vm1856_vm6, %v7988_v17  ;;  %6150 = vmatmul.msk.bf16.gmra.mxu2 %vm1856_vm6, %v7988_v17 }
 0x6ac   : > { %6168 = vmatmul.msk.bf16.gmra.mxu0 %vm1856_vm6, %v7988_v17 }
 0x6bb   : > { %6198 = vmatmul.msk.bf16.vlgmr.msrb.gmra.mxu2 %vm1856_vm6, %v7975_v12 }
 0x6bc   : > { %6225 = vmatmul.msk.bf16.vlgmr.msrb.gmra.mxu0 %vm1856_vm6, %v7975_v12 }
 0x6cb   : > { %6199 = vmatmul.msk.bf16.gmra.mxu2 %vm1856_vm6, %v7988_v17 }
 0x6cc   : > { %6226 = vmatmul.msk.bf16.gmra.mxu0 %vm1856_vm6, %v7988_v17 }
 0x719   : > { %v2663_v13 = vpop.f32.mrf.mxu0 }
 0x71a   : > { %v2664_v31 = vadd.f32 %v7212_v23, %v2663_v13 }
 0x71e   : > { %v2555_v18 = vpop.f32.mrf.mxu3  ;;  %v2609_v19 = vpop.f32.mrf.mxu2 }
 0x71f   : > { %v2610_v60 = vadd.f32 %v7214_v45, %v2609_v19  ;;  %v2556_v49 = vadd.f32 %v7213_v41, %v2555_v18 }
 0x721   : > { %v2665_v20 = vpop.f32.mrf.mxu0 }
 0x722   : > { %v2666_v28 = vadd.f32 %v7212_v23, %v2665_v20 }
 0x724   : > { %v2747_v55 = vpack.c.bf16 %v2666_v28, %v2664_v31 }
 0x726   : > { %v2557_v21 = vpop.f32.mrf.mxu3  ;;  %v2611_v22 = vpop.f32.mrf.mxu2 }
 0x727   : > { %v2612_v59 = vadd.f32 %v7214_v45, %v2611_v22  ;;  %v2558_v46 = vadd.f32 %v7213_v41, %v2557_v21 }
 0x729   : > { %v2668_v24 = vpop.f32.mrf.mxu0  ;;  %v2674_v36 = vpack.c.bf16 %v2612_v59, %v2610_v60  ;;  %v2672_v50 = vpack.c.bf16 %v2558_v46, %v2556_v49 }
 0x72a   : > { %v2669_v25 = vadd.f32 %v7212_v23, %v2668_v24 }
 0x72b   : > { %v2684_v44 = vsel %vm2676_vm1, %v2674_v36, 0 }
 0x72c   : > { %v2748_v26 = vpack.c.bf16 %v2669_v25, %v2669_v25  ;;  %v7217_v25 = vld [vmem:[%s8656_s15 + $0x1] ss:$0 sm:$0xff] }
 0x72e   : > { %v2759_v47 = vand.u32 %v7670_v6, %v2748_v26  ;;  %v2560_v29 = vpop.f32.mrf.mxu3  ;;  %v2614_v52 = vpop.f32.mrf.mxu2 }
 0x72f   : > { %v2615_v30 = vadd.f32 %v7214_v45, %v2614_v52  ;;  %v2561_v62 = vadd.f32 %v7213_v41, %v2560_v29 }
 0x730   : > { %2767 = vmatpush.bf16.msrb.mxu3 %v2759_v47 }
 0x731   : > { %v2675_v32 = vpack.c.bf16 %v2615_v30, %v2615_v30  ;;  %v2670_v33 = vpop.f32.mrf.mxu0  ;;  %v2673_v43 = vpack.c.bf16 %v2561_v62, %v2561_v62 }
 0x733   : > { %v2687_v34 = vsel %vm2676_vm1, %v2675_v32, 0 }
 0x734   : > { %2768 = vmatpush.bf16.msrb.mxu3 %v2747_v55  ;;  %2695 = vmatpush.bf16.xpose.msra.mxu1 %v2687_v34 }
 0x736   : > { %v2562_v35 = vpop.f32.mrf.mxu3  ;;  %v2616_v61 = vpop.f32.mrf.mxu2 }
 0x739   : > { %v2886_v37 = vpop.f32.mrf.mxu0 }
 0x73a   : > { %v2887_v2 = vadd.f32 %v7215_v58, %v2886_v37 }
 0x73c   : > { %2696 = vmatpush.bf16.xpose.msra.mxu1 %v2684_v44 }
 0x73e   : > { %v8012_v48 = vpop.f32.mrf.mxu2 }
 0x741   : > { %v2888_v51 = vpop.f32.mrf.mxu0 }
 0x742   : > { %v2889_v63 = vadd.f32 %v7215_v58, %v2888_v51 }
 0x743   : > { %6169 = vmatmul.msk.bf16.vlgmr.msra.gmra.mxu1 %vm2676_vm1, %v2672_v50 }
 0x744   : > { %2937 = vmatpush.bf16.msrb.mxu1 %v7049_v38  ;;  %v2953_v5 = vpack.c.bf16 %v2889_v63, %v2887_v2  ;;  %v7053_v2 = vld [vmem:[%s7568_s12 + $0x50] sm:$0xff] }
 0x746   : > { %v8017_v27 = vpop.f32.mrf.mxu2  ;;  %v2962_v7 = vsel %vm2676_vm1, %v2953_v5, 0 }
 0x748   : > { %2938 = vmatpush.bf16.msrb.mxu1 %v7048_v42 }
 0x749   : > { %v2891_v53 = vpop.f32.mrf.mxu0 }
 0x74a   : > { %v2892_v39 = vadd.f32 %v7215_v58, %v2891_v53 }
 0x74c   : > { %2939 = vmatpush.bf16.msrb.mxu1 %v7047_v56  ;;  %v2954_v40 = vpack.c.bf16 %v2892_v39, %v2892_v39 }
 0x74e   : > { %v2965_v0 = vsel %vm2676_vm1, %v2954_v40, 0  ;;  %v8021_v1 = vpop.f32.mrf.mxu2 }
 0x74f   : > { %2973 = vmatpush.bf16.xpose.msra.mxu3 %v2965_v0  ;;  %v7054_v0 = vld [vmem:[%s7568_s12 + $0x58] sm:$0xff] }
 0x750   : > { %2940 = vmatpush.bf16.msrb.mxu1 %v7046_v57 }
 0x751   : > { %v2893_v4 = vpop.f32.mrf.mxu0 }
 0x752   : > { %v7216_v4 = vld [vmem:[%s8658_s18 + $0x1] ss:$0 sm:$0xff] }
 0x753   : > { %6170 = vmatmul.msk.bf16.gmra.mxu1 %vm2676_vm1, %v2673_v43  ;;  %v7052_v43 = vld [vmem:[%s7568_s12 + $0x48] sm:$0xff]  ;;  %v2833_v5 = vadd.f32 %v7216_v4, %v8017_v27  ;;  %v7037_v27 = vld [vmem:[%s8659_s22] sm:$0xff] }
 0x754   : > { %3106 = vmatpush.bf16.msra.mxu1 %v7037_v27 }
 0x756   : > { %v2837_v3 = vpop.f32.mrf.mxu2 }
 0x757   : > { %2974 = vmatpush.bf16.xpose.msra.mxu3 %v2962_v7  ;;  %v7051_v3 = vld [vmem:[%s7568_s12 + $0x40] sm:$0xff]  ;;  %v2831_v7 = vadd.f32 %v7216_v4, %v8012_v48 }
 0x763   : > { %6252 = vmatmul.msk.bf16.vlgmr.msrb.gmra.mxu1 %vm1856_vm6, %v7975_v12 }
 0x773   : > { %6253 = vmatmul.msk.bf16.gmra.mxu1 %vm1856_vm6, %v7988_v17 }
 0x7c0   : > { %v2698_v11 = vpop.f32.mrf.mxu1 }
 0x7c1   : > { %v2707_v8 = vmul.f32 0.25, %v2698_v11  ;;  %v2951_v11 = vpack.c.bf16 %v2833_v5, %v2831_v7 }
 0x7c3   : > { %v2711_v14 = vsel %vm2710_vm2, %v2707_v8, -inf }
 0x7c4   : > { %2712 = vmax.xlane.f32.xlu0 %v2711_v14 }
 0x7c8   : > { %v2700_v15 = vpop.f32.mrf.mxu1 }
 0x7c9   : > { %v2708_v13 = vmul.f32 0.25, %v2700_v15 }
 0x7cb   : > { %v2714_v18 = vsel %vm2710_vm2, %v2708_v13, -inf }
 0x7cc   : > { %2715 = vmax.xlane.f32.xlu1 %v2714_v18 }
 0x7d0   : > { %v2703_v19 = vpop.f32.mrf.mxu1 }
 0x7d1   : > { %v2709_v20 = vmul.f32 0.25, %v2703_v19 }
 0x7d3   : > { %v2718_v21 = vsel %vm2717_vm3, %v2709_v20, -inf }
 0x7d4   : > { %2719 = vmax.xlane.f32.xlu2 %v2718_v21 }
 0x7d8   : > { %v2705_v22 = vpop.f32.mrf.mxu1 }
 0x7e0   : > { %v2942_v23 = vpop.f32.mrf.mxu1 }
 0x7e1   : > { %v2943_v52 = vadd.f32 %v7217_v25, %v2942_v23 }
 0x7e8   : > { %v2944_v24 = vpop.f32.mrf.mxu1 }
 0x7e9   : > { %v2945_v47 = vadd.f32 %v7217_v25, %v2944_v24 }
 0x7eb   : > { %v3023_v31 = vpack.c.bf16 %v2945_v47, %v2943_v52 }
 0x7f0   : > { %v2947_v26 = vpop.f32.mrf.mxu1 }
 0x7f1   : > { %v2948_v45 = vadd.f32 %v7217_v25, %v2947_v26 }
 0x7f3   : > { %v3024_v28 = vpack.c.bf16 %v2948_v45, %v2948_v45 }
 0x7f5   : > { %v3032_v29 = vand.u32 %v3024_v28, %v7670_v6 }
 0x7f7   : > { %3040 = vmatpush.bf16.msra.mxu2 %v3032_v29 }
 0x7f8   : > { %v2949_v30 = vpop.f32.mrf.mxu1 }
 0x7fb   : > { %3041 = vmatpush.bf16.msra.mxu2 %v3023_v31 }
 0x837   : > { %v2713_v32 = vpop.xlane.xlu0 %2712 }
 0x838   : > { %v2721_v33 = vsub.f32 %v2707_v8, %v2713_v32  ;;  %v2836_v8 = vadd.f32 %v7216_v4, %v8021_v1 }
 0x83a   : > { %v2724_v55 = vmul.f32 1.442695, %v2721_v33  ;;  %v2952_v14 = vpack.c.bf16 %v2836_v8, %v2836_v8  ;;  %v7050_v8 = vld [vmem:[%s8659_s22 + $0x8] sm:$0xff] }
 0x83b   : > { %3076 = vmatpush.bf16.msra.mxu0 %v7050_v8 }
 0x83c   : > { %7313 = vpow2.f32 %v2724_v55 }
 0x83f   : > { %v2716_v59 = vpop.xlane.xlu1 %2715 }
 0x840   : > { %v2722_v34 = vsub.f32 %v2708_v13, %v2716_v59 }
 0x842   : > { %v7314_v60 = vpop.eup %7313  ;;  %v2726_v35 = vmul.f32 1.442695, %v2722_v34 }
 0x843   : > { %v2730_v61 = vsel %vm2710_vm2, %v7314_v60, 0.0 }
 0x844   : > { %7315 = vpow2.f32 %v2726_v35  ;;  %2731 = vadd.xlane.f32.xlu0 %v2730_v61 }
 0x847   : > { %v2720_v36 = vpop.xlane.xlu2 %2719 }
 0x848   : > { %v2723_v37 = vsub.f32 %v2709_v20, %v2720_v36 }
 0x84a   : > { %v7316_v38 = vpop.eup %7315  ;;  %v2728_v41 = vmul.f32 1.442695, %v2723_v37 }
 0x84b   : > { %v2733_v44 = vsel %vm2710_vm2, %v7316_v38, 0.0 }
 0x84c   : > { %7317 = vpow2.f32 %v2728_v41  ;;  %2734 = vadd.xlane.f32.xlu1 %v2733_v44 }
 0x852   : > { %v7318_v46 = vpop.eup %7317 }
 0x853   : > { %v2736_v42 = vsel %vm2717_vm3, %v7318_v46, 0.0 }
 0x854   : > { %2737 = vadd.xlane.f32.xlu2 %v2736_v42 }
 0x8b7   : > { %v2732_v49 = vpop.xlane.xlu0 %2731 }
 0x8b8   : > { %7319 = vrcp.f32 %v2732_v49 }
 0x8be   : > { %v7320_v51 = vpop.eup %7319 }
 0x8bf   : > { %v2735_v50 = vpop.xlane.xlu1 %2734  ;;  %v2742_v57 = vmul.f32 %v7320_v51, %v7314_v60 }
 0x8c0   : > { %7321 = vrcp.f32 %v2735_v50 }
 0x8c6   : > { %v7322_v56 = vpop.eup %7321 }
 0x8c7   : > { %v2743_v58 = vmul.f32 %v7322_v56, %v7316_v38  ;;  %v2738_v39 = vpop.xlane.xlu2 %2737 }
 0x8c8   : > { %7323 = vrcp.f32 %v2738_v39 }
 0x8c9   : > { %v2745_v53 = vpack.c.bf16 %v2743_v58, %v2742_v57  ;;  %v7058_v58 = vld [vmem:[%s7578_s27 + $0x58] sm:$0xff] }
 0x8ca   : > { %3215 = vmatpush.bf16.msrb.mxu2 %v7058_v58 }
 0x8cb   : > { %6171 = vmatmul.msk.bf16.vlgmr.msrb.gmra.mxu3 %vm2710_vm2, %v2745_v53  ;;  %v7057_v53 = vld [vmem:[%s7578_s27 + $0x50] sm:$0xff] }
 0x8cc   : > { %3159 = vmatpush.bf16.msrb.mxu3 %v7054_v0 }
 0x8ce   : > { %v7324_v40 = vpop.eup %7323  ;;  %3216 = vmatpush.bf16.msrb.mxu2 %v7057_v53 }
 0x8cf   : > { %v2744_v62 = vmul.f32 %v7324_v40, %v7318_v46  ;;  %v7056_v40 = vld [vmem:[%s7578_s27 + $0x48] sm:$0xff] }
 0x8d0   : > { %3160 = vmatpush.bf16.msrb.mxu3 %v7053_v2 }
 0x8d1   : > { %v2746_v63 = vpack.c.bf16 %v2744_v62, %v2744_v62 }
 0x8d2   : > { %3217 = vmatpush.bf16.msrb.mxu2 %v7056_v40  ;;  %v7220_v40 = vld [vmem:[%s8656_s15 + $0x2] ss:$0 sm:$0xff] }
 0x8d4   : > { %3161 = vmatpush.bf16.msrb.mxu3 %v7052_v43 }
 0x8d8   : > { %3162 = vmatpush.bf16.msrb.mxu3 %v7051_v3 }
 0x8db   : > { %6172 = vmatmul.msk.bf16.gmra.mxu3 %vm2710_vm2, %v2746_v63  ;;  %v7055_v63 = vld [vmem:[%s7578_s27 + $0x40] sm:$0xff] }
 0x8dc   : > { %3218 = vmatpush.bf16.msrb.mxu2 %v7055_v63 }
 0x8eb   : > { %6254 = vmatmul.msk.bf16.vlgmr.msra.gmra.mxu3 %vm2676_vm1, %v2951_v11 }
 0x8fb   : > { %6255 = vmatmul.msk.bf16.gmra.mxu3 %vm2676_vm1, %v2952_v14  ;;  %v7062_v14 = vld [vmem:[%s8653_s7 + $0x58] sm:$0xff] }
 0x8fc   : > { %3271 = vmatpush.bf16.msrb.mxu0 %v7062_v14 }
 0x90b   : > { %6297 = vmatmul.msk.bf16.vlgmr.msrb.gmra.mxu3 %vm1856_vm6, %v7975_v12 }
 0x91b   : > { %6298 = vmatmul.msk.bf16.gmra.mxu3 %vm1856_vm6, %v7988_v17 }
 0x94e   : > { %v2770_v15 = vpop.f32.mrf.mxu3 }
 0x956   : > { %v2772_v13 = vpop.f32.mrf.mxu3 }
 0x957   : > { %v2779_v48 = vpack.c.bf16 %v2772_v13, %v2770_v15  ;;  %v7061_v15 = vld [vmem:[%s8653_s7 + $0x50] sm:$0xff]  ;;  %v7060_v13 = vld [vmem:[%s8653_s7 + $0x48] sm:$0xff] }
 0x958   : > { %3272 = vmatpush.bf16.msrb.mxu0 %v7061_v15 }
 0x959   : > { %6270 = vmatmul.msk.bf16.vlgmr.msra.gmra.mxu1 %vm2676_vm1, %v2779_v48 }
 0x95c   : > { %3273 = vmatpush.bf16.msrb.mxu0 %v7060_v13 }
 0x95e   : > { %v2775_v18 = vpop.f32.mrf.mxu3 }
 0x95f   : > { %v2780_v20 = vpack.c.bf16 %v2775_v18, %v2775_v18 }
 0x966   : > { %v2777_v19 = vpop.f32.mrf.mxu3 }
 0x967   : > { %v7059_v19 = vld [vmem:[%s8653_s7 + $0x40] sm:$0xff] }
 0x968   : > { %3274 = vmatpush.bf16.msrb.mxu0 %v7059_v19 }
 0x969   : > { %6271 = vmatmul.msk.bf16.gmra.mxu1 %vm2676_vm1, %v2780_v20 }
 0x96e   : > { %v2976_v1 = vpop.f32.mrf.mxu3 }
 0x96f   : > { %v2985_v21 = vmul.f32 0.25, %v2976_v1 }
 0x971   : > { %v2988_v22 = vsel %vm2710_vm2, %v2985_v21, -inf }
 0x972   : > { %2989 = vmax.xlane.f32.xlu0 %v2988_v22  ;;  %v7067_v22 = vld [vmem:[%s7568_s12 + $0x78] sm:$0xff] }
 0x976   : > { %v2978_v23 = vpop.f32.mrf.mxu3 }
 0x977   : > { %v2986_v24 = vmul.f32 0.25, %v2978_v23  ;;  %v7066_v23 = vld [vmem:[%s7568_s12 + $0x70] sm:$0xff] }
 0x979   : > { %v2991_v25 = vsel %vm2710_vm2, %v2986_v24, -inf }
 0x97a   : > { %2992 = vmax.xlane.f32.xlu1 %v2991_v25  ;;  %v7065_v25 = vld [vmem:[%s7568_s12 + $0x68] sm:$0xff] }
 0x97e   : > { %v2981_v26 = vpop.f32.mrf.mxu3 }
 0x97f   : > { %v2987_v45 = vmul.f32 0.25, %v2981_v26  ;;  %v7064_v26 = vld [vmem:[%s7568_s12 + $0x60] sm:$0xff] }
 0x981   : > { %v2994_v28 = vsel %vm2717_vm3, %v2987_v45, -inf }
 0x982   : > { %2995 = vmax.xlane.f32.xlu2 %v2994_v28  ;;  %v7219_v28 = vld [vmem:[%s8657_s16 + $0x2] ss:$0 sm:$0xff] }
 0x986   : > { %v2983_v47 = vpop.f32.mrf.mxu3 }
 0x98e   : > { %v8059_v29 = vpop.f32.mrf.mxu3 }
 0x996   : > { %v8061_v52 = vpop.f32.mrf.mxu3 }
 0x99e   : > { %v8063_v30 = vpop.f32.mrf.mxu3 }
 0x9a6   : > { %v3171_v31 = vpop.f32.mrf.mxu3 }
 0x9d6   : > { %v8065_v32 = vpop.f32.mrf.mxu1 }
 0x9de   : > { %v8067_v33 = vpop.f32.mrf.mxu1 }
 0x9e5   : > { %v2990_v55 = vpop.xlane.xlu0 %2989 }
 0x9e6   : > { %v2997_v59 = vsub.f32 %v2985_v21, %v2990_v55  ;;  %v8069_v34 = vpop.f32.mrf.mxu1 }
 0x9e8   : > { %v3000_v60 = vmul.f32 1.442695, %v2997_v59 }
 0x9ea   : > { %7325 = vpow2.f32 %v3000_v60 }
 0x9ed   : > { %v2993_v35 = vpop.xlane.xlu1 %2992 }
 0x9ee   : > { %v2998_v61 = vsub.f32 %v2986_v24, %v2993_v35  ;;  %v3115_v36 = vpop.f32.mrf.mxu1 }
 0x9f0   : > { %v7326_v37 = vpop.eup %7325  ;;  %v3002_v38 = vmul.f32 1.442695, %v2998_v61 }
 0x9f1   : > { %v3006_v41 = vsel %vm2710_vm2, %v7326_v37, 0.0 }
 0x9f2   : > { %7327 = vpow2.f32 %v3002_v38  ;;  %3007 = vadd.xlane.f32.xlu0 %v3006_v41  ;;  %v7218_v38 = vld [vmem:[%s8658_s18 + $0x2] ss:$0 sm:$0xff] }
 0x9f5   : > { %v2996_v44 = vpop.xlane.xlu2 %2995 }
 0x9f6   : > { %v2999_v46 = vsub.f32 %v2987_v45, %v2996_v44  ;;  %v3167_v44 = vadd.f32 %v7218_v38, %v8061_v52 }
 0x9f8   : > { %v7328_v42 = vpop.eup %7327  ;;  %v3004_v49 = vmul.f32 1.442695, %v2999_v46  ;;  %v7070_v46 = vld [vmem:[%s7578_s27 + $0x70] sm:$0xff] }
 0x9f9   : > { %v3009_v50 = vsel %vm2710_vm2, %v7328_v42, 0.0 }
 0x9fa   : > { %7329 = vpow2.f32 %v3004_v49  ;;  %3010 = vadd.xlane.f32.xlu1 %v3009_v50  ;;  %v7069_v50 = vld [vmem:[%s7578_s27 + $0x68] sm:$0xff] }
 0xa00   : > { %v7330_v51 = vpop.eup %7329 }
 0xa01   : > { %v3012_v56 = vsel %vm2717_vm3, %v7330_v51, 0.0 }
 0xa02   : > { %3013 = vadd.xlane.f32.xlu2 %v3012_v56  ;;  %v3170_v56 = vadd.f32 %v7218_v38, %v8063_v30 }
 0xa65   : > { %v3008_v57 = vpop.xlane.xlu0 %3007 }
 0xa66   : > { %7331 = vrcp.f32 %v3008_v57  ;;  %v3286_v57 = vpack.c.bf16 %v3170_v56, %v3170_v56 }
 0xa6c   : > { %v7332_v62 = vpop.eup %7331 }
 0xa6d   : > { %v3011_v39 = vpop.xlane.xlu1 %3010  ;;  %v3018_v2 = vmul.f32 %v7332_v62, %v7326_v37  ;;  %v7071_v37 = vld [vmem:[%s7578_s27 + $0x78] sm:$0xff] }
 0xa6e   : > { %7333 = vrcp.f32 %v3011_v39 }
 0xa74   : > { %v7334_v0 = vpop.eup %7333 }
 0xa75   : > { %v3019_v43 = vmul.f32 %v7334_v0, %v7328_v42  ;;  %v3014_v5 = vpop.xlane.xlu2 %3013  ;;  %v3165_v42 = vadd.f32 %v7218_v38, %v8059_v29 }
 0xa76   : > { %7335 = vrcp.f32 %v3014_v5 }
 0xa77   : > { %v3021_v4 = vpack.c.bf16 %v3019_v43, %v3018_v2  ;;  %v3285_v49 = vpack.c.bf16 %v3167_v44, %v3165_v42 }
 0xa79   : > { %6256 = vmatmul.msk.bf16.vlgmr.msra.gmra.mxu2 %vm2710_vm2, %v3021_v4 }
 0xa7c   : > { %v7336_v3 = vpop.eup %7335 }
 0xa7d   : > { %v3020_v7 = vmul.f32 %v7336_v3, %v7330_v51  ;;  %v7068_v51 = vld [vmem:[%s7578_s27 + $0x60] sm:$0xff] }
 0xa7f   : > { %v3022_v11 = vpack.c.bf16 %v3020_v7, %v3020_v7 }
 0xa89   : > { %6257 = vmatmul.msk.bf16.gmra.mxu2 %vm2710_vm2, %v3022_v11 }
 0xa99   : > { %6324 = vmatmul.msk.bf16.vlgmr.msrb.gmra.mxu2 %vm1856_vm6, %v7975_v12 }
 0xaa9   : > { %6325 = vmatmul.msk.bf16.gmra.mxu2 %vm1856_vm6, %v7988_v17 }
 0xafc   : > { %v3043_v27 = vpop.f32.mrf.mxu2 }
 0xb04   : > { %v3045_v48 = vpop.f32.mrf.mxu2 }
 0xb05   : > { %v3052_v18 = vpack.c.bf16 %v3045_v48, %v3043_v27 }
 0xb07   : > { %6264 = vmatmul.msk.bf16.vlgmr.msra.gmra.mxu0 %vm2676_vm1, %v3052_v18 }
 0xb08   : > { %3466 = vmatpush.bf16.msra.mxu0 %v7067_v22 }
 0xb0c   : > { %v3048_v20 = vpop.f32.mrf.mxu2  ;;  %3467 = vmatpush.bf16.msra.mxu0 %v7066_v23 }
 0xb0d   : > { %v3053_v21 = vpack.c.bf16 %v3048_v20, %v3048_v20 }
 0xb10   : > { %3468 = vmatpush.bf16.msra.mxu0 %v7065_v25 }
 0xb14   : > { %v3050_v1 = vpop.f32.mrf.mxu2  ;;  %3469 = vmatpush.bf16.msra.mxu0 %v7064_v26  ;;  %v7222_v26 = vld [vmem:[%s8657_s16 + $0x3] ss:$0 sm:$0xff] }
 0xb15   : > { %v7063_v1 = vld [vmem:[%s8659_s22 + $0x10] sm:$0xff] }
 0xb16   : > { %3410 = vmatpush.bf16.msra.mxu2 %v7063_v1 }
 0xb17   : > { %6265 = vmatmul.msk.bf16.gmra.mxu0 %vm2676_vm1, %v3053_v21 }
 0xb1c   : > { %v3220_v24 = vpop.f32.mrf.mxu2 }
 0xb1d   : > { %v3221_v35 = vadd.f32 %v7219_v28, %v3220_v24 }
 0xb24   : > { %v3222_v45 = vpop.f32.mrf.mxu2 }
 0xb25   : > { %v3223_v59 = vadd.f32 %v7219_v28, %v3222_v45 }
 0xb27   : > { %6351 = vmatmul.msk.bf16.vlgmr.msrb.gmra.mxu0 %vm1856_vm6, %v7975_v12  ;;  %v3287_v36 = vpack.c.bf16 %v3223_v59, %v3221_v35 }
 0xb29   : > { %v3296_v41 = vsel %vm2676_vm1, %v3287_v36, 0 }
 0xb2c   : > { %v3225_v47 = vpop.f32.mrf.mxu2 }
 0xb2d   : > { %v3226_v31 = vadd.f32 %v7219_v28, %v3225_v47 }
 0xb2f   : > { %v3288_v55 = vpack.c.bf16 %v3226_v31, %v3226_v31 }
 0xb31   : > { %v3299_v60 = vsel %vm2676_vm1, %v3288_v55, 0 }
 0xb32   : > { %3307 = vmatpush.bf16.xpose.msrb.mxu1 %v3299_v60 }
 0xb34   : > { %v3227_v61 = vpop.f32.mrf.mxu2 }
 0xb37   : > { %6352 = vmatmul.msk.bf16.gmra.mxu0 %vm1856_vm6, %v7988_v17 }
 0xb3a   : > { %3308 = vmatpush.bf16.xpose.msrb.mxu1 %v3296_v41 }
 0xb41   : > { %6353 = vmatmul.msk.bf16.vlgmr.msrb.gmra.mxu1 %vm2676_vm1, %v3285_v49 }
 0xb42   : > { %3522 = vmatpush.bf16.msra.mxu1 %v7071_v37 }
 0xb46   : > { %3523 = vmatpush.bf16.msra.mxu1 %v7070_v46 }
 0xb47   : > { %6390 = vmatmul.msk.bf16.vlgmr.msra.gmra.mxu0 %vm1856_vm6, %v7975_v12 }
 0xb4a   : > { %3524 = vmatpush.bf16.msra.mxu1 %v7069_v50 }
 0xb4e   : > { %3525 = vmatpush.bf16.msra.mxu1 %v7068_v51 }
 0xb51   : > { %6354 = vmatmul.msk.bf16.gmra.mxu1 %vm2676_vm1, %v3286_v57 }
 0xb57   : > { %6391 = vmatmul.msk.bf16.gmra.mxu0 %vm1856_vm6, %v7988_v17 }
 0xb61   : > { %6417 = vmatmul.msk.bf16.vlgmr.msra.gmra.mxu1 %vm1856_vm6, %v7975_v12 }
 0xb71   : > { %6418 = vmatmul.msk.bf16.gmra.mxu1 %vm1856_vm6, %v7988_v17 }
 0xb84   : > { %v8120_v29 = vpop.f32.mrf.mxu0 }
 0xb8c   : > { %v8122_v52 = vpop.f32.mrf.mxu0 }
 0xb94   : > { %v8124_v58 = vpop.f32.mrf.mxu0 }
 0xb9c   : > { %v3085_v53 = vpop.f32.mrf.mxu0 }
 0xba4   : > { %v3276_v30 = vpop.f32.mrf.mxu0 }
 0xba5   : > { %v3277_v4 = vadd.f32 %v7220_v40, %v3276_v30 }
 0xbac   : > { %v3278_v39 = vpop.f32.mrf.mxu0 }
 0xbad   : > { %v3279_v2 = vadd.f32 %v7220_v40, %v3278_v39 }
 0xbaf   : > { %v3357_v3 = vpack.c.bf16 %v3279_v2, %v3277_v4  ;;  %v7073_v2 = vld [vmem:[%s8653_s7 + $0x68] sm:$0xff]  ;;  %v7072_v4 = vld [vmem:[%s8653_s7 + $0x60] sm:$0xff] }
 0xbb4   : > { %v3281_v62 = vpop.f32.mrf.mxu0 }
 0xbb5   : > { %v3282_v63 = vadd.f32 %v7220_v40, %v3281_v62  ;;  %v7075_v62 = vld [vmem:[%s8653_s7 + $0x78] sm:$0xff] }
 0xbb7   : > { %v3358_v0 = vpack.c.bf16 %v3282_v63, %v3282_v63  ;;  %v7074_v63 = vld [vmem:[%s8653_s7 + $0x70] sm:$0xff] }
 0xbb9   : > { %v3366_v43 = vand.u32 %v3358_v0, %v7670_v6 }
 0xbbb   : > { %3374 = vmatpush.bf16.msra.mxu3 %v3366_v43 }
 0xbbc   : > { %v3283_v5 = vpop.f32.mrf.mxu0 }
 0xbbe   : > { %v3310_v7 = vpop.f32.mrf.mxu1 }
 0xbbf   : > { %v3319_v11 = vmul.f32 0.25, %v3310_v7  ;;  %3375 = vmatpush.bf16.msra.mxu3 %v3357_v3 }
 0xbc1   : > { %v3322_v8 = vsel %vm2710_vm2, %v3319_v11, -inf }
 0xbc2   : > { %3323 = vmax.xlane.f32.xlu0 %v3322_v8 }
 0xbc3   : > { %3578 = vmatpush.bf16.msrb.mxu3 %v7075_v62 }
 0xbc4   : > { %v8129_v14 = vpop.f32.mrf.mxu0 }
 0xbc6   : > { %v3312_v27 = vpop.f32.mrf.mxu1 }
 0xbc7   : > { %v3320_v15 = vmul.f32 0.25, %v3312_v27  ;;  %3579 = vmatpush.bf16.msrb.mxu3 %v7074_v63 }
 0xbc9   : > { %v3325_v13 = vsel %vm2710_vm2, %v3320_v15, -inf }
 0xbca   : > { %3326 = vmax.xlane.f32.xlu1 %v3325_v13 }
 0xbcb   : > { %3580 = vmatpush.bf16.msrb.mxu3 %v7073_v2 }
 0xbcc   : > { %v8132_v48 = vpop.f32.mrf.mxu0 }
 0xbce   : > { %v3315_v18 = vpop.f32.mrf.mxu1 }
 0xbcf   : > { %v3321_v19 = vmul.f32 0.25, %v3315_v18  ;;  %3581 = vmatpush.bf16.msrb.mxu3 %v7072_v4 }
 0xbd1   : > { %v3328_v20 = vsel %vm2717_vm3, %v3321_v19, -inf }
 0xbd2   : > { %3329 = vmax.xlane.f32.xlu2 %v3328_v20 }
 0xbd4   : > { %v8136_v21 = vpop.f32.mrf.mxu0 }
 0xbd6   : > { %v3317_v22 = vpop.f32.mrf.mxu1 }
 0xbdc   : > { %v3478_v23 = vpop.f32.mrf.mxu0 }
 0xbde   : > { %v3527_v24 = vpop.f32.mrf.mxu1 }
 0xbdf   : > { %v3528_v59 = vadd.f32 %v7222_v26, %v3527_v24 }
 0xbe6   : > { %v3529_v25 = vpop.f32.mrf.mxu1 }
 0xbe7   : > { %v3530_v31 = vadd.f32 %v7222_v26, %v3529_v25  ;;  %v7221_v25 = vld [vmem:[%s8658_s18 + $0x3] ss:$0 sm:$0xff] }
 0xbe9   : > { %v3594_v35 = vpack.c.bf16 %v3530_v31, %v3528_v59  ;;  %v3477_v59 = vadd.f32 %v7221_v25, %v8136_v21  ;;  %v3114_v21 = vadd.f32 %v8069_v34, %v8124_v58 }
 0xbeb   : > { %v3603_v61 = vsel %vm2676_vm1, %v3594_v35, 0 }
 0xbee   : > { %v3532_v45 = vpop.f32.mrf.mxu1 }
 0xbef   : > { %v3533_v28 = vadd.f32 %v7222_v26, %v3532_v45  ;;  %v3474_v26 = vadd.f32 %v7221_v25, %v8132_v48 }
 0xbf1   : > { %v3595_v47 = vpack.c.bf16 %v3533_v28, %v3533_v28 }
 0xbf3   : > { %v3606_v55 = vsel %vm2676_vm1, %v3595_v47, 0 }
 0xbf4   : > { %3614 = vmatpush.bf16.xpose.msrb.mxu2 %v3606_v55 }
 0xbf6   : > { %v3534_v60 = vpop.f32.mrf.mxu1 }
 0xbfc   : > { %3615 = vmatpush.bf16.xpose.msrb.mxu2 %v3603_v61 }
 0xc35   : > { %v3324_v36 = vpop.xlane.xlu0 %3323 }
 0xc36   : > { %v3331_v37 = vsub.f32 %v3319_v11, %v3324_v36 }
 0xc38   : > { %v3334_v38 = vmul.f32 1.442695, %v3331_v37  ;;  %v3593_v37 = vpack.c.bf16 %v3477_v59, %v3477_v59 }
 0xc3a   : > { %7337 = vpow2.f32 %v3334_v38 }
 0xc3d   : > { %v3327_v41 = vpop.xlane.xlu1 %3326 }
 0xc3e   : > { %v3332_v44 = vsub.f32 %v3320_v15, %v3327_v41 }
 0xc40   : > { %v7338_v46 = vpop.eup %7337  ;;  %v3336_v42 = vmul.f32 1.442695, %v3332_v44 }
 0xc41   : > { %v3340_v49 = vsel %vm2710_vm2, %v7338_v46, 0.0 }
 0xc42   : > { %7339 = vpow2.f32 %v3336_v42  ;;  %3341 = vadd.xlane.f32.xlu0 %v3340_v49 }
 0xc45   : > { %v3330_v50 = vpop.xlane.xlu2 %3329 }
 0xc46   : > { %v3333_v51 = vsub.f32 %v3321_v19, %v3330_v50 }
 0xc48   : > { %v7340_v56 = vpop.eup %7339  ;;  %v3338_v57 = vmul.f32 1.442695, %v3333_v51 }
 0xc49   : > { %v3343_v53 = vsel %vm2710_vm2, %v7340_v56, 0.0 }
 0xc4a   : > { %7341 = vpow2.f32 %v3338_v57  ;;  %3344 = vadd.xlane.f32.xlu1 %v3343_v53 }
 0xc50   : > { %v7342_v30 = vpop.eup %7341 }
 0xc51   : > { %v3346_v39 = vsel %vm2717_vm3, %v7342_v30, 0.0 }
 0xc52   : > { %3347 = vadd.xlane.f32.xlu2 %v3346_v39 }
 0xcb5   : > { %v3342_v40 = vpop.xlane.xlu0 %3341 }
 0xcb6   : > { %7343 = vrcp.f32 %v3342_v40 }
 0xcbc   : > { %v7344_v43 = vpop.eup %7343 }
 0xcbd   : > { %v3345_v0 = vpop.xlane.xlu1 %3344  ;;  %v3352_v3 = vmul.f32 %v7344_v43, %v7338_v46 }
 0xcbe   : > { %7345 = vrcp.f32 %v3345_v0 }
 0xcc4   : > { %v7346_v5 = vpop.eup %7345 }
 0xcc5   : > { %v3353_v7 = vmul.f32 %v7346_v5, %v7340_v56  ;;  %v3348_v8 = vpop.xlane.xlu2 %3347 }
 0xcc6   : > { %7347 = vrcp.f32 %v3348_v8 }
 0xcc7   : > { %v3355_v11 = vpack.c.bf16 %v3353_v7, %v3352_v3 }
 0xcc9   : > { %6355 = vmatmul.msk.bf16.vlgmr.msra.gmra.mxu3 %vm2710_vm2, %v3355_v11 }
 0xccc   : > { %v7348_v27 = vpop.eup %7347 }
 0xccd   : > { %v3354_v15 = vmul.f32 %v7348_v27, %v7342_v30 }
 0xccf   : > { %v3356_v13 = vpack.c.bf16 %v3354_v15, %v3354_v15 }
 0xcd9   : > { %6356 = vmatmul.msk.bf16.gmra.mxu3 %vm2710_vm2, %v3356_v13 }
 0xce9   : > { %6444 = vmatmul.msk.bf16.vlgmr.msrb.gmra.mxu3 %vm1856_vm6, %v7975_v12  ;;  %v3472_v12 = vadd.f32 %v7221_v25, %v8129_v14  ;;  %v3109_v14 = vadd.f32 %v8065_v32, %v8120_v29 }
 0xceb   : > { %v3592_v28 = vpack.c.bf16 %v3474_v26, %v3472_v12 }
 0xcf9   : > { %6445 = vmatmul.msk.bf16.gmra.mxu3 %vm1856_vm6, %v7988_v17  ;;  %v7223_v17 = vld [vmem:[%s8656_s15 + $0x3] ss:$0 sm:$0xff] }
 0xd4c   : > { %v3377_v18 = vpop.f32.mrf.mxu3 }
 0xd54   : > { %v3379_v19 = vpop.f32.mrf.mxu3 }
 0xd55   : > { %v3386_v20 = vpack.c.bf16 %v3379_v19, %v3377_v18  ;;  %v7076_v18 = vld [vmem:[%s8659_s22 + $0x18] sm:$0xff] }
 0xd56   : > { %3717 = vmatpush.bf16.msrb.mxu1 %v7076_v18 }
 0xd57   : > { %6363 = vmatmul.msk.bf16.vlgmr.msra.gmra.mxu2 %vm2676_vm1, %v3386_v20 }
 0xd5c   : > { %v3382_v1 = vpop.f32.mrf.mxu3 }
 0xd5d   : > { %v3387_v23 = vpack.c.bf16 %v3382_v1, %v3382_v1 }
 0xd64   : > { %v3384_v22 = vpop.f32.mrf.mxu3 }
 0xd67   : > { %6364 = vmatmul.msk.bf16.gmra.mxu2 %vm2676_vm1, %v3387_v23 }
 0xd6c   : > { %v3583_v24 = vpop.f32.mrf.mxu3 }
 0xd6d   : > { %v3584_v61 = vadd.f32 %v7223_v17, %v3583_v24 }
 0xd74   : > { %v3585_v45 = vpop.f32.mrf.mxu3 }
 0xd75   : > { %v3586_v60 = vadd.f32 %v7223_v17, %v3585_v45 }
 0xd77   : > { %6446 = vmatmul.msk.bf16.vlgmr.msrb.gmra.mxu2 %vm2676_vm1, %v3592_v28  ;;  %v3664_v48 = vpack.c.bf16 %v3586_v60, %v3584_v61  ;;  %v7224_v60 = vld [vmem:[%s8660_s23] ss:$0 sm:$0xff] }
 0xd7c   : > { %v3588_v47 = vpop.f32.mrf.mxu3 }
 0xd7d   : > { %v3589_v31 = vadd.f32 %v7223_v17, %v3588_v47 }
 0xd7f   : > { %v3665_v55 = vpack.c.bf16 %v3589_v31, %v3589_v31 }
 0xd81   : > { %v3673_v35 = vand.u32 %v3665_v55, %v7670_v6 }
 0xd83   : > { %3681 = vmatpush.bf16.msrb.mxu0 %v3673_v35 }
 0xd84   : > { %v3590_v36 = vpop.f32.mrf.mxu3 }
 0xd87   : > { %6447 = vmatmul.msk.bf16.gmra.mxu2 %vm2676_vm1, %v3593_v37  ;;  %3682 = vmatpush.bf16.msrb.mxu0 %v3664_v48  ;;  %v3111_v37 = vadd.f32 %v8067_v33, %v8122_v52 }
 0xdda   : > { %v3412_v38 = vpop.f32.mrf.mxu2 }
 0xddb   : > { %v8166_v41 = vadd.f32 %v3412_v38, %v3109_v14 }
 0xde2   : > { %v8168_v44 = vpop.f32.mrf.mxu2 }
 0xde3   : > { %v3422_v14 = vadd.f32 %v8168_v44, %v3111_v37  ;;  %v7226_v37 = vld [vmem:[%s8663_s2] ss:$0 sm:$0xff] }
 0xdea   : > { %v3417_v46 = vpop.f32.mrf.mxu2 }
 0xdeb   : > { %v8172_v42 = vadd.f32 %v3417_v46, %v3114_v21 }
 0xdf2   : > { %v3419_v49 = vpop.f32.mrf.mxu2 }
 0xdfa   : > { %v3617_v50 = vpop.f32.mrf.mxu2 }
 0xdfb   : > { %v3626_v51 = vmul.f32 0.25, %v3617_v50 }
 0xdfd   : > { %v3629_v56 = vsel %vm2710_vm2, %v3626_v51, -inf }
 0xdfe   : > { %3630 = vmax.xlane.f32.xlu0 %v3629_v56 }
 0xe02   : > { %v3619_v57 = vpop.f32.mrf.mxu2 }
 0xe03   : > { %v3627_v53 = vmul.f32 0.25, %v3619_v57 }
 0xe05   : > { %v3632_v32 = vsel %vm2710_vm2, %v3627_v53, -inf }
 0xe06   : > { %3633 = vmax.xlane.f32.xlu1 %v3632_v32 }
 0xe0a   : > { %v3622_v29 = vpop.f32.mrf.mxu2 }
 0xe0b   : > { %v3628_v30 = vmul.f32 0.25, %v3622_v29 }
 0xe0d   : > { %v3635_v39 = vsel %vm2717_vm3, %v3628_v30, -inf }
 0xe0e   : > { %3636 = vmax.xlane.f32.xlu2 %v3635_v39 }
 0xe12   : > { %v3624_v34 = vpop.f32.mrf.mxu2 }
 0xe71   : > { %v3631_v58 = vpop.xlane.xlu0 %3630 }
 0xe72   : > { %v3638_v40 = vsub.f32 %v3626_v51, %v3631_v58 }
 0xe74   : > { %v3641_v62 = vmul.f32 1.442695, %v3638_v40 }
 0xe76   : > { %7349 = vpow2.f32 %v3641_v62 }
 0xe79   : > { %v3634_v63 = vpop.xlane.xlu1 %3633 }
 0xe7a   : > { %v3639_v0 = vsub.f32 %v3627_v53, %v3634_v63 }
 0xe7c   : > { %v7350_v2 = vpop.eup %7349  ;;  %v3643_v43 = vmul.f32 1.442695, %v3639_v0 }
 0xe7d   : > { %v3647_v4 = vsel %vm2710_vm2, %v7350_v2, 0.0 }
 0xe7e   : > { %7351 = vpow2.f32 %v3643_v43  ;;  %3648 = vadd.xlane.f32.xlu0 %v3647_v4  ;;  %v7079_v43 = vld [vmem:[%s8661_s26 + $0x10] sm:$0xff] }
 0xe81   : > { %v3637_v5 = vpop.xlane.xlu2 %3636 }
 0xe82   : > { %v3640_v3 = vsub.f32 %v3628_v30, %v3637_v5 }
 0xe84   : > { %v7352_v7 = vpop.eup %7351  ;;  %v3645_v11 = vmul.f32 1.442695, %v3640_v3  ;;  %v7078_v3 = vld [vmem:[%s8661_s26 + $0x8] sm:$0xff] }
 0xe85   : > { %v3650_v8 = vsel %vm2710_vm2, %v7352_v7, 0.0 }
 0xe86   : > { %7353 = vpow2.f32 %v3645_v11  ;;  %3651 = vadd.xlane.f32.xlu1 %v3650_v8  ;;  %v7077_v11 = vld [vmem:[%s8661_s26] sm:$0xff] }
 0xe8c   : > { %v7354_v27 = vpop.eup %7353 }
 0xe8d   : > { %v3653_v15 = vsel %vm2717_vm3, %v7354_v27, 0.0 }
 0xe8e   : > { %3654 = vadd.xlane.f32.xlu2 %v3653_v15 }
 0xef1   : > { %v3649_v13 = vpop.xlane.xlu0 %3648 }
 0xef2   : > { %7355 = vrcp.f32 %v3649_v13 }
 0xef8   : > { %v7356_v20 = vpop.eup %7355 }
 0xef9   : > { %v3652_v19 = vpop.xlane.xlu1 %3651  ;;  %v3659_v22 = vmul.f32 %v7356_v20, %v7350_v2  ;;  %v7080_v2 = vld [vmem:[%s8661_s26 + $0x18] sm:$0xff] }
 0xefa   : > { %7357 = vrcp.f32 %v3652_v19  ;;  %3869 = vmatpush.bf16.msra.mxu3 %v7080_v2 }
 0xefe   : > { %3870 = vmatpush.bf16.msra.mxu3 %v7079_v43 }
 0xf00   : > { %v7358_v1 = vpop.eup %7357 }
 0xf01   : > { %v3660_v23 = vmul.f32 %v7358_v1, %v7352_v7  ;;  %v3655_v25 = vpop.xlane.xlu2 %3654 }
 0xf02   : > { %7359 = vrcp.f32 %v3655_v25  ;;  %3871 = vmatpush.bf16.msra.mxu3 %v7078_v3 }
 0xf03   : > { %v3662_v24 = vpack.c.bf16 %v3660_v23, %v3659_v22 }
 0xf05   : > { %6448 = vmatmul.msk.bf16.vlgmr.msrb.gmra.mxu0 %vm2710_vm2, %v3662_v24 }
 0xf06   : > { %3872 = vmatpush.bf16.msra.mxu3 %v7077_v11 }
 0xf08   : > { %v7360_v26 = vpop.eup %7359 }
 0xf09   : > { %v3661_v12 = vmul.f32 %v7360_v26, %v7354_v27 }
 0xf0b   : > { %v3663_v45 = vpack.c.bf16 %v3661_v12, %v3661_v12 }
 0xf15   : > { %6449 = vmatmul.msk.bf16.gmra.mxu0 %vm2710_vm2, %v3663_v45 }
 0xf82   : > { %v3684_v28 = vpop.f32.mrf.mxu0 }
 0xf8a   : > { %v3686_v17 = vpop.f32.mrf.mxu0 }
 0xf8b   : > { %v3693_v47 = vpack.c.bf16 %v3686_v17, %v3684_v28 }
 0xf8d   : > { %6456 = vmatmul.msk.bf16.vlgmr.msrb.gmra.mxu1 %vm2676_vm1, %v3693_v47 }
 0xf92   : > { %v3689_v31 = vpop.f32.mrf.mxu0 }
 0xf93   : > { %v3694_v59 = vpack.c.bf16 %v3689_v31, %v3689_v31 }
 0xf9a   : > { %v3691_v55 = vpop.f32.mrf.mxu0 }
 0xf9b   : > { %v7225_v55 = vld [vmem:[%s8662_s0] ss:$0 sm:$0xff] }
 0xf9d   : > { %6457 = vmatmul.msk.bf16.gmra.mxu1 %vm2676_vm1, %v3694_v59 }
0x100a   : > { %v3719_v35 = vpop.f32.mrf.mxu1 }
0x100b   : > { %v3728_v61 = vadd.f32 %v3719_v35, %v8166_v41 }
0x100d   : > { %v3735_v36 = vadd.f32 %v7224_v60, %v3728_v61 }
0x100f   : > { %v3738_v48 = vadd.f32 %v3735_v36, %v7969_v9 }
0x1011   : > { %v3743_v38 = vsel %vm1856_vm6, %v3738_v48, 0.0 }
0x1012   : > { %3744 = vadd.xlane.f32.xlu0 %v3743_v38  ;;  %v3721_v21 = vpop.f32.mrf.mxu1 }
0x1013   : > { %v3729_v46 = vadd.f32 %v3721_v21, %v3422_v14 }
0x1015   : > { %v3736_v49 = vadd.f32 %v7224_v60, %v3729_v46 }
0x1017   : > { %v3739_v50 = vadd.f32 %v3736_v49, %v7971_v10 }
0x1019   : > { %v3746_v51 = vsel %vm1856_vm6, %v3739_v50, 0.0 }
0x101a   : > { %3747 = vadd.xlane.f32.xlu1 %v3746_v51  ;;  %v3724_v41 = vpop.f32.mrf.mxu1 }
0x101b   : > { %v3730_v56 = vadd.f32 %v3724_v41, %v8172_v42 }
0x101d   : > { %v3737_v57 = vadd.f32 %v7224_v60, %v3730_v56 }
0x101f   : > { %v3740_v33 = vadd.f32 %v3737_v57, %v7984_v16 }
0x1021   : > { %v3749_v9 = vsel %vm1863_vm4, %v3740_v33, 0.0 }
0x1022   : > { %3750 = vadd.xlane.f32.xlu2 %v3749_v9  ;;  %v3726_v52 = vpop.f32.mrf.mxu1 }
0x1085   : > { %v3745_v44 = vpop.xlane.xlu0 %3744 }
0x1086   : > { %v3752_v53 = vmul.f32 %v3745_v44, %v7922_v54  ;;  %v7088_v44 = vld [vmem:[%s8664_s10 + $0x38] sm:$0xff] }
0x1087   : > { %3980 = vmatpush.bf16.msra.mxu2 %v7088_v44 }
0x1088   : > { %v3755_v32 = vsub.f32 %v3738_v48, %v3752_v53  ;;  %v7087_v53 = vld [vmem:[%s8664_s10 + $0x30] sm:$0xff] }
0x108a   : > { %v3758_v29 = vmul.f32 %v3755_v32, %v3755_v32 }
0x108b   : > { %3981 = vmatpush.bf16.msra.mxu2 %v7087_v53 }
0x108c   : > { %v3761_v10 = vsel %vm1856_vm6, %v3758_v29, 0.0  ;;  %v7085_v29 = vld [vmem:[%s8664_s10 + $0x20] sm:$0xff] }
0x108d   : > { %3762 = vadd.xlane.f32.xlu0 %v3761_v10  ;;  %v3748_v30 = vpop.xlane.xlu1 %3747  ;;  %v7084_v10 = vld [vmem:[%s8664_s10 + $0x18] sm:$0xff] }
0x108e   : > { %v3753_v42 = vmul.f32 %v3748_v30, %v7922_v54  ;;  %v7083_v30 = vld [vmem:[%s8664_s10 + $0x10] sm:$0xff] }
0x1090   : > { %v3756_v39 = vsub.f32 %v3739_v50, %v3753_v42  ;;  %v7227_v42 = vld [vmem:[%s8665_s11] ss:$0 sm:$0xff] }
0x1092   : > { %v3759_v16 = vmul.f32 %v3756_v39, %v3756_v39 }
0x1094   : > { %v3764_v34 = vsel %vm1856_vm6, %v3759_v16, 0.0 }
0x1095   : > { %3765 = vadd.xlane.f32.xlu1 %v3764_v34  ;;  %v3751_v58 = vpop.xlane.xlu2 %3750 }
0x1096   : > { %v3754_v40 = vmul.f32 %v3751_v58, %v7922_v54  ;;  %v7081_v58 = vld [vmem:[%s8664_s10] sm:$0xff] }
0x1098   : > { %v8202_v62 = vsub.f32 %v3740_v33, %v3754_v40 }
0x109a   : > { %v3760_v63 = vmul.f32 %v8202_v62, %v8202_v62 }
0x109c   : > { %v3767_v0 = vsel %vm1863_vm4, %v3760_v63, 0.0 }
0x109d   : > { %3768 = vadd.xlane.f32.xlu2 %v3767_v0 }
0x1100   : > { %v3763_v4 = vpop.xlane.xlu0 %3762 }
0x1101   : > { %v3770_v5 = vmul.f32 %v3763_v4, %v7922_v54 }
0x1103   : > { %v3773_v7 = vadd.f32 1e-05, %v3770_v5 }
0x1105   : > { %7361 = vrsqrt.f32 %v3773_v7  ;;  %vm3782_vm7 = vweird.f32 %v3773_v7 }
0x1108   : > { %v3766_v8 = vpop.xlane.xlu1 %3765 }
0x1109   : > { %v3771_v27 = vmul.f32 %v3766_v8, %v7922_v54 }
0x110b   : > { %v7362_v15 = vpop.eup %7361  ;;  %v3774_v13 = vadd.f32 1e-05, %v3771_v27 }
0x110c   : > { %v3777_v18 = vmul.f32 %v7362_v15, %v3773_v7  ;;  %vm3783_vm5 = vweird.f32 %v7362_v15 }
0x110d   : > { %7363 = vrsqrt.f32 %v3774_v13  ;;  %vm3784_vm8 = vmor %vm3782_vm7, %vm3783_vm5  ;;  %vm3792_vm10 = vweird.f32 %v3774_v13 }
0x110e   : > { %v3778_v19 = vmul.f32 %v7362_v15, %v3777_v18 }
0x1110   : > { %v3779_v20 = vmul.f32 0.5, %v3778_v19  ;;  %v3769_v1 = vpop.xlane.xlu2 %3768 }
0x1111   : > { %v3772_v22 = vmul.f32 %v3769_v1, %v7922_v54 }
0x1112   : > { %v3780_v23 = vsub.f32 1.5, %v3779_v20 }
0x1113   : > { %v7364_v24 = vpop.eup %7363  ;;  %v3775_v25 = vadd.f32 1e-05, %v3772_v22 }
0x1114   : > { %v3781_v26 = vmul.f32 %v7362_v15, %v3780_v23  ;;  %v3787_v12 = vmul.f32 %v7364_v24, %v3774_v13  ;;  %vm3793_vm9 = vweird.f32 %v7364_v24 }
0x1115   : > { %7365 = vrsqrt.f32 %v3775_v25  ;;  %vm3794_vm11 = vmor %vm3792_vm10, %vm3793_vm9  ;;  %vm3802_vm13 = vweird.f32 %v3775_v25 }
0x1116   : > { %v3788_v45 = vmul.f32 %v7364_v24, %v3787_v12  ;;  %v3785_v28 = vsel %vm3784_vm8, %v7362_v15, %v3781_v26 }
0x1117   : > { %v3806_v59 = vmul.f32 %v3785_v28, %v3755_v32  ;;  %v7086_v32 = vld [vmem:[%s8664_s10 + $0x28] sm:$0xff] }
0x1118   : > { %v3789_v17 = vmul.f32 0.5, %v3788_v45  ;;  %3982 = vmatpush.bf16.msra.mxu2 %v7086_v32 }
0x1119   : > { %v3812_v48 = vmul.f32 %v7225_v55, %v3806_v59 }
0x111a   : > { %v3790_v47 = vsub.f32 1.5, %v3789_v17 }
0x111b   : > { %v7366_v31 = vpop.eup %7365  ;;  %v8216_v49 = vadd.f32 %v7226_v37, %v3812_v48 }
0x111c   : > { %v3791_v60 = vmul.f32 %v7364_v24, %v3790_v47  ;;  %v3797_v35 = vmul.f32 %v7366_v31, %v3775_v25  ;;  %vm3803_vm12 = vweird.f32 %v7366_v31  ;;  %3983 = vmatpush.bf16.msra.mxu2 %v7085_v29 }
0x111d   : > { %vm3804_vm14 = vmor %vm3802_vm13, %vm3803_vm12 }
0x111e   : > { %v3795_v61 = vsel %vm3794_vm11, %v7364_v24, %v3791_v60  ;;  %v3798_v36 = vmul.f32 %v7366_v31, %v3797_v35 }
0x111f   : > { %v3807_v14 = vmul.f32 %v3795_v61, %v3756_v39  ;;  %v7082_v39 = vld [vmem:[%s8664_s10 + $0x8] sm:$0xff]  ;;  %v7228_v61 = vld [vmem:[%s8666_s3] ss:$0 sm:$0xff] }
0x1120   : > { %v3799_v38 = vmul.f32 0.5, %v3798_v36  ;;  %3984 = vmatpush.bf16.msra.mxu2 %v7084_v10 }
0x1121   : > { %v3813_v21 = vmul.f32 %v7225_v55, %v3807_v14 }
0x1122   : > { %v3800_v46 = vsub.f32 1.5, %v3799_v38 }
0x1123   : > { %v8218_v50 = vadd.f32 %v7226_v37, %v3813_v21 }
0x1124   : > { %v3801_v51 = vmul.f32 %v7366_v31, %v3800_v46  ;;  %3985 = vmatpush.bf16.msra.mxu2 %v7083_v30 }
0x1125   : > { %v3821_v41 = vpack.c.bf16 %v8218_v50, %v8216_v49 }
0x1126   : > { %v3805_v56 = vsel %vm3804_vm14, %v7366_v31, %v3801_v51 }
0x1127   : > { %6474 = vmatmul.msk.bf16.vlgmr.msra.gmra.mxu3 %vm1856_vm6, %v3821_v41  ;;  %v3808_v57 = vmul.f32 %v3805_v56, %v8202_v62 }
0x1128   : > { %3986 = vmatpush.bf16.msra.mxu2 %v7082_v39 }
0x1129   : > { %v3814_v33 = vmul.f32 %v7225_v55, %v3808_v57 }
0x112b   : > { %v8224_v9 = vadd.f32 %v7226_v37, %v3814_v33 }
0x112c   : > { %3987 = vmatpush.bf16.msra.mxu2 %v7081_v58 }
0x112d   : > { %v3822_v52 = vpack.c.bf16 %v8224_v9, %v8224_v9 }
0x1137   : > { %6475 = vmatmul.msk.bf16.gmra.mxu3 %vm1856_vm6, %v3822_v52 }
0x11aa   : > { %v3874_v16 = vpop.f32.mrf.mxu3 }
0x11ab   : > { %v3875_v34 = vadd.f32 %v7227_v42, %v3874_v16 }
0x11ad   : > { %v3883_v40 = vmul.f32 %v3875_v34, %v3875_v34 }
0x11af   : > { %v3886_v62 = vmul.f32 %v3883_v40, %v3875_v34 }
0x11b1   : > { %v3889_v63 = vmul.f32 0.044715, %v3886_v62  ;;  %v7092_v62 = vld [vmem:[%s7568_s12 + $0x98] sm:$0xff] }
0x11b2   : > { %v3876_v0 = vpop.f32.mrf.mxu3  ;;  %4131 = vmatpush.bf16.msra.mxu0 %v7092_v62 }
0x11b3   : > { %v3892_v2 = vadd.f32 %v3889_v63, %v3875_v34  ;;  %v3877_v43 = vadd.f32 %v7227_v42, %v3876_v0  ;;  %v7096_v63 = vld [vmem:[%s7578_s27 + $0x98] sm:$0xff] }
0x11b4   : > { %v7100_v0 = vld [vmem:[%s8653_s7 + $0x98] sm:$0xff]  ;;  %4187 = vmatpush.bf16.msra.mxu1 %v7096_v63 }
0x11b5   : > { %v3895_v4 = vmul.f32 0.7978846, %v3892_v2  ;;  %v3884_v5 = vmul.f32 %v3877_v43, %v3877_v43  ;;  %4243 = vmatpush.bf16.msrb.mxu3 %v7100_v0  ;;  %v7091_v2 = vld [vmem:[%s7568_s12 + $0x90] sm:$0xff] }
0x11b6   : > { %4132 = vmatpush.bf16.msra.mxu0 %v7091_v2 }
0x11b7   : > { %v3887_v3 = vmul.f32 %v3884_v5, %v3877_v43  ;;  %7367 = vtanh.f32 %v3895_v4  ;;  %v7099_v4 = vld [vmem:[%s8653_s7 + $0x90] sm:$0xff] }
0x11b9   : > { %v3890_v7 = vmul.f32 0.044715, %v3887_v3  ;;  %4244 = vmatpush.bf16.msrb.mxu3 %v7099_v4 }
0x11ba   : > { %v3879_v11 = vpop.f32.mrf.mxu3 }
0x11bb   : > { %v3893_v8 = vadd.f32 %v3890_v7, %v3877_v43  ;;  %v3880_v27 = vadd.f32 %v7227_v42, %v3879_v11  ;;  %v7090_v7 = vld [vmem:[%s7568_s12 + $0x88] sm:$0xff] }
0x11bc   : > { %v7094_v11 = vld [vmem:[%s7578_s27 + $0x88] sm:$0xff]  ;;  %4133 = vmatpush.bf16.msra.mxu0 %v7090_v7 }
0x11bd   : > { %v3896_v15 = vmul.f32 0.7978846, %v3893_v8  ;;  %v3885_v13 = vmul.f32 %v3880_v27, %v3880_v27  ;;  %v7368_v18 = vpop.eup %7367  ;;  %v7098_v8 = vld [vmem:[%s8653_s7 + $0x88] sm:$0xff] }
0x11be   : > { %v3901_v1 = vadd.f32 1.0, %v7368_v18  ;;  %4245 = vmatpush.bf16.msrb.mxu3 %v7098_v8  ;;  %v7097_v18 = vld [vmem:[%s8653_s7 + $0x80] sm:$0xff] }
0x11bf   : > { %7369 = vtanh.f32 %v3896_v15  ;;  %v3888_v19 = vmul.f32 %v3885_v13, %v3880_v27  ;;  %v7089_v15 = vld [vmem:[%s7568_s12 + $0x80] sm:$0xff] }
0x11c0   : > { %v3904_v26 = vmul.f32 0.5, %v3901_v1  ;;  %v7093_v13 = vld [vmem:[%s7578_s27 + $0x80] sm:$0xff]  ;;  %4134 = vmatpush.bf16.msra.mxu0 %v7089_v15 }
0x11c1   : > { %v3891_v20 = vmul.f32 0.044715, %v3888_v19 }
0x11c2   : > { %v3881_v22 = vpop.f32.mrf.mxu3  ;;  %v3907_v28 = vmul.f32 %v3904_v26, %v3875_v34  ;;  %4246 = vmatpush.bf16.msrb.mxu3 %v7097_v18  ;;  %v7233_v18 = vld [vmem:[%s8656_s15 + $0x4] ss:$0 sm:$0xff] }
0x11c3   : > { %v3894_v23 = vadd.f32 %v3891_v20, %v3880_v27 }
0x11c5   : > { %v7370_v24 = vpop.eup %7369  ;;  %v3897_v25 = vmul.f32 0.7978846, %v3894_v23 }
0x11c6   : > { %v3902_v12 = vadd.f32 1.0, %v7370_v24 }
0x11c7   : > { %7371 = vtanh.f32 %v3897_v25 }
0x11c8   : > { %v3905_v45 = vmul.f32 0.5, %v3902_v12 }
0x11ca   : > { %v3908_v17 = vmul.f32 %v3905_v45, %v3877_v43  ;;  %v7095_v43 = vld [vmem:[%s7578_s27 + $0x90] sm:$0xff] }
0x11cb   : > { %4188 = vmatpush.bf16.msra.mxu1 %v7095_v43 }
0x11cc   : > { %v3910_v47 = vpack.c.bf16 %v3908_v17, %v3907_v28 }
0x11cd   : > { %v7372_v31 = vpop.eup %7371 }
0x11ce   : > { %3988 = vmatmul.bf16.vlgmr.msra.gmra.mxu2 %v3910_v47  ;;  %v3903_v55 = vadd.f32 1.0, %v7372_v31 }
0x11cf   : > { %4189 = vmatpush.bf16.msra.mxu1 %v7094_v11 }
0x11d0   : > { %v3906_v59 = vmul.f32 0.5, %v3903_v55 }
0x11d2   : > { %v3909_v60 = vmul.f32 %v3906_v59, %v3880_v27 }
0x11d3   : > { %4190 = vmatpush.bf16.msra.mxu1 %v7093_v13 }
0x11d4   : > { %v3911_v35 = vpack.c.bf16 %v3909_v60, %v3909_v60 }
0x11de   : > { %3993 = vmatmul.bf16.gmra.mxu2 %v3911_v35  ;;  %v7105_v35 = vld [vmem:[%s7568_s12 + $0xb8] sm:$0xff] }
0x11df   : > { %4405 = vmatpush.bf16.msrb.mxu1 %v7105_v35 }
0x1251   : > { %v3989_v36 = vpop.f32.mrf.mxu2 }
0x1252   : > { %v3990_v37 = vadd.f32 %v7228_v61, %v3989_v36 }
0x1254   : > { %v3998_v48 = vadd.f32 %v3990_v37, %v8216_v49  ;;  %v7104_v37 = vld [vmem:[%s7568_s12 + $0xb0] sm:$0xff] }
0x1255   : > { %4406 = vmatpush.bf16.msrb.mxu1 %v7104_v37  ;;  %v7111_v37 = vld [vmem:[%s8653_s7 + $0xa8] sm:$0xff] }
0x1256   : > { %v4003_v14 = vsel %vm1856_vm6, %v3998_v48, 0.0 }
0x1257   : > { %4004 = vadd.xlane.f32.xlu0 %v4003_v14 }
0x1259   : > { %v3991_v38 = vpop.f32.mrf.mxu2 }
0x125a   : > { %v3992_v21 = vadd.f32 %v7228_v61, %v3991_v38  ;;  %v7229_v38 = vld [vmem:[%s8667_s5] ss:$0 sm:$0xff] }
0x125c   : > { %v3999_v46 = vadd.f32 %v3992_v21, %v8218_v50 }
0x125e   : > { %v4006_v51 = vsel %vm1856_vm6, %v3999_v46, 0.0 }
0x125f   : > { %4007 = vadd.xlane.f32.xlu1 %v4006_v51 }
0x1261   : > { %v3994_v41 = vpop.f32.mrf.mxu2 }
0x1262   : > { %v3995_v56 = vadd.f32 %v7228_v61, %v3994_v41  ;;  %v7109_v61 = vld [vmem:[%s7578_s27 + $0xb8] sm:$0xff] }
0x1263   : > { %4461 = vmatpush.bf16.msra.mxu3 %v7109_v61 }
0x1264   : > { %v4000_v57 = vadd.f32 %v3995_v56, %v8224_v9 }
0x1266   : > { %v4009_v33 = vsel %vm1863_vm4, %v4000_v57, 0.0 }
0x1267   : > { %4010 = vadd.xlane.f32.xlu2 %v4009_v33  ;;  %v7107_v33 = vld [vmem:[%s7578_s27 + $0xa8] sm:$0xff] }
0x1269   : > { %v3996_v52 = vpop.f32.mrf.mxu2 }
0x126a   : > { %v7230_v52 = vld [vmem:[%s7643_s4] ss:$0 sm:$0xff] }
0x12ca   : > { %v4005_v44 = vpop.xlane.xlu0 %4004 }
0x12cb   : > { %v4012_v49 = vmul.f32 %v4005_v44, %v7922_v54 }
0x12cd   : > { %v8246_v53 = vsub.f32 %v3998_v48, %v4012_v49  ;;  %v7108_v48 = vld [vmem:[%s7578_s27 + $0xb0] sm:$0xff] }
0x12ce   : > { %4462 = vmatpush.bf16.msra.mxu3 %v7108_v48  ;;  %v8335_v48 = vld [vmem:[%s8658_s18 + $0x5] ss:$0 sm:$0xff] }
0x12cf   : > { %v4018_v50 = vmul.f32 %v8246_v53, %v8246_v53 }
0x12d1   : > { %v4021_v32 = vsel %vm1856_vm6, %v4018_v50, 0.0 }
0x12d2   : > { %v4008_v29 = vpop.xlane.xlu1 %4007  ;;  %4022 = vadd.xlane.f32.xlu0 %v4021_v32  ;;  %4463 = vmatpush.bf16.msra.mxu3 %v7107_v33 }
0x12d3   : > { %v4013_v9 = vmul.f32 %v4008_v29, %v7922_v54 }
0x12d5   : > { %v8252_v10 = vsub.f32 %v3999_v46, %v4013_v9  ;;  %v7106_v9 = vld [vmem:[%s7578_s27 + $0xa0] sm:$0xff] }
0x12d6   : > { %4464 = vmatpush.bf16.msra.mxu3 %v7106_v9 }
0x12d7   : > { %v4019_v30 = vmul.f32 %v8252_v10, %v8252_v10 }
0x12d9   : > { %v4024_v42 = vsel %vm1856_vm6, %v4019_v30, 0.0 }
0x12da   : > { %v4011_v39 = vpop.xlane.xlu2 %4010  ;;  %4025 = vadd.xlane.f32.xlu1 %v4024_v42 }
0x12db   : > { %v4014_v16 = vmul.f32 %v4011_v39, %v7922_v54 }
0x12dd   : > { %v8258_v34 = vsub.f32 %v4000_v57, %v4014_v16  ;;  %v7103_v57 = vld [vmem:[%s7568_s12 + $0xa8] sm:$0xff] }
0x12de   : > { %4407 = vmatpush.bf16.msrb.mxu1 %v7103_v57 }
0x12df   : > { %v4020_v58 = vmul.f32 %v8258_v34, %v8258_v34 }
0x12e1   : > { %v4027_v40 = vsel %vm1863_vm4, %v4020_v58, 0.0 }
0x12e2   : > { %4028 = vadd.xlane.f32.xlu2 %v4027_v40 }
0x1345   : > { %v4023_v5 = vpop.xlane.xlu0 %4022 }
0x1346   : > { %v4030_v3 = vmul.f32 %v4023_v5, %v7922_v54  ;;  %v7232_v5 = vld [vmem:[%s8657_s16 + $0x4] ss:$0 sm:$0xff] }
0x1348   : > { %v4033_v27 = vadd.f32 1e-05, %v4030_v3 }
0x134a   : > { %7373 = vrsqrt.f32 %v4033_v27  ;;  %vm4042_vm0 = vweird.f32 %v4033_v27 }
0x134d   : > { %v4026_v19 = vpop.xlane.xlu1 %4025 }
0x134e   : > { %v4031_v20 = vmul.f32 %v4026_v19, %v7922_v54 }
0x1350   : > { %v7374_v1 = vpop.eup %7373  ;;  %v4034_v22 = vadd.f32 1e-05, %v4031_v20 }
0x1351   : > { %v4037_v23 = vmul.f32 %v7374_v1, %v4033_v27  ;;  %vm4043_vm15 = vweird.f32 %v7374_v1 }
0x1352   : > { %7375 = vrsqrt.f32 %v4034_v22  ;;  %vm4044_vm5 = vmor %vm4042_vm0, %vm4043_vm15  ;;  %vm4052_vm8 = vweird.f32 %v4034_v22 }
0x1353   : > { %v4038_v24 = vmul.f32 %v7374_v1, %v4037_v23 }
0x1355   : > { %v4039_v25 = vmul.f32 0.5, %v4038_v24  ;;  %v4029_v26 = vpop.xlane.xlu2 %4028 }
0x1356   : > { %v4032_v12 = vmul.f32 %v4029_v26, %v7922_v54  ;;  %v7113_v26 = vld [vmem:[%s8653_s7 + $0xb8] sm:$0xff] }
0x1357   : > { %v4040_v45 = vsub.f32 1.5, %v4039_v25 }
0x1358   : > { %v7376_v28 = vpop.eup %7375  ;;  %v4035_v17 = vadd.f32 1e-05, %v4032_v12 }
0x1359   : > { %v4041_v47 = vmul.f32 %v7374_v1, %v4040_v45  ;;  %v4047_v31 = vmul.f32 %v7376_v28, %v4034_v22  ;;  %vm4053_vm7 = vweird.f32 %v7376_v28 }
0x135a   : > { %7377 = vrsqrt.f32 %v4035_v17  ;;  %vm4054_vm9 = vmor %vm4052_vm8, %vm4053_vm7  ;;  %vm4062_vm11 = vweird.f32 %v4035_v17 }
0x135b   : > { %v4048_v55 = vmul.f32 %v7376_v28, %v4047_v31  ;;  %v4045_v59 = vsel %vm4044_vm5, %v7374_v1, %v4041_v47 }
0x135c   : > { %v4066_v21 = vmul.f32 %v4045_v59, %v8246_v53  ;;  %v7102_v53 = vld [vmem:[%s7568_s12 + $0xa0] sm:$0xff]  ;;  %v7112_v59 = vld [vmem:[%s8653_s7 + $0xb0] sm:$0xff] }
0x135d   : > { %v4049_v60 = vmul.f32 0.5, %v4048_v55  ;;  %4408 = vmatpush.bf16.msrb.mxu1 %v7102_v53 }
0x135e   : > { %v4072_v44 = vmul.f32 %v7229_v38, %v4066_v21 }
0x135f   : > { %v4050_v36 = vsub.f32 1.5, %v4049_v60 }
0x1360   : > { %v7378_v14 = vpop.eup %7377  ;;  %v8290_v30 = vadd.f32 %v7230_v52, %v4072_v44  ;;  %v7235_v44 = vld [vmem:[%s8657_s16 + $0x5] ss:$0 sm:$0xff] }
0x1361   : > { %v4051_v46 = vmul.f32 %v7376_v28, %v4050_v36  ;;  %v4057_v51 = vmul.f32 %v7378_v14, %v4035_v17  ;;  %vm4063_vm10 = vweird.f32 %v7378_v14 }
0x1362   : > { %vm4064_vm12 = vmor %vm4062_vm11, %vm4063_vm10 }
0x1363   : > { %v4055_v41 = vsel %vm4054_vm9, %v7376_v28, %v4051_v46  ;;  %v4058_v56 = vmul.f32 %v7378_v14, %v4057_v51  ;;  %v7231_v28 = vld [vmem:[%s8658_s18 + $0x4] ss:$0 sm:$0xff] }
0x1364   : > { %v4067_v49 = vmul.f32 %v4055_v41, %v8252_v10 }
0x1365   : > { %v4059_v50 = vmul.f32 0.5, %v4058_v56 }
0x1366   : > { %v4073_v32 = vmul.f32 %v7229_v38, %v4067_v49 }
0x1367   : > { %v4060_v29 = vsub.f32 1.5, %v4059_v50 }
0x1368   : > { %v8292_v42 = vadd.f32 %v7230_v52, %v4073_v32 }
0x1369   : > { %v4061_v39 = vmul.f32 %v7378_v14, %v4060_v29 }
0x136a   : > { %v8296_v16 = vpack.c.bf16 %v8292_v42, %v8290_v30 }
0x136b   : > { %v4065_v10 = vsel %vm4064_vm12, %v7378_v14, %v4061_v39 }
0x136c   : > { %6533 = vmatmul.msk.bf16.vlgmr.msra.gmra.mxu0 %vm1856_vm6, %v8296_v16  ;;  %6560 = vmatmul.msk.bf16.vlgmr.msra.gmra.mxu1 %vm1856_vm6, %v8296_v16  ;;  %v4068_v58 = vmul.f32 %v4065_v10, %v8258_v34 }
0x136d   : > { %6587 = vmatmul.msk.bf16.vlgmr.msrb.gmra.mxu3 %vm1856_vm6, %v8296_v16 }
0x136e   : > { %v4074_v40 = vmul.f32 %v7229_v38, %v4068_v58  ;;  %v7110_v38 = vld [vmem:[%s8653_s7 + $0xa0] sm:$0xff] }
0x1370   : > { %v8305_v62 = vadd.f32 %v7230_v52, %v4074_v40 }
0x1372   : > { %v8309_v63 = vpack.c.bf16 %v8305_v62, %v8305_v62 }
0x137c   : > { %6534 = vmatmul.msk.bf16.gmra.mxu0 %vm1856_vm6, %v8309_v63  ;;  %6561 = vmatmul.msk.bf16.gmra.mxu1 %vm1856_vm6, %v8309_v63 }
0x137d   : > { %6588 = vmatmul.msk.bf16.gmra.mxu3 %vm1856_vm6, %v8309_v63 }
0x138c   : > { %6620 = vmatmul.msk.bf16.vlgmr.msrb.gmra.mxu1 %vm1856_vm6, %v8296_v16 }
0x138d   : > { %6647 = vmatmul.msk.bf16.vlgmr.msra.gmra.mxu3 %vm1856_vm6, %v8296_v16 }
0x139c   : > { %6621 = vmatmul.msk.bf16.gmra.mxu1 %vm1856_vm6, %v8309_v63 }
0x139d   : > { %6648 = vmatmul.msk.bf16.gmra.mxu3 %vm1856_vm6, %v8309_v63 }
0x13e9   : > { %v4136_v34 = vpop.f32.mrf.mxu0  ;;  %v4192_v0 = vpop.f32.mrf.mxu1 }
0x13ea   : > { %v4193_v19 = vadd.f32 %v7232_v5, %v4192_v0  ;;  %v4137_v61 = vadd.f32 %v7231_v28, %v4136_v34 }
0x13f0   : > { %v4248_v2 = vpop.f32.mrf.mxu3 }
0x13f1   : > { %v4138_v43 = vpop.f32.mrf.mxu0  ;;  %v4194_v4 = vpop.f32.mrf.mxu1  ;;  %v4249_v47 = vadd.f32 %v7233_v18, %v4248_v2 }
0x13f2   : > { %v4195_v15 = vadd.f32 %v7232_v5, %v4194_v4  ;;  %v4139_v31 = vadd.f32 %v7231_v28, %v4138_v43 }
0x13f4   : > { %v4259_v24 = vpack.c.bf16 %v4195_v15, %v4193_v19  ;;  %v4257_v36 = vpack.c.bf16 %v4139_v31, %v4137_v61 }
0x13f6   : > { %v4268_v17 = vsel %vm2676_vm1, %v4259_v24, 0 }
0x13f8   : > { %v4250_v3 = vpop.f32.mrf.mxu3 }
0x13f9   : > { %v4141_v7 = vpop.f32.mrf.mxu0  ;;  %v4197_v11 = vpop.f32.mrf.mxu1  ;;  %v4251_v12 = vadd.f32 %v7233_v18, %v4250_v3 }
0x13fa   : > { %v4198_v8 = vadd.f32 %v7232_v5, %v4197_v11  ;;  %v4142_v56 = vadd.f32 %v7231_v28, %v4141_v7 }
0x13fb   : > { %v4329_v60 = vpack.c.bf16 %v4251_v12, %v4249_v47 }
0x13fc   : > { %v4260_v27 = vpack.c.bf16 %v4198_v8, %v4198_v8  ;;  %v4258_v52 = vpack.c.bf16 %v4142_v56, %v4142_v56 }
0x13fe   : > { %v4271_v13 = vsel %vm2676_vm1, %v4260_v27, 0 }
0x13ff   : > { %4279 = vmatpush.bf16.xpose.msrb.mxu2 %v4271_v13  ;;  %v7236_v13 = vld [vmem:[%s8656_s15 + $0x5] ss:$0 sm:$0xff] }
0x1400   : > { %v4253_v20 = vpop.f32.mrf.mxu3 }
0x1401   : > { %v4254_v1 = vadd.f32 %v7233_v18, %v4253_v20  ;;  %v4143_v22 = vpop.f32.mrf.mxu0  ;;  %v4199_v23 = vpop.f32.mrf.mxu1 }
0x1403   : > { %v4330_v25 = vpack.c.bf16 %v4254_v1, %v4254_v1 }
0x1405   : > { %v4338_v45 = vand.u32 %v4330_v25, %v7670_v6 }
0x1407   : > { %4346 = vmatpush.bf16.msrb.mxu0 %v4338_v45  ;;  %4280 = vmatpush.bf16.xpose.msrb.mxu2 %v4268_v17 }
0x1408   : > { %v4255_v55 = vpop.f32.mrf.mxu3 }
0x1409   : > { %v4410_v35 = vpop.f32.mrf.mxu1 }
0x140a   : > { %v8340_v46 = vadd.f32 %v8335_v48, %v4410_v35 }
0x140b   : > { %4347 = vmatpush.bf16.msrb.mxu0 %v4329_v60 }
0x140e   : > { %6589 = vmatmul.msk.bf16.vlgmr.msrb.gmra.mxu2 %vm2676_vm1, %v4257_v36 }
0x140f   : > { %4517 = vmatpush.bf16.msra.mxu2 %v7113_v26 }
0x1410   : > { %v4466_v14 = vpop.f32.mrf.mxu3 }
0x1411   : > { %v4412_v21 = vpop.f32.mrf.mxu1  ;;  %v4467_v39 = vadd.f32 %v7235_v44, %v4466_v14 }
0x1412   : > { %v8343_v51 = vadd.f32 %v8335_v48, %v4412_v21 }
0x1413   : > { %4518 = vmatpush.bf16.msra.mxu2 %v7112_v59 }
0x1414   : > { %v4531_v41 = vpack.c.bf16 %v8343_v51, %v8340_v46 }
0x1417   : > { %4519 = vmatpush.bf16.msra.mxu2 %v7111_v37 }
0x1418   : > { %v4468_v57 = vpop.f32.mrf.mxu3 }
0x1419   : > { %v8347_v33 = vpop.f32.mrf.mxu1  ;;  %v4469_v53 = vadd.f32 %v7235_v44, %v4468_v57 }
0x141b   : > { %4520 = vmatpush.bf16.msra.mxu2 %v7110_v38  ;;  %v4533_v58 = vpack.c.bf16 %v4469_v53, %v4467_v39  ;;  %v7117_v39 = vld [vmem:[%s7568_s12 + $0xd0] sm:$0xff] }
0x141d   : > { %v4542_v40 = vsel %vm2676_vm1, %v4533_v58, 0  ;;  %v7115_v58 = vld [vmem:[%s7568_s12 + $0xc0] sm:$0xff] }
0x141e   : > { %6590 = vmatmul.msk.bf16.gmra.mxu2 %vm2676_vm1, %v4258_v52 }
0x1420   : > { %v4471_v49 = vpop.f32.mrf.mxu3 }
0x1421   : > { %v4472_v50 = vadd.f32 %v7235_v44, %v4471_v49  ;;  %v4417_v32 = vpop.f32.mrf.mxu1 }
0x1423   : > { %v4534_v29 = vpack.c.bf16 %v4472_v50, %v4472_v50 }
0x1425   : > { %v4545_v9 = vsel %vm2676_vm1, %v4534_v29, 0 }
0x1426   : > { %4553 = vmatpush.bf16.xpose.msra.mxu0 %v4545_v9  ;;  %v7118_v9 = vld [vmem:[%s7568_s12 + $0xd8] sm:$0xff] }
0x1428   : > { %v4473_v10 = vpop.f32.mrf.mxu3 }
0x1429   : > { %v7116_v10 = vld [vmem:[%s7568_s12 + $0xc8] sm:$0xff] }
0x142e   : > { %4554 = vmatpush.bf16.xpose.msra.mxu0 %v4542_v40  ;;  %6674 = vmatmul.msk.bf16.vlgmr.msra.gmra.mxu2 %vm1856_vm6, %v8296_v16  ;;  %v4416_v40 = vadd.f32 %v8335_v48, %v8347_v33 }
0x143e   : > { %6675 = vmatmul.msk.bf16.gmra.mxu2 %vm1856_vm6, %v8309_v63 }
0x1491   : > { %v4282_v34 = vpop.f32.mrf.mxu2 }
0x1492   : > { %v4291_v0 = vmul.f32 0.25, %v4282_v34  ;;  %v4532_v34 = vpack.c.bf16 %v4416_v40, %v4416_v40 }
0x1494   : > { %v4294_v2 = vsel %vm2710_vm2, %v4291_v0, -inf }
0x1495   : > { %4295 = vmax.xlane.f32.xlu0 %v4294_v2 }
0x1499   : > { %v4284_v43 = vpop.f32.mrf.mxu2 }
0x149a   : > { %v4292_v4 = vmul.f32 0.25, %v4284_v43 }
0x149c   : > { %v4297_v5 = vsel %vm2710_vm2, %v4292_v4, -inf }
0x149d   : > { %4298 = vmax.xlane.f32.xlu1 %v4297_v5 }
0x14a1   : > { %v4287_v3 = vpop.f32.mrf.mxu2 }
0x14a2   : > { %v4293_v7 = vmul.f32 0.25, %v4287_v3 }
0x14a4   : > { %v4300_v11 = vsel %vm2717_vm3, %v4293_v7, -inf }
0x14a5   : > { %4301 = vmax.xlane.f32.xlu2 %v4300_v11 }
0x14a9   : > { %v4289_v8 = vpop.f32.mrf.mxu2 }
0x14b1   : > { %v4522_v27 = vpop.f32.mrf.mxu2 }
0x14b2   : > { %v4523_v23 = vadd.f32 %v7236_v13, %v4522_v27 }
0x14b9   : > { %v4524_v15 = vpop.f32.mrf.mxu2 }
0x14ba   : > { %v4525_v1 = vadd.f32 %v7236_v13, %v4524_v15 }
0x14bc   : > { %v4603_v25 = vpack.c.bf16 %v4525_v1, %v4523_v23 }
0x14c1   : > { %v4527_v18 = vpop.f32.mrf.mxu2 }
0x14c2   : > { %v4528_v19 = vadd.f32 %v7236_v13, %v4527_v18 }
0x14c4   : > { %v4604_v20 = vpack.c.bf16 %v4528_v19, %v4528_v19  ;;  %v8389_v19 = vld [vmem:[%s8658_s18 + $0x6] ss:$0 sm:$0xff] }
0x14c6   : > { %v4612_v22 = vand.u32 %v4604_v20, %v7670_v6 }
0x14c8   : > { %4620 = vmatpush.bf16.msra.mxu1 %v4612_v22 }
0x14c9   : > { %v4529_v24 = vpop.f32.mrf.mxu2 }
0x14cc   : > { %4621 = vmatpush.bf16.msra.mxu1 %v4603_v25 }
0x1508   : > { %v4296_v26 = vpop.xlane.xlu0 %4295 }
0x1509   : > { %v4303_v12 = vsub.f32 %v4291_v0, %v4296_v26  ;;  %v7101_v0 = vld [vmem:[%s8659_s22 + $0x20] sm:$0xff] }
0x150a   : > { %4686 = vmatpush.bf16.msrb.mxu2 %v7101_v0 }
0x150b   : > { %v4306_v45 = vmul.f32 1.442695, %v4303_v12 }
0x150d   : > { %7379 = vpow2.f32 %v4306_v45 }
0x1510   : > { %v4299_v28 = vpop.xlane.xlu1 %4298 }
0x1511   : > { %v4304_v17 = vsub.f32 %v4292_v4, %v4299_v28 }
0x1513   : > { %v7380_v47 = vpop.eup %7379  ;;  %v4308_v31 = vmul.f32 1.442695, %v4304_v17 }
0x1514   : > { %v4312_v55 = vsel %vm2710_vm2, %v7380_v47, 0.0 }
0x1515   : > { %7381 = vpow2.f32 %v4308_v31  ;;  %4313 = vadd.xlane.f32.xlu0 %v4312_v55 }
0x1518   : > { %v4302_v59 = vpop.xlane.xlu2 %4301 }
0x1519   : > { %v4305_v60 = vsub.f32 %v4293_v7, %v4302_v59 }
0x151b   : > { %v7382_v35 = vpop.eup %7381  ;;  %v4310_v61 = vmul.f32 1.442695, %v4305_v60 }
0x151c   : > { %v4315_v36 = vsel %vm2710_vm2, %v7382_v35, 0.0 }
0x151d   : > { %7383 = vpow2.f32 %v4310_v61  ;;  %4316 = vadd.xlane.f32.xlu1 %v4315_v36 }
0x1523   : > { %v7384_v37 = vpop.eup %7383 }
0x1524   : > { %v4318_v14 = vsel %vm2717_vm3, %v7384_v37, 0.0 }
0x1525   : > { %4319 = vadd.xlane.f32.xlu2 %v4318_v14 }
0x1588   : > { %v4314_v38 = vpop.xlane.xlu0 %4313 }
0x1589   : > { %7385 = vrcp.f32 %v4314_v38 }
0x158f   : > { %v7386_v56 = vpop.eup %7385 }
0x1590   : > { %v4317_v21 = vpop.xlane.xlu1 %4316  ;;  %v4324_v52 = vmul.f32 %v7386_v56, %v7380_v47 }
0x1591   : > { %7387 = vrcp.f32 %v4317_v21 }
0x1597   : > { %v7388_v57 = vpop.eup %7387 }
0x1598   : > { %v4325_v44 = vmul.f32 %v7388_v57, %v7382_v35  ;;  %v4320_v50 = vpop.xlane.xlu2 %4319 }
0x1599   : > { %7389 = vrcp.f32 %v4320_v50 }
0x159a   : > { %v4327_v49 = vpack.c.bf16 %v4325_v44, %v4324_v52  ;;  %v7122_v44 = vld [vmem:[%s7578_s27 + $0xd8] sm:$0xff] }
0x159b   : > { %4795 = vmatpush.bf16.msrb.mxu1 %v7122_v44 }
0x159c   : > { %6591 = vmatmul.msk.bf16.vlgmr.msrb.gmra.mxu0 %vm2710_vm2, %v4327_v49  ;;  %v7121_v49 = vld [vmem:[%s7578_s27 + $0xd0] sm:$0xff] }
0x159d   : > { %4739 = vmatpush.bf16.msrb.mxu0 %v7118_v9 }
0x159f   : > { %v7390_v32 = vpop.eup %7389  ;;  %4796 = vmatpush.bf16.msrb.mxu1 %v7121_v49 }
0x15a0   : > { %v4326_v29 = vmul.f32 %v7390_v32, %v7384_v37  ;;  %v7120_v32 = vld [vmem:[%s7578_s27 + $0xc8] sm:$0xff] }
0x15a1   : > { %4740 = vmatpush.bf16.msrb.mxu0 %v7117_v39 }
0x15a2   : > { %v4328_v53 = vpack.c.bf16 %v4326_v29, %v4326_v29 }
0x15a3   : > { %4797 = vmatpush.bf16.msrb.mxu1 %v7120_v32 }
0x15a5   : > { %4741 = vmatpush.bf16.msrb.mxu0 %v7116_v10 }
0x15a9   : > { %4742 = vmatpush.bf16.msrb.mxu0 %v7115_v58 }
0x15ac   : > { %6592 = vmatmul.msk.bf16.gmra.mxu0 %vm2710_vm2, %v4328_v53  ;;  %v7119_v53 = vld [vmem:[%s7578_s27 + $0xc0] sm:$0xff] }
0x15ad   : > { %4798 = vmatpush.bf16.msrb.mxu1 %v7119_v53 }
0x15bc   : > { %6676 = vmatmul.msk.bf16.vlgmr.msra.gmra.mxu0 %vm2676_vm1, %v4531_v41 }
0x15cc   : > { %6677 = vmatmul.msk.bf16.gmra.mxu0 %vm2676_vm1, %v4532_v34 }
0x15dc   : > { %6719 = vmatmul.msk.bf16.vlgmr.msrb.gmra.mxu0 %vm1856_vm6, %v8296_v16 }
0x15ec   : > { %6720 = vmatmul.msk.bf16.gmra.mxu0 %vm1856_vm6, %v8309_v63 }
0x1619   : > { %v4349_v2 = vpop.f32.mrf.mxu0 }
0x1621   : > { %v4351_v43 = vpop.f32.mrf.mxu0 }
0x1622   : > { %v4358_v4 = vpack.c.bf16 %v4351_v43, %v4349_v2  ;;  %v7114_v43 = vld [vmem:[%s8659_s22 + $0x28] sm:$0xff] }
0x1623   : > { %4656 = vmatpush.bf16.msrb.mxu3 %v7114_v43  ;;  %v8467_v43 = vld [vmem:[%s8658_s18 + $0x7] ss:$0 sm:$0xff] }
0x1624   : > { %6692 = vmatmul.msk.bf16.vlgmr.msrb.gmra.mxu2 %vm2676_vm1, %v4358_v4  ;;  %v7126_v4 = vld [vmem:[%s8653_s7 + $0xd8] sm:$0xff] }
0x1627   : > { %4851 = vmatpush.bf16.msra.mxu3 %v7126_v4 }
0x1629   : > { %v4354_v46 = vpop.f32.mrf.mxu0 }
0x162a   : > { %v4359_v41 = vpack.c.bf16 %v4354_v46, %v4354_v46 }
0x1631   : > { %v4356_v51 = vpop.f32.mrf.mxu0 }
0x1632   : > { %v7125_v51 = vld [vmem:[%s8653_s7 + $0xd0] sm:$0xff] }
0x1633   : > { %4852 = vmatpush.bf16.msra.mxu3 %v7125_v51 }
0x1634   : > { %6693 = vmatmul.msk.bf16.gmra.mxu2 %vm2676_vm1, %v4359_v41  ;;  %v7124_v41 = vld [vmem:[%s8653_s7 + $0xc8] sm:$0xff] }
0x1637   : > { %4853 = vmatpush.bf16.msra.mxu3 %v7124_v41 }
0x1639   : > { %v4556_v48 = vpop.f32.mrf.mxu0 }
0x163a   : > { %v4565_v33 = vmul.f32 0.25, %v4556_v48 }
0x163c   : > { %v4568_v5 = vsel %vm2710_vm2, %v4565_v33, -inf }
0x163d   : > { %4569 = vmax.xlane.f32.xlu0 %v4568_v5  ;;  %v7123_v5 = vld [vmem:[%s8653_s7 + $0xc0] sm:$0xff] }
0x163e   : > { %4854 = vmatpush.bf16.msra.mxu3 %v7123_v5 }
0x1641   : > { %v4558_v3 = vpop.f32.mrf.mxu0 }
0x1642   : > { %v4566_v7 = vmul.f32 0.25, %v4558_v3 }
0x1644   : > { %v4571_v11 = vsel %vm2710_vm2, %v4566_v7, -inf }
0x1645   : > { %4572 = vmax.xlane.f32.xlu1 %v4571_v11 }
0x1649   : > { %v4561_v8 = vpop.f32.mrf.mxu0 }
0x164a   : > { %v4567_v27 = vmul.f32 0.25, %v4561_v8  ;;  %v7131_v8 = vld [vmem:[%s7568_s12 + $0xf8] sm:$0xff] }
0x164c   : > { %v4574_v15 = vsel %vm2717_vm3, %v4567_v27, -inf }
0x164d   : > { %4575 = vmax.xlane.f32.xlu2 %v4574_v15 }
0x1651   : > { %v4563_v13 = vpop.f32.mrf.mxu0 }
0x1652   : > { %v7129_v13 = vld [vmem:[%s7568_s12 + $0xe8] sm:$0xff] }
0x1659   : > { %v4744_v18 = vpop.f32.mrf.mxu0 }
0x165a   : > { %v8392_v1 = vadd.f32 %v8389_v19, %v4744_v18  ;;  %v7128_v18 = vld [vmem:[%s7568_s12 + $0xe0] sm:$0xff] }
0x1661   : > { %v4746_v20 = vpop.f32.mrf.mxu0 }
0x1662   : > { %v8395_v22 = vadd.f32 %v8389_v19, %v4746_v20 }
0x1664   : > { %v4865_v23 = vpack.c.bf16 %v8395_v22, %v8392_v1 }
0x1669   : > { %v8399_v24 = vpop.f32.mrf.mxu0 }
0x1671   : > { %v4751_v25 = vpop.f32.mrf.mxu0 }
0x1672   : > { %v7238_v25 = vld [vmem:[%s8657_s16 + $0x6] ss:$0 sm:$0xff] }
0x16a7   : > { %v8401_v26 = vpop.f32.mrf.mxu2 }
0x16af   : > { %v8403_v12 = vpop.f32.mrf.mxu2 }
0x16b0   : > { %v4570_v45 = vpop.xlane.xlu0 %4569 }
0x16b1   : > { %v4577_v28 = vsub.f32 %v4565_v33, %v4570_v45 }
0x16b3   : > { %v4580_v17 = vmul.f32 1.442695, %v4577_v28 }
0x16b5   : > { %7391 = vpow2.f32 %v4580_v17 }
0x16b7   : > { %v8405_v47 = vpop.f32.mrf.mxu2 }
0x16b8   : > { %v4573_v31 = vpop.xlane.xlu1 %4572 }
0x16b9   : > { %v4578_v55 = vsub.f32 %v4566_v7, %v4573_v31 }
0x16bb   : > { %v7392_v59 = vpop.eup %7391  ;;  %v4582_v60 = vmul.f32 1.442695, %v4578_v55 }
0x16bc   : > { %v4586_v35 = vsel %vm2710_vm2, %v7392_v59, 0.0 }
0x16bd   : > { %7393 = vpow2.f32 %v4582_v60  ;;  %4587 = vadd.xlane.f32.xlu0 %v4586_v35 }
0x16bf   : > { %v4695_v61 = vpop.f32.mrf.mxu2 }
0x16c0   : > { %v4576_v36 = vpop.xlane.xlu2 %4575  ;;  %v7135_v61 = vld [vmem:[%s7578_s27 + $0xf8] sm:$0xff] }
0x16c1   : > { %v4579_v37 = vsub.f32 %v4567_v27, %v4576_v36  ;;  %v7130_v27 = vld [vmem:[%s7568_s12 + $0xf0] sm:$0xff] }
0x16c3   : > { %v7394_v14 = vpop.eup %7393  ;;  %v4584_v38 = vmul.f32 1.442695, %v4579_v37  ;;  %v7134_v37 = vld [vmem:[%s7578_s27 + $0xf0] sm:$0xff] }
0x16c4   : > { %v4589_v21 = vsel %vm2710_vm2, %v7394_v14, 0.0 }
0x16c5   : > { %7395 = vpow2.f32 %v4584_v38  ;;  %4590 = vadd.xlane.f32.xlu1 %v4589_v21  ;;  %v7132_v38 = vld [vmem:[%s7578_s27 + $0xe0] sm:$0xff]  ;;  %v4750_v21 = vadd.f32 %v8389_v19, %v8399_v24 }
0x16cb   : > { %v7396_v56 = vpop.eup %7395 }
0x16cc   : > { %v4592_v57 = vsel %vm2717_vm3, %v7396_v56, 0.0 }
0x16cd   : > { %4593 = vadd.xlane.f32.xlu2 %v4592_v57 }
0x1730   : > { %v4588_v52 = vpop.xlane.xlu0 %4587 }
0x1731   : > { %7397 = vrcp.f32 %v4588_v52  ;;  %v7239_v52 = vld [vmem:[%s8656_s15 + $0x6] ss:$0 sm:$0xff] }
0x1737   : > { %v7398_v29 = vpop.eup %7397 }
0x1738   : > { %v4591_v50 = vpop.xlane.xlu1 %4590  ;;  %v4598_v39 = vmul.f32 %v7398_v29, %v7392_v59 }
0x1739   : > { %7399 = vrcp.f32 %v4591_v50 }
0x173f   : > { %v7400_v9 = vpop.eup %7399 }
0x1740   : > { %v4599_v10 = vmul.f32 %v7400_v9, %v7394_v14  ;;  %v4594_v40 = vpop.xlane.xlu2 %4593  ;;  %v7133_v14 = vld [vmem:[%s7578_s27 + $0xe8] sm:$0xff] }
0x1741   : > { %7401 = vrcp.f32 %v4594_v40 }
0x1742   : > { %v4601_v58 = vpack.c.bf16 %v4599_v10, %v4598_v39 }
0x1744   : > { %6678 = vmatmul.msk.bf16.vlgmr.msra.gmra.mxu1 %vm2710_vm2, %v4601_v58 }
0x1747   : > { %v7402_v34 = vpop.eup %7401 }
0x1748   : > { %v4600_v0 = vmul.f32 %v7402_v34, %v7396_v56  ;;  %v4866_v56 = vpack.c.bf16 %v4750_v21, %v4750_v21 }
0x174a   : > { %v4602_v2 = vpack.c.bf16 %v4600_v0, %v4600_v0 }
0x1754   : > { %6679 = vmatmul.msk.bf16.gmra.mxu1 %vm2710_vm2, %v4602_v2 }
0x1764   : > { %6746 = vmatmul.msk.bf16.vlgmr.msrb.gmra.mxu1 %vm1856_vm6, %v8296_v16 }
0x1774   : > { %6747 = vmatmul.msk.bf16.gmra.mxu1 %vm1856_vm6, %v8309_v63 }
0x17c1   : > { %v4623_v46 = vpop.f32.mrf.mxu1 }
0x17c9   : > { %v4625_v48 = vpop.f32.mrf.mxu1 }
0x17ca   : > { %v4632_v33 = vpack.c.bf16 %v4625_v48, %v4623_v46 }
0x17cc   : > { %6686 = vmatmul.msk.bf16.vlgmr.msrb.gmra.mxu3 %vm2676_vm1, %v4632_v33 }
0x17cd   : > { %5046 = vmatpush.bf16.msrb.mxu3 %v7131_v8 }
0x17d1   : > { %v4628_v3 = vpop.f32.mrf.mxu1  ;;  %5047 = vmatpush.bf16.msrb.mxu3 %v7130_v27 }
0x17d2   : > { %v4633_v11 = vpack.c.bf16 %v4628_v3, %v4628_v3 }
0x17d5   : > { %5048 = vmatpush.bf16.msrb.mxu3 %v7129_v13 }
0x17d9   : > { %v4630_v7 = vpop.f32.mrf.mxu1  ;;  %5049 = vmatpush.bf16.msrb.mxu3 %v7128_v18  ;;  %v7241_v18 = vld [vmem:[%s8657_s16 + $0x7] ss:$0 sm:$0xff] }
0x17da   : > { %v7127_v7 = vld [vmem:[%s8659_s22 + $0x30] sm:$0xff] }
0x17db   : > { %4990 = vmatpush.bf16.msra.mxu1 %v7127_v7 }
0x17dc   : > { %6687 = vmatmul.msk.bf16.gmra.mxu3 %vm2676_vm1, %v4633_v11 }
0x17e1   : > { %v4800_v15 = vpop.f32.mrf.mxu1 }
0x17e2   : > { %v4801_v59 = vadd.f32 %v7238_v25, %v4800_v15 }
0x17e9   : > { %v4802_v20 = vpop.f32.mrf.mxu1 }
0x17ea   : > { %v4803_v31 = vadd.f32 %v7238_v25, %v4802_v20 }
0x17ec   : > { %6773 = vmatmul.msk.bf16.vlgmr.msra.gmra.mxu3 %vm1856_vm6, %v8296_v16  ;;  %v4867_v35 = vpack.c.bf16 %v4803_v31, %v4801_v59 }
0x17ee   : > { %v4876_v36 = vsel %vm2676_vm1, %v4867_v35, 0 }
0x17f1   : > { %v4805_v45 = vpop.f32.mrf.mxu1 }
0x17f2   : > { %v4806_v28 = vadd.f32 %v7238_v25, %v4805_v45 }
0x17f4   : > { %v4868_v17 = vpack.c.bf16 %v4806_v28, %v4806_v28 }
0x17f6   : > { %v4879_v55 = vsel %vm2676_vm1, %v4868_v17, 0 }
0x17f7   : > { %4887 = vmatpush.bf16.xpose.msra.mxu2 %v4879_v55 }
0x17f9   : > { %v4807_v60 = vpop.f32.mrf.mxu1 }
0x17fc   : > { %6774 = vmatmul.msk.bf16.gmra.mxu3 %vm1856_vm6, %v8309_v63 }
0x17ff   : > { %4888 = vmatpush.bf16.xpose.msra.mxu2 %v4876_v36 }
0x1806   : > { %6775 = vmatmul.msk.bf16.vlgmr.msra.gmra.mxu2 %vm2676_vm1, %v4865_v23 }
0x1807   : > { %5102 = vmatpush.bf16.msrb.mxu2 %v7135_v61 }
0x180b   : > { %5103 = vmatpush.bf16.msrb.mxu2 %v7134_v37 }
0x180c   : > { %6812 = vmatmul.msk.bf16.vlgmr.msrb.gmra.mxu3 %vm1856_vm6, %v8296_v16 }
0x180f   : > { %5104 = vmatpush.bf16.msrb.mxu2 %v7133_v14 }
0x1813   : > { %5105 = vmatpush.bf16.msrb.mxu2 %v7132_v38 }
0x1816   : > { %6776 = vmatmul.msk.bf16.gmra.mxu2 %vm2676_vm1, %v4866_v56 }
0x181c   : > { %6813 = vmatmul.msk.bf16.gmra.mxu3 %vm1856_vm6, %v8309_v63 }
0x1826   : > { %6839 = vmatmul.msk.bf16.vlgmr.msrb.gmra.mxu2 %vm1856_vm6, %v8296_v16 }
0x1836   : > { %6840 = vmatmul.msk.bf16.gmra.mxu2 %vm1856_vm6, %v8309_v63 }
0x184f   : > { %v8457_v1 = vpop.f32.mrf.mxu3 }
0x1857   : > { %v8459_v22 = vpop.f32.mrf.mxu3 }
0x185f   : > { %v8461_v23 = vpop.f32.mrf.mxu3 }
0x1867   : > { %v4665_v57 = vpop.f32.mrf.mxu3 }
0x186f   : > { %v4856_v19 = vpop.f32.mrf.mxu3 }
0x1870   : > { %v4857_v53 = vadd.f32 %v7239_v52, %v4856_v19 }
0x1877   : > { %v4858_v24 = vpop.f32.mrf.mxu3 }
0x1878   : > { %v4859_v32 = vadd.f32 %v7239_v52, %v4858_v24 }
0x187a   : > { %v4937_v39 = vpack.c.bf16 %v4859_v32, %v4857_v53  ;;  %v7138_v53 = vld [vmem:[%s8653_s7 + $0xf0] sm:$0xff] }
0x187f   : > { %v4861_v44 = vpop.f32.mrf.mxu3 }
0x1880   : > { %v4862_v49 = vadd.f32 %v7239_v52, %v4861_v44 }
0x1882   : > { %v4938_v50 = vpack.c.bf16 %v4862_v49, %v4862_v49 }
0x1884   : > { %v4946_v29 = vand.u32 %v4938_v50, %v7670_v6 }
0x1886   : > { %4954 = vmatpush.bf16.msra.mxu0 %v4946_v29  ;;  %v7139_v29 = vld [vmem:[%s8653_s7 + $0xf8] sm:$0xff] }
0x1887   : > { %v4863_v9 = vpop.f32.mrf.mxu3 }
0x1889   : > { %v4890_v10 = vpop.f32.mrf.mxu2 }
0x188a   : > { %v4899_v58 = vmul.f32 0.25, %v4890_v10  ;;  %4955 = vmatpush.bf16.msra.mxu0 %v4937_v39  ;;  %v7137_v39 = vld [vmem:[%s8653_s7 + $0xe8] sm:$0xff] }
0x188c   : > { %v4902_v40 = vsel %vm2710_vm2, %v4899_v58, -inf }
0x188d   : > { %4903 = vmax.xlane.f32.xlu0 %v4902_v40 }
0x188e   : > { %5158 = vmatpush.bf16.msrb.mxu0 %v7139_v29 }
0x188f   : > { %v5051_v34 = vpop.f32.mrf.mxu3 }
0x1890   : > { %v8471_v51 = vadd.f32 %v8467_v43, %v5051_v34 }
0x1891   : > { %v4892_v0 = vpop.f32.mrf.mxu2 }
0x1892   : > { %v4900_v2 = vmul.f32 0.25, %v4892_v0  ;;  %5159 = vmatpush.bf16.msrb.mxu0 %v7138_v53 }
0x1894   : > { %v4905_v4 = vsel %vm2710_vm2, %v4900_v2, -inf }
0x1895   : > { %4906 = vmax.xlane.f32.xlu1 %v4905_v4 }
0x1896   : > { %5160 = vmatpush.bf16.msrb.mxu0 %v7137_v39 }
0x1897   : > { %v5053_v46 = vpop.f32.mrf.mxu3 }
0x1898   : > { %v8474_v41 = vadd.f32 %v8467_v43, %v5053_v46 }
0x1899   : > { %v4895_v48 = vpop.f32.mrf.mxu2 }
0x189a   : > { %v5172_v33 = vpack.c.bf16 %v8474_v41, %v8471_v51  ;;  %v4901_v5 = vmul.f32 0.25, %v4895_v48  ;;  %v4689_v51 = vadd.f32 %v8401_v26, %v8457_v1 }
0x189c   : > { %v4908_v3 = vsel %vm2717_vm3, %v4901_v5, -inf }
0x189d   : > { %4909 = vmax.xlane.f32.xlu2 %v4908_v3 }
0x189f   : > { %v8480_v11 = vpop.f32.mrf.mxu3 }
0x18a1   : > { %v4897_v8 = vpop.f32.mrf.mxu2 }
0x18a7   : > { %v5058_v27 = vpop.f32.mrf.mxu3 }
0x18a9   : > { %v5107_v15 = vpop.f32.mrf.mxu2 }
0x18aa   : > { %v5108_v31 = vadd.f32 %v7241_v18, %v5107_v15 }
0x18b1   : > { %v5109_v13 = vpop.f32.mrf.mxu2 }
0x18b2   : > { %v5110_v28 = vadd.f32 %v7241_v18, %v5109_v13 }
0x18b4   : > { %v5174_v59 = vpack.c.bf16 %v5110_v28, %v5108_v31  ;;  %v5057_v28 = vadd.f32 %v8467_v43, %v8480_v11  ;;  %v4691_v43 = vadd.f32 %v8403_v12, %v8459_v22 }
0x18b6   : > { %v5183_v60 = vsel %vm2676_vm1, %v5174_v59, 0 }
0x18b9   : > { %v5112_v20 = vpop.f32.mrf.mxu2 }
0x18ba   : > { %v5113_v25 = vadd.f32 %v7241_v18, %v5112_v20 }
0x18bc   : > { %v5175_v45 = vpack.c.bf16 %v5113_v25, %v5113_v25 }
0x18be   : > { %v5186_v17 = vsel %vm2676_vm1, %v5175_v45, 0 }
0x18bf   : > { %5194 = vmatpush.bf16.xpose.msrb.mxu1 %v5186_v17 }
0x18c1   : > { %v5114_v55 = vpop.f32.mrf.mxu2 }
0x18c7   : > { %5195 = vmatpush.bf16.xpose.msrb.mxu1 %v5183_v60  ;;  %v5173_v60 = vpack.c.bf16 %v5057_v28, %v5057_v28  ;;  %v7243_v28 = vld [vmem:[%s8660_s23 + $0x1] ss:$0 sm:$0xff] }
0x1900   : > { %v4904_v35 = vpop.xlane.xlu0 %4903 }
0x1901   : > { %v4911_v61 = vsub.f32 %v4899_v58, %v4904_v35  ;;  %v7136_v58 = vld [vmem:[%s8653_s7 + $0xe0] sm:$0xff] }
0x1902   : > { %5161 = vmatpush.bf16.msrb.mxu0 %v7136_v58 }
0x1903   : > { %v4914_v36 = vmul.f32 1.442695, %v4911_v61 }
0x1905   : > { %7403 = vpow2.f32 %v4914_v36 }
0x1908   : > { %v4907_v37 = vpop.xlane.xlu1 %4906 }
0x1909   : > { %v4912_v14 = vsub.f32 %v4900_v2, %v4907_v37 }
0x190b   : > { %v7404_v38 = vpop.eup %7403  ;;  %v4916_v21 = vmul.f32 1.442695, %v4912_v14 }
0x190c   : > { %v4920_v56 = vsel %vm2710_vm2, %v7404_v38, 0.0 }
0x190d   : > { %7405 = vpow2.f32 %v4916_v21  ;;  %4921 = vadd.xlane.f32.xlu0 %v4920_v56 }
0x1910   : > { %v4910_v57 = vpop.xlane.xlu2 %4909 }
0x1911   : > { %v4913_v19 = vsub.f32 %v4901_v5, %v4910_v57 }
0x1913   : > { %v7406_v24 = vpop.eup %7405  ;;  %v4918_v52 = vmul.f32 1.442695, %v4913_v19 }
0x1914   : > { %v4923_v44 = vsel %vm2710_vm2, %v7406_v24, 0.0 }
0x1915   : > { %7407 = vpow2.f32 %v4918_v52  ;;  %4924 = vadd.xlane.f32.xlu1 %v4923_v44 }
0x191b   : > { %v7408_v49 = vpop.eup %7407 }
0x191c   : > { %v4926_v50 = vsel %vm2717_vm3, %v7408_v49, 0.0 }
0x191d   : > { %4927 = vadd.xlane.f32.xlu2 %v4926_v50 }
0x1980   : > { %v4922_v32 = vpop.xlane.xlu0 %4921 }
0x1981   : > { %7409 = vrcp.f32 %v4922_v32 }
0x1987   : > { %v7410_v10 = vpop.eup %7409 }
0x1988   : > { %v4925_v9 = vpop.xlane.xlu1 %4924  ;;  %v4932_v34 = vmul.f32 %v7410_v10, %v7404_v38 }
0x1989   : > { %7411 = vrcp.f32 %v4925_v9 }
0x198f   : > { %v7412_v40 = vpop.eup %7411 }
0x1990   : > { %v4933_v0 = vmul.f32 %v7412_v40, %v7406_v24  ;;  %v4928_v4 = vpop.xlane.xlu2 %4927 }
0x1991   : > { %7413 = vrcp.f32 %v4928_v4 }
0x1992   : > { %v4935_v2 = vpack.c.bf16 %v4933_v0, %v4932_v34 }
0x1994   : > { %6777 = vmatmul.msk.bf16.vlgmr.msra.gmra.mxu0 %vm2710_vm2, %v4935_v2  ;;  %v7140_v2 = vld [vmem:[%s8659_s22 + $0x38] sm:$0xff] }
0x1995   : > { %5297 = vmatpush.bf16.msra.mxu2 %v7140_v2 }
0x1997   : > { %v7414_v46 = vpop.eup %7413 }
0x1998   : > { %v4934_v48 = vmul.f32 %v7414_v46, %v7408_v49 }
0x199a   : > { %v4936_v5 = vpack.c.bf16 %v4934_v48, %v4934_v48 }
0x19a4   : > { %6778 = vmatmul.msk.bf16.gmra.mxu0 %vm2710_vm2, %v4936_v5 }
0x19b4   : > { %6866 = vmatmul.msk.bf16.vlgmr.msrb.gmra.mxu0 %vm1856_vm6, %v8296_v16  ;;  %v7242_v16 = vld [vmem:[%s8656_s15 + $0x7] ss:$0 sm:$0xff] }
0x19c4   : > { %6867 = vmatmul.msk.bf16.gmra.mxu0 %vm1856_vm6, %v8309_v63 }
0x1a11   : > { %v4957_v3 = vpop.f32.mrf.mxu0 }
0x1a19   : > { %v4959_v7 = vpop.f32.mrf.mxu0 }
0x1a1a   : > { %v4966_v8 = vpack.c.bf16 %v4959_v7, %v4957_v3 }
0x1a1c   : > { %6785 = vmatmul.msk.bf16.vlgmr.msra.gmra.mxu1 %vm2676_vm1, %v4966_v8 }
0x1a21   : > { %v4962_v27 = vpop.f32.mrf.mxu0 }
0x1a22   : > { %v4967_v13 = vpack.c.bf16 %v4962_v27, %v4962_v27 }
0x1a29   : > { %v4964_v15 = vpop.f32.mrf.mxu0 }
0x1a2c   : > { %6786 = vmatmul.msk.bf16.gmra.mxu1 %vm2676_vm1, %v4967_v13 }
0x1a31   : > { %v5163_v18 = vpop.f32.mrf.mxu0 }
0x1a32   : > { %v5164_v55 = vadd.f32 %v7242_v16, %v5163_v18 }
0x1a39   : > { %v5165_v20 = vpop.f32.mrf.mxu0 }
0x1a3a   : > { %v5166_v17 = vadd.f32 %v7242_v16, %v5165_v20 }
0x1a3c   : > { %6868 = vmatmul.msk.bf16.vlgmr.msrb.gmra.mxu1 %vm2676_vm1, %v5172_v33  ;;  %v5244_v35 = vpack.c.bf16 %v5166_v17, %v5164_v55 }
0x1a41   : > { %v5168_v25 = vpop.f32.mrf.mxu0 }
0x1a42   : > { %v5169_v63 = vadd.f32 %v7242_v16, %v5168_v25 }
0x1a44   : > { %v5245_v45 = vpack.c.bf16 %v5169_v63, %v5169_v63 }
0x1a46   : > { %v5253_v31 = vand.u32 %v5245_v45, %v7670_v6  ;;  %v4694_v6 = vadd.f32 %v8405_v47, %v8461_v23 }
0x1a48   : > { %5261 = vmatpush.bf16.msra.mxu3 %v5253_v31 }
0x1a49   : > { %v5170_v59 = vpop.f32.mrf.mxu0 }
0x1a4c   : > { %6869 = vmatmul.msk.bf16.gmra.mxu1 %vm2676_vm1, %v5173_v60  ;;  %5262 = vmatpush.bf16.msra.mxu3 %v5244_v35 }
0x1a99   : > { %v4992_v41 = vpop.f32.mrf.mxu1 }
0x1a9a   : > { %v8511_v33 = vadd.f32 %v4992_v41, %v4689_v51 }
0x1aa1   : > { %v4994_v11 = vpop.f32.mrf.mxu1 }
0x1aa2   : > { %v8515_v61 = vadd.f32 %v4994_v11, %v4691_v43 }
0x1aa9   : > { %v4997_v36 = vpop.f32.mrf.mxu1 }
0x1aaa   : > { %v8519_v37 = vadd.f32 %v4997_v36, %v4694_v6 }
0x1ab1   : > { %v4999_v14 = vpop.f32.mrf.mxu1 }
0x1ab9   : > { %v5197_v38 = vpop.f32.mrf.mxu1 }
0x1aba   : > { %v5206_v21 = vmul.f32 0.25, %v5197_v38 }
0x1abc   : > { %v5209_v26 = vsel %vm2710_vm2, %v5206_v21, -inf }
0x1abd   : > { %5210 = vmax.xlane.f32.xlu0 %v5209_v26 }
0x1ac1   : > { %v5199_v1 = vpop.f32.mrf.mxu1 }
0x1ac2   : > { %v5207_v56 = vmul.f32 0.25, %v5199_v1 }
0x1ac4   : > { %v5212_v57 = vsel %vm2710_vm2, %v5207_v56, -inf }
0x1ac5   : > { %5213 = vmax.xlane.f32.xlu1 %v5212_v57 }
0x1ac9   : > { %v5202_v12 = vpop.f32.mrf.mxu1 }
0x1aca   : > { %v5208_v22 = vmul.f32 0.25, %v5202_v12 }
0x1acc   : > { %v5215_v19 = vsel %vm2717_vm3, %v5208_v22, -inf }
0x1acd   : > { %5216 = vmax.xlane.f32.xlu2 %v5215_v19 }
0x1ad1   : > { %v5204_v47 = vpop.f32.mrf.mxu1 }
0x1b30   : > { %v5211_v23 = vpop.xlane.xlu0 %5210 }
0x1b31   : > { %v5218_v24 = vsub.f32 %v5206_v21, %v5211_v23 }
0x1b33   : > { %v5221_v52 = vmul.f32 1.442695, %v5218_v24 }
0x1b35   : > { %7415 = vpow2.f32 %v5221_v52  ;;  %v7144_v52 = vld [vmem:[%s8661_s26 + $0x38] sm:$0xff] }
0x1b36   : > { %5454 = vmatpush.bf16.msra.mxu0 %v7144_v52 }
0x1b38   : > { %v5214_v44 = vpop.xlane.xlu1 %5213 }
0x1b39   : > { %v5219_v49 = vsub.f32 %v5207_v56, %v5214_v44  ;;  %v7143_v44 = vld [vmem:[%s8661_s26 + $0x30] sm:$0xff] }
0x1b3a   : > { %5455 = vmatpush.bf16.msra.mxu0 %v7143_v44 }
0x1b3b   : > { %v7416_v50 = vpop.eup %7415  ;;  %v5223_v32 = vmul.f32 1.442695, %v5219_v49 }
0x1b3c   : > { %v5227_v29 = vsel %vm2710_vm2, %v7416_v50, 0.0 }
0x1b3d   : > { %7417 = vpow2.f32 %v5223_v32  ;;  %5228 = vadd.xlane.f32.xlu0 %v5227_v29  ;;  %v7142_v32 = vld [vmem:[%s8661_s26 + $0x28] sm:$0xff] }
0x1b3e   : > { %5456 = vmatpush.bf16.msra.mxu0 %v7142_v32 }
0x1b40   : > { %v5217_v53 = vpop.xlane.xlu2 %5216 }
0x1b41   : > { %v5220_v9 = vsub.f32 %v5208_v22, %v5217_v53  ;;  %v7141_v53 = vld [vmem:[%s8661_s26 + $0x20] sm:$0xff] }
0x1b42   : > { %5457 = vmatpush.bf16.msra.mxu0 %v7141_v53 }
0x1b43   : > { %v7418_v39 = vpop.eup %7417  ;;  %v5225_v10 = vmul.f32 1.442695, %v5220_v9 }
0x1b44   : > { %v5230_v58 = vsel %vm2710_vm2, %v7418_v39, 0.0 }
0x1b45   : > { %7419 = vpow2.f32 %v5225_v10  ;;  %5231 = vadd.xlane.f32.xlu1 %v5230_v58 }
0x1b4b   : > { %v7420_v40 = vpop.eup %7419 }
0x1b4c   : > { %v5233_v34 = vsel %vm2717_vm3, %v7420_v40, 0.0 }
0x1b4d   : > { %5234 = vadd.xlane.f32.xlu2 %v5233_v34 }
0x1bb0   : > { %v5229_v0 = vpop.xlane.xlu0 %5228 }
0x1bb1   : > { %7421 = vrcp.f32 %v5229_v0 }
0x1bb7   : > { %v7422_v46 = vpop.eup %7421 }
0x1bb8   : > { %v5232_v4 = vpop.xlane.xlu1 %5231  ;;  %v5239_v5 = vmul.f32 %v7422_v46, %v7416_v50 }
0x1bb9   : > { %7423 = vrcp.f32 %v5232_v4 }
0x1bbf   : > { %v7424_v48 = vpop.eup %7423 }
0x1bc0   : > { %v5240_v3 = vmul.f32 %v7424_v48, %v7418_v39  ;;  %v5235_v8 = vpop.xlane.xlu2 %5234 }
0x1bc1   : > { %7425 = vrcp.f32 %v5235_v8 }
0x1bc2   : > { %v5242_v7 = vpack.c.bf16 %v5240_v3, %v5239_v5 }
0x1bc4   : > { %6870 = vmatmul.msk.bf16.vlgmr.msra.gmra.mxu3 %vm2710_vm2, %v5242_v7 }
0x1bc7   : > { %v7426_v27 = vpop.eup %7425 }
0x1bc8   : > { %v5241_v15 = vmul.f32 %v7426_v27, %v7420_v40 }
0x1bca   : > { %v5243_v13 = vpack.c.bf16 %v5241_v15, %v5241_v15 }
0x1bd4   : > { %6871 = vmatmul.msk.bf16.gmra.mxu3 %vm2710_vm2, %v5243_v13 }
0x1c47   : > { %v5264_v18 = vpop.f32.mrf.mxu3 }
0x1c4f   : > { %v5266_v20 = vpop.f32.mrf.mxu3 }
0x1c50   : > { %v5273_v16 = vpack.c.bf16 %v5266_v20, %v5264_v18  ;;  %v7244_v20 = vld [vmem:[%s8662_s0 + $0x1] ss:$0 sm:$0xff]  ;;  %s7158_s0 = smul.u32 24, %s8669_s1 }
0x1c52   : > { %6878 = vmatmul.msk.bf16.vlgmr.msra.gmra.mxu2 %vm2676_vm1, %v5273_v16 }
0x1c57   : > { %v5269_v25 = vpop.f32.mrf.mxu3 }
0x1c58   : > { %v5274_v45 = vpack.c.bf16 %v5269_v25, %v5269_v25 }
0x1c5f   : > { %v5271_v63 = vpop.f32.mrf.mxu3 }
0x1c62   : > { %6879 = vmatmul.msk.bf16.gmra.mxu2 %vm2676_vm1, %v5274_v45 }
0x1cd5   : > { %v5299_v17 = vpop.f32.mrf.mxu2 }
0x1cd6   : > { %v5308_v31 = vadd.f32 %v5299_v17, %v8511_v33  ;;  %v7245_v17 = vld [vmem:[%s8663_s2 + $0x1] ss:$0 sm:$0xff]  ;;  %s986_s2 = scalar_lea.vmem %s7658_s30, %s7158_s0 }
0x1cd8   : > { %v5316_v55 = vadd.f32 %v7243_v28, %v5308_v31 }
0x1cda   : > { %v5319_v59 = vadd.f32 %v5316_v55, %v8290_v30 }
0x1cdc   : > { %v5326_v60 = vsel %vm1856_vm6, %v5319_v59, 0.0 }
0x1cdd   : > { %5327 = vadd.xlane.f32.xlu0 %v5326_v60  ;;  %v5301_v35 = vpop.f32.mrf.mxu2 }
0x1cde   : > { %v5309_v51 = vadd.f32 %v5301_v35, %v8515_v61 }
0x1ce0   : > { %v5317_v41 = vadd.f32 %v7243_v28, %v5309_v51 }
0x1ce2   : > { %v5320_v43 = vadd.f32 %v5317_v41, %v8292_v42 }
0x1ce4   : > { %v5329_v11 = vsel %vm1856_vm6, %v5320_v43, 0.0 }
0x1ce5   : > { %5330 = vadd.xlane.f32.xlu1 %v5329_v11  ;;  %v5304_v6 = vpop.f32.mrf.mxu2 }
0x1ce6   : > { %v5310_v36 = vadd.f32 %v5304_v6, %v8519_v37 }
0x1ce8   : > { %v5318_v14 = vadd.f32 %v7243_v28, %v5310_v36 }
0x1cea   : > { %v5321_v33 = vadd.f32 %v5318_v14, %v8305_v62 }
0x1cec   : > { %v5332_v30 = vsel %vm1863_vm4, %v5321_v33, 0.0 }
0x1ced   : > { %5333 = vadd.xlane.f32.xlu2 %v5332_v30  ;;  %v5306_v38 = vpop.f32.mrf.mxu2 }
0x1cee   : > { %v7152_v38 = vld [vmem:[%s8664_s10 + $0x78] sm:$0xff] }
0x1cef   : > { %5567 = vmatpush.bf16.msra.mxu1 %v7152_v38 }
0x1d50   : > { %v5328_v21 = vpop.xlane.xlu0 %5327 }
0x1d51   : > { %v5335_v26 = vmul.f32 %v5328_v21, %v7922_v54  ;;  %v7151_v21 = vld [vmem:[%s8664_s10 + $0x70] sm:$0xff] }
0x1d52   : > { %5568 = vmatpush.bf16.msra.mxu1 %v7151_v21 }
0x1d53   : > { %v5338_v61 = vsub.f32 %v5319_v59, %v5335_v26  ;;  %v7150_v26 = vld [vmem:[%s8664_s10 + $0x68] sm:$0xff] }
0x1d55   : > { %v5341_v1 = vmul.f32 %v5338_v61, %v5338_v61 }
0x1d56   : > { %5569 = vmatpush.bf16.msra.mxu1 %v7150_v26 }
0x1d57   : > { %v5344_v42 = vsel %vm1856_vm6, %v5341_v1, 0.0  ;;  %v7148_v1 = vld [vmem:[%s8664_s10 + $0x58] sm:$0xff] }
0x1d58   : > { %5345 = vadd.xlane.f32.xlu0 %v5344_v42  ;;  %v5331_v56 = vpop.xlane.xlu1 %5330  ;;  %v7147_v42 = vld [vmem:[%s8664_s10 + $0x50] sm:$0xff] }
0x1d59   : > { %v5336_v37 = vmul.f32 %v5331_v56, %v7922_v54  ;;  %v7246_v56 = vld [vmem:[%s8665_s11 + $0x1] ss:$0 sm:$0xff] }
0x1d5b   : > { %v5339_v57 = vsub.f32 %v5320_v43, %v5336_v37  ;;  %v7146_v37 = vld [vmem:[%s8664_s10 + $0x48] sm:$0xff] }
0x1d5d   : > { %v5342_v62 = vmul.f32 %v5339_v57, %v5339_v57 }
0x1d5f   : > { %v5347_v12 = vsel %vm1856_vm6, %v5342_v62, 0.0 }
0x1d60   : > { %5348 = vadd.xlane.f32.xlu1 %v5347_v12  ;;  %v5334_v22 = vpop.xlane.xlu2 %5333  ;;  %v7145_v12 = vld [vmem:[%s8664_s10 + $0x40] sm:$0xff] }
0x1d61   : > { %v5337_v19 = vmul.f32 %v5334_v22, %v7922_v54 }
0x1d63   : > { %v8547_v47 = vsub.f32 %v5321_v33, %v5337_v19 }
0x1d65   : > { %v5343_v23 = vmul.f32 %v8547_v47, %v8547_v47 }
0x1d67   : > { %v5350_v24 = vsel %vm1863_vm4, %v5343_v23, 0.0 }
0x1d68   : > { %5351 = vadd.xlane.f32.xlu2 %v5350_v24 }
0x1dcb   : > { %v5346_v49 = vpop.xlane.xlu0 %5345 }
0x1dcc   : > { %v5353_v50 = vmul.f32 %v5346_v49, %v7922_v54 }
0x1dce   : > { %v5356_v29 = vadd.f32 1e-05, %v5353_v50 }
0x1dd0   : > { %7427 = vrsqrt.f32 %v5356_v29  ;;  %vm5365_vm2 = vweird.f32 %v5356_v29 }
0x1dd3   : > { %v5349_v9 = vpop.xlane.xlu1 %5348 }
0x1dd4   : > { %v5354_v39 = vmul.f32 %v5349_v9, %v7922_v54 }
0x1dd6   : > { %v7428_v10 = vpop.eup %7427  ;;  %v5357_v58 = vadd.f32 1e-05, %v5354_v39 }
0x1dd7   : > { %v5360_v40 = vmul.f32 %v7428_v10, %v5356_v29  ;;  %vm5366_vm1 = vweird.f32 %v7428_v10 }
0x1dd8   : > { %7429 = vrsqrt.f32 %v5357_v58  ;;  %vm5367_vm3 = vmor %vm5365_vm2, %vm5366_vm1  ;;  %vm5375_vm14 = vweird.f32 %v5357_v58 }
0x1dd9   : > { %v5361_v34 = vmul.f32 %v7428_v10, %v5360_v40 }
0x1ddb   : > { %v5362_v0 = vmul.f32 0.5, %v5361_v34  ;;  %v5352_v2 = vpop.xlane.xlu2 %5351 }
0x1ddc   : > { %v5355_v4 = vmul.f32 %v5352_v2, %v7922_v54 }
0x1ddd   : > { %v5363_v46 = vsub.f32 1.5, %v5362_v0 }
0x1dde   : > { %v7430_v48 = vpop.eup %7429  ;;  %v5358_v5 = vadd.f32 1e-05, %v5355_v4 }
0x1ddf   : > { %v5364_v3 = vmul.f32 %v7428_v10, %v5363_v46  ;;  %v5370_v7 = vmul.f32 %v7430_v48, %v5357_v58  ;;  %vm5376_vm13 = vweird.f32 %v7430_v48 }
0x1de0   : > { %7431 = vrsqrt.f32 %v5358_v5  ;;  %vm5377_vm15 = vmor %vm5375_vm14, %vm5376_vm13  ;;  %vm5385_vm5 = vweird.f32 %v5358_v5 }
0x1de1   : > { %v5371_v8 = vmul.f32 %v7430_v48, %v5370_v7  ;;  %v5368_v27 = vsel %vm5367_vm3, %v7428_v10, %v5364_v3 }
0x1de2   : > { %v5389_v16 = vmul.f32 %v5368_v27, %v5338_v61  ;;  %v7149_v61 = vld [vmem:[%s8664_s10 + $0x60] sm:$0xff] }
0x1de3   : > { %v5372_v15 = vmul.f32 0.5, %v5371_v8  ;;  %5570 = vmatpush.bf16.msra.mxu1 %v7149_v61 }
0x1de4   : > { %v5395_v31 = vmul.f32 %v7244_v20, %v5389_v16 }
0x1de5   : > { %v5373_v13 = vsub.f32 1.5, %v5372_v15 }
0x1de6   : > { %v7432_v18 = vpop.eup %7431  ;;  %v8561_v51 = vadd.f32 %v7245_v17, %v5395_v31 }
0x1de7   : > { %v5374_v25 = vmul.f32 %v7430_v48, %v5373_v13  ;;  %v5380_v63 = vmul.f32 %v7432_v18, %v5358_v5  ;;  %vm5386_vm0 = vweird.f32 %v7432_v18  ;;  %5571 = vmatpush.bf16.msra.mxu1 %v7148_v1 }
0x1de8   : > { %vm5387_vm7 = vmor %vm5385_vm5, %vm5386_vm0 }
0x1de9   : > { %v5378_v45 = vsel %vm5377_vm15, %v7430_v48, %v5374_v25  ;;  %v5381_v28 = vmul.f32 %v7432_v18, %v5380_v63  ;;  %v7247_v63 = vld [vmem:[%s8666_s3 + $0x1] ss:$0 sm:$0xff] }
0x1dea   : > { %v5390_v55 = vmul.f32 %v5378_v45, %v5339_v57 }
0x1deb   : > { %v5382_v59 = vmul.f32 0.5, %v5381_v28  ;;  %5572 = vmatpush.bf16.msra.mxu1 %v7147_v42 }
0x1dec   : > { %v5396_v60 = vmul.f32 %v7244_v20, %v5390_v55 }
0x1ded   : > { %v5383_v35 = vsub.f32 1.5, %v5382_v59 }
0x1dee   : > { %v8563_v41 = vadd.f32 %v7245_v17, %v5396_v60 }
0x1def   : > { %v5384_v43 = vmul.f32 %v7432_v18, %v5383_v35  ;;  %5573 = vmatpush.bf16.msra.mxu1 %v7146_v37 }
0x1df0   : > { %v5404_v11 = vpack.c.bf16 %v8563_v41, %v8561_v51 }
0x1df1   : > { %v5388_v6 = vsel %vm5387_vm7, %v7432_v18, %v5384_v43 }
0x1df2   : > { %6908 = vmatmul.msk.bf16.vlgmr.msra.gmra.mxu0 %vm1856_vm6, %v5404_v11  ;;  %v5391_v36 = vmul.f32 %v5388_v6, %v8547_v47 }
0x1df3   : > { %5574 = vmatpush.bf16.msra.mxu1 %v7145_v12 }
0x1df4   : > { %v5397_v14 = vmul.f32 %v7244_v20, %v5391_v36 }
0x1df6   : > { %v8569_v33 = vadd.f32 %v7245_v17, %v5397_v14 }
0x1df8   : > { %v5405_v30 = vpack.c.bf16 %v8569_v33, %v8569_v33 }
0x1e02   : > { %6909 = vmatmul.msk.bf16.gmra.mxu0 %vm1856_vm6, %v5405_v30 }
0x1e6f   : > { %v5459_v57 = vpop.f32.mrf.mxu0 }
0x1e70   : > { %v5460_v62 = vadd.f32 %v7246_v56, %v5459_v57 }
0x1e72   : > { %v5468_v22 = vmul.f32 %v5460_v62, %v5460_v62 }
0x1e74   : > { %v5471_v19 = vmul.f32 %v5468_v22, %v5460_v62  ;;  %v7156_v22 = vld [vmem:[%s7648_s6 + $0x18] sm:$0xff] }
0x1e75   : > { %5718 = vmatpush.bf16.msrb.mxu3 %v7156_v22 }
0x1e76   : > { %v5474_v47 = vmul.f32 0.044715, %v5471_v19  ;;  %v7155_v19 = vld [vmem:[%s7648_s6 + $0x10] sm:$0xff] }
0x1e77   : > { %v5461_v23 = vpop.f32.mrf.mxu0 }
0x1e78   : > { %v5477_v24 = vadd.f32 %v5474_v47, %v5460_v62  ;;  %v5462_v52 = vadd.f32 %v7246_v56, %v5461_v23 }
0x1e79   : > { %5719 = vmatpush.bf16.msrb.mxu3 %v7155_v19 }
0x1e7a   : > { %v5480_v44 = vmul.f32 0.7978846, %v5477_v24  ;;  %v5469_v49 = vmul.f32 %v5462_v52, %v5462_v52  ;;  %v7154_v24 = vld [vmem:[%s7648_s6 + $0x8] sm:$0xff] }
0x1e7c   : > { %v5472_v50 = vmul.f32 %v5469_v49, %v5462_v52  ;;  %7433 = vtanh.f32 %v5480_v44  ;;  %v7153_v44 = vld [vmem:[%s7648_s6] sm:$0xff] }
0x1e7d   : > { %5720 = vmatpush.bf16.msrb.mxu3 %v7154_v24 }
0x1e7e   : > { %v5475_v32 = vmul.f32 0.044715, %v5472_v50 }
0x1e7f   : > { %v5464_v29 = vpop.f32.mrf.mxu0 }
0x1e80   : > { %v5478_v53 = vadd.f32 %v5475_v32, %v5462_v52  ;;  %v5465_v9 = vadd.f32 %v7246_v56, %v5464_v29 }
0x1e81   : > { %5721 = vmatpush.bf16.msrb.mxu3 %v7153_v44 }
0x1e82   : > { %v5481_v39 = vmul.f32 0.7978846, %v5478_v53  ;;  %v5470_v10 = vmul.f32 %v5465_v9, %v5465_v9  ;;  %v7434_v58 = vpop.eup %7433 }
0x1e83   : > { %v5486_v0 = vadd.f32 1.0, %v7434_v58 }
0x1e84   : > { %7435 = vtanh.f32 %v5481_v39  ;;  %v5473_v40 = vmul.f32 %v5470_v10, %v5465_v9 }
0x1e85   : > { %v5489_v5 = vmul.f32 0.5, %v5486_v0 }
0x1e86   : > { %v5476_v34 = vmul.f32 0.044715, %v5473_v40 }
0x1e87   : > { %v5466_v2 = vpop.f32.mrf.mxu0  ;;  %v5492_v8 = vmul.f32 %v5489_v5, %v5460_v62 }
0x1e88   : > { %v5479_v4 = vadd.f32 %v5476_v34, %v5465_v9 }
0x1e8a   : > { %v7436_v46 = vpop.eup %7435  ;;  %v5482_v48 = vmul.f32 0.7978846, %v5479_v4 }
0x1e8b   : > { %v5487_v3 = vadd.f32 1.0, %v7436_v46 }
0x1e8c   : > { %7437 = vtanh.f32 %v5482_v48 }
0x1e8d   : > { %v5490_v7 = vmul.f32 0.5, %v5487_v3 }
0x1e8f   : > { %v5493_v27 = vmul.f32 %v5490_v7, %v5462_v52 }
0x1e91   : > { %v5495_v15 = vpack.c.bf16 %v5493_v27, %v5492_v8  ;;  %v7248_v8 = vld [vmem:[%s8667_s5 + $0x1] ss:$0 sm:$0xff] }
0x1e92   : > { %v7438_v13 = vpop.eup %7437 }
0x1e93   : > { %5575 = vmatmul.bf16.vlgmr.msra.gmra.mxu1 %v5495_v15  ;;  %v5488_v18 = vadd.f32 1.0, %v7438_v13 }
0x1e95   : > { %v5491_v20 = vmul.f32 0.5, %v5488_v18 }
0x1e97   : > { %v5494_v16 = vmul.f32 %v5491_v20, %v5465_v9  ;;  %v7249_v20 = vld [vmem:[%s7643_s4 + $0x1] ss:$0 sm:$0xff] }
0x1e99   : > { %v5496_v25 = vpack.c.bf16 %v5494_v16, %v5494_v16 }
0x1ea3   : > { %5580 = vmatmul.bf16.gmra.mxu1 %v5496_v25 }
0x1f10   : > { %v5576_v45 = vpop.f32.mrf.mxu1 }
0x1f11   : > { %v5577_v28 = vadd.f32 %v7247_v63, %v5576_v45 }
0x1f13   : > { %v5585_v17 = vadd.f32 %v5577_v28, %v8561_v51 }
0x1f15   : > { %v5592_v31 = vsel %vm1856_vm6, %v5585_v17, 0.0 }
0x1f16   : > { %5593 = vadd.xlane.f32.xlu0 %v5592_v31 }
0x1f18   : > { %v5578_v55 = vpop.f32.mrf.mxu1 }
0x1f19   : > { %v5579_v59 = vadd.f32 %v7247_v63, %v5578_v55 }
0x1f1b   : > { %v5586_v60 = vadd.f32 %v5579_v59, %v8563_v41 }
0x1f1d   : > { %v5595_v35 = vsel %vm1856_vm6, %v5586_v60, 0.0 }
0x1f1e   : > { %5596 = vadd.xlane.f32.xlu1 %v5595_v35 }
0x1f20   : > { %v5581_v43 = vpop.f32.mrf.mxu1 }
0x1f21   : > { %v5582_v11 = vadd.f32 %v7247_v63, %v5581_v43 }
0x1f23   : > { %v5587_v6 = vadd.f32 %v5582_v11, %v8569_v33 }
0x1f25   : > { %v5598_v36 = vsel %vm1863_vm4, %v5587_v6, 0.0 }
0x1f26   : > { %5599 = vadd.xlane.f32.xlu2 %v5598_v36  ;;  %v7250_v36 = vld [vmem:[%s7653_s20] ss:$0 sm:$0xff] }
0x1f28   : > { %v5583_v14 = vpop.f32.mrf.mxu1 }
0x1f89   : > { %v5594_v30 = vpop.xlane.xlu0 %5593 }
0x1f8a   : > { %v5601_v51 = vmul.f32 %v5594_v30, %v7922_v54 }
0x1f8c   : > { %v5604_v38 = vsub.f32 %v5585_v17, %v5601_v51 }
0x1f8e   : > { %v5607_v21 = vmul.f32 %v5604_v38, %v5604_v38 }
0x1f90   : > { %v5610_v26 = vsel %vm1856_vm6, %v5607_v21, 0.0 }
0x1f91   : > { %v5597_v41 = vpop.xlane.xlu1 %5596  ;;  %5611 = vadd.xlane.f32.xlu0 %v5610_v26 }
0x1f92   : > { %v5602_v61 = vmul.f32 %v5597_v41, %v7922_v54 }
0x1f94   : > { %v5605_v1 = vsub.f32 %v5586_v60, %v5602_v61 }
0x1f96   : > { %v5608_v33 = vmul.f32 %v5605_v1, %v5605_v1 }
0x1f98   : > { %v5613_v42 = vsel %vm1856_vm6, %v5608_v33, 0.0 }
0x1f99   : > { %v5600_v56 = vpop.xlane.xlu2 %5599  ;;  %5614 = vadd.xlane.f32.xlu1 %v5613_v42 }
0x1f9a   : > { %v5603_v37 = vmul.f32 %v5600_v56, %v7922_v54 }
0x1f9c   : > { %v8595_v57 = vsub.f32 %v5587_v6, %v5603_v37 }
0x1f9e   : > { %v5609_v62 = vmul.f32 %v8595_v57, %v8595_v57 }
0x1fa0   : > { %v5616_v12 = vsel %vm1863_vm4, %v5609_v62, 0.0 }
0x1fa1   : > { %5617 = vadd.xlane.f32.xlu2 %v5616_v12 }
0x2004   : > { %v5612_v47 = vpop.xlane.xlu0 %5611 }
0x2005   : > { %v5619_v23 = vmul.f32 %v5612_v47, %v7922_v54 }
0x2007   : > { %v5622_v52 = vadd.f32 1e-05, %v5619_v23 }
0x2009   : > { %7439 = vrsqrt.f32 %v5622_v52  ;;  %vm5631_vm8 = vweird.f32 %v5622_v52 }
0x200c   : > { %v5615_v49 = vpop.xlane.xlu1 %5614 }
0x200d   : > { %v5620_v50 = vmul.f32 %v5615_v49, %v7922_v54 }
0x200f   : > { %v7440_v32 = vpop.eup %7439  ;;  %v5623_v29 = vadd.f32 1e-05, %v5620_v50 }
0x2010   : > { %v5626_v53 = vmul.f32 %v7440_v32, %v5622_v52  ;;  %vm5632_vm4 = vweird.f32 %v7440_v32 }
0x2011   : > { %7441 = vrsqrt.f32 %v5623_v29  ;;  %vm5633_vm9 = vmor %vm5631_vm8, %vm5632_vm4  ;;  %vm5641_vm11 = vweird.f32 %v5623_v29 }
0x2012   : > { %v5627_v9 = vmul.f32 %v7440_v32, %v5626_v53 }
0x2014   : > { %v5628_v39 = vmul.f32 0.5, %v5627_v9  ;;  %v5618_v10 = vpop.xlane.xlu2 %5617 }
0x2015   : > { %v5621_v58 = vmul.f32 %v5618_v10, %v7922_v54 }
0x2016   : > { %v5629_v40 = vsub.f32 1.5, %v5628_v39 }
0x2017   : > { %v7442_v34 = vpop.eup %7441  ;;  %v5624_v0 = vadd.f32 1e-05, %v5621_v58 }
0x2018   : > { %v5630_v2 = vmul.f32 %v7440_v32, %v5629_v40  ;;  %v5636_v4 = vmul.f32 %v7442_v34, %v5623_v29  ;;  %vm5642_vm10 = vweird.f32 %v7442_v34 }
0x2019   : > { %7443 = vrsqrt.f32 %v5624_v0  ;;  %vm5643_vm12 = vmor %vm5641_vm11, %vm5642_vm10  ;;  %vm5651_vm2 = vweird.f32 %v5624_v0 }
0x201a   : > { %v5637_v46 = vmul.f32 %v7442_v34, %v5636_v4  ;;  %v5634_v48 = vsel %vm5633_vm9, %v7440_v32, %v5630_v2 }
0x201b   : > { %v5655_v27 = vmul.f32 %v5634_v48, %v5604_v38 }
0x201c   : > { %v5638_v5 = vmul.f32 0.5, %v5637_v46 }
0x201d   : > { %v5661_v16 = vmul.f32 %v7248_v8, %v5655_v27 }
0x201e   : > { %v5639_v3 = vsub.f32 1.5, %v5638_v5 }
0x201f   : > { %v7444_v7 = vpop.eup %7443  ;;  %v5667_v17 = vadd.f32 %v7249_v20, %v5661_v16 }
0x2020   : > { %v5640_v54 = vmul.f32 %v7442_v34, %v5639_v3  ;;  %v5646_v15 = vmul.f32 %v7444_v7, %v5624_v0  ;;  %vm5652_vm1 = vweird.f32 %v7444_v7 }
0x2021   : > { %vm5653_vm3 = vmor %vm5651_vm2, %vm5652_vm1 }
0x2022   : > { %v5644_v13 = vsel %vm5643_vm12, %v7442_v34, %v5640_v54  ;;  %v5647_v18 = vmul.f32 %v7444_v7, %v5646_v15 }
0x2023   : > { %v5656_v25 = vmul.f32 %v5644_v13, %v5605_v1 }
0x2024   : > { %v5648_v63 = vmul.f32 0.5, %v5647_v18 }
0x2025   : > { %v5662_v45 = vmul.f32 %v7248_v8, %v5656_v25 }
0x2026   : > { %v5649_v28 = vsub.f32 1.5, %v5648_v63 }
0x2027   : > { %v5668_v31 = vadd.f32 %v7249_v20, %v5662_v45 }
0x2028   : > { %v5650_v55 = vmul.f32 %v7444_v7, %v5649_v28 }
0x2029   : > { %v5670_v59 = vpack.c.bf16 %v5668_v31, %v5667_v17 }
0x202a   : > { %v5654_v60 = vsel %vm5653_vm3, %v7444_v7, %v5650_v55 }
0x202b   : > { %6977 = vmatmul.msk.bf16.vlgmr.msrb.gmra.mxu3 %vm1856_vm6, %v5670_v59  ;;  %v5657_v35 = vmul.f32 %v5654_v60, %v8595_v57 }
0x202d   : > { %v5663_v43 = vmul.f32 %v7248_v8, %v5657_v35 }
0x202f   : > { %v5669_v11 = vadd.f32 %v7249_v20, %v5663_v43 }
0x2031   : > { %v5671_v6 = vpack.c.bf16 %v5669_v11, %v5669_v11 }
0x203b   : > { %6978 = vmatmul.msk.bf16.gmra.mxu3 %vm1856_vm6, %v5671_v6 }
0x20ae   : > { %v5723_v14 = vpop.f32.mrf.mxu3 }
0x20af   : > { %v5724_v30 = vadd.f32 %v7250_v36, %v5723_v14 }
0x20b1   : > { %5732 = vst [vmem:[%s986_s2] sm:$0xff] %v5724_v30 }
0x20b6   : > { %v5725_v51 = vpop.f32.mrf.mxu3 }
0x20b7   : > { %v5726_v38 = vadd.f32 %v7250_v36, %v5725_v51 }
0x20b9   : > { %5733 = vst [vmem:[%s986_s2 + $0x8] sm:$0xff] %v5726_v38 }
0x20be   : > { %v5728_v21 = vpop.f32.mrf.mxu3 }
0x20bf   : > { %v5729_v26 = vadd.f32 %v7250_v36, %v5728_v21 }
0x20c1   : > { %5734 = vst [vmem:[%s986_s2 + $0x10] sm:$0x7] %v5729_v26 }
0x20c6   : > { %v5730_v41 = vpop.f32.mrf.mxu3 }
0x20c7 PF: > { %s75_s28 = sadd.s32 1, %s7451_s28  }
0x20c8   : > { %p72_p4 = scmp.ge.s32.totalorder %s75_s28, 4  }
0x20ca   :  { %74 = sbr.rel (!%p72_p4) target bundleno = 51 (0x33), region = 298 }

</bundles_post_ra>
